<compile_context>
chip_gen: v6e
topology: v6e:2x2x1
jax: 0.10.0
libtpu: 0.0.40
codegen_flags: <defaults>
</compile_context>

<pallas_src>
import functools

import jax
import jax.numpy as jnp
from jax.experimental import pallas as pl
from jax.experimental.pallas import tpu as pltpu

BN_EPS = 1e-5
LEAKY_SLOPE = 0.1
_LANE = 128
_SUBLANE = 8
_VMEM_LIMIT_BYTES = 64 * 1024 * 1024


def _round_up(v, m):
    return (v + m - 1) // m * m


def _pick_row_tile(h_out, w_out, target_rows=1024):
    """Largest row tile th that divides h_out, keeps th*w_out sublane aligned
    and th*w_out <= ~target_rows.  Falls back to the whole image (always a
    legal block because it equals the full array dim)."""
    upper = max(1, min(h_out, target_rows // max(w_out, 1)))
    for th in range(upper, 0, -1):
        if h_out % th == 0 and (th * w_out) % _SUBLANE == 0:
            return th
    return h_out


def _conv_tile(x_ref, w_ref, row_tile, *, th, w_out, c_in, kh, kw, c_pad):
    """Fused-im2col conv (stride 1) for one tile of `th` output rows.

    x_ref: (1, Hp, Wp, c_in)    padded NHWC image block (resident in VMEM)
    w_ref: (kh*kw, c_in, c_pad) per-tap weight matrices (resident in VMEM)
    Returns f32 (th*w_out, c_pad) conv output for this tile.
    """
    row0 = row_tile * th
    acc = jnp.zeros((th * w_out, c_pad), dtype=jnp.float32)
    for ki in range(kh):
        for kj in range(kw):
            xs = x_ref[0, pl.ds(row0 + ki, th), pl.ds(kj, w_out), :]
            xs = xs.reshape(th * w_out, c_in)
            acc = acc + jnp.dot(xs, w_ref[ki * kw + kj],
                                preferred_element_type=jnp.float32)
    return acc


def _stats_kernel(x_ref, w_ref, sum_ref, sumsq_ref, *,
                  th, w_out, c_in, kh, kw, c_pad):
    """Pass 1: accumulate per-image sum / sum-of-squares of the conv output."""
    r = pl.program_id(1)

    @pl.when(r == 0)
    def _():
        sum_ref[...] = jnp.zeros_like(sum_ref)
        sumsq_ref[...] = jnp.zeros_like(sumsq_ref)

    y = _conv_tile(x_ref, w_ref, r, th=th, w_out=w_out, c_in=c_in,
                   kh=kh, kw=kw, c_pad=c_pad)
    sum_ref[...] += jnp.sum(y, axis=0, keepdims=True).reshape(1, 1, c_pad)
    sumsq_ref[...] += jnp.sum(y * y, axis=0, keepdims=True).reshape(1, 1, c_pad)


def _norm_kernel(x_ref, w_ref, scale_ref, shift_ref, out_ref, *,
                 th, w_out, c_in, kh, kw, c_pad):
    """Pass 2: recompute conv tile, apply folded BN affine + LeakyReLU."""
    r = pl.program_id(1)
    y = _conv_tile(x_ref, w_ref, r, th=th, w_out=w_out, c_in=c_in,
                   kh=kh, kw=kw, c_pad=c_pad)
    z = y * scale_ref[...] + shift_ref[...]
    out_ref[0] = jnp.where(z > 0, z, LEAKY_SLOPE * z).astype(out_ref.dtype)


@functools.partial(jax.jit, static_argnames=("stride", "padding", "compute_dtype"))
def cnnblock_forward(x, weight, gamma, beta, *, stride=1, padding=1,
                     compute_dtype=jnp.bfloat16):
    """x: (N, C_in, H, W) NCHW f32; weight: (C_out, C_in, KH, KW) OIHW.

    Returns LeakyReLU(BatchNorm(Conv(x))) in NCHW, f32.
    """
    if stride != 1:
        # TODO(synk): strided taps (pl.ds stride) for stride > 1 convolutions.
        raise NotImplementedError("cnnblock_forward currently supports stride=1")

    n, c_in, h, w_in = x.shape
    c_out, _, kh, kw = weight.shape
    h_out = (h + 2 * padding - kh) // stride + 1
    w_out = (w_in + 2 * padding - kw) // stride + 1
    hp, wp = h + 2 * padding, w_in + 2 * padding

    c_pad = _round_up(c_out, _LANE)       # lane-dense output channels
    c_in_pad = _round_up(c_in, _SUBLANE)  # sublane-aligned contraction dim

    # ---- input / weight prep (channel-last, zero-padded, bf16) ----
    x_nhwc = jnp.transpose(x, (0, 2, 3, 1))
    x_pad = jnp.pad(
        x_nhwc, ((0, 0), (padding, padding), (padding, padding),
                 (0, c_in_pad - c_in))).astype(compute_dtype)
    # (C_out, C_in, KH, KW) -> (KH*KW, C_in_pad, C_pad), tap index = ki*KW + kj
    w_taps = jnp.transpose(weight, (2, 3, 1, 0)).reshape(kh * kw, c_in, c_out)
    w_taps = jnp.pad(
        w_taps, ((0, 0), (0, c_in_pad - c_in), (0, c_pad - c_out))
    ).astype(compute_dtype)
    gamma_pad = jnp.pad(gamma.astype(jnp.float32), (0, c_pad - c_out))
    beta_pad = jnp.pad(beta.astype(jnp.float32), (0, c_pad - c_out))

    # ---- tiling ----
    th = _pick_row_tile(h_out, w_out)
    rt = h_out // th
    tm = th * w_out
    m_img = h_out * w_out
    m_total = n * m_img

    x_spec = pl.BlockSpec((1, hp, wp, c_in_pad), lambda ni, ri: (ni, 0, 0, 0))
    w_spec = pl.BlockSpec((kh * kw, c_in_pad, c_pad), lambda ni, ri: (0, 0, 0))
    stat_spec = pl.BlockSpec((1, 1, c_pad), lambda ni, ri: (ni, 0, 0))
    ss_spec = pl.BlockSpec((1, c_pad), lambda ni, ri: (0, 0))
    out_spec = pl.BlockSpec((1, tm, c_pad), lambda ni, ri: (ni, ri, 0))

    kernel_kwargs = dict(th=th, w_out=w_out, c_in=c_in_pad, kh=kh, kw=kw,
                         c_pad=c_pad)

    # ---- pass 1: global batch statistics of the conv output ----
    sums, sumsqs = pl.pallas_call(
        functools.partial(_stats_kernel, **kernel_kwargs),
        grid=(n, rt),
        in_specs=[x_spec, w_spec],
        out_specs=(stat_spec, stat_spec),
        out_shape=(jax.ShapeDtypeStruct((n, 1, c_pad), jnp.float32),
                   jax.ShapeDtypeStruct((n, 1, c_pad), jnp.float32)),
        compiler_params=pltpu.CompilerParams(
            dimension_semantics=("parallel", "arbitrary"),
            vmem_limit_bytes=_VMEM_LIMIT_BYTES),
    )(x_pad, w_taps)

    # ---- fold BN (training-mode / biased batch stats) into scale & shift ----
    # TODO(synk): running_mean / running_var (unbiased) buffer updates of
    #             nn.BatchNorm2d are not produced by this forward pass.
    total = jnp.sum(sums, axis=(0, 1))                        # (c_pad,)
    totalsq = jnp.sum(sumsqs, axis=(0, 1))
    mean = total / m_total
    var = jnp.maximum(totalsq / m_total - mean * mean, 0.0)
    inv_std = jax.lax.rsqrt(var + BN_EPS)
    scale = (gamma_pad * inv_std).reshape(1, c_pad)
    shift = (beta_pad - mean * gamma_pad * inv_std).reshape(1, c_pad)

    # ---- pass 2: recompute conv tile, normalize + LeakyReLU, store ----
    out_flat = pl.pallas_call(
        functools.partial(_norm_kernel, **kernel_kwargs),
        grid=(n, rt),
        in_specs=[x_spec, w_spec, ss_spec, ss_spec],
        out_specs=out_spec,
        out_shape=jax.ShapeDtypeStruct((n, m_img, c_pad), jnp.float32),
        compiler_params=pltpu.CompilerParams(
            dimension_semantics=("parallel", "parallel"),
            vmem_limit_bytes=_VMEM_LIMIT_BYTES),
    )(x_pad, w_taps, scale, shift)

    out = out_flat[:, :, :c_out].reshape(n, h_out, w_out, c_out)
    return jnp.transpose(out, (0, 3, 1, 2))   # back to NCHW for the module API


def _reference(x, weight, gamma, beta, stride, padding):
    """Pure-JAX f32 reference (Conv2d -> BatchNorm2d(train) -> LeakyReLU)."""
    y = jax.lax.conv_general_dilated(
        x, weight, (stride, stride),
        [(padding, padding), (padding, padding)],
        dimension_numbers=("NCHW", "OIHW", "NCHW"))
    mean = y.mean(axis=(0, 2, 3), keepdims=True)
    var = y.var(axis=(0, 2, 3), keepdims=True)          # biased, as in training BN
    z = (y - mean) * jax.lax.rsqrt(var + BN_EPS)
    z = z * gamma.reshape(1, -1, 1, 1) + beta.reshape(1, -1, 1, 1)
    return jnp.where(z > 0, z, LEAKY_SLOPE * z)


if __name__ == "__main__":
    # CNNblock(in_channels=4, out_channels=8, kernel_size=3, stride=1, padding=1)
    N, C_IN, H, W = 2, 4, 16, 16
    C_OUT, KH, KW = 8, 3, 3

    key = jax.random.PRNGKey(0)
    kx, kw_ = jax.random.split(key)
    x = jax.random.normal(kx, (N, C_IN, H, W), dtype=jnp.float32)
    weight = jax.random.normal(kw_, (C_OUT, C_IN, KH, KW), dtype=jnp.float32) * 0.1
    gamma = jnp.ones((C_OUT,), dtype=jnp.float32)   # BatchNorm2d weight init
    beta = jnp.zeros((C_OUT,), dtype=jnp.float32)   # BatchNorm2d bias init

    out = cnnblock_forward(x, weight, gamma, beta, stride=1, padding=1)
    out = jax.block_until_ready(out)
    assert out.shape == (N, C_OUT, H, W), out.shape

    ref = _reference(x, weight, gamma, beta, 1, 1)
    max_err = float(jnp.max(jnp.abs(out - ref)))
    assert max_err < 0.1, f"max abs err vs reference too large: {max_err}"

    print("KERNEL_OK")
</pallas_src>

<mosaic_0001>
module attributes {stable_mosaic.version = 11 : i64} {
  func.func @_stats_kernel(%arg0: i32, %arg1: i32, %arg2: memref<1x18x18x8xbf16, #tpu.memory_space<vmem>>, %arg3: memref<9x8x128xbf16, #tpu.memory_space<vmem>>, %arg4: memref<1x1x128xf32, #tpu.memory_space<vmem>>, %arg5: memref<1x1x128xf32, #tpu.memory_space<vmem>>) attributes {dimension_semantics = [#tpu.dimension_semantics<parallel>, #tpu.dimension_semantics<arbitrary>], iteration_bounds = array<i64: 2, 1>, scalar_prefetch = 0 : i64, scratch_operands = 0 : i64, tpu.core_type = #tpu.core_type<tc>, window_params = [{transform_indices = @transform_0, window_bounds = array<i64: 1, 18, 18, 8>}, {pipeline_mode = #tpu.pipeline_mode<synchronous>, transform_indices = @transform_1, window_bounds = array<i64: 9, 8, 128>}, {transform_indices = @transform_2, window_bounds = array<i64: 1, 1, 128>}, {transform_indices = @transform_3, window_bounds = array<i64: 1, 1, 128>}]} {
    %c0_i32 = arith.constant 0 : i32
    %0 = arith.cmpi eq, %arg1, %c0_i32 : i32
    %1 = arith.extui %0 : i1 to i32
    %c0_i32_0 = arith.constant 0 : i32
    %2 = arith.cmpi ne, %1, %c0_i32_0 : i32
    scf.if %2 {
      %cst_76 = arith.constant 0.000000e+00 : f32
      %99 = vector.broadcast %cst_76 : f32 to vector<1x1x128xf32>
      %c0_77 = arith.constant 0 : index
      %c0_78 = arith.constant 0 : index
      %c0_79 = arith.constant 0 : index
      %100 = vector.load %arg4[%c0_77, %c0_78, %c0_79] : memref<1x1x128xf32, #tpu.memory_space<vmem>>, vector<1x1x128xf32>
      tpu.vector_store %arg4[%c0_77, %c0_78, %c0_79], %99 {strides = array<i32>} : memref<1x1x128xf32, #tpu.memory_space<vmem>>, vector<1x1x128xf32>,
      %cst_80 = arith.constant 0.000000e+00 : f32
      %101 = vector.broadcast %cst_80 : f32 to vector<1x1x128xf32>
      %c0_81 = arith.constant 0 : index
      %c0_82 = arith.constant 0 : index
      %c0_83 = arith.constant 0 : index
      %102 = vector.load %arg5[%c0_81, %c0_82, %c0_83] : memref<1x1x128xf32, #tpu.memory_space<vmem>>, vector<1x1x128xf32>
      tpu.vector_store %arg5[%c0_81, %c0_82, %c0_83], %101 {strides = array<i32>} : memref<1x1x128xf32, #tpu.memory_space<vmem>>, vector<1x1x128xf32>,
    } else {
    }
    %c16_i32 = arith.constant 16 : i32
    %3 = arith.muli %arg1, %c16_i32 : i32
    %cst = arith.constant 0.000000e+00 : f32
    %4 = vector.broadcast %cst : f32 to vector<256x128xf32>
    %c0_i32_1 = arith.constant 0 : i32
    %5 = arith.addi %3, %c0_i32_1 : i32
    %c0 = arith.constant 0 : index
    %6 = arith.index_cast %5 : i32 to index
    %c0_2 = arith.constant 0 : index
    %c0_3 = arith.constant 0 : index
    %7 = vector.load %arg2[%c0, %6, %c0_2, %c0_3] : memref<1x18x18x8xbf16, #tpu.memory_space<vmem>>, vector<1x16x16x8xbf16>
    %8 = vector.shape_cast %7 : vector<1x16x16x8xbf16> to vector<16x16x8xbf16>
    %9 = vector.shape_cast %8 : vector<16x16x8xbf16> to vector<256x8xbf16>
    %c0_4 = arith.constant 0 : index
    %c0_5 = arith.constant 0 : index
    %c0_6 = arith.constant 0 : index
    %10 = vector.load %arg3[%c0_4, %c0_5, %c0_6] : memref<9x8x128xbf16, #tpu.memory_space<vmem>>, vector<1x8x128xbf16>
    %11 = vector.shape_cast %10 : vector<1x8x128xbf16> to vector<8x128xbf16>
    %cst_7 = arith.constant dense<0.000000e+00> : vector<256x128xf32>
    %12 = tpu.matmul %9, %11, %cst_7 {dimension_numbers = #tpu.dot_dimension_numbers<[1], [0], [0], [1], [0, 0, 1, 1], [], []>} : vector<256x8xbf16>, vector<8x128xbf16>, vector<256x128xf32> -> vector<256x128xf32>
    %13 = arith.addf %4, %12 : vector<256x128xf32>
    %c0_i32_8 = arith.constant 0 : i32
    %14 = arith.addi %3, %c0_i32_8 : i32
    %c0_9 = arith.constant 0 : index
    %15 = arith.index_cast %14 : i32 to index
    %c1 = arith.constant 1 : index
    %c0_10 = arith.constant 0 : index
    %16 = vector.load %arg2[%c0_9, %15, %c1, %c0_10] : memref<1x18x18x8xbf16, #tpu.memory_space<vmem>>, vector<1x16x16x8xbf16>
    %17 = vector.shape_cast %16 : vector<1x16x16x8xbf16> to vector<16x16x8xbf16>
    %18 = vector.shape_cast %17 : vector<16x16x8xbf16> to vector<256x8xbf16>
    %c1_11 = arith.constant 1 : index
    %c0_12 = arith.constant 0 : index
    %c0_13 = arith.constant 0 : index
    %19 = vector.load %arg3[%c1_11, %c0_12, %c0_13] : memref<9x8x128xbf16, #tpu.memory_space<vmem>>, vector<1x8x128xbf16>
    %20 = vector.shape_cast %19 : vector<1x8x128xbf16> to vector<8x128xbf16>
    %cst_14 = arith.constant dense<0.000000e+00> : vector<256x128xf32>
    %21 = tpu.matmul %18, %20, %cst_14 {dimension_numbers = #tpu.dot_dimension_numbers<[1], [0], [0], [1], [0, 0, 1, 1], [], []>} : vector<256x8xbf16>, vector<8x128xbf16>, vector<256x128xf32> -> vector<256x128xf32>
    %22 = arith.addf %13, %21 : vector<256x128xf32>
    %c0_i32_15 = arith.constant 0 : i32
    %23 = arith.addi %3, %c0_i32_15 : i32
    %c0_16 = arith.constant 0 : index
    %24 = arith.index_cast %23 : i32 to index
    %c2 = arith.constant 2 : index
    %c0_17 = arith.constant 0 : index
    %25 = vector.load %arg2[%c0_16, %24, %c2, %c0_17] : memref<1x18x18x8xbf16, #tpu.memory_space<vmem>>, vector<1x16x16x8xbf16>
    %26 = vector.shape_cast %25 : vector<1x16x16x8xbf16> to vector<16x16x8xbf16>
    %27 = vector.shape_cast %26 : vector<16x16x8xbf16> to vector<256x8xbf16>
    %c2_18 = arith.constant 2 : index
    %c0_19 = arith.constant 0 : index
    %c0_20 = arith.constant 0 : index
    %28 = vector.load %arg3[%c2_18, %c0_19, %c0_20] : memref<9x8x128xbf16, #tpu.memory_space<vmem>>, vector<1x8x128xbf16>
    %29 = vector.shape_cast %28 : vector<1x8x128xbf16> to vector<8x128xbf16>
    %cst_21 = arith.constant dense<0.000000e+00> : vector<256x128xf32>
    %30 = tpu.matmul %27, %29, %cst_21 {dimension_numbers = #tpu.dot_dimension_numbers<[1], [0], [0], [1], [0, 0, 1, 1], [], []>} : vector<256x8xbf16>, vector<8x128xbf16>, vector<256x128xf32> -> vector<256x128xf32>
    %31 = arith.addf %22, %30 : vector<256x128xf32>
    %c1_i32 = arith.constant 1 : i32
    %32 = arith.addi %3, %c1_i32 : i32
    %c0_22 = arith.constant 0 : index
    %33 = arith.index_cast %32 : i32 to index
    %c0_23 = arith.constant 0 : index
    %c0_24 = arith.constant 0 : index
    %34 = vector.load %arg2[%c0_22, %33, %c0_23, %c0_24] : memref<1x18x18x8xbf16, #tpu.memory_space<vmem>>, vector<1x16x16x8xbf16>
    %35 = vector.shape_cast %34 : vector<1x16x16x8xbf16> to vector<16x16x8xbf16>
    %36 = vector.shape_cast %35 : vector<16x16x8xbf16> to vector<256x8xbf16>
    %c3 = arith.constant 3 : index
    %c0_25 = arith.constant 0 : index
    %c0_26 = arith.constant 0 : index
    %37 = vector.load %arg3[%c3, %c0_25, %c0_26] : memref<9x8x128xbf16, #tpu.memory_space<vmem>>, vector<1x8x128xbf16>
    %38 = vector.shape_cast %37 : vector<1x8x128xbf16> to vector<8x128xbf16>
    %cst_27 = arith.constant dense<0.000000e+00> : vector<256x128xf32>
    %39 = tpu.matmul %36, %38, %cst_27 {dimension_numbers = #tpu.dot_dimension_numbers<[1], [0], [0], [1], [0, 0, 1, 1], [], []>} : vector<256x8xbf16>, vector<8x128xbf16>, vector<256x128xf32> -> vector<256x128xf32>
    %40 = arith.addf %31, %39 : vector<256x128xf32>
    %c1_i32_28 = arith.constant 1 : i32
    %41 = arith.addi %3, %c1_i32_28 : i32
    %c0_29 = arith.constant 0 : index
    %42 = arith.index_cast %41 : i32 to index
    %c1_30 = arith.constant 1 : index
    %c0_31 = arith.constant 0 : index
    %43 = vector.load %arg2[%c0_29, %42, %c1_30, %c0_31] : memref<1x18x18x8xbf16, #tpu.memory_space<vmem>>, vector<1x16x16x8xbf16>
    %44 = vector.shape_cast %43 : vector<1x16x16x8xbf16> to vector<16x16x8xbf16>
    %45 = vector.shape_cast %44 : vector<16x16x8xbf16> to vector<256x8xbf16>
    %c4 = arith.constant 4 : index
    %c0_32 = arith.constant 0 : index
    %c0_33 = arith.constant 0 : index
    %46 = vector.load %arg3[%c4, %c0_32, %c0_33] : memref<9x8x128xbf16, #tpu.memory_space<vmem>>, vector<1x8x128xbf16>
    %47 = vector.shape_cast %46 : vector<1x8x128xbf16> to vector<8x128xbf16>
    %cst_34 = arith.constant dense<0.000000e+00> : vector<256x128xf32>
    %48 = tpu.matmul %45, %47, %cst_34 {dimension_numbers = #tpu.dot_dimension_numbers<[1], [0], [0], [1], [0, 0, 1, 1], [], []>} : vector<256x8xbf16>, vector<8x128xbf16>, vector<256x128xf32> -> vector<256x128xf32>
    %49 = arith.addf %40, %48 : vector<256x128xf32>
    %c1_i32_35 = arith.constant 1 : i32
    %50 = arith.addi %3, %c1_i32_35 : i32
    %c0_36 = arith.constant 0 : index
    %51 = arith.index_cast %50 : i32 to index
    %c2_37 = arith.constant 2 : index
    %c0_38 = arith.constant 0 : index
    %52 = vector.load %arg2[%c0_36, %51, %c2_37, %c0_38] : memref<1x18x18x8xbf16, #tpu.memory_space<vmem>>, vector<1x16x16x8xbf16>
    %53 = vector.shape_cast %52 : vector<1x16x16x8xbf16> to vector<16x16x8xbf16>
    %54 = vector.shape_cast %53 : vector<16x16x8xbf16> to vector<256x8xbf16>
    %c5 = arith.constant 5 : index
    %c0_39 = arith.constant 0 : index
    %c0_40 = arith.constant 0 : index
    %55 = vector.load %arg3[%c5, %c0_39, %c0_40] : memref<9x8x128xbf16, #tpu.memory_space<vmem>>, vector<1x8x128xbf16>
    %56 = vector.shape_cast %55 : vector<1x8x128xbf16> to vector<8x128xbf16>
    %cst_41 = arith.constant dense<0.000000e+00> : vector<256x128xf32>
    %57 = tpu.matmul %54, %56, %cst_41 {dimension_numbers = #tpu.dot_dimension_numbers<[1], [0], [0], [1], [0, 0, 1, 1], [], []>} : vector<256x8xbf16>, vector<8x128xbf16>, vector<256x128xf32> -> vector<256x128xf32>
    %58 = arith.addf %49, %57 : vector<256x128xf32>
    %c2_i32 = arith.constant 2 : i32
    %59 = arith.addi %3, %c2_i32 : i32
    %c0_42 = arith.constant 0 : index
    %60 = arith.index_cast %59 : i32 to index
    %c0_43 = arith.constant 0 : index
    %c0_44 = arith.constant 0 : index
    %61 = vector.load %arg2[%c0_42, %60, %c0_43, %c0_44] : memref<1x18x18x8xbf16, #tpu.memory_space<vmem>>, vector<1x16x16x8xbf16>
    %62 = vector.shape_cast %61 : vector<1x16x16x8xbf16> to vector<16x16x8xbf16>
    %63 = vector.shape_cast %62 : vector<16x16x8xbf16> to vector<256x8xbf16>
    %c6 = arith.constant 6 : index
    %c0_45 = arith.constant 0 : index
    %c0_46 = arith.constant 0 : index
    %64 = vector.load %arg3[%c6, %c0_45, %c0_46] : memref<9x8x128xbf16, #tpu.memory_space<vmem>>, vector<1x8x128xbf16>
    %65 = vector.shape_cast %64 : vector<1x8x128xbf16> to vector<8x128xbf16>
    %cst_47 = arith.constant dense<0.000000e+00> : vector<256x128xf32>
    %66 = tpu.matmul %63, %65, %cst_47 {dimension_numbers = #tpu.dot_dimension_numbers<[1], [0], [0], [1], [0, 0, 1, 1], [], []>} : vector<256x8xbf16>, vector<8x128xbf16>, vector<256x128xf32> -> vector<256x128xf32>
    %67 = arith.addf %58, %66 : vector<256x128xf32>
    %c2_i32_48 = arith.constant 2 : i32
    %68 = arith.addi %3, %c2_i32_48 : i32
    %c0_49 = arith.constant 0 : index
    %69 = arith.index_cast %68 : i32 to index
    %c1_50 = arith.constant 1 : index
    %c0_51 = arith.constant 0 : index
    %70 = vector.load %arg2[%c0_49, %69, %c1_50, %c0_51] : memref<1x18x18x8xbf16, #tpu.memory_space<vmem>>, vector<1x16x16x8xbf16>
    %71 = vector.shape_cast %70 : vector<1x16x16x8xbf16> to vector<16x16x8xbf16>
    %72 = vector.shape_cast %71 : vector<16x16x8xbf16> to vector<256x8xbf16>
    %c7 = arith.constant 7 : index
    %c0_52 = arith.constant 0 : index
    %c0_53 = arith.constant 0 : index
    %73 = vector.load %arg3[%c7, %c0_52, %c0_53] : memref<9x8x128xbf16, #tpu.memory_space<vmem>>, vector<1x8x128xbf16>
    %74 = vector.shape_cast %73 : vector<1x8x128xbf16> to vector<8x128xbf16>
    %cst_54 = arith.constant dense<0.000000e+00> : vector<256x128xf32>
    %75 = tpu.matmul %72, %74, %cst_54 {dimension_numbers = #tpu.dot_dimension_numbers<[1], [0], [0], [1], [0, 0, 1, 1], [], []>} : vector<256x8xbf16>, vector<8x128xbf16>, vector<256x128xf32> -> vector<256x128xf32>
    %76 = arith.addf %67, %75 : vector<256x128xf32>
    %c2_i32_55 = arith.constant 2 : i32
    %77 = arith.addi %3, %c2_i32_55 : i32
    %c0_56 = arith.constant 0 : index
    %78 = arith.index_cast %77 : i32 to index
    %c2_57 = arith.constant 2 : index
    %c0_58 = arith.constant 0 : index
    %79 = vector.load %arg2[%c0_56, %78, %c2_57, %c0_58] : memref<1x18x18x8xbf16, #tpu.memory_space<vmem>>, vector<1x16x16x8xbf16>
    %80 = vector.shape_cast %79 : vector<1x16x16x8xbf16> to vector<16x16x8xbf16>
    %81 = vector.shape_cast %80 : vector<16x16x8xbf16> to vector<256x8xbf16>
    %c8 = arith.constant 8 : index
    %c0_59 = arith.constant 0 : index
    %c0_60 = arith.constant 0 : index
    %82 = vector.load %arg3[%c8, %c0_59, %c0_60] : memref<9x8x128xbf16, #tpu.memory_space<vmem>>, vector<1x8x128xbf16>
    %83 = vector.shape_cast %82 : vector<1x8x128xbf16> to vector<8x128xbf16>
    %cst_61 = arith.constant dense<0.000000e+00> : vector<256x128xf32>
    %84 = tpu.matmul %81, %83, %cst_61 {dimension_numbers = #tpu.dot_dimension_numbers<[1], [0], [0], [1], [0, 0, 1, 1], [], []>} : vector<256x8xbf16>, vector<8x128xbf16>, vector<256x128xf32> -> vector<256x128xf32>
    %85 = arith.addf %76, %84 : vector<256x128xf32>
    %c0_62 = arith.constant 0 : index
    %c0_63 = arith.constant 0 : index
    %c0_64 = arith.constant 0 : index
    %86 = vector.load %arg4[%c0_62, %c0_63, %c0_64] : memref<1x1x128xf32, #tpu.memory_space<vmem>>, vector<1x1x128xf32>
    %cst_65 = arith.constant dense<0.000000e+00> : vector<128xf32>
    %87 = vector.multi_reduction <add>, %85, %cst_65 [0] : vector<256x128xf32> to vector<128xf32>
    %88 = vector.shape_cast %87 : vector<128xf32> to vector<1x128xf32>
    %89 = vector.shape_cast %88 : vector<1x128xf32> to vector<1x1x128xf32>
    %90 = arith.addf %86, %89 : vector<1x1x128xf32>
    %c0_66 = arith.constant 0 : index
    %c0_67 = arith.constant 0 : index
    %c0_68 = arith.constant 0 : index
    %91 = vector.load %arg4[%c0_66, %c0_67, %c0_68] : memref<1x1x128xf32, #tpu.memory_space<vmem>>, vector<1x1x128xf32>
    tpu.vector_store %arg4[%c0_66, %c0_67, %c0_68], %90 {strides = array<i32>} : memref<1x1x128xf32, #tpu.memory_space<vmem>>, vector<1x1x128xf32>,
    %c0_69 = arith.constant 0 : index
    %c0_70 = arith.constant 0 : index
    %c0_71 = arith.constant 0 : index
    %92 = vector.load %arg5[%c0_69, %c0_70, %c0_71] : memref<1x1x128xf32, #tpu.memory_space<vmem>>, vector<1x1x128xf32>
    %93 = arith.mulf %85, %85 : vector<256x128xf32>
    %cst_72 = arith.constant dense<0.000000e+00> : vector<128xf32>
    %94 = vector.multi_reduction <add>, %93, %cst_72 [0] : vector<256x128xf32> to vector<128xf32>
    %95 = vector.shape_cast %94 : vector<128xf32> to vector<1x128xf32>
    %96 = vector.shape_cast %95 : vector<1x128xf32> to vector<1x1x128xf32>
    %97 = arith.addf %92, %96 : vector<1x1x128xf32>
    %c0_73 = arith.constant 0 : index
    %c0_74 = arith.constant 0 : index
    %c0_75 = arith.constant 0 : index
    %98 = vector.load %arg5[%c0_73, %c0_74, %c0_75] : memref<1x1x128xf32, #tpu.memory_space<vmem>>, vector<1x1x128xf32>
    tpu.vector_store %arg5[%c0_73, %c0_74, %c0_75], %97 {strides = array<i32>} : memref<1x1x128xf32, #tpu.memory_space<vmem>>, vector<1x1x128xf32>,
    return
  }
  func.func @transform_0(%arg0: i32, %arg1: i32) -> (i32, i32, i32, i32) {
    %c0_i32 = arith.constant 0 : i32
    %c0_i32_0 = arith.constant 0 : i32
    %c0_i32_1 = arith.constant 0 : i32
    %c0_i32_2 = arith.constant 0 : i32
    return %arg0, %c0_i32, %c0_i32_0, %c0_i32_1 : i32, i32, i32, i32
  }
  func.func @transform_1(%arg0: i32, %arg1: i32) -> (i32, i32, i32) {
    %c0_i32 = arith.constant 0 : i32
    %c0_i32_0 = arith.constant 0 : i32
    %c0_i32_1 = arith.constant 0 : i32
    %c0_i32_2 = arith.constant 0 : i32
    return %c0_i32, %c0_i32_0, %c0_i32_1 : i32, i32, i32
  }
  func.func @transform_2(%arg0: i32, %arg1: i32) -> (i32, i32, i32) {
    %c0_i32 = arith.constant 0 : i32
    %c0_i32_0 = arith.constant 0 : i32
    %c0_i32_1 = arith.constant 0 : i32
    return %arg0, %c0_i32, %c0_i32_0 : i32, i32, i32
  }
  func.func @transform_3(%arg0: i32, %arg1: i32) -> (i32, i32, i32) {
    %c0_i32 = arith.constant 0 : i32
    %c0_i32_0 = arith.constant 0 : i32
    %c0_i32_1 = arith.constant 0 : i32
    return %arg0, %c0_i32, %c0_i32_0 : i32, i32, i32
  }
}

module attributes {stable_mosaic.version = 11 : i64} {
  func.func @_norm_kernel(%arg0: i32, %arg1: i32, %arg2: memref<1x18x18x8xbf16, #tpu.memory_space<vmem>>, %arg3: memref<9x8x128xbf16, #tpu.memory_space<vmem>>, %arg4: memref<1x128xf32, #tpu.memory_space<vmem>>, %arg5: memref<1x128xf32, #tpu.memory_space<vmem>>, %arg6: memref<1x256x128xf32, #tpu.memory_space<vmem>>) attributes {dimension_semantics = [#tpu.dimension_semantics<parallel>, #tpu.dimension_semantics<parallel>], iteration_bounds = array<i64: 2, 1>, scalar_prefetch = 0 : i64, scratch_operands = 0 : i64, tpu.core_type = #tpu.core_type<tc>, window_params = [{transform_indices = @transform_0, window_bounds = array<i64: 1, 18, 18, 8>}, {pipeline_mode = #tpu.pipeline_mode<synchronous>, transform_indices = @transform_1, window_bounds = array<i64: 9, 8, 128>}, {pipeline_mode = #tpu.pipeline_mode<synchronous>, transform_indices = @transform_2, window_bounds = array<i64: 1, 128>}, {pipeline_mode = #tpu.pipeline_mode<synchronous>, transform_indices = @transform_3, window_bounds = array<i64: 1, 128>}, {transform_indices = @transform_4, window_bounds = array<i64: 1, 256, 128>}]} {
    %c16_i32 = arith.constant 16 : i32
    %0 = arith.muli %arg1, %c16_i32 : i32
    %cst = arith.constant 0.000000e+00 : f32
    %1 = vector.broadcast %cst : f32 to vector<256x128xf32>
    %c0_i32 = arith.constant 0 : i32
    %2 = arith.addi %0, %c0_i32 : i32
    %c0 = arith.constant 0 : index
    %3 = arith.index_cast %2 : i32 to index
    %c0_0 = arith.constant 0 : index
    %c0_1 = arith.constant 0 : index
    %4 = vector.load %arg2[%c0, %3, %c0_0, %c0_1] : memref<1x18x18x8xbf16, #tpu.memory_space<vmem>>, vector<1x16x16x8xbf16>
    %5 = vector.shape_cast %4 : vector<1x16x16x8xbf16> to vector<16x16x8xbf16>
    %6 = vector.shape_cast %5 : vector<16x16x8xbf16> to vector<256x8xbf16>
    %c0_2 = arith.constant 0 : index
    %c0_3 = arith.constant 0 : index
    %c0_4 = arith.constant 0 : index
    %7 = vector.load %arg3[%c0_2, %c0_3, %c0_4] : memref<9x8x128xbf16, #tpu.memory_space<vmem>>, vector<1x8x128xbf16>
    %8 = vector.shape_cast %7 : vector<1x8x128xbf16> to vector<8x128xbf16>
    %cst_5 = arith.constant dense<0.000000e+00> : vector<256x128xf32>
    %9 = tpu.matmul %6, %8, %cst_5 {dimension_numbers = #tpu.dot_dimension_numbers<[1], [0], [0], [1], [0, 0, 1, 1], [], []>} : vector<256x8xbf16>, vector<8x128xbf16>, vector<256x128xf32> -> vector<256x128xf32>
    %10 = arith.addf %1, %9 : vector<256x128xf32>
    %c0_i32_6 = arith.constant 0 : i32
    %11 = arith.addi %0, %c0_i32_6 : i32
    %c0_7 = arith.constant 0 : index
    %12 = arith.index_cast %11 : i32 to index
    %c1 = arith.constant 1 : index
    %c0_8 = arith.constant 0 : index
    %13 = vector.load %arg2[%c0_7, %12, %c1, %c0_8] : memref<1x18x18x8xbf16, #tpu.memory_space<vmem>>, vector<1x16x16x8xbf16>
    %14 = vector.shape_cast %13 : vector<1x16x16x8xbf16> to vector<16x16x8xbf16>
    %15 = vector.shape_cast %14 : vector<16x16x8xbf16> to vector<256x8xbf16>
    %c1_9 = arith.constant 1 : index
    %c0_10 = arith.constant 0 : index
    %c0_11 = arith.constant 0 : index
    %16 = vector.load %arg3[%c1_9, %c0_10, %c0_11] : memref<9x8x128xbf16, #tpu.memory_space<vmem>>, vector<1x8x128xbf16>
    %17 = vector.shape_cast %16 : vector<1x8x128xbf16> to vector<8x128xbf16>
    %cst_12 = arith.constant dense<0.000000e+00> : vector<256x128xf32>
    %18 = tpu.matmul %15, %17, %cst_12 {dimension_numbers = #tpu.dot_dimension_numbers<[1], [0], [0], [1], [0, 0, 1, 1], [], []>} : vector<256x8xbf16>, vector<8x128xbf16>, vector<256x128xf32> -> vector<256x128xf32>
    %19 = arith.addf %10, %18 : vector<256x128xf32>
    %c0_i32_13 = arith.constant 0 : i32
    %20 = arith.addi %0, %c0_i32_13 : i32
    %c0_14 = arith.constant 0 : index
    %21 = arith.index_cast %20 : i32 to index
    %c2 = arith.constant 2 : index
    %c0_15 = arith.constant 0 : index
    %22 = vector.load %arg2[%c0_14, %21, %c2, %c0_15] : memref<1x18x18x8xbf16, #tpu.memory_space<vmem>>, vector<1x16x16x8xbf16>
    %23 = vector.shape_cast %22 : vector<1x16x16x8xbf16> to vector<16x16x8xbf16>
    %24 = vector.shape_cast %23 : vector<16x16x8xbf16> to vector<256x8xbf16>
    %c2_16 = arith.constant 2 : index
    %c0_17 = arith.constant 0 : index
    %c0_18 = arith.constant 0 : index
    %25 = vector.load %arg3[%c2_16, %c0_17, %c0_18] : memref<9x8x128xbf16, #tpu.memory_space<vmem>>, vector<1x8x128xbf16>
    %26 = vector.shape_cast %25 : vector<1x8x128xbf16> to vector<8x128xbf16>
    %cst_19 = arith.constant dense<0.000000e+00> : vector<256x128xf32>
    %27 = tpu.matmul %24, %26, %cst_19 {dimension_numbers = #tpu.dot_dimension_numbers<[1], [0], [0], [1], [0, 0, 1, 1], [], []>} : vector<256x8xbf16>, vector<8x128xbf16>, vector<256x128xf32> -> vector<256x128xf32>
    %28 = arith.addf %19, %27 : vector<256x128xf32>
    %c1_i32 = arith.constant 1 : i32
    %29 = arith.addi %0, %c1_i32 : i32
    %c0_20 = arith.constant 0 : index
    %30 = arith.index_cast %29 : i32 to index
    %c0_21 = arith.constant 0 : index
    %c0_22 = arith.constant 0 : index
    %31 = vector.load %arg2[%c0_20, %30, %c0_21, %c0_22] : memref<1x18x18x8xbf16, #tpu.memory_space<vmem>>, vector<1x16x16x8xbf16>
    %32 = vector.shape_cast %31 : vector<1x16x16x8xbf16> to vector<16x16x8xbf16>
    %33 = vector.shape_cast %32 : vector<16x16x8xbf16> to vector<256x8xbf16>
    %c3 = arith.constant 3 : index
    %c0_23 = arith.constant 0 : index
    %c0_24 = arith.constant 0 : index
    %34 = vector.load %arg3[%c3, %c0_23, %c0_24] : memref<9x8x128xbf16, #tpu.memory_space<vmem>>, vector<1x8x128xbf16>
    %35 = vector.shape_cast %34 : vector<1x8x128xbf16> to vector<8x128xbf16>
    %cst_25 = arith.constant dense<0.000000e+00> : vector<256x128xf32>
    %36 = tpu.matmul %33, %35, %cst_25 {dimension_numbers = #tpu.dot_dimension_numbers<[1], [0], [0], [1], [0, 0, 1, 1], [], []>} : vector<256x8xbf16>, vector<8x128xbf16>, vector<256x128xf32> -> vector<256x128xf32>
    %37 = arith.addf %28, %36 : vector<256x128xf32>
    %c1_i32_26 = arith.constant 1 : i32
    %38 = arith.addi %0, %c1_i32_26 : i32
    %c0_27 = arith.constant 0 : index
    %39 = arith.index_cast %38 : i32 to index
    %c1_28 = arith.constant 1 : index
    %c0_29 = arith.constant 0 : index
    %40 = vector.load %arg2[%c0_27, %39, %c1_28, %c0_29] : memref<1x18x18x8xbf16, #tpu.memory_space<vmem>>, vector<1x16x16x8xbf16>
    %41 = vector.shape_cast %40 : vector<1x16x16x8xbf16> to vector<16x16x8xbf16>
    %42 = vector.shape_cast %41 : vector<16x16x8xbf16> to vector<256x8xbf16>
    %c4 = arith.constant 4 : index
    %c0_30 = arith.constant 0 : index
    %c0_31 = arith.constant 0 : index
    %43 = vector.load %arg3[%c4, %c0_30, %c0_31] : memref<9x8x128xbf16, #tpu.memory_space<vmem>>, vector<1x8x128xbf16>
    %44 = vector.shape_cast %43 : vector<1x8x128xbf16> to vector<8x128xbf16>
    %cst_32 = arith.constant dense<0.000000e+00> : vector<256x128xf32>
    %45 = tpu.matmul %42, %44, %cst_32 {dimension_numbers = #tpu.dot_dimension_numbers<[1], [0], [0], [1], [0, 0, 1, 1], [], []>} : vector<256x8xbf16>, vector<8x128xbf16>, vector<256x128xf32> -> vector<256x128xf32>
    %46 = arith.addf %37, %45 : vector<256x128xf32>
    %c1_i32_33 = arith.constant 1 : i32
    %47 = arith.addi %0, %c1_i32_33 : i32
    %c0_34 = arith.constant 0 : index
    %48 = arith.index_cast %47 : i32 to index
    %c2_35 = arith.constant 2 : index
    %c0_36 = arith.constant 0 : index
    %49 = vector.load %arg2[%c0_34, %48, %c2_35, %c0_36] : memref<1x18x18x8xbf16, #tpu.memory_space<vmem>>, vector<1x16x16x8xbf16>
    %50 = vector.shape_cast %49 : vector<1x16x16x8xbf16> to vector<16x16x8xbf16>
    %51 = vector.shape_cast %50 : vector<16x16x8xbf16> to vector<256x8xbf16>
    %c5 = arith.constant 5 : index
    %c0_37 = arith.constant 0 : index
    %c0_38 = arith.constant 0 : index
    %52 = vector.load %arg3[%c5, %c0_37, %c0_38] : memref<9x8x128xbf16, #tpu.memory_space<vmem>>, vector<1x8x128xbf16>
    %53 = vector.shape_cast %52 : vector<1x8x128xbf16> to vector<8x128xbf16>
    %cst_39 = arith.constant dense<0.000000e+00> : vector<256x128xf32>
    %54 = tpu.matmul %51, %53, %cst_39 {dimension_numbers = #tpu.dot_dimension_numbers<[1], [0], [0], [1], [0, 0, 1, 1], [], []>} : vector<256x8xbf16>, vector<8x128xbf16>, vector<256x128xf32> -> vector<256x128xf32>
    %55 = arith.addf %46, %54 : vector<256x128xf32>
    %c2_i32 = arith.constant 2 : i32
    %56 = arith.addi %0, %c2_i32 : i32
    %c0_40 = arith.constant 0 : index
    %57 = arith.index_cast %56 : i32 to index
    %c0_41 = arith.constant 0 : index
    %c0_42 = arith.constant 0 : index
    %58 = vector.load %arg2[%c0_40, %57, %c0_41, %c0_42] : memref<1x18x18x8xbf16, #tpu.memory_space<vmem>>, vector<1x16x16x8xbf16>
    %59 = vector.shape_cast %58 : vector<1x16x16x8xbf16> to vector<16x16x8xbf16>
    %60 = vector.shape_cast %59 : vector<16x16x8xbf16> to vector<256x8xbf16>
    %c6 = arith.constant 6 : index
    %c0_43 = arith.constant 0 : index
    %c0_44 = arith.constant 0 : index
    %61 = vector.load %arg3[%c6, %c0_43, %c0_44] : memref<9x8x128xbf16, #tpu.memory_space<vmem>>, vector<1x8x128xbf16>
    %62 = vector.shape_cast %61 : vector<1x8x128xbf16> to vector<8x128xbf16>
    %cst_45 = arith.constant dense<0.000000e+00> : vector<256x128xf32>
    %63 = tpu.matmul %60, %62, %cst_45 {dimension_numbers = #tpu.dot_dimension_numbers<[1], [0], [0], [1], [0, 0, 1, 1], [], []>} : vector<256x8xbf16>, vector<8x128xbf16>, vector<256x128xf32> -> vector<256x128xf32>
    %64 = arith.addf %55, %63 : vector<256x128xf32>
    %c2_i32_46 = arith.constant 2 : i32
    %65 = arith.addi %0, %c2_i32_46 : i32
    %c0_47 = arith.constant 0 : index
    %66 = arith.index_cast %65 : i32 to index
    %c1_48 = arith.constant 1 : index
    %c0_49 = arith.constant 0 : index
    %67 = vector.load %arg2[%c0_47, %66, %c1_48, %c0_49] : memref<1x18x18x8xbf16, #tpu.memory_space<vmem>>, vector<1x16x16x8xbf16>
    %68 = vector.shape_cast %67 : vector<1x16x16x8xbf16> to vector<16x16x8xbf16>
    %69 = vector.shape_cast %68 : vector<16x16x8xbf16> to vector<256x8xbf16>
    %c7 = arith.constant 7 : index
    %c0_50 = arith.constant 0 : index
    %c0_51 = arith.constant 0 : index
    %70 = vector.load %arg3[%c7, %c0_50, %c0_51] : memref<9x8x128xbf16, #tpu.memory_space<vmem>>, vector<1x8x128xbf16>
    %71 = vector.shape_cast %70 : vector<1x8x128xbf16> to vector<8x128xbf16>
    %cst_52 = arith.constant dense<0.000000e+00> : vector<256x128xf32>
    %72 = tpu.matmul %69, %71, %cst_52 {dimension_numbers = #tpu.dot_dimension_numbers<[1], [0], [0], [1], [0, 0, 1, 1], [], []>} : vector<256x8xbf16>, vector<8x128xbf16>, vector<256x128xf32> -> vector<256x128xf32>
    %73 = arith.addf %64, %72 : vector<256x128xf32>
    %c2_i32_53 = arith.constant 2 : i32
    %74 = arith.addi %0, %c2_i32_53 : i32
    %c0_54 = arith.constant 0 : index
    %75 = arith.index_cast %74 : i32 to index
    %c2_55 = arith.constant 2 : index
    %c0_56 = arith.constant 0 : index
    %76 = vector.load %arg2[%c0_54, %75, %c2_55, %c0_56] : memref<1x18x18x8xbf16, #tpu.memory_space<vmem>>, vector<1x16x16x8xbf16>
    %77 = vector.shape_cast %76 : vector<1x16x16x8xbf16> to vector<16x16x8xbf16>
    %78 = vector.shape_cast %77 : vector<16x16x8xbf16> to vector<256x8xbf16>
    %c8 = arith.constant 8 : index
    %c0_57 = arith.constant 0 : index
    %c0_58 = arith.constant 0 : index
    %79 = vector.load %arg3[%c8, %c0_57, %c0_58] : memref<9x8x128xbf16, #tpu.memory_space<vmem>>, vector<1x8x128xbf16>
    %80 = vector.shape_cast %79 : vector<1x8x128xbf16> to vector<8x128xbf16>
    %cst_59 = arith.constant dense<0.000000e+00> : vector<256x128xf32>
    %81 = tpu.matmul %78, %80, %cst_59 {dimension_numbers = #tpu.dot_dimension_numbers<[1], [0], [0], [1], [0, 0, 1, 1], [], []>} : vector<256x8xbf16>, vector<8x128xbf16>, vector<256x128xf32> -> vector<256x128xf32>
    %82 = arith.addf %73, %81 : vector<256x128xf32>
    %c0_60 = arith.constant 0 : index
    %c0_61 = arith.constant 0 : index
    %83 = vector.load %arg4[%c0_60, %c0_61] : memref<1x128xf32, #tpu.memory_space<vmem>>, vector<1x128xf32>
    %84 = vector.broadcast %83 : vector<1x128xf32> to vector<256x128xf32>
    %85 = arith.mulf %82, %84 : vector<256x128xf32>
    %c0_62 = arith.constant 0 : index
    %c0_63 = arith.constant 0 : index
    %86 = vector.load %arg5[%c0_62, %c0_63] : memref<1x128xf32, #tpu.memory_space<vmem>>, vector<1x128xf32>
    %87 = vector.broadcast %86 : vector<1x128xf32> to vector<256x128xf32>
    %88 = arith.addf %85, %87 : vector<256x128xf32>
    %cst_64 = arith.constant 0.000000e+00 : f32
    %89 = vector.broadcast %cst_64 : f32 to vector<256x128xf32>
    %90 = arith.cmpf ogt, %88, %89 : vector<256x128xf32>
    %cst_65 = arith.constant 1.000000e-01 : f32
    %91 = vector.broadcast %cst_65 : f32 to vector<256x128xf32>
    %92 = arith.mulf %91, %88 : vector<256x128xf32>
    %93 = arith.select %90, %88, %92 : vector<256x128xi1>, vector<256x128xf32>
    %c0_66 = arith.constant 0 : index
    %c0_67 = arith.constant 0 : index
    %c0_68 = arith.constant 0 : index
    %94 = vector.load %arg6[%c0_66, %c0_67, %c0_68] : memref<1x256x128xf32, #tpu.memory_space<vmem>>, vector<1x256x128xf32>
    %95 = vector.shape_cast %94 : vector<1x256x128xf32> to vector<256x128xf32>
    %96 = vector.shape_cast %93 : vector<256x128xf32> to vector<1x256x128xf32>
    tpu.vector_store %arg6[%c0_66, %c0_67, %c0_68], %96 {strides = array<i32>} : memref<1x256x128xf32, #tpu.memory_space<vmem>>, vector<1x256x128xf32>,
    return
  }
  func.func @transform_0(%arg0: i32, %arg1: i32) -> (i32, i32, i32, i32) {
    %c0_i32 = arith.constant 0 : i32
    %c0_i32_0 = arith.constant 0 : i32
    %c0_i32_1 = arith.constant 0 : i32
    %c0_i32_2 = arith.constant 0 : i32
    return %arg0, %c0_i32, %c0_i32_0, %c0_i32_1 : i32, i32, i32, i32
  }
  func.func @transform_1(%arg0: i32, %arg1: i32) -> (i32, i32, i32) {
    %c0_i32 = arith.constant 0 : i32
    %c0_i32_0 = arith.constant 0 : i32
    %c0_i32_1 = arith.constant 0 : i32
    %c0_i32_2 = arith.constant 0 : i32
    return %c0_i32, %c0_i32_0, %c0_i32_1 : i32, i32, i32
  }
  func.func @transform_2(%arg0: i32, %arg1: i32) -> (i32, i32) {
    %c0_i32 = arith.constant 0 : i32
    %c0_i32_0 = arith.constant 0 : i32
    %c0_i32_1 = arith.constant 0 : i32
    return %c0_i32, %c0_i32_0 : i32, i32
  }
  func.func @transform_3(%arg0: i32, %arg1: i32) -> (i32, i32) {
    %c0_i32 = arith.constant 0 : i32
    %c0_i32_0 = arith.constant 0 : i32
    %c0_i32_1 = arith.constant 0 : i32
    return %c0_i32, %c0_i32_0 : i32, i32
  }
  func.func @transform_4(%arg0: i32, %arg1: i32) -> (i32, i32, i32) {
    %c0_i32 = arith.constant 0 : i32
    %c0_i32_0 = arith.constant 0 : i32
    return %arg0, %arg1, %c0_i32 : i32, i32, i32
  }
}

</mosaic_0001>

<bundles_post_ra>
// kernel: cnnblock_forward.2
= control target key start
LH: loop header
LB: loop body
LE: loop exit
PB: predicated region body
PF: predicated region fallthrough
CT: control target
= control target key end

     0   :  { %s6102_s12 = smov 0   ;;  %s6104_s13 = smov 0   ;;  %s8664_s0 = inlined_call_operand.vmem [shape: bf16[2,18,18,8], index: 0, kind: input, shape index: {}]   ;;  %s8665_s1 = inlined_call_operand.vmem [shape: bf16[9,8,128], index: 1, kind: input, shape index: {}]   ;;  %s8666_s2 = inlined_call_operand.vmem [shape: f32[2,1,128], index: 2, kind: output, shape index: {0}]   ;;  %s8667_s3 = inlined_call_operand.vmem [shape: f32[2,1,128], index: 3, kind: output, shape index: {1}]  }
   0x1   :  { %s6106_s14 = smov 0  }
   0x2 LB: > { %s26_s15 = sadd.s32 1, %s6075_s13  ;;  %p4970_p0 = scmp.ge.s32.totalorder %s6079_s14, 1  ;;  %s6079_s14 = sphi %s6106_s14, %s14_s14   ;;  %s6075_s13 = sphi %s6104_s13, %s8895_s13   ;;  %s6071_s12 = sphi %s6102_s12, %s8894_s12  }
   0x3   : > { %p28_p1 = scmp.ge.s32.totalorder %s26_s15, 2  ;;  %p152_p2 = scmp.lt.s32.totalorder %s6079_s14, 3 }
   0x5   : > { %s8897_s15 = smov (%p28_p1, %s26_s15), 0  ;;  %p153_p3 = pnand %p4970_p0, %p152_p2 }
   0x7   : > { %156 = sbr.rel (%p153_p3) target bundleno = 575 (0x23f), region = 28 }
   0xc   : > { %v4972_v0 = vld [vmem:[%s8665_s1 + $0x4] sm:$0xf]  ;;  %vm734_vm0 = vcmask 1043456   ;;  %p177_p4 = scmp.lt.s32.totalorder %s6071_s12, 1  ;;  %v231_v2 = vld [vmem:[%s8665_s1] sm:$0xf] }
   0xd   : > { %5972 = vmatprep.subr.msk.bf16.mxu1 %vm734_vm0, %v4972_v0  ;;  %5971 = vmatprep.subr.msk.bf16.mxu0 %vm734_vm0, %v4972_v0  ;;  %v736_v1 = vsel %vm734_vm0, %v4972_v0, 0  ;;  %v5053_v3 = vld [vmem:[%s8665_s1 + $0x8] sm:$0xf]  ;;  %vm248_vm1 = vsmask.f32 3328  ;;  %v6143_v4 = vsel %vm734_vm0, %v231_v2, 0 }
   0xe   : > { %5970 = vmatpush3.bf16.msra.mxu1 %v736_v1  ;;  %5664 = vmatpush3.bf16.msra.mxu0 %v736_v1  ;;  %s8899_s12 = smov (!%p177_p4, %s6071_s12), 1  ;;  %vm249_vm2 = vsmask.f32 7440  ;;  %vm685_vm3 = vcmask 64512   ;;  %v6169_v16 = vsel %vm734_vm0, %v5053_v3, 0  ;;  %vm1239_vm5 = vcmask 1042432  }
   0xf   : > { %5973 = vmatprep.subr.msk.bf16.mxu1 %vm734_vm0, %v231_v2  ;;  %5974 = vmatprep.subr.msk.bf16.mxu0 %vm734_vm0, %v5053_v3  ;;  %s5981_s22 = smul.u32 216, %s8899_s12  ;;  %vm6184_vm4 = vmor %vm248_vm1, %vm249_vm2  ;;  %vm1240_vm6 = vcmask 1046532   ;;  %s8474_s17 = scalar_lea.vmem %s8666_s2, %s8899_s12 }
  0x10   : > { %vm6470_vm7 = vmor %vm1239_vm5, %vm1240_vm6  ;;  %s8480_s20 = scalar_lea.vmem %s8667_s3, %s8899_s12 }
  0x11   : > { %s6140_s25 = scalar_lea.vmem %s8664_s0, %s5981_s22 }
  0x12   : > { %v6146_v5 = vld [vmem:[%s6140_s25] sm:$0xf]  ;;  %v6149_v6 = vld [vmem:[%s6140_s25 + $0x4] sm:$0xf]  ;;  %v6152_v7 = vld [vmem:[%s6140_s25 + $0x8] sm:$0x1] }
  0x13   : > { %v252_v8 = vshrl.u32 %v6146_v5, 16  ;;  %v255_v9 = vshll.u32 %v6146_v5, 16  ;;  %v261_v10 = vshll.u32 %v6149_v6, 16  ;;  %v265_v11 = vshrl.u32 %v6149_v6, 16  ;;  %v6159_v12 = vld [vmem:[%s6140_s25 + $0x60] sm:$0xf] }
  0x14   : > { %v271_v13 = vshll.u32 %v6152_v7, 16  ;;  %v6163_v14 = vld [vmem:[%s6140_s25 + $0x64] sm:$0xf]  ;;  %v6166_v15 = vld [vmem:[%s6140_s25 + $0x68] sm:$0x1]  ;;  %v444_v22 = vshrl.u32 %v6159_v12, 16 }
  0x15   : > { %v254_v17 = vrot.slane %v252_v8, 4  ;;  %v257_v18 = vrot.slane %v255_v9, 5  ;;  %v263_v19 = vrot.slane %v261_v10, 5  ;;  %v267_v20 = vrot.slane %v265_v11, 4  ;;  %v6177_v29 = vld [vmem:[%s6140_s25 + $0xc] sm:$0xf] }
  0x16   : > { %v273_v21 = vrot.slane %v271_v13, 5  ;;  %v447_v23 = vshll.u32 %v6159_v12, 16  ;;  %v453_v24 = vshll.u32 %v6163_v14, 16  ;;  %v457_v27 = vshrl.u32 %v6163_v14, 16  ;;  %v6180_v30 = vld [vmem:[%s6140_s25 + $0x10] sm:$0xf] }
  0x17   : > { %v258_v25 = vor.u32 %v257_v18, %v254_v17  ;;  %v268_v26 = vor.u32 %v267_v20, %v263_v19  ;;  %v463_v28 = vshll.u32 %v6166_v15, 16  ;;  %v446_v33 = vrot.slane %v444_v22, 4  ;;  %v6190_v41 = vld [vmem:[%s6140_s25 + $0x14] sm:$0x1]  ;;  %v6201_v53 = vld [vmem:[%s6140_s25 + $0x6c] sm:$0xf] }
  0x18   : > { %v449_v34 = vrot.slane %v447_v23, 5  ;;  %v455_v35 = vrot.slane %v453_v24, 5  ;;  %v459_v38 = vrot.slane %v457_v27, 4  ;;  %v276_v42 = vshrl.u32 %v6177_v29, 16  ;;  %v6205_v58 = vld [vmem:[%s6140_s25 + $0x70] sm:$0xf] }
  0x19   : > { %v259_v36 = vrot.slane %v258_v25, 4  ;;  %v269_v37 = vrot.slane %v268_v26, 4  ;;  %v465_v39 = vrot.slane %v463_v28, 5  ;;  %v279_v43 = vshll.u32 %v6177_v29, 16  ;;  %v6213_v63 = vld [vmem:[%s6140_s25 + $0x74] sm:$0x1] }
  0x1a   : > { %v450_v40 = vor.u32 %v449_v34, %v446_v33  ;;  %v285_v44 = vshll.u32 %v6180_v30, 16  ;;  %v460_v47 = vor.u32 %v459_v38, %v455_v35  ;;  %v289_v48 = vshrl.u32 %v6180_v30, 16  ;;  %v6219_v8 = vld [vmem:[%s6140_s25 + $0x18] sm:$0xf]  ;;  %v6232_v25 = vld [vmem:[%s6140_s25 + $0x20] sm:$0x1] }
  0x1b   : > { %v264_v45 = vsel %vm6184_vm4, %v259_v36, %v263_v19  ;;  %v274_v46 = vsel %vm6184_vm4, %v269_v37, %v273_v21  ;;  %v278_v51 = vrot.slane %v276_v42, 4  ;;  %v281_v52 = vrot.slane %v279_v43, 5  ;;  %v6226_v21 = vld [vmem:[%s6140_s25 + $0x1c] sm:$0xf] }
  0x1c   : > { %v4973_v49 = vcombine.low %v264_v45, %v274_v46  ;;  %v451_v50 = vrot.slane %v450_v40, 4  ;;  %v461_v54 = vrot.slane %v460_v47, 4  ;;  %v287_v55 = vrot.slane %v285_v44, 5  ;;  %v6245_v40 = vld [vmem:[%s8665_s1 + $0x10] sm:$0xf] }
  0x1d   : > { %v291_v56 = vrot.slane %v289_v48, 4  ;;  %v295_v57 = vshll.u32 %v6190_v41, 16  ;;  %v282_v60 = vor.u32 %v281_v52, %v278_v51  ;;  %v468_v3 = vshrl.u32 %v6201_v53, 16  ;;  %v6250_v46 = vld [vmem:[%s6140_s25 + $0x7c] sm:$0xf] }
  0x1e   : > { %5665 = vmatprep.mubr.msk.bf16.mxu0 %vm685_vm3, %v4973_v49  ;;  %v456_v59 = vsel %vm6184_vm4, %v451_v50, %v455_v35  ;;  %v466_v0 = vsel %vm6184_vm4, %v461_v54, %v465_v39  ;;  %v471_v11 = vshll.u32 %v6201_v53, 16  ;;  %v477_v13 = vshll.u32 %v6205_v58, 16  ;;  %v6239_v35 = vld [vmem:[%s6140_s25 + $0x78] sm:$0xf] }
  0x1f   : > { %v292_v1 = vor.u32 %v291_v56, %v287_v55  ;;  %v297_v2 = vrot.slane %v295_v57, 5  ;;  %v4981_v9 = vcombine.low %v456_v59, %v466_v0  ;;  %v283_v10 = vrot.slane %v282_v60, 4  ;;  %v6257_v56 = vld [vmem:[%s6140_s25 + $0x80] sm:$0x1] }
  0x20   : > { %v470_v18 = vrot.slane %v468_v3, 4  ;;  %v481_v19 = vshrl.u32 %v6205_v58, 16  ;;  %v487_v20 = vshll.u32 %v6213_v63, 16  ;;  %v473_v23 = vrot.slane %v471_v11, 5  ;;  %8703 = vst [vmem:[#allocation2_spill] sm:$0xff] %v6257_v56 }
  0x21   : > { %v293_v17 = vrot.slane %v292_v1, 4  ;;  %5681 = vmatprep.mubr.msk.bf16.mxu1 %vm685_vm3, %v4981_v9  ;;  %v288_v22 = vsel %vm6184_vm4, %v283_v10, %v287_v55  ;;  %v479_v24 = vrot.slane %v477_v13, 5  ;;  %v300_v26 = vshrl.u32 %v6219_v8, 16  ;;  %v6263_v1 = vld [vmem:[%s6140_s25 + $0x24] sm:$0xf] }
  0x22   : > { %v483_v28 = vrot.slane %v481_v19, 4  ;;  %v489_v33 = vrot.slane %v487_v20, 5  ;;  %v303_v34 = vshll.u32 %v6219_v8, 16  ;;  %v474_v37 = vor.u32 %v473_v23, %v470_v18  ;;  %v6271_v10 = vld [vmem:[%s6140_s25 + $0x28] sm:$0xf] }
  0x23   : > { %v298_v27 = vsel %vm6184_vm4, %v293_v17, %v297_v2  ;;  %v302_v38 = vrot.slane %v300_v26, 4  ;;  %v309_v39 = vshll.u32 %v6226_v21, 16  ;;  %v313_v44 = vshrl.u32 %v6226_v21, 16  ;;  %v6277_v19 = vld [vmem:[%s8665_s1 + $0xc] sm:$0xf] }
  0x24   : > { %v4974_v36 = vcombine.low %v288_v22, %v298_v27  ;;  %v484_v42 = vor.u32 %v483_v28, %v479_v24  ;;  %v305_v43 = vrot.slane %v303_v34, 5  ;;  %v319_v45 = vshll.u32 %v6232_v25, 16 }
  0x25   : > { %v475_v47 = vrot.slane %v474_v37, 4  ;;  %v311_v48 = vrot.slane %v309_v39, 5  ;;  %v492_v49 = vshrl.u32 %v6239_v35, 16  ;;  %v495_v50 = vshll.u32 %v6239_v35, 16 }
  0x26   : > { %5666 = vmatmul.mubr.msk.bf16.vlgmr.msra.gmra.mxu0 %vm685_vm3, %v4974_v36  ;;  %v485_v51 = vrot.slane %v484_v42, 4  ;;  %v306_v52 = vor.u32 %v305_v43, %v302_v38  ;;  %v315_v54 = vrot.slane %v313_v44, 4  ;;  %v321_v55 = vrot.slane %v319_v45, 5  ;;  %v6289_v36 = vld [vmem:[%s6140_s25 + $0x84] sm:$0xf] }
  0x27   : > { %5732 = vmatpush3.bf16.msra.mxu0 %v6169_v16  ;;  %v480_v57 = vsel %vm6184_vm4, %v475_v47, %v479_v24  ;;  %v494_v59 = vrot.slane %v492_v49, 4  ;;  %v497_v60 = vrot.slane %v495_v50, 5  ;;  %v501_v0 = vshll.u32 %v6250_v46, 16  ;;  %v6282_v24 = vld [vmem:[%s6140_s25 + $0x2c] sm:$0x1] }
  0x28   : > { %5976 = vmatprep.subr.msk.bf16.mxu0 %vm734_vm0, %v6245_v40  ;;  %v490_v16 = vsel %vm6184_vm4, %v485_v51, %v489_v33  ;;  %v307_v2 = vrot.slane %v306_v52, 4  ;;  %v316_v3 = vor.u32 %v315_v54, %v311_v48  ;;  %v505_v9 = vshrl.u32 %v6250_v46, 16  ;;  %v6296_v43 = vld [vmem:[%s6140_s25 + $0x88] sm:$0xf]  ;;  %v6304_v51 = vld [vmem:[%s6140_s25 + $0x8c] sm:$0x1] }
  0x29   : > { %v4982_v11 = vcombine.low %v480_v57, %v490_v16  ;;  %v498_v13 = vor.u32 %v497_v60, %v494_v59  ;;  %v503_v17 = vrot.slane %v501_v0, 5  ;;  %v511_v18 = vshll.u32 %v6257_v56, 16  ;;  %8704 = vst [vmem:[#allocation3_spill] sm:$0xff] %v6304_v51  ;;  %v6312_v60 = vld [vmem:[%s6140_s25 + $0x30] sm:$0xf] }
  0x2a   : > { %v312_v20 = vsel %vm6184_vm4, %v307_v2, %v311_v48  ;;  %v317_v22 = vrot.slane %v316_v3, 4  ;;  %v507_v23 = vrot.slane %v505_v9, 4  ;;  %v324_v26 = vshrl.u32 %v6263_v1, 16  ;;  %v6317_v9 = vld [vmem:[%s6140_s25 + $0x34] sm:$0xf] }
  0x2b   : > { %5682 = vmatmul.mubr.msk.bf16.vlgmr.msra.gmra.mxu1 %vm685_vm3, %v4982_v11  ;;  %v499_v27 = vrot.slane %v498_v13, 4  ;;  %v513_v28 = vrot.slane %v511_v18, 5  ;;  %v327_v33 = vshll.u32 %v6263_v1, 16  ;;  %v333_v34 = vshll.u32 %v6271_v10, 16 }
  0x2c   : > { %5698 = vmatpush3.bf16.msra.mxu1 %v6143_v4  ;;  %v322_v37 = vsel %vm6184_vm4, %v317_v22, %v321_v55  ;;  %v508_v38 = vor.u32 %v507_v23, %v503_v17  ;;  %v326_v39 = vrot.slane %v324_v26, 4  ;;  %v337_v42 = vshrl.u32 %v6271_v10, 16 }
  0x2d   : > { %v4975_v44 = vcombine.low %v312_v20, %v322_v37  ;;  %v504_v45 = vsel %vm6184_vm4, %v499_v27, %v503_v17  ;;  %v329_v47 = vrot.slane %v327_v33, 5  ;;  %v335_v48 = vrot.slane %v333_v34, 5  ;;  %5975 = vmatprep.subr.msk.bf16.mxu1 %vm734_vm0, %v6277_v19  ;;  %v6325_v33 = vld [vmem:[%s6140_s25 + $0x38] sm:$0x1] }
  0x2e   : > { %v509_v4 = vrot.slane %v508_v38, 4  ;;  %v339_v49 = vrot.slane %v337_v42, 4  ;;  %v343_v50 = vshll.u32 %v6282_v24, 16  ;;  %v516_v52 = vshrl.u32 %v6289_v36, 16  ;;  %v6330_v38 = vld [vmem:[%s6140_s25 + $0x90] sm:$0xf] }
  0x2f   : > { %5669 = vmatprep.mubr.msk.bf16.mxu0 %vm685_vm3, %v4975_v44  ;;  %v330_v54 = vor.u32 %v329_v47, %v326_v39  ;;  %v519_v55 = vshll.u32 %v6289_v36, 16  ;;  %v525_v57 = vshll.u32 %v6296_v43, 16  ;;  %v529_v59 = vshrl.u32 %v6296_v43, 16  ;;  %8705 = vst [vmem:[#allocation4_spill] sm:$0xff] %v6330_v38  ;;  %v6335_v47 = vld [vmem:[%s6140_s25 + $0x94] sm:$0xf] }
  0x30   : > { %v514_v0 = vsel %vm6184_vm4, %v509_v4, %v513_v28  ;;  %v340_v16 = vor.u32 %v339_v49, %v335_v48  ;;  %v345_v2 = vrot.slane %v343_v50, 5  ;;  %v518_v3 = vrot.slane %v516_v52, 4  ;;  %8706 = vst [vmem:[#allocation5_spill] sm:$0xff] %v6335_v47 }
  0x31   : > { %v4983_v11 = vcombine.low %v504_v45, %v514_v0  ;;  %v331_v13 = vrot.slane %v330_v54, 4  ;;  %v521_v17 = vrot.slane %v519_v55, 5  ;;  %v527_v18 = vrot.slane %v525_v57, 5 }
  0x32   : > { %v341_v20 = vrot.slane %v340_v16, 4  ;;  %v531_v22 = vrot.slane %v529_v59, 4  ;;  %v535_v23 = vshll.u32 %v6304_v51, 16  ;;  %v348_v26 = vshrl.u32 %v6312_v60, 16  ;;  %v6344_v16 = vld [vmem:[%s6140_s25 + $0x98] sm:$0x1] }
  0x33   : > { %5685 = vmatprep.mubr.msk.bf16.mxu1 %vm685_vm3, %v4983_v11  ;;  %v336_v27 = vsel %vm6184_vm4, %v331_v13, %v335_v48  ;;  %v522_v28 = vor.u32 %v521_v17, %v518_v3  ;;  %v351_v34 = vshll.u32 %v6312_v60, 16  ;;  %v357_v37 = vshll.u32 %v6317_v9, 16  ;;  %8707 = vst [vmem:[#allocation6_spill] sm:$0xff] %v6344_v16  ;;  %v6349_v11 = vld [vmem:[%s6140_s25 + $0x3c] sm:$0xf] }
  0x34   : > { %v346_v39 = vsel %vm6184_vm4, %v341_v20, %v345_v2  ;;  %v532_v42 = vor.u32 %v531_v22, %v527_v18  ;;  %v537_v44 = vrot.slane %v535_v23, 5  ;;  %v350_v45 = vrot.slane %v348_v26, 4  ;;  %v6354_v23 = vld [vmem:[%s6140_s25 + $0x40] sm:$0xf]  ;;  %v1192_v51 = vld [vmem:[%s6140_s25 + $0xc] sm:$0xe] }
  0x35   : > { %v4976_v48 = vcombine.low %v336_v27, %v346_v39  ;;  %v523_v4 = vrot.slane %v522_v28, 4  ;;  %v353_v49 = vrot.slane %v351_v34, 5  ;;  %v359_v50 = vrot.slane %v357_v37, 5 }
  0x36   : > { %v533_v52 = vrot.slane %v532_v42, 4  ;;  %v361_v54 = vshrl.u32 %v6317_v9, 16  ;;  %v367_v55 = vshll.u32 %v6325_v33, 16  ;;  %v540_v57 = vshrl.u32 %v6330_v38, 16 }
  0x37   : > { %5670 = vmatmul.mubr.msk.bf16.gmra.mxu0 %vm685_vm3, %v4976_v48  ;;  %v528_v59 = vsel %vm6184_vm4, %v523_v4, %v527_v18  ;;  %v354_v0 = vor.u32 %v353_v49, %v350_v45  ;;  %v543_v2 = vshll.u32 %v6330_v38, 16  ;;  %v549_v3 = vshll.u32 %v6335_v47, 16  ;;  %v6363_v48 = vld [vmem:[%s6140_s25 + $0x44] sm:$0x1] }
  0x38   : > { %v538_v13 = vsel %vm6184_vm4, %v533_v52, %v537_v44  ;;  %v363_v17 = vrot.slane %v361_v54, 4  ;;  %v369_v20 = vrot.slane %v367_v55, 5  ;;  %v542_v22 = vrot.slane %v540_v57, 4  ;;  %v6368_v52 = vld [vmem:[%s6140_s25 + $0x9c] sm:$0xf] }
  0x39   : > { %v4984_v18 = vcombine.low %v528_v59, %v538_v13  ;;  %v355_v26 = vrot.slane %v354_v0, 4  ;;  %v545_v27 = vrot.slane %v543_v2, 5  ;;  %v551_v28 = vrot.slane %v549_v3, 5  ;;  %8708 = vst [vmem:[#allocation7_spill] sm:$0xff] %v6368_v52  ;;  %v6372_v13 = vld [vmem:[%s6140_s25 + $0xa0] sm:$0xf] }
  0x3a   : > { %v364_v34 = vor.u32 %v363_v17, %v359_v50  ;;  %v553_v37 = vshrl.u32 %v6335_v47, 16  ;;  %v559_v39 = vshll.u32 %v6344_v16, 16  ;;  %v372_v42 = vshrl.u32 %v6349_v11, 16  ;;  %8709 = vst [vmem:[#allocation8_spill] sm:$0xff] %v6372_v13 }
  0x3b   : > { %5686 = vmatmul.mubr.msk.bf16.gmra.mxu1 %vm685_vm3, %v4984_v18  ;;  %v360_v44 = vsel %vm6184_vm4, %v355_v26, %v359_v50  ;;  %v546_v45 = vor.u32 %v545_v27, %v542_v22  ;;  %v375_v4 = vshll.u32 %v6349_v11, 16  ;;  %v381_v49 = vshll.u32 %v6354_v23, 16  ;;  %v6378_v26 = vld [vmem:[%s6140_s25 + $0xa4] sm:$0x1] }
  0x3c   : > { %v365_v54 = vrot.slane %v364_v34, 4  ;;  %v555_v55 = vrot.slane %v553_v37, 4  ;;  %v561_v57 = vrot.slane %v559_v39, 5  ;;  %v374_v59 = vrot.slane %v372_v42, 4  ;;  %8710 = vst [vmem:[#allocation9_spill] sm:$0xff] %v6378_v26 }
  0x3d   : > { %v547_v0 = vrot.slane %v546_v45, 4  ;;  %v377_v2 = vrot.slane %v375_v4, 5  ;;  %v383_v3 = vrot.slane %v381_v49, 5  ;;  %v385_v50 = vshrl.u32 %v6354_v23, 16  ;;  %v6382_v34 = vld [vmem:[%s6140_s25 + $0x48] sm:$0xf] }
  0x3e   : > { %v370_v17 = vsel %vm6184_vm4, %v365_v54, %v369_v20  ;;  %v556_v22 = vor.u32 %v555_v55, %v551_v28  ;;  %v391_v18 = vshll.u32 %v6363_v48, 16  ;;  %v564_v27 = vshrl.u32 %v6368_v52, 16 }
  0x3f   : > { %v4977_v37 = vcombine.low %v360_v44, %v370_v17  ;;  %v552_v39 = vsel %vm6184_vm4, %v547_v0, %v551_v28  ;;  %v378_v42 = vor.u32 %v377_v2, %v374_v59  ;;  %v387_v45 = vrot.slane %v385_v50, 4  ;;  %v6391_v17 = vld [vmem:[%s6140_s25 + $0x4c] sm:$0xf]  ;;  %v6397_v2 = vld [vmem:[%s6140_s25 + $0x50] sm:$0x1] }
  0x40   : > { %v557_v4 = vrot.slane %v556_v22, 4  ;;  %v393_v49 = vrot.slane %v391_v18, 5  ;;  %v566_v20 = vrot.slane %v564_v27, 4  ;;  %v567_v54 = vshll.u32 %v6368_v52, 16 }
  0x41   : > { %5673 = vmatprep.mubr.msk.bf16.mxu0 %vm685_vm3, %v4977_v37  ;;  %v379_v55 = vrot.slane %v378_v42, 4  ;;  %v388_v62 = vor.u32 %v387_v45, %v383_v3  ;;  %v573_v32 = vshll.u32 %v6372_v13, 16  ;;  %v577_v44 = vshrl.u32 %v6372_v13, 16  ;;  %v6403_v42 = vld [vmem:[%s6140_s25 + $0xa8] sm:$0xf] }
  0x42   : > { %v562_v28 = vsel %vm6184_vm4, %v557_v4, %v561_v57  ;;  %v569_v59 = vrot.slane %v567_v54, 5  ;;  %v583_v0 = vshll.u32 %v6378_v26, 16  ;;  %v396_v50 = vshrl.u32 %v6382_v34, 16  ;;  %8711 = vst [vmem:[#allocation10_spill] sm:$0xff] %v6403_v42 }
  0x43   : > { %v4985_v22 = vcombine.low %v552_v39, %v562_v28  ;;  %v384_v18 = vsel %vm6184_vm4, %v379_v55, %v383_v3  ;;  %v389_v27 = vrot.slane %v388_v62, 4  ;;  %v575_v37 = vrot.slane %v573_v32, 5 }
  0x44   : > { %v570_v45 = vor.u32 %v569_v59, %v566_v20  ;;  %v579_v61 = vrot.slane %v577_v44, 4  ;;  %v585_v57 = vrot.slane %v583_v0, 5  ;;  %v398_v4 = vrot.slane %v396_v50, 4  ;;  %v6413_v44 = vld [vmem:[%s6140_s25 + $0xac] sm:$0xf] }
  0x45   : > { %5689 = vmatprep.mubr.msk.bf16.mxu1 %vm685_vm3, %v4985_v22  ;;  %v394_v54 = vsel %vm6184_vm4, %v389_v27, %v393_v49  ;;  %v399_v39 = vshll.u32 %v6382_v34, 16  ;;  %v405_v28 = vshll.u32 %v6391_v17, 16  ;;  %v409_v62 = vshrl.u32 %v6391_v17, 16  ;;  %8712 = vst [vmem:[#allocation11_spill] sm:$0xff] %v6413_v44  ;;  %v6416_v22 = vld [vmem:[%s6140_s25 + $0xb0] sm:$0x1] }
  0x46   : > { %v4978_v3 = vcombine.low %v384_v18, %v394_v54  ;;  %v571_v32 = vrot.slane %v570_v45, 4  ;;  %v580_v55 = vor.u32 %v579_v61, %v575_v37  ;;  %v415_v20 = vshll.u32 %v6397_v2, 16  ;;  %8713 = vst [vmem:[#allocation12_spill] sm:$0xff] %v6416_v22 }
  0x47   : > { %v401_v59 = vrot.slane %v399_v39, 5  ;;  %v407_v0 = vrot.slane %v405_v28, 5  ;;  %v411_v50 = vrot.slane %v409_v62, 4  ;;  %v588_v49 = vshrl.u32 %v6403_v42, 16  ;;  %v6425_v62 = vld [vmem:[%s6140_s25 + $0x54] sm:$0xf] }
  0x48   : > { %5674 = vmatmul.mubr.msk.bf16.gmra.mxu0 %vm685_vm3, %v4978_v3  ;;  %v576_v18 = vsel %vm6184_vm4, %v571_v32, %v575_v37  ;;  %v581_v27 = vrot.slane %v580_v55, 4  ;;  %v417_v61 = vrot.slane %v415_v20, 5  ;;  %v591_v45 = vshll.u32 %v6403_v42, 16  ;;  %v6432_v55 = vld [vmem:[%s6140_s25 + $0x58] sm:$0xf] }
  0x49   : > { %v402_v54 = vor.u32 %v401_v59, %v398_v4  ;;  %v412_v56 = vor.u32 %v411_v50, %v407_v0  ;;  %v590_v39 = vrot.slane %v588_v49, 4  ;;  %v597_v28 = vshll.u32 %v6413_v44, 16  ;;  %v6435_v49 = vld [vmem:[%s6140_s25 + $0x5c] sm:$0x1] }
  0x4a   : > { %v586_v3 = vsel %vm6184_vm4, %v581_v27, %v585_v57  ;;  %v593_v26 = vrot.slane %v591_v45, 5  ;;  %v601_v37 = vshrl.u32 %v6413_v44, 16  ;;  %v607_v32 = vshll.u32 %v6416_v22, 16  ;;  %v1191_v22 = vld [vmem:[%s6140_s25] sm:$0xe] }
  0x4b   : > { %v4986_v4 = vcombine.low %v576_v18, %v586_v3  ;;  %v403_v20 = vrot.slane %v402_v54, 4  ;;  %v413_v59 = vrot.slane %v412_v56, 4  ;;  %v599_v50 = vrot.slane %v597_v28, 5  ;;  %v6446_v54 = vld [vmem:[%s6140_s25 + $0xb4] sm:$0xf] }
  0x4c   : > { %v594_v42 = vor.u32 %v593_v26, %v590_v39  ;;  %v603_v52 = vrot.slane %v601_v37, 4  ;;  %v609_v13 = vrot.slane %v607_v32, 5  ;;  %v420_v57 = vshrl.u32 %v6425_v62, 16  ;;  %8714 = vst [vmem:[#allocation13_spill] sm:$0xff] %v6446_v54  ;;  %v6449_v37 = vld [vmem:[%s6140_s25 + $0xb8] sm:$0xf] }
  0x4d   : > { %5690 = vmatmul.mubr.msk.bf16.gmra.mxu1 %vm685_vm3, %v4986_v4  ;;  %v408_v27 = vsel %vm6184_vm4, %v403_v20, %v407_v0  ;;  %v418_v18 = vsel %vm6184_vm4, %v413_v59, %v417_v61  ;;  %v423_v56 = vshll.u32 %v6425_v62, 16  ;;  %v429_v45 = vshll.u32 %v6432_v55, 16  ;;  %v6454_v61 = vld [vmem:[%s6140_s25 + $0xbc] sm:$0x1] }
  0x4e   : > { %v4979_v26 = vcombine.low %v408_v27, %v418_v18  ;;  %v595_v39 = vrot.slane %v594_v42, 4  ;;  %v604_v28 = vor.u32 %v603_v52, %v599_v50  ;;  %v422_v3 = vrot.slane %v420_v57, 4 }
  0x4f   : > { %v425_v32 = vrot.slane %v423_v56, 5  ;;  %v431_v4 = vrot.slane %v429_v45, 5  ;;  %v433_v0 = vshrl.u32 %v6432_v55, 16  ;;  %v439_v20 = vshll.u32 %v6435_v49, 16 }
  0x50   : > { %5677 = vmatprep.mubr.msk.bf16.mxu0 %vm685_vm3, %v4979_v26  ;;  %v600_v59 = vsel %vm6184_vm4, %v595_v39, %v599_v50  ;;  %v605_v27 = vrot.slane %v604_v28, 4  ;;  %v612_v52 = vshrl.u32 %v6446_v54, 16  ;;  %v615_v42 = vshll.u32 %v6446_v54, 16 }
  0x51   : > { %v426_v57 = vor.u32 %v425_v32, %v422_v3  ;;  %v435_v18 = vrot.slane %v433_v0, 4  ;;  %v441_v56 = vrot.slane %v439_v20, 5  ;;  %v621_v45 = vshll.u32 %v6449_v37, 16 }
  0x52   : > { %v610_v44 = vsel %vm6184_vm4, %v605_v27, %v609_v13  ;;  %v614_v16 = vrot.slane %v612_v52, 4  ;;  %v617_v26 = vrot.slane %v615_v42, 5  ;;  %v625_v38 = vshrl.u32 %v6449_v37, 16 }
  0x53   : > { %v4987_v50 = vcombine.low %v600_v59, %v610_v44  ;;  %v427_v39 = vrot.slane %v426_v57, 4  ;;  %v436_v28 = vor.u32 %v435_v18, %v431_v4  ;;  %v623_v47 = vrot.slane %v621_v45, 5  ;;  %v1193_v57 = vld [vmem:[%s6140_s25 + $0x18] sm:$0xe] }
  0x54   : > { %v618_v54 = vor.u32 %v617_v26, %v614_v16  ;;  %v627_v3 = vrot.slane %v625_v38, 4  ;;  %v631_v32 = vshll.u32 %v6454_v61, 16  ;;  %v5037_v13 = vrot.slane %v1191_v22, 9 }
  0x55   : > { %5693 = vmatprep.mubr.msk.bf16.mxu1 %vm685_vm3, %v4987_v50  ;;  %v432_v44 = vsel %vm6184_vm4, %v427_v39, %v431_v4  ;;  %v437_v20 = vrot.slane %v436_v28, 4  ;;  %v1244_v59 = vrot.slane %v6149_v6, 5  ;;  %v5006_v38 = vcombine.low %v6177_v29, %v6180_v30 }
  0x56   : > { %v619_v16 = vrot.slane %v618_v54, 4  ;;  %v628_v27 = vor.u32 %v627_v3, %v623_v47  ;;  %v633_v52 = vrot.slane %v631_v32, 5  ;;  %v5038_v42 = vrot.slane %v1192_v51, 9 }
  0x57   : > { %v442_v18 = vsel %vm6184_vm4, %v437_v20, %v441_v56  ;;  %v1245_v22 = vsel %vm6470_vm7, %v5037_v13, %v1244_v59  ;;  %v1246_v45 = vrot.slane %v1244_v59, 4  ;;  %v8717_v4 = vrot.slane %v6180_v30, 5 }
  0x58   : > { %v4980_v50 = vcombine.low %v432_v44, %v442_v18  ;;  %v624_v54 = vsel %vm6184_vm4, %v619_v16, %v623_v47  ;;  %v629_v39 = vrot.slane %v628_v27, 4  ;;  %v5005_v51 = vcombine.low %v6146_v5, %v6149_v6  ;;  %v1194_v27 = vld [vmem:[%s6140_s25 + $0x24] sm:$0xe] }
  0x59   : > { %v1253_v26 = vrot.slane %v8717_v4, 4  ;;  %v8718_v28 = vrot.slane %v6152_v7, 5  ;;  %v8719_v3 = vmov %v8717_v4  ;;  %v5007_v13 = vcombine.low %v6219_v8, %v6226_v21  ;;  %v1196_v4 = vld [vmem:[%s6140_s25 + $0x3c] sm:$0xe] }
  0x5a   : > { %v1252_v32 = vsel %vm6470_vm7, %v5038_v42, %v8719_v3  ;;  %v5039_v44 = vrot.slane %v1193_v57, 9  ;;  %5678 = vmatmul.mubr.msk.bf16.gmra.mxu0 %vm685_vm3, %v4980_v50  ;;  %v634_v47 = vsel %vm6184_vm4, %v629_v39, %v633_v52  ;;  %v8720_v6 = vrot.slane %v6190_v41, 5  ;;  %v1195_v42 = vld [vmem:[%s6140_s25 + $0x30] sm:$0xe]  ;;  %v1197_v39 = vld [vmem:[%s6140_s25 + $0x48] sm:$0xe] }
  0x5b   : > { %v1248_v56 = vsel %vm6470_vm7, %v1246_v45, %v8718_v28  ;;  %v1258_v20 = vrot.slane %v6226_v21, 5  ;;  %v4988_v59 = vcombine.low %v624_v54, %v634_v47  ;;  %v1261_v16 = vrot.slane %v6232_v25, 5  ;;  %v1198_v47 = vld [vmem:[%s6140_s25 + $0x54] sm:$0xe]  ;;  %v6765_v21 = vld [vmem:[%s6140_s25 + $0x2c] sm:$0x1] }
  0x5c   : > { %v5054_v5 = vcombine.low %v1245_v22, %v1248_v56  ;;  %v1255_v7 = vsel %vm6470_vm7, %v1253_v26, %v8720_v6  ;;  %v1815_v52 = vsel %vm734_vm0, %v6277_v19, 0  ;;  %v1265_v18 = vrot.slane %v6271_v10, 5 }
  0x5d   : > { %v1259_v41 = vsel %vm6470_vm7, %v5039_v44, %v1258_v20  ;;  %v1260_v57 = vrot.slane %v1258_v20, 4  ;;  %5694 = vmatmul.mubr.msk.bf16.gmra.mxu1 %vm685_vm3, %v4988_v59  ;;  %v5055_v22 = vcombine.low %v1252_v32, %v1255_v7  ;;  %v2541_v25 = vsel %vm734_vm0, %v6245_v40, 0 }
  0x5e   : > { %5733 = vmatprep.mubr.msk.bf16.mxu0 %vm685_vm3, %v5054_v5  ;;  %v1272_v45 = vrot.slane %v6317_v9, 5  ;;  %5699 = vmatprep.mubr.msk.bf16.mxu1 %vm685_vm3, %v5005_v51  ;;  %v5040_v26 = vrot.slane %v1194_v27, 9  ;;  %v1268_v50 = vrot.slane %v6282_v24, 5  ;;  %v5041_v54 = vrot.slane %v1195_v42, 9  ;;  %v6537_v24 = vld [vmem:[%s8665_s1 + $0x18] sm:$0xf] }
  0x5f   : > { %v1262_v19 = vsel %vm6470_vm7, %v1260_v57, %v1261_v16  ;;  %v1267_v56 = vrot.slane %v1265_v18, 4  ;;  %v1275_v32 = vrot.slane %v6325_v33, 5  ;;  %v5042_v44 = vrot.slane %v1196_v4, 9 }
  0x60   : > { %v5056_v28 = vcombine.low %v1259_v41, %v1262_v19  ;;  %v1274_v3 = vrot.slane %v1272_v45, 4  ;;  %v1279_v40 = vrot.slane %v6354_v23, 5  ;;  %v1303_v5 = vrot.slane %v6166_v15, 5 }
  0x61   : > { %v1282_v51 = vrot.slane %v6363_v48, 5  ;;  %v5043_v6 = vrot.slane %v1197_v39, 9  ;;  %v1286_v7 = vrot.slane %v6391_v17, 5  ;;  %v5008_v33 = vcombine.low %v6263_v1, %v6271_v10  ;;  %v1199_v1 = vld [vmem:[%s6140_s25 + $0x60] sm:$0xe] }
  0x62   : > { %5734 = vmatmul.mubr.msk.bf16.vlgmr.msra.gmra.mxu0 %vm685_vm3, %v5055_v22  ;;  %v1266_v20 = vsel %vm6470_vm7, %v5040_v26, %v1265_v18  ;;  %v1281_v59 = vrot.slane %v1279_v40, 4  ;;  %v1289_v16 = vrot.slane %v6397_v2, 5  ;;  %v1269_v48 = vsel %vm6470_vm7, %v1267_v56, %v1268_v50  ;;  %v6565_v22 = vld [vmem:[%s8665_s1 + $0x14] sm:$0xf]  ;;  %v6590_v50 = vld [vmem:[%s6140_s25 + $0x6c] sm:$0xe] }
  0x63   : > { %5800 = vmatpush3.bf16.msra.mxu0 %v2541_v25  ;;  %5737 = vmatprep.mubr.msk.bf16.mxu0 %vm685_vm3, %v5056_v28  ;;  %v1273_v27 = vsel %vm6470_vm7, %v5041_v54, %v1272_v45  ;;  %v1276_v42 = vsel %vm6470_vm7, %v1274_v3, %v1275_v32  ;;  %v1288_v41 = vrot.slane %v1286_v7, 4  ;;  %v6555_v10 = vsel %vm6470_vm7, %v5042_v44, %v1279_v40  ;;  %v1202_v39 = vld [vmem:[%s6140_s25 + $0x84] sm:$0xe]  ;;  %v6619_v44 = vld [vmem:[%s6140_s25 + $0x78] sm:$0xe] }
  0x64   : > { %v6559_v2 = vsel %vm6470_vm7, %v5043_v6, %v1286_v7  ;;  %v5044_v57 = vrot.slane %v1198_v47, 9  ;;  %v1293_v18 = vrot.slane %v6432_v55, 5  ;;  %5978 = vmatprep.subr.msk.bf16.mxu0 %vm734_vm0, %v6537_v24  ;;  %v6575_v25 = vsel %vm6470_vm7, %v1281_v59, %v1282_v51  ;;  %v1203_v40 = vld [vmem:[%s6140_s25 + $0x90] sm:$0xe] }
  0x65   : > { %5700 = vmatmul.mubr.msk.bf16.vlgmr.msra.gmra.mxu1 %vm685_vm3, %v5006_v38  ;;  %v6579_v45 = vsel %vm6470_vm7, %v1288_v41, %v1289_v16  ;;  %v1296_v4 = vrot.slane %v6435_v49, 5  ;;  %v1300_v19 = vrot.slane %v6163_v14, 5  ;;  %v5057_v29 = vcombine.low %v1266_v20, %v1269_v48  ;;  %v8721_v48 = vld [vmem:[#allocation3_spill] sm:$0xff] }
  0x66   : > { %5766 = vmatpush3.bf16.msra.mxu1 %v1815_v52  ;;  %5703 = vmatprep.mubr.msk.bf16.mxu1 %vm685_vm3, %v5007_v13  ;;  %v5009_v30 = vcombine.low %v6312_v60, %v6317_v9  ;;  %v1295_v38 = vrot.slane %v1293_v18, 4  ;;  %v5045_v26 = vrot.slane %v1199_v1, 9  ;;  %v5058_v49 = vcombine.low %v1273_v27, %v1276_v42  ;;  %v1204_v42 = vld [vmem:[%s6140_s25 + $0x9c] sm:$0xe] }
  0x67   : > { %v5010_v52 = vcombine.low %v6349_v11, %v6354_v23  ;;  %v5011_v8 = vcombine.low %v6382_v34, %v6391_v17  ;;  %5977 = vmatprep.subr.msk.bf16.mxu1 %vm734_vm0, %v6565_v22  ;;  %v5059_v60 = vcombine.low %v6555_v10, %v6575_v25  ;;  %v5060_v9 = vcombine.low %v6559_v2, %v6579_v45  ;;  %v8722_v10 = vld [vmem:[#allocation5_spill] sm:$0xff]  ;;  %v8723_v2 = vld [vmem:[#allocation4_spill] sm:$0xff] }
  0x68   : > { %v1302_v54 = vrot.slane %v1300_v19, 4  ;;  %v6609_v28 = vsel %vm6470_vm7, %v5044_v57, %v1293_v18  ;;  %v6613_v56 = vsel %vm6470_vm7, %v1295_v38, %v1296_v4  ;;  %v5046_v32 = vrot.slane %v6590_v50, 9  ;;  %v1205_v18 = vld [vmem:[%s6140_s25 + $0xa8] sm:$0xe]  ;;  %v8725_v38 = vld [vmem:[#allocation8_spill] sm:$0xff] }
  0x69   : > { %v6625_v47 = vsel %vm6470_vm7, %v5045_v26, %v1300_v19  ;;  %v1307_v51 = vrot.slane %v6205_v58, 5  ;;  %v1310_v6 = vrot.slane %v6213_v63, 5  ;;  %v5048_v59 = vrot.slane %v1202_v39, 9  ;;  %v8724_v19 = vld [vmem:[#allocation6_spill] sm:$0xff]  ;;  %v8726_v26 = vld [vmem:[#allocation7_spill] sm:$0xff] }
  0x6a   : > { %5738 = vmatmul.mubr.msk.bf16.gmra.mxu0 %vm685_vm3, %v5057_v29  ;;  %v1321_v16 = vrot.slane %v6296_v43, 5  ;;  %v1324_v27 = vrot.slane %v8721_v48, 5  ;;  %v5061_v41 = vcombine.low %v6609_v28, %v6613_v56  ;;  %v6643_v63 = vsel %vm6470_vm7, %v1302_v54, %v1303_v5  ;;  %v8728_v48 = vld [vmem:[#allocation11_spill] sm:$0xff] }
  0x6b   : > { %5741 = vmatprep.mubr.msk.bf16.mxu0 %vm685_vm3, %v5058_v49  ;;  %v5047_v1 = vrot.slane %v6619_v44, 9  ;;  %v5049_v4 = vrot.slane %v1203_v40, 9  ;;  %v1328_v15 = vrot.slane %v8722_v10, 5  ;;  %v1309_v5 = vrot.slane %v1307_v51, 4  ;;  %v5151_v57 = vld [vmem:[%s6140_s25 + $0xc] sm:$0xf] }
  0x6c   : > { %v6652_v25 = vsel %vm6470_vm7, %v5048_v59, %v1321_v16  ;;  %v1323_v45 = vrot.slane %v1321_v16, 4  ;;  %v1331_v29 = vrot.slane %v8724_v19, 5  ;;  %v5050_v49 = vrot.slane %v1204_v42, 9  ;;  %v8727_v59 = vld [vmem:[#allocation9_spill] sm:$0xff]  ;;  %v8729_v42 = vld [vmem:[#allocation10_spill] sm:$0xff] }
  0x6d   : > { %5704 = vmatmul.mubr.msk.bf16.gmra.mxu1 %vm685_vm3, %v5008_v33  ;;  %v1314_v33 = vrot.slane %v6250_v46, 5  ;;  %v6666_v39 = vsel %vm6470_vm7, %v5049_v4, %v1328_v15  ;;  %v1330_v44 = vrot.slane %v1328_v15, 4  ;;  %v1335_v40 = vrot.slane %v8725_v38, 5  ;;  %v8730_v15 = vld [vmem:[#allocation12_spill] sm:$0xff] }
  0x6e   : > { %5707 = vmatprep.mubr.msk.bf16.mxu1 %vm685_vm3, %v5009_v30  ;;  %v6662_v54 = vsel %vm6470_vm7, %v1323_v45, %v1324_v27  ;;  %v1338_v16 = vrot.slane %v8727_v59, 5  ;;  %v5051_v45 = vrot.slane %v1205_v18, 9  ;;  %v1342_v4 = vrot.slane %v8728_v48, 5 }
  0x6f   : > { %v6676_v27 = vsel %vm6470_vm7, %v1330_v44, %v1331_v29  ;;  %v1345_v50 = vrot.slane %v8730_v15, 5  ;;  %v6686_v19 = vsel %vm6470_vm7, %v5050_v49, %v1335_v40  ;;  %v1337_v7 = vrot.slane %v1335_v40, 4  ;;  %v8731_v29 = vld [vmem:[#allocation13_spill] sm:$0xff]  ;;  %v8732_v15 = vld [vmem:[#allocation2_spill] sm:$0xff]  ;;  %v6701_v49 = vld [vmem:[%s6140_s25 + $0x10] sm:$0xf] }
  0x70   : > { %v6693_v18 = vsel %vm6470_vm7, %v5046_v32, %v1307_v51  ;;  %v6698_v59 = vsel %vm6470_vm7, %v5051_v45, %v1342_v4  ;;  %v1344_v30 = vrot.slane %v1342_v4, 4  ;;  %v5154_v40 = vld [vmem:[%s6140_s25 + $0x18] sm:$0xf]  ;;  %v1316_v20 = vrot.slane %v1314_v33, 4 }
  0x71   : > { %v2059_v44 = vshrl.u32 %v5151_v57, 16  ;;  %v2062_v32 = vshll.u32 %v5151_v57, 16  ;;  %v5062_v51 = vcombine.low %v6625_v47, %v6643_v63  ;;  %v6716_v45 = vsel %vm6470_vm7, %v1309_v5, %v1310_v6  ;;  %v1206_v57 = vld [vmem:[%s6140_s25 + $0xb4] sm:$0xe]  ;;  %v6737_v47 = vld [vmem:[%s6140_s25 + $0x14] sm:$0x1] }
  0x72   : > { %5742 = vmatmul.mubr.msk.bf16.gmra.mxu0 %vm685_vm3, %v5059_v60  ;;  %v1317_v60 = vrot.slane %v8732_v15, 5  ;;  %v6731_v11 = vsel %vm6470_vm7, %v5047_v1, %v1314_v33  ;;  %v2068_v6 = vshll.u32 %v6701_v49, 16  ;;  %v5155_v63 = vld [vmem:[%s6140_s25 + $0x1c] sm:$0xf]  ;;  %v2072_v17 = vshrl.u32 %v6701_v49, 16 }
  0x73   : > { %5745 = vmatprep.mubr.msk.bf16.mxu0 %vm685_vm3, %v5060_v9  ;;  %v6706_v9 = vsel %vm6470_vm7, %v1337_v7, %v1338_v16  ;;  %v6722_v7 = vsel %vm6470_vm7, %v1344_v30, %v1345_v50  ;;  %v2061_v5 = vrot.slane %v2059_v44, 4  ;;  %v2064_v34 = vrot.slane %v2062_v32, 5  ;;  %v5157_v15 = vld [vmem:[%s6140_s25 + $0x24] sm:$0xf]  ;;  %v6750_v44 = vld [vmem:[%s6140_s25 + $0x28] sm:$0xf] }
  0x74   : > { %v2083_v50 = vshrl.u32 %v5154_v40, 16  ;;  %v1318_v1 = vsel %vm6470_vm7, %v1316_v20, %v1317_v60  ;;  %v5052_v33 = vrot.slane %v1206_v57, 9  ;;  %v6745_v30 = vrot.slane %v2068_v6, 5 }
  0x75   : > { %5708 = vmatmul.mubr.msk.bf16.gmra.mxu1 %vm685_vm3, %v5010_v52  ;;  %v1349_v52 = vrot.slane %v6449_v37, 5  ;;  %v2086_v16 = vshll.u32 %v5154_v40, 16  ;;  %v1352_v23 = vrot.slane %v6454_v61, 5  ;;  %v2074_v4 = vrot.slane %v2072_v17, 4 }
  0x76   : > { %5711 = vmatprep.mubr.msk.bf16.mxu1 %vm685_vm3, %v5011_v8  ;;  %v5156_v8 = vld [vmem:[%s6140_s25 + $0x20] sm:$0x1]  ;;  %v2085_v3 = vrot.slane %v2083_v50, 4  ;;  %v2092_v13 = vshll.u32 %v5155_v63, 16  ;;  %v2078_v20 = vshll.u32 %v6737_v47, 16  ;;  %v2096_v57 = vshrl.u32 %v5155_v63, 16 }
  0x77   : > { %v1351_v32 = vrot.slane %v1349_v52, 4  ;;  %v2088_v60 = vrot.slane %v2086_v16, 5  ;;  %v5063_v61 = vcombine.low %v6693_v18, %v6716_v45  ;;  %v5064_v40 = vcombine.low %v6731_v11, %v1318_v1 }
  0x78   : > { %v2065_v6 = vor.u32 %v2064_v34, %v2061_v5  ;;  %v6761_v17 = vrot.slane %v2092_v13, 5  ;;  %v2075_v28 = vor.u32 %v2074_v4, %v6745_v30  ;;  %v2102_v50 = vshll.u32 %v5156_v8, 16  ;;  %v6788_v5 = vld [vmem:[%s6140_s25 + $0x34] sm:$0xf] }
  0x79   : > { %v2089_v56 = vor.u32 %v2088_v60, %v2085_v3  ;;  %v6773_v18 = vsel %vm6470_vm7, %v5052_v33, %v1349_v52  ;;  %v2107_v13 = vshrl.u32 %v5157_v15, 16  ;;  %v2110_v45 = vshll.u32 %v5157_v15, 16  ;;  %v5160_v52 = vld [vmem:[%s6140_s25 + $0x30] sm:$0xf] }
  0x7a   : > { %5746 = vmatmul.mubr.msk.bf16.gmra.mxu0 %vm685_vm3, %v5061_v41  ;;  %v2098_v41 = vrot.slane %v2096_v57, 4  ;;  %v2116_v11 = vshll.u32 %v6750_v44, 16  ;;  %v8734_v3 = vcombine.low %v6159_v12, %v6163_v14  ;;  %v6782_v4 = vsel %vm6470_vm7, %v1351_v32, %v1352_v23 }
  0x7b   : > { %5749 = vmatprep.mubr.msk.bf16.mxu0 %vm685_vm3, %v5062_v51  ;;  %v8733_v51 = vcombine.low %v6425_v62, %v6432_v55  ;;  %v2080_v62 = vrot.slane %v2078_v20, 5  ;;  %v2120_v63 = vshrl.u32 %v6750_v44, 16  ;;  %v2066_v34 = vrot.slane %v2065_v6, 4 }
  0x7c   : > { %v2099_v55 = vor.u32 %v2098_v41, %v6761_v17  ;;  %v2109_v8 = vrot.slane %v2107_v13, 4  ;;  %v2112_v1 = vrot.slane %v2110_v45, 5  ;;  %v6790_v33 = vrot.slane %v2116_v11, 5  ;;  %v6796_v41 = vld [vmem:[%s6140_s25 + $0x38] sm:$0x1] }
  0x7d   : > { %5712 = vmatmul.mubr.msk.bf16.gmra.mxu1 %vm685_vm3, %v8733_v51  ;;  %v2076_v12 = vrot.slane %v2075_v28, 4  ;;  %v2090_v14 = vrot.slane %v2089_v56, 4  ;;  %v2104_v16 = vrot.slane %v2102_v50, 5  ;;  %v2122_v23 = vrot.slane %v2120_v63, 4  ;;  %v5163_v13 = vld [vmem:[%s6140_s25 + $0x3c] sm:$0xf] }
  0x7e   : > { %5715 = vmatprep.mubr.msk.bf16.mxu1 %vm685_vm3, %v8734_v3  ;;  %v2100_v15 = vrot.slane %v2099_v55, 4  ;;  %v2126_v32 = vshll.u32 %v6765_v21, 16  ;;  %v2131_v20 = vshrl.u32 %v5160_v52, 16  ;;  %v2134_v60 = vshll.u32 %v5160_v52, 16 }
  0x7f   : > { %v2113_v57 = vor.u32 %v2112_v1, %v2109_v8  ;;  %v2123_v6 = vor.u32 %v2122_v23, %v6790_v33  ;;  %v2140_v28 = vshll.u32 %v6788_v5, 16  ;;  %v2144_v56 = vshrl.u32 %v6788_v5, 16  ;;  %v5166_v8 = vld [vmem:[%s6140_s25 + $0x48] sm:$0xf]  ;;  %v6823_v1 = vld [vmem:[%s6140_s25 + $0x4c] sm:$0xf] }
  0x80   : > { %v2133_v50 = vrot.slane %v2131_v20, 4  ;;  %v2136_v51 = vrot.slane %v2134_v60, 5  ;;  %v8735_v3 = vcombine.low %v6201_v53, %v6205_v58  ;;  %v5069_v55 = vcombine.low %v6773_v18, %v6782_v4 }
  0x81   : > { %v6802_v45 = vrot.slane %v2140_v28, 5  ;;  %v2146_v11 = vrot.slane %v2144_v56, 4  ;;  %v2081_v63 = vsel %vm6184_vm4, %v2076_v12, %v2080_v62  ;;  %v2095_v52 = vsel %vm6184_vm4, %v2090_v14, %v6761_v17 }
  0x82   : > { %5750 = vmatmul.mubr.msk.bf16.gmra.mxu0 %vm685_vm3, %v5063_v61  ;;  %v6805_v61 = vld [vmem:[%s6140_s25 + $0x40] sm:$0xf]  ;;  %v8736_v53 = vcombine.low %v6239_v35, %v6250_v46  ;;  %v2105_v58 = vsel %vm6184_vm4, %v2100_v15, %v2104_v16  ;;  %v2114_v23 = vrot.slane %v2113_v57, 4  ;;  %v2137_v20 = vor.u32 %v2136_v51, %v2133_v50  ;;  %v6857_v50 = vld [vmem:[%s6140_s25 + $0x44] sm:$0x1] }
  0x83   : > { %5753 = vmatprep.mubr.msk.bf16.mxu0 %vm685_vm3, %v5064_v40  ;;  %v2071_v40 = vsel %vm6184_vm4, %v2066_v34, %v6745_v30  ;;  %v2124_v30 = vrot.slane %v2123_v6, 4  ;;  %v2128_v34 = vrot.slane %v2126_v32, 5  ;;  %v2150_v62 = vshll.u32 %v6796_v41, 16  ;;  %v5169_v51 = vld [vmem:[%s6140_s25 + $0x54] sm:$0xf] }
  0x84   : > { %v2155_v12 = vshrl.u32 %v5163_v13, 16  ;;  %v2158_v17 = vshll.u32 %v5163_v13, 16  ;;  %v6834_v14 = vsel %vm734_vm0, %v6565_v22, 0  ;;  %v2147_v35 = vor.u32 %v2146_v11, %v6802_v45 }
  0x85   : > { %5716 = vmatmul.mubr.msk.bf16.gmra.mxu1 %vm685_vm3, %v8735_v3  ;;  %v2164_v46 = vshll.u32 %v6805_v61, 16  ;;  %v2168_v16 = vshrl.u32 %v6805_v61, 16  ;;  %v6839_v15 = vcombine.low %v2071_v40, %v2081_v63  ;;  %v6843_v32 = vsel %vm734_vm0, %v6537_v24, 0  ;;  %v6866_v40 = vld [vmem:[%s6140_s25 + $0x58] sm:$0xf] }
  0x86   : > { %5719 = vmatprep.mubr.msk.bf16.mxu1 %vm685_vm3, %v8736_v53  ;;  %v2179_v60 = vshrl.u32 %v5166_v8, 16  ;;  %v2182_v57 = vshll.u32 %v5166_v8, 16  ;;  %v8737_v6 = vcombine.low %v6652_v25, %v6662_v54  ;;  %v6849_v22 = vcombine.low %v2095_v52, %v2105_v58  ;;  %v6871_v8 = vld [vmem:[%s6140_s25 + $0x50] sm:$0x1] }
  0x87   : > { %v2119_v28 = vsel %vm6184_vm4, %v2114_v23, %v6790_v33  ;;  %v2129_v56 = vsel %vm6184_vm4, %v2124_v30, %v2128_v34  ;;  %v2188_v24 = vshll.u32 %v6823_v1, 16  ;;  %v8738_v25 = vcombine.low %v6666_v39, %v6676_v27  ;;  %v5172_v34 = vld [vmem:[%s6140_s25 + $0x60] sm:$0xf] }
  0x88   : > { %v2138_v54 = vrot.slane %v2137_v20, 4  ;;  %v2152_v13 = vrot.slane %v2150_v62, 5  ;;  %v2157_v11 = vrot.slane %v2155_v12, 4  ;;  %v2160_v3 = vrot.slane %v2158_v17, 5 }
  0x89   : > { %v2148_v33 = vrot.slane %v2147_v35, 4  ;;  %v6868_v63 = vrot.slane %v2164_v46, 5  ;;  %v2170_v52 = vrot.slane %v2168_v16, 4  ;;  %v2192_v53 = vshrl.u32 %v6823_v1, 16  ;;  %v6888_v35 = vld [vmem:[%s6140_s25 + $0x5c] sm:$0x1] }
  0x8a   : > { %5754 = vmatmul.mubr.msk.bf16.gmra.mxu0 %vm685_vm3, %v8737_v6  ;;  %v8739_v39 = vcombine.low %v6289_v36, %v6296_v43  ;;  %v2181_v27 = vrot.slane %v2179_v60, 4  ;;  %v2184_v58 = vrot.slane %v2182_v57, 5  ;;  %v2203_v23 = vshrl.u32 %v5169_v51, 16 }
  0x8b   : > { %5757 = vmatprep.mubr.msk.bf16.mxu0 %vm685_vm3, %v8738_v25  ;;  %v2206_v30 = vshll.u32 %v5169_v51, 16  ;;  %v8740_v20 = vcombine.low %v8723_v2, %v8722_v10  ;;  %v6883_v62 = vcombine.low %v2119_v28, %v2129_v56  ;;  %v6885_v12 = vrot.slane %v2188_v24, 5  ;;  %v6901_v28 = vld [vmem:[%s6140_s25 + $0x64] sm:$0xf] }
  0x8c   : > { %v2194_v17 = vrot.slane %v2192_v53, 4  ;;  %v2212_v36 = vshll.u32 %v6866_v40, 16  ;;  %v2174_v43 = vshll.u32 %v6857_v50, 16  ;;  %v2205_v46 = vrot.slane %v2203_v23, 4 }
  0x8d   : > { %5720 = vmatmul.mubr.msk.bf16.gmra.mxu1 %vm685_vm3, %v8739_v39  ;;  %v2208_v16 = vrot.slane %v2206_v30, 5  ;;  %v2216_v60 = vshrl.u32 %v6866_v40, 16  ;;  %v2143_v10 = vsel %vm6184_vm4, %v2138_v54, %v6802_v45  ;;  %v2153_v2 = vsel %vm6184_vm4, %v2148_v33, %v2152_v13  ;;  %v6923_v30 = vld [vmem:[%s6140_s25 + $0x68] sm:$0x1] }
  0x8e   : > { %5723 = vmatprep.mubr.msk.bf16.mxu1 %vm685_vm3, %v8740_v20  ;;  %v2161_v57 = vor.u32 %v2160_v3, %v2157_v11  ;;  %v6898_v6 = vrot.slane %v2212_v36, 5  ;;  %v2171_v56 = vor.u32 %v2170_v52, %v6868_v63  ;;  %v2185_v24 = vor.u32 %v2184_v58, %v2181_v27  ;;  %v5175_v3 = vld [vmem:[%s6140_s25 + $0x6c] sm:$0xf]  ;;  %v6920_v27 = vld [vmem:[%s6140_s25 + $0x70] sm:$0xf] }
  0x8f   : > { %v2198_v51 = vshll.u32 %v6871_v8, 16  ;;  %v2218_v25 = vrot.slane %v2216_v60, 4  ;;  %v8741_v53 = vcombine.low %v6686_v19, %v6706_v9  ;;  %v2195_v45 = vor.u32 %v2194_v17, %v6885_v12 }
  0x90   : > { %v2209_v54 = vor.u32 %v2208_v16, %v2205_v46  ;;  %v2227_v13 = vshrl.u32 %v5172_v34, 16  ;;  %v2230_v11 = vshll.u32 %v5172_v34, 16  ;;  %v8742_v33 = vcombine.low %v6698_v59, %v6722_v7  ;;  %v5178_v16 = vld [vmem:[%s6140_s25 + $0x78] sm:$0xf] }
  0x91   : > { %v2219_v52 = vor.u32 %v2218_v25, %v6898_v6  ;;  %v2222_v39 = vshll.u32 %v6888_v35, 16  ;;  %v2236_v19 = vshll.u32 %v6901_v28, 16  ;;  %v2240_v9 = vshrl.u32 %v6901_v28, 16 }
  0x92   : > { %5758 = vmatmul.mubr.msk.bf16.gmra.mxu0 %vm685_vm3, %v8741_v53  ;;  %v2162_v58 = vrot.slane %v2161_v57, 4  ;;  %v2176_v23 = vrot.slane %v2174_v43, 5  ;;  %v2229_v34 = vrot.slane %v2227_v13, 4  ;;  %v2232_v20 = vrot.slane %v2230_v11, 5 }
  0x93   : > { %5761 = vmatprep.mubr.msk.bf16.mxu0 %vm685_vm3, %v8742_v33  ;;  %v8743_v59 = vcombine.low %v8726_v26, %v8725_v38  ;;  %v6929_v7 = vcombine.low %v2143_v10, %v2153_v2  ;;  %v2172_v17 = vrot.slane %v2171_v56, 4  ;;  %v2186_v36 = vrot.slane %v2185_v24, 4  ;;  %v6939_v2 = vld [vmem:[%s6140_s25 + $0x7c] sm:$0xf] }
  0x94   : > { %v6931_v46 = vrot.slane %v2236_v19, 5  ;;  %v8744_v43 = vcombine.low %v8729_v42, %v8728_v48  ;;  %v2196_v60 = vrot.slane %v2195_v45, 4  ;;  %v2200_v57 = vrot.slane %v2198_v51, 5  ;;  %8745 = vst [vmem:[#allocation3_spill] sm:$0xff] %v6939_v2  ;;  %v5181_v19 = vld [vmem:[%s6140_s25 + $0x84] sm:$0xf] }
  0x95   : > { %5724 = vmatmul.mubr.msk.bf16.gmra.mxu1 %vm685_vm3, %v8743_v59  ;;  %v2210_v25 = vrot.slane %v2209_v54, 4  ;;  %v2242_v38 = vrot.slane %v2240_v9, 4  ;;  %v2220_v26 = vrot.slane %v2219_v52, 4  ;;  %v2224_v53 = vrot.slane %v2222_v39, 5 }
  0x96   : > { %5727 = vmatprep.mubr.msk.bf16.mxu1 %vm685_vm3, %v8744_v43  ;;  %v2233_v13 = vor.u32 %v2232_v20, %v2229_v34  ;;  %v2251_v10 = vshrl.u32 %v5175_v3, 16  ;;  %v2167_v56 = vsel %vm6184_vm4, %v2162_v58, %v6868_v63  ;;  %v2254_v24 = vshll.u32 %v5175_v3, 16  ;;  %v6023_v63 = vld [vmem:[%s6140_s25 + $0xc] sm:$0xff]   ;;  %v6973_v34 = vld [vmem:[%s6140_s25 + $0x88] sm:$0xf] }
  0x97   : > { %v2260_v48 = vshll.u32 %v6920_v27, 16  ;;  %v2264_v42 = vshrl.u32 %v6920_v27, 16  ;;  %v2177_v51 = vsel %vm6184_vm4, %v2172_v17, %v2176_v23  ;;  %v2191_v45 = vsel %vm6184_vm4, %v2186_v36, %v6885_v12  ;;  %8746 = vst [vmem:[#allocation5_spill] sm:$0xff] %v6973_v34  ;;  %v6982_v36 = vld [vmem:[%s6140_s25 + $0x74] sm:$0x1] }
  0x98   : > { %v2243_v54 = vor.u32 %v2242_v38, %v6931_v46  ;;  %v2246_v11 = vshll.u32 %v6923_v30, 16  ;;  %v2201_v3 = vsel %vm6184_vm4, %v2196_v60, %v2200_v57  ;;  %v2215_v33 = vsel %vm6184_vm4, %v2210_v25, %v6898_v6  ;;  %8748 = vst [vmem:[#allocation4_spill] sm:$0xff] %v6982_v36  ;;  %v6992_v38 = vld [vmem:[%s6140_s25 + $0x80] sm:$0x1] }
  0x99   : > { %v2275_v52 = vshrl.u32 %v5178_v16, 16  ;;  %v2278_v12 = vshll.u32 %v5178_v16, 16  ;;  %v2225_v18 = vsel %vm6184_vm4, %v2220_v26, %v2224_v53  ;;  %v2234_v4 = vrot.slane %v2233_v13, 4  ;;  %8749 = vst [vmem:[#allocation6_spill] sm:$0xff] %v6992_v38  ;;  %v6995_v26 = vld [vmem:[%s6140_s25 + $0x8c] sm:$0x1] }
  0x9a   : > { %5762 = vmatmul.mubr.msk.bf16.gmra.mxu0 %vm685_vm3, %v5069_v55  ;;  %v2253_v55 = vrot.slane %v2251_v10, 4  ;;  %v2284_v39 = vshll.u32 %v6939_v2, 16  ;;  %v2256_v9 = vrot.slane %v2254_v24, 5  ;;  %v6969_v58 = vrot.slane %v2260_v48, 5  ;;  %8750 = vst [vmem:[#allocation8_spill] sm:$0xff] %v6995_v26  ;;  %v6024_v10 = vld [vmem:[%s6140_s25 + $0x18] sm:$0xff]  }
  0x9b   : > { %5801 = vmatprep.mubr.msk.bf16.mxu0 %vm685_vm3, %v6839_v15  ;;  %v2266_v23 = vrot.slane %v2264_v42, 4  ;;  %v2288_v6 = vshrl.u32 %v6939_v2, 16  ;;  %v8747_v15 = vcombine.low %v8731_v29, %v6449_v37  ;;  %v6979_v20 = vcombine.low %v2167_v56, %v2177_v51  ;;  %v5184_v51 = vld [vmem:[%s6140_s25 + $0x90] sm:$0xf] }
  0x9c   : > { %v2244_v59 = vrot.slane %v2243_v54, 4  ;;  %v2248_v17 = vrot.slane %v2246_v11, 5  ;;  %v2277_v16 = vrot.slane %v2275_v52, 4  ;;  %v2280_v43 = vrot.slane %v2278_v12, 5 }
  0x9d   : > { %5728 = vmatmul.mubr.msk.bf16.gmra.mxu1 %vm685_vm3, %v8747_v15  ;;  %v6985_v60 = vrot.slane %v2284_v39, 5  ;;  %v2290_v57 = vrot.slane %v2288_v6, 4  ;;  %v2299_v25 = vshrl.u32 %v5181_v19, 16  ;;  %v6987_v37 = vcombine.low %v2191_v45, %v2201_v3  ;;  %v7006_v45 = vld [vmem:[%s6140_s25 + $0x94] sm:$0xf] }
  0x9e   : > { %5767 = vmatprep.mubr.msk.bf16.mxu1 %vm685_vm3, %v6023_v63  ;;  %v6989_v29 = vcombine.low %v2215_v33, %v2225_v18  ;;  %v2302_v53 = vshll.u32 %v5181_v19, 16  ;;  %v2308_v13 = vshll.u32 %v6973_v34, 16  ;;  %v2239_v56 = vsel %vm6184_vm4, %v2234_v4, %v6931_v46  ;;  %8751 = vst [vmem:[#allocation7_spill] sm:$0xff] %v7006_v45  ;;  %v7014_v33 = vld [vmem:[%s8665_s1 + $0x20] sm:$0xf]  ;;  %v6025_v46 = vld [vmem:[%s6140_s25 + $0x24] sm:$0xff]  }
  0x9f   : > { %v2257_v24 = vor.u32 %v2256_v9, %v2253_v55  ;;  %v2267_v48 = vor.u32 %v2266_v23, %v6969_v58  ;;  %v2270_v42 = vshll.u32 %v6982_v36, 16  ;;  %v2301_v54 = vrot.slane %v2299_v25, 4  ;;  %8752 = vst [vmem:[#allocation9_spill] sm:$0xff] %v7014_v33 }
  0xa0   : > { %v2304_v11 = vrot.slane %v2302_v53, 5  ;;  %v7008_v63 = vrot.slane %v2308_v13, 5  ;;  %v2312_v3 = vshrl.u32 %v6973_v34, 16  ;;  %v2249_v52 = vsel %vm6184_vm4, %v2244_v59, %v2248_v17 }
  0xa1   : > { %v2281_v12 = vor.u32 %v2280_v43, %v2277_v16  ;;  %v2291_v18 = vor.u32 %v2290_v57, %v6985_v60  ;;  %v2294_v4 = vshll.u32 %v6992_v38, 16  ;;  %v2323_v19 = vshrl.u32 %v5184_v51, 16  ;;  %v7048_v57 = vld [vmem:[%s6140_s25 + $0xa0] sm:$0xf] }
  0xa2   : > { %5802 = vmatmul.mubr.msk.bf16.vlgmr.msra.gmra.mxu0 %vm685_vm3, %v6849_v22  ;;  %v2305_v55 = vor.u32 %v2304_v11, %v2301_v54  ;;  %v2314_v39 = vrot.slane %v2312_v3, 4  ;;  %v2326_v9 = vshll.u32 %v5184_v51, 16  ;;  %v5187_v22 = vld [vmem:[%s6140_s25 + $0x9c] sm:$0xf]  ;;  %v7027_v23 = vrot.slane %v2257_v24, 4  ;;  %8754 = vst [vmem:[#allocation10_spill] sm:$0xff] %v7048_v57 }
  0xa3   : > { %5868 = vmatpush3.bf16.msra.mxu0 %v6843_v32  ;;  %5805 = vmatprep.mubr.msk.bf16.mxu0 %vm685_vm3, %v6883_v62  ;;  %v7029_v6 = vrot.slane %v2270_v42, 5  ;;  %v2318_v15 = vshll.u32 %v6995_v26, 16  ;;  %v2332_v59 = vshll.u32 %v7006_v45, 16  ;;  %v7036_v32 = vld [vmem:[%s8665_s1 + $0x1c] sm:$0xf]  ;;  %v7041_v62 = vcombine.low %v2239_v56, %v2249_v52 }
  0xa4   : > { %8753 = vst [vmem:[#allocation11_spill] sm:$0xff] %v7036_v32  ;;  %5980 = vmatprep.subr.msk.bf16.mxu0 %vm734_vm0, %v7014_v33  ;;  %v7043_v17 = vrot.slane %v2267_v48, 4  ;;  %v2315_v16 = vor.u32 %v2314_v39, %v7008_v63  ;;  %v2336_v43 = vshrl.u32 %v7006_v45, 16  ;;  %v7052_v25 = vrot.slane %v2281_v12, 4  ;;  %v7061_v56 = vld [vmem:[%s6140_s25 + $0x98] sm:$0x1] }
  0xa5   : > { %5768 = vmatmul.mubr.msk.bf16.vlgmr.msra.gmra.mxu1 %vm685_vm3, %v6024_v10  ;;  %v7054_v53 = vrot.slane %v2291_v18, 4  ;;  %v7056_v13 = vrot.slane %v2294_v4, 5  ;;  %v7058_v10 = vrot.slane %v2305_v55, 4  ;;  %8755 = vst [vmem:[#allocation12_spill] sm:$0xff] %v7061_v56  ;;  %v2325_v24 = vrot.slane %v2323_v19, 4  ;;  %v6027_v19 = vld [vmem:[%s6140_s25 + $0x3c] sm:$0xff]  }
  0xa6   : > { %5834 = vmatpush3.bf16.msra.mxu1 %v6834_v14  ;;  %5771 = vmatprep.mubr.msk.bf16.mxu1 %vm685_vm3, %v6025_v46  ;;  %v2328_v48 = vrot.slane %v2326_v9, 5  ;;  %v2347_v42 = vshrl.u32 %v5187_v22, 16  ;;  %v2350_v51 = vshll.u32 %v5187_v22, 16  ;;  %v6026_v14 = vld [vmem:[%s6140_s25 + $0x30] sm:$0xff]   ;;  %v7070_v11 = vrot.slane %v2318_v15, 5 }
  0xa7   : > { %5979 = vmatprep.subr.msk.bf16.mxu1 %vm734_vm0, %v7036_v32  ;;  %v7072_v3 = vrot.slane %v2332_v59, 5  ;;  %v2356_v46 = vshll.u32 %v7048_v57, 16  ;;  %v5190_v52 = vld [vmem:[%s6140_s25 + $0xa8] sm:$0xf]  ;;  %v7076_v12 = vrot.slane %v2315_v16, 4  ;;  %v2338_v18 = vrot.slane %v2336_v43, 4 }
  0xa8   : > { %v2342_v4 = vshll.u32 %v7061_v56, 16  ;;  %v2360_v55 = vshrl.u32 %v7048_v57, 16  ;;  %v7081_v39 = vld [vmem:[%s6140_s25 + $0xac] sm:$0xf]  ;;  %v2329_v59 = vor.u32 %v2328_v48, %v2325_v24  ;;  %v7105_v16 = vld [vmem:[%s6140_s25 + $0xa4] sm:$0x1] }
  0xa9   : > { %8756 = vst [vmem:[#allocation13_spill] sm:$0xff] %v7081_v39  ;;  %8757 = vst [vmem:[#allocation2_spill] sm:$0xff] %v7105_v16  ;;  %v2349_v43 = vrot.slane %v2347_v42, 4  ;;  %v2352_v22 = vrot.slane %v2350_v51, 5  ;;  %v2371_v54 = vshrl.u32 %v5190_v52, 16  ;;  %v7107_v9 = vrot.slane %v2356_v46, 5 }
  0xaa   : > { %5806 = vmatmul.mubr.msk.bf16.gmra.mxu0 %vm685_vm3, %v6929_v7  ;;  %v2362_v32 = vrot.slane %v2360_v55, 4  ;;  %v2374_v15 = vshll.u32 %v5190_v52, 16  ;;  %v2380_v33 = vshll.u32 %v7081_v39, 16  ;;  %v5193_v57 = vld [vmem:[%s6140_s25 + $0xb4] sm:$0xf]  ;;  %v2339_v24 = vor.u32 %v2338_v18, %v7072_v3 }
  0xab   : > { %5809 = vmatprep.mubr.msk.bf16.mxu0 %vm685_vm3, %v6979_v20  ;;  %v2321_v20 = vsel %vm6184_vm4, %v7076_v12, %v7070_v11  ;;  %v7117_v48 = vrot.slane %v2342_v4, 5  ;;  %v7120_v42 = vld [vmem:[%s6140_s25 + $0xb0] sm:$0x1]  ;;  %v2373_v51 = vrot.slane %v2371_v54, 4  ;;  %v7123_v46 = vld [vmem:[%s6140_s25 + $0xb8] sm:$0xf]  ;;  %v2353_v18 = vor.u32 %v2352_v22, %v2349_v43 }
  0xac   : > { %8758 = vst [vmem:[#allocation14_spill] sm:$0xff] %v7120_v42  ;;  %8759 = vst [vmem:[#allocation15_spill] sm:$0xff] %v7123_v46  ;;  %v2376_v52 = vrot.slane %v2374_v15, 5  ;;  %v7127_v55 = vrot.slane %v2380_v33, 5  ;;  %v2384_v11 = vshrl.u32 %v7081_v39, 16  ;;  %v7130_v12 = vrot.slane %v2329_v59, 4 }
  0xad   : > { %5772 = vmatmul.mubr.msk.bf16.gmra.mxu1 %vm685_vm3, %v6026_v14  ;;  %v2366_v14 = vshll.u32 %v7105_v16, 16  ;;  %v7133_v4 = vld [vmem:[%s6140_s25 + $0xbc] sm:$0x1]  ;;  %v2395_v54 = vshrl.u32 %v5193_v57, 16  ;;  %v2398_v7 = vshll.u32 %v5193_v57, 16  ;;  %v2363_v56 = vor.u32 %v2362_v32, %v7107_v9  ;;  %v6028_v16 = vld [vmem:[%s6140_s25 + $0x48] sm:$0xff]  }
  0xae   : > { %5775 = vmatprep.mubr.msk.bf16.mxu1 %vm685_vm3, %v6027_v19  ;;  %v2386_v45 = vrot.slane %v2384_v11, 4  ;;  %v2390_v19 = vshll.u32 %v7120_v42, 16  ;;  %v2404_v15 = vshll.u32 %v7123_v46, 16  ;;  %v5196_v33 = vld [vmem:[%s6140_s25 + $0xc0] sm:$0xf]  ;;  %v2377_v26 = vor.u32 %v2376_v52, %v2373_v51  ;;  %v6029_v57 = vld [vmem:[%s6140_s25 + $0x54] sm:$0xff]  }
  0xaf   : > { %v2397_v39 = vrot.slane %v2395_v54, 4  ;;  %v2400_v34 = vrot.slane %v2398_v7, 5  ;;  %v2408_v59 = vshrl.u32 %v7123_v46, 16  ;;  %v7142_v22 = vld [vmem:[%s6140_s25 + $0xc4] sm:$0xf]  ;;  %v2340_v43 = vrot.slane %v2339_v24, 4 }
  0xb0   : > { %v2368_v32 = vrot.slane %v2366_v14, 5  ;;  %v2387_v11 = vor.u32 %v2386_v45, %v7127_v55  ;;  %v2406_v42 = vrot.slane %v2404_v15, 5  ;;  %v2414_v7 = vshll.u32 %v7133_v4, 16  ;;  %v7154_v45 = vld [vmem:[%s6140_s25 + $0xc8] sm:$0x1] }
  0xb1   : > { %v2401_v51 = vor.u32 %v2400_v34, %v2397_v39  ;;  %v2410_v52 = vrot.slane %v2408_v59, 4  ;;  %v2419_v54 = vshrl.u32 %v5196_v33, 16  ;;  %v2354_v46 = vrot.slane %v2353_v18, 4 }
  0xb2   : > { %5810 = vmatmul.mubr.msk.bf16.gmra.mxu0 %vm685_vm3, %v6987_v37  ;;  %v2364_v38 = vrot.slane %v2363_v56, 4  ;;  %v2422_v2 = vshll.u32 %v5196_v33, 16  ;;  %v2428_v37 = vshll.u32 %v7142_v22, 16  ;;  %v2378_v24 = vrot.slane %v2377_v26, 4 }
  0xb3   : > { %5813 = vmatprep.mubr.msk.bf16.mxu0 %vm685_vm3, %v6989_v29  ;;  %v2392_v14 = vrot.slane %v2390_v19, 5  ;;  %v2411_v36 = vor.u32 %v2410_v52, %v2406_v42  ;;  %v2421_v15 = vrot.slane %v2419_v54, 4  ;;  %v2388_v34 = vrot.slane %v2387_v11, 4 }
  0xb4   : > { %v2424_v29 = vrot.slane %v2422_v2, 5  ;;  %v7157_v39 = vrot.slane %v2428_v37, 5  ;;  %v2432_v56 = vshrl.u32 %v7142_v22, 16  ;;  %v8760_v26 = vsel %vm6184_vm4, %v7043_v17, %v7029_v6 }
  0xb5   : > { %5776 = vmatmul.mubr.msk.bf16.gmra.mxu1 %vm685_vm3, %v6028_v16  ;;  %v8761_v16 = vsel %vm6184_vm4, %v7027_v23, %v6969_v58  ;;  %v2402_v19 = vrot.slane %v2401_v51, 4  ;;  %v2412_v33 = vrot.slane %v2411_v36, 4  ;;  %v2416_v2 = vrot.slane %v2414_v7, 5  ;;  %v6030_v23 = vld [vmem:[%s6140_s25 + $0x60] sm:$0xff]  }
  0xb6   : > { %5779 = vmatprep.mubr.msk.bf16.mxu1 %vm685_vm3, %v6029_v57  ;;  %v5208_v18 = vcombine.low %v8761_v16, %v8760_v26  ;;  %v8762_v59 = vsel %vm6184_vm4, %v7054_v53, %v7056_v13  ;;  %v8763_v6 = vsel %vm6184_vm4, %v7052_v25, %v6985_v60  ;;  %v2425_v57 = vor.u32 %v2424_v29, %v2421_v15  ;;  %v5234_v13 = vld [vmem:[%s6140_s25 + $0x24] sm:$0xe]  ;;  %v5237_v26 = vld [vmem:[%s6140_s25 + $0x48] sm:$0xe] }
  0xb7   : > { %v5209_v17 = vcombine.low %v8763_v6, %v8762_v59  ;;  %v2434_v11 = vrot.slane %v2432_v56, 4  ;;  %v2438_v58 = vshll.u32 %v7154_v45, 16  ;;  %v8764_v36 = vsel %vm6184_vm4, %v7058_v10, %v7008_v63  ;;  %v6031_v63 = vld [vmem:[%s6140_s25 + $0x6c] sm:$0xff]   ;;  %v5238_v6 = vld [vmem:[%s6140_s25 + $0x54] sm:$0xe] }
  0xb8   : > { %v5210_v51 = vcombine.low %v8764_v36, %v2321_v20  ;;  %v2335_v53 = vsel %vm6184_vm4, %v7130_v12, %v7072_v3  ;;  %v2345_v60 = vsel %vm6184_vm4, %v2340_v43, %v7117_v48  ;;  %v2359_v25 = vsel %vm6184_vm4, %v2354_v46, %v7107_v9  ;;  %v7210_v12 = vld [vmem:[%s6140_s25 + $0xc] sm:$0xe] }
  0xb9   : > { %v2369_v10 = vsel %vm6184_vm4, %v2364_v38, %v2368_v32  ;;  %v2383_v3 = vsel %vm6184_vm4, %v2378_v24, %v7127_v55  ;;  %v2393_v20 = vsel %vm6184_vm4, %v2388_v34, %v2392_v14  ;;  %v2435_v48 = vor.u32 %v2434_v11, %v7157_v39  ;;  %v5235_v55 = vld [vmem:[%s6140_s25 + $0x30] sm:$0xe]  ;;  %v5236_v14 = vld [vmem:[%s6140_s25 + $0x3c] sm:$0xe] }
  0xba   : > { %5814 = vmatmul.mubr.msk.bf16.gmra.mxu0 %vm685_vm3, %v7041_v62  ;;  %v2407_v62 = vsel %vm6184_vm4, %v2402_v19, %v2406_v42  ;;  %v2417_v38 = vsel %vm6184_vm4, %v2412_v33, %v2416_v2  ;;  %v7217_v9 = vrot.slane %v2425_v57, 4  ;;  %v2802_v46 = vrot.slane %v6701_v49, 5  ;;  %v6032_v57 = vld [vmem:[%s6140_s25 + $0x78] sm:$0xff]  }
  0xbb   : > { %5817 = vmatprep.mubr.msk.bf16.mxu0 %vm685_vm3, %v5208_v18  ;;  %v7221_v43 = vcombine.low %v2335_v53, %v2345_v60  ;;  %v7223_v32 = vrot.slane %v2435_v48, 4  ;;  %v7225_v52 = vrot.slane %v2438_v58, 5  ;;  %v5250_v7 = vrot.slane %v5234_v13, 9  ;;  %v6033_v53 = vld [vmem:[%s6140_s25 + $0x84] sm:$0xff]   ;;  %v5239_v13 = vld [vmem:[%s6140_s25 + $0x60] sm:$0xe] }
  0xbc   : > { %v7228_v54 = vcombine.low %v2359_v25, %v2369_v10  ;;  %v7230_v42 = vcombine.low %v2383_v3, %v2393_v20  ;;  %v5248_v37 = vrot.slane %v7210_v12, 9  ;;  %v2816_v24 = vrot.slane %v6750_v44, 5  ;;  %v6039_v49 = vld [vmem:[%s6140_s25 + $0x18] sm:$0xff]  }
  0xbd   : > { %5780 = vmatmul.mubr.msk.bf16.gmra.mxu1 %vm685_vm3, %v6030_v23  ;;  %v7236_v15 = vcombine.low %v2407_v62, %v2417_v38  ;;  %v2805_v34 = vrot.slane %v6737_v47, 5  ;;  %v2819_v29 = vrot.slane %v6765_v21, 5  ;;  %v5251_v56 = vrot.slane %v5235_v55, 9  ;;  %v5241_v55 = vld [vmem:[%s6140_s25 + $0x78] sm:$0xe] }
  0xbe   : > { %5783 = vmatprep.mubr.msk.bf16.mxu1 %vm685_vm3, %v6031_v63  ;;  %v2431_v16 = vsel %vm6184_vm4, %v7217_v9, %v7157_v39  ;;  %v7247_v44 = vrot.slane %v2802_v46, 4  ;;  %v7251_v18 = vsel %vm6470_vm7, %v5250_v7, %v2816_v24  ;;  %v2818_v19 = vrot.slane %v2816_v24, 4 }
  0xbf   : > { %v2441_v21 = vsel %vm6184_vm4, %v7223_v32, %v7225_v52  ;;  %v2823_v33 = vrot.slane %v6788_v5, 5  ;;  %v2826_v2 = vrot.slane %v6796_v41, 5  ;;  %v5252_v59 = vrot.slane %v5236_v14, 9  ;;  %v6038_v52 = vld [vmem:[%s6140_s25 + $0xc0] sm:$0xff]  }
  0xc0   : > { %v7263_v11 = vsel %vm6470_vm7, %v2818_v19, %v2819_v29  ;;  %v2830_v58 = vrot.slane %v6805_v61, 5  ;;  %v2833_v23 = vrot.slane %v6857_v50, 5  ;;  %v5253_v36 = vrot.slane %v5237_v26, 9  ;;  %v5242_v19 = vld [vmem:[%s6140_s25 + $0x84] sm:$0xe] }
  0xc1   : > { %v5267_v5 = vcombine.low %v7251_v18, %v7263_v11  ;;  %v7273_v41 = vsel %vm6470_vm7, %v5251_v56, %v2823_v33  ;;  %v2825_v60 = vrot.slane %v2823_v33, 4  ;;  %v2837_v25 = vrot.slane %v6823_v1, 5 }
  0xc2   : > { %5818 = vmatmul.mubr.msk.bf16.gmra.mxu0 %vm685_vm3, %v5209_v17  ;;  %v7280_v61 = vsel %vm6470_vm7, %v5252_v59, %v2830_v58  ;;  %v2832_v50 = vrot.slane %v2830_v58, 4  ;;  %v2840_v17 = vrot.slane %v6871_v8, 5  ;;  %v5254_v63 = vrot.slane %v5238_v6, 9  ;;  %v8765_v59 = vld [vmem:[#allocation4_spill] sm:$0xff] }
  0xc3   : > { %5821 = vmatprep.mubr.msk.bf16.mxu0 %vm685_vm3, %v5210_v51  ;;  %v7285_v10 = vsel %vm6470_vm7, %v2825_v60, %v2826_v2  ;;  %v7289_v3 = vsel %vm6470_vm7, %v5253_v36, %v2837_v25  ;;  %v2839_v1 = vrot.slane %v2837_v25, 4  ;;  %v2844_v20 = vrot.slane %v6866_v40, 5  ;;  %v5240_v51 = vld [vmem:[%s6140_s25 + $0x6c] sm:$0xe]  ;;  %v6034_v58 = vld [vmem:[%s6140_s25 + $0x90] sm:$0xff]  }
  0xc4   : > { %v5268_v48 = vcombine.low %v7273_v41, %v7285_v10  ;;  %v7298_v8 = vsel %vm6470_vm7, %v2832_v50, %v2833_v23  ;;  %v2847_v62 = vrot.slane %v6888_v35, 5  ;;  %v5255_v38 = vrot.slane %v5239_v13, 9  ;;  %v8766_v36 = vld [vmem:[#allocation3_spill] sm:$0xff]  ;;  %v5243_v60 = vld [vmem:[%s6140_s25 + $0x90] sm:$0xe]  ;;  %v8767_v50 = vld [vmem:[#allocation6_spill] sm:$0xff] }
  0xc5   : > { %5784 = vmatmul.mubr.msk.bf16.gmra.mxu1 %vm685_vm3, %v6032_v57  ;;  %v5269_v40 = vcombine.low %v7280_v61, %v7298_v8  ;;  %v7307_v7 = vsel %vm6470_vm7, %v2839_v1, %v2840_v17  ;;  %v7311_v24 = vsel %vm6470_vm7, %v5254_v63, %v2844_v20  ;;  %v2846_v14 = vrot.slane %v2844_v20, 4 }
  0xc6   : > { %5787 = vmatprep.mubr.msk.bf16.mxu1 %vm685_vm3, %v6033_v53  ;;  %v5270_v35 = vcombine.low %v7289_v3, %v7307_v7  ;;  %v2851_v29 = vrot.slane %v6901_v28, 5  ;;  %v2854_v56 = vrot.slane %v6923_v30, 5  ;;  %v5256_v26 = vrot.slane %v5240_v51, 9  ;;  %v8768_v51 = vld [vmem:[#allocation5_spill] sm:$0xff]  ;;  %v5374_v3 = vld [vmem:[%s6140_s25 + $0x48] sm:$0xf] }
  0xc7   : > { %v7320_v33 = vsel %vm6470_vm7, %v2846_v14, %v2847_v62  ;;  %v2858_v2 = vrot.slane %v6920_v27, 5  ;;  %v2861_v6 = vrot.slane %v8765_v59, 5  ;;  %v5257_v57 = vrot.slane %v5241_v55, 9  ;;  %v6035_v27 = vld [vmem:[%s6140_s25 + $0x9c] sm:$0xff]   ;;  %v8776_v55 = vld [vmem:[#allocation15_spill] sm:$0xff] }
  0xc8   : > { %v5271_v23 = vcombine.low %v7311_v24, %v7320_v33  ;;  %v7329_v28 = vsel %vm6470_vm7, %v5255_v38, %v2851_v29  ;;  %v2853_v30 = vrot.slane %v2851_v29, 4  ;;  %v2865_v53 = vrot.slane %v8766_v36, 5  ;;  %v5244_v38 = vld [vmem:[%s6140_s25 + $0x9c] sm:$0xe]  ;;  %v8771_v36 = vld [vmem:[#allocation12_spill] sm:$0xff] }
  0xc9   : > { %v7338_v25 = vsel %vm6470_vm7, %v5256_v26, %v2858_v2  ;;  %v2860_v13 = vrot.slane %v2858_v2, 4  ;;  %v2868_v17 = vrot.slane %v8767_v50, 5  ;;  %v5258_v63 = vrot.slane %v5242_v19, 9  ;;  %v5245_v26 = vld [vmem:[%s6140_s25 + $0xa8] sm:$0xe] }
  0xca   : > { %5822 = vmatmul.mubr.msk.bf16.gmra.mxu0 %vm685_vm3, %v7221_v43  ;;  %v7345_v1 = vsel %vm6470_vm7, %v2853_v30, %v2854_v56  ;;  %v7349_v43 = vsel %vm6470_vm7, %v5257_v57, %v2865_v53  ;;  %v2867_v20 = vrot.slane %v2865_v53, 4  ;;  %v2872_v62 = vrot.slane %v8768_v51, 5  ;;  %v5247_v57 = vld [vmem:[%s6140_s25 + $0xc0] sm:$0xe]  ;;  %v6036_v19 = vld [vmem:[%s6140_s25 + $0xa8] sm:$0xff]  }
  0xcb   : > { %5825 = vmatprep.mubr.msk.bf16.mxu0 %vm685_vm3, %v7228_v54  ;;  %v7357_v14 = vsel %vm6470_vm7, %v2860_v13, %v2861_v6  ;;  %v8769_v54 = vld [vmem:[#allocation8_spill] sm:$0xff]  ;;  %v5259_v56 = vrot.slane %v5243_v60, 9  ;;  %v2882_v53 = vrot.slane %v8771_v36, 5  ;;  %v5260_v60 = vrot.slane %v5244_v38, 9  ;;  %v8774_v38 = vld [vmem:[#allocation13_spill] sm:$0xff] }
  0xcc   : > { %v2875_v29 = vrot.slane %v8769_v54, 5  ;;  %v7366_v2 = vsel %vm6470_vm7, %v2867_v20, %v2868_v17  ;;  %v7370_v59 = vsel %vm6470_vm7, %v5258_v63, %v2872_v62  ;;  %v2874_v6 = vrot.slane %v2872_v62, 4  ;;  %v5246_v13 = vld [vmem:[%s6140_s25 + $0xb4] sm:$0xe]  ;;  %v8772_v17 = vld [vmem:[#allocation10_spill] sm:$0xff] }
  0xcd   : > { %5788 = vmatmul.mubr.msk.bf16.gmra.mxu1 %vm685_vm3, %v6034_v58  ;;  %v8770_v58 = vld [vmem:[#allocation7_spill] sm:$0xff]  ;;  %v2886_v63 = vrot.slane %v8772_v17, 5  ;;  %v8773_v20 = vld [vmem:[#allocation2_spill] sm:$0xff]  ;;  %v5261_v62 = vrot.slane %v5245_v26, 9  ;;  %v2893_v36 = vrot.slane %v8774_v38, 5  ;;  %v5262_v26 = vrot.slane %v5246_v13, 9 }
  0xce   : > { %5791 = vmatprep.mubr.msk.bf16.mxu1 %vm685_vm3, %v6035_v27  ;;  %v2879_v30 = vrot.slane %v8770_v58, 5  ;;  %v7380_v50 = vsel %vm6470_vm7, %v2874_v6, %v2875_v29  ;;  %v2889_v51 = vrot.slane %v8773_v20, 5  ;;  %v8775_v17 = vld [vmem:[#allocation14_spill] sm:$0xff]  ;;  %v6037_v27 = vld [vmem:[%s6140_s25 + $0xb4] sm:$0xff]   ;;  %v2806_v39 = vsel %vm6470_vm7, %v7247_v44, %v2805_v34  ;;  %v7597_v7 = vld [vmem:[%s6140_s25 + $0x4c] sm:$0xf] }
  0xcf   : > { %v7395_v29 = vsel %vm6470_vm7, %v5260_v60, %v2886_v63  ;;  %v2888_v6 = vrot.slane %v2886_v63, 4  ;;  %v2896_v20 = vrot.slane %v8775_v17, 5  ;;  %v2895_v38 = vrot.slane %v2893_v36, 4  ;;  %v6056_v44 = vld [vmem:[%s6140_s25 + $0x20] sm:$0x1] }
  0xd0   : > { %v7388_v54 = vsel %vm6470_vm7, %v5259_v56, %v2879_v30  ;;  %v2881_v58 = vrot.slane %v2879_v30, 4  ;;  %v7407_v30 = vsel %vm6470_vm7, %v5261_v62, %v2893_v36  ;;  %v2900_v60 = vrot.slane %v8776_v55, 5 }
  0xd1   : > { %v5263_v63 = vrot.slane %v5247_v57, 9  ;;  %v7423_v55 = vsel %vm6470_vm7, %v2895_v38, %v2896_v20  ;;  %v2907_v57 = vrot.slane %v7142_v22, 5  ;;  %v2803_v22 = vsel %vm6470_vm7, %v5248_v37, %v2802_v46  ;;  %v6041_v38 = vld [vmem:[%s6140_s25 + $0x30] sm:$0xff]  }
  0xd2   : > { %5826 = vmatmul.mubr.msk.bf16.gmra.mxu0 %vm685_vm3, %v7230_v42  ;;  %v7403_v56 = vsel %vm6470_vm7, %v2881_v58, %v2882_v53  ;;  %v7416_v42 = vsel %vm6470_vm7, %v2888_v6, %v2889_v51  ;;  %v2903_v53 = vrot.slane %v7133_v4, 5  ;;  %v2902_v58 = vrot.slane %v2900_v60, 4 }
  0xd3   : > { %5829 = vmatprep.mubr.msk.bf16.mxu0 %vm685_vm3, %v7236_v15  ;;  %v7427_v15 = vsel %vm6470_vm7, %v5262_v26, %v2900_v60  ;;  %v2910_v51 = vrot.slane %v7154_v45, 5  ;;  %v5233_v45 = vld [vmem:[%s6140_s25 + $0x18] sm:$0xe]  ;;  %v7467_v9 = vsel %vm6470_vm7, %v5263_v63, %v2907_v57  ;;  %v2909_v46 = vrot.slane %v2907_v57, 4  ;;  %v6040_v26 = vld [vmem:[%s6140_s25 + $0x24] sm:$0xff]  }
  0xd4   : > { %v7455_v32 = vsel %vm6470_vm7, %v2902_v58, %v2903_v53  ;;  %v5249_v37 = vrot.slane %v5233_v45, 9  ;;  %v5265_v34 = vcombine.low %v2803_v22, %v2806_v39  ;;  %v8777_v60 = vld [vmem:[#allocation9_spill] sm:$0xff] }
  0xd5   : > { %5792 = vmatmul.mubr.msk.bf16.gmra.mxu1 %vm685_vm3, %v6036_v19  ;;  %v5215_v19 = vcombine.low %v2431_v16, %v2441_v21  ;;  %v7472_v47 = vsel %vm6470_vm7, %v2909_v46, %v2910_v51  ;;  %v2812_v21 = vrot.slane %v6056_v44, 5  ;;  %v4569_v53 = vsel %vm734_vm0, %v8777_v60, 0  ;;  %v5362_v63 = vld [vmem:[%s6140_s25 + $0x18] sm:$0xf]  ;;  %v5363_v57 = vld [vmem:[%s6140_s25 + $0x1c] sm:$0xf] }
  0xd6   : > { %5795 = vmatprep.mubr.msk.bf16.mxu1 %vm685_vm3, %v6037_v27  ;;  %v6055_v27 = vld [vmem:[%s6140_s25 + $0x1c] sm:$0xf]  ;;  %v5365_v51 = vld [vmem:[%s6140_s25 + $0x24] sm:$0xf]  ;;  %v3617_v45 = vshrl.u32 %v5362_v63, 16  ;;  %v3626_v39 = vshll.u32 %v5363_v57, 16 }
  0xd7   : > { %v2809_v36 = vrot.slane %v6055_v27, 5  ;;  %v3620_v27 = vshll.u32 %v5362_v63, 16  ;;  %v3641_v46 = vshrl.u32 %v5365_v51, 16  ;;  %v6043_v44 = vld [vmem:[%s6140_s25 + $0x48] sm:$0xff]   ;;  %v5443_v60 = vld [vmem:[%s6140_s25 + $0x18] sm:$0xe] }
  0xd8   : > { %v7513_v63 = vld [vmem:[%s6140_s25 + $0x2c] sm:$0x1] }
  0xd9   : > { %v2811_v16 = vrot.slane %v2809_v36, 4  ;;  %v2810_v17 = vsel %vm6470_vm7, %v5249_v37, %v2809_v36  ;;  %v7497_v36 = vld [vmem:[%s6140_s25 + $0x28] sm:$0xf]  ;;  %v6042_v37 = vld [vmem:[%s6140_s25 + $0x3c] sm:$0xff]   ;;  %v3643_v18 = vrot.slane %v3641_v46, 4 }
  0xda   : > { %5830 = vmatmul.mubr.msk.bf16.gmra.mxu0 %vm685_vm3, %v5215_v19  ;;  %v8778_v19 = vld [vmem:[#allocation11_spill] sm:$0xff] }
  0xdb   : > { %5869 = vmatprep.mubr.msk.bf16.mxu0 %vm685_vm3, %v6039_v49  ;;  %v2813_v20 = vsel %vm6470_vm7, %v2811_v16, %v2812_v21  ;;  %v4099_v22 = vsel %vm734_vm0, %v8778_v19, 0  ;;  %v3630_v49 = vshrl.u32 %v5363_v57, 16  ;;  %v3654_v16 = vshrl.u32 %v7497_v36, 16  ;;  %v5364_v21 = vld [vmem:[%s6140_s25 + $0x20] sm:$0x1] }
  0xdc   : > { %v5266_v58 = vcombine.low %v2810_v17, %v2813_v20  ;;  %v3619_v17 = vrot.slane %v3617_v45, 4  ;;  %v3622_v20 = vrot.slane %v3620_v27, 5  ;;  %v5368_v19 = vld [vmem:[%s6140_s25 + $0x30] sm:$0xf]  ;;  %v3636_v45 = vshll.u32 %v5364_v21, 16 }
  0xdd   : > { %5796 = vmatmul.mubr.msk.bf16.gmra.mxu1 %vm685_vm3, %v6038_v52  ;;  %v3644_v52 = vshll.u32 %v5365_v51, 16  ;;  %v3656_v51 = vrot.slane %v3654_v16, 4  ;;  %v5459_v27 = vrot.slane %v5443_v60, 9  ;;  %v4363_v46 = vrot.slane %v5364_v21, 5  ;;  %v5444_v16 = vld [vmem:[%s6140_s25 + $0x24] sm:$0xe] }
  0xde   : > { %5835 = vmatprep.mubr.msk.bf16.mxu1 %vm685_vm3, %v5265_v34  ;;  %v3650_v34 = vshll.u32 %v7497_v36, 16  ;;  %v6044_v21 = vld [vmem:[%s6140_s25 + $0x54] sm:$0xff]   ;;  %v3668_v10 = vshll.u32 %v5368_v19, 16  ;;  %v6045_v60 = vld [vmem:[%s6140_s25 + $0x60] sm:$0xff]  }
  0xdf   : > { %v3646_v11 = vrot.slane %v3644_v52, 5  ;;  %v3660_v52 = vshll.u32 %v7513_v63, 16 }
  0xe2   : > { %5870 = vmatmul.mubr.msk.bf16.vlgmr.msra.gmra.mxu0 %vm685_vm3, %v6040_v26  ;;  %v7509_v26 = vrot.slane %v3626_v39, 5 }
  0xe3   : > { %5936 = vmatpush3.bf16.msra.mxu0 %v4569_v53  ;;  %5873 = vmatprep.mubr.msk.bf16.mxu0 %vm685_vm3, %v6041_v38  ;;  %v3632_v38 = vrot.slane %v3630_v49, 4  ;;  %v4360_v53 = vrot.slane %v5363_v57, 5  ;;  %v7523_v57 = vld [vmem:[%s6140_s25 + $0x34] sm:$0xf] }
  0xe5   : > { %5836 = vmatmul.mubr.msk.bf16.vlgmr.msra.gmra.mxu1 %vm685_vm3, %v5266_v58  ;;  %v7518_v58 = vrot.slane %v3650_v34, 5  ;;  %v3633_v39 = vor.u32 %v3632_v38, %v7509_v26  ;;  %v4362_v49 = vrot.slane %v4360_v53, 4  ;;  %v3647_v34 = vor.u32 %v3646_v11, %v3643_v18 }
  0xe6   : > { %5902 = vmatpush3.bf16.msra.mxu1 %v4099_v22  ;;  %5839 = vmatprep.mubr.msk.bf16.mxu1 %vm685_vm3, %v5267_v5  ;;  %v7516_v5 = vpop.f32.mrf.mxu0  ;;  %v3623_v22 = vor.u32 %v3622_v20, %v3619_v17  ;;  %v3665_v17 = vshrl.u32 %v5368_v19, 16  ;;  %v3678_v38 = vshrl.u32 %v7523_v57, 16  ;;  %v7548_v61 = vsel %vm6470_vm7, %v5459_v27, %v4360_v53  ;;  %v5371_v19 = vld [vmem:[%s6140_s25 + $0x3c] sm:$0xf] }
  0xe7   : > { %v3657_v41 = vor.u32 %v3656_v51, %v7518_v58  ;;  %v3634_v8 = vrot.slane %v3633_v39, 4  ;;  %v3662_v11 = vrot.slane %v3660_v52, 5  ;;  %v5460_v51 = vrot.slane %v5444_v16, 9  ;;  %v7562_v39 = vld [vmem:[%s6140_s25 + $0x38] sm:$0x1] }
  0xe8   : > { %v7540_v20 = vpop.f32.mrf.mxu0  ;;  %v3624_v18 = vrot.slane %v3623_v22, 4  ;;  %v3648_v12 = vrot.slane %v3647_v34, 4  ;;  %v4370_v22 = vrot.slane %v7513_v63, 5  ;;  %v3680_v52 = vrot.slane %v3678_v38, 4 }
  0xe9   : > { %v3658_v27 = vrot.slane %v3657_v41, 4  ;;  %v3689_v34 = vshrl.u32 %v5371_v19, 16  ;;  %v3692_v16 = vshll.u32 %v5371_v19, 16  ;;  %v7575_v41 = vld [vmem:[%s6140_s25 + $0x40] sm:$0xf] }
  0xea   : > { %5874 = vmatmul.mubr.msk.bf16.gmra.mxu0 %vm685_vm3, %v6042_v37  ;;  %v7559_v53 = vpop.f32.mrf.mxu0  ;;  %v3629_v63 = vsel %vm6184_vm4, %v3624_v18, %v7509_v26  ;;  %v3653_v26 = vsel %vm6184_vm4, %v3648_v12, %v7518_v58  ;;  %v5445_v18 = vld [vmem:[%s6140_s25 + $0x30] sm:$0xe]  ;;  %v3698_v24 = vshll.u32 %v7575_v41, 16  ;;  %v3702_v33 = vshrl.u32 %v7575_v41, 16 }
  0xeb   : > { %5877 = vmatprep.mubr.msk.bf16.mxu0 %vm685_vm3, %v6043_v44  ;;  %v7531_v37 = vpop.f32.mrf.mxu1  ;;  %v4367_v44 = vrot.slane %v7497_v36, 5  ;;  %v3638_v36 = vrot.slane %v3636_v45, 5  ;;  %v3667_v45 = vrot.slane %v3665_v17, 4  ;;  %v3663_v58 = vsel %vm6184_vm4, %v3658_v27, %v3662_v11 }
  0xec   : > { %8779 = vst [vmem:[#allocation4_spill] sm:$0xff] %v7531_v37  ;;  %v7604_v12 = vpop.f32.mrf.mxu0  ;;  %v3694_v19 = vrot.slane %v3692_v16, 5  ;;  %v3726_v11 = vshrl.u32 %v7597_v7, 16 }
  0xed   : > { %5840 = vmatmul.mubr.msk.bf16.gmra.mxu1 %vm685_vm3, %v5268_v48  ;;  %v3674_v48 = vshll.u32 %v7523_v57, 16  ;;  %v7555_v6 = vpop.f32.mrf.mxu1  ;;  %v4369_v4 = vrot.slane %v4367_v44, 4  ;;  %v3639_v17 = vsel %vm6184_vm4, %v3634_v8, %v3638_v36  ;;  %v4374_v36 = vrot.slane %v7523_v57, 5  ;;  %v6047_v8 = vld [vmem:[%s6140_s25 + $0x78] sm:$0xff]  }
  0xee   : > { %5843 = vmatprep.mubr.msk.bf16.mxu1 %vm685_vm3, %v5269_v40  ;;  %v7552_v40 = vsel %vm6470_vm7, %v4362_v49, %v4363_v46  ;;  %8780 = vst [vmem:[#allocation3_spill] sm:$0xff] %v7555_v6  ;;  %v3670_v49 = vrot.slane %v3668_v10, 5  ;;  %v7618_v27 = vcombine.low %v3629_v63, %v3639_v17  ;;  %v7620_v57 = vcombine.low %v3653_v26, %v3663_v58  ;;  %v7634_v17 = vld [vmem:[%s6140_s25 + $0x58] sm:$0xf]  ;;  %v7640_v58 = vld [vmem:[%s6140_s25 + $0x44] sm:$0x1] }
  0xef   : > { %v7564_v46 = vrot.slane %v3674_v48, 5  ;;  %v7581_v10 = vpop.f32.mrf.mxu1  ;;  %v7588_v48 = vsel %vm6470_vm7, %v5460_v51, %v4367_v44  ;;  %v7592_v38 = vsel %vm6470_vm7, %v4369_v4, %v4370_v22  ;;  %v3691_v51 = vrot.slane %v3689_v34, 4  ;;  %v5377_v34 = vld [vmem:[%s6140_s25 + $0x54] sm:$0xf] }
  0xf0   : > { %8781 = vst [vmem:[#allocation6_spill] sm:$0xff] %v7581_v10  ;;  %v3671_v44 = vor.u32 %v3670_v49, %v3667_v45  ;;  %v3716_v22 = vshll.u32 %v5374_v3, 16  ;;  %v4376_v13 = vrot.slane %v4374_v36, 4  ;;  %v4377_v63 = vrot.slane %v7562_v39, 5  ;;  %v5446_v49 = vld [vmem:[%s6140_s25 + $0x3c] sm:$0xe] }
  0xf1   : > { %v3681_v4 = vor.u32 %v3680_v52, %v7564_v46  ;;  %v7616_v45 = vpop.f32.mrf.mxu1  ;;  %v5461_v52 = vrot.slane %v5445_v18, 9  ;;  %v3695_v18 = vor.u32 %v3694_v19, %v3691_v51  ;;  %v8784_v6 = vcombine.low %v7329_v28, %v7345_v1 }
  0xf2   : > { %5878 = vmatmul.mubr.msk.bf16.gmra.mxu0 %vm685_vm3, %v6044_v21  ;;  %v3722_v21 = vshll.u32 %v7597_v7, 16  ;;  %8782 = vst [vmem:[#allocation5_spill] sm:$0xff] %v7616_v45  ;;  %v3718_v45 = vrot.slane %v3716_v22, 5  ;;  %v3737_v51 = vshrl.u32 %v5377_v34, 16  ;;  %v3740_v19 = vshll.u32 %v5377_v34, 16 }
  0xf3   : > { %5881 = vmatprep.mubr.msk.bf16.mxu0 %vm685_vm3, %v6045_v60  ;;  %v3684_v60 = vshll.u32 %v7562_v39, 16  ;;  %v7637_v26 = vrot.slane %v3681_v4, 4  ;;  %v3728_v39 = vrot.slane %v3726_v11, 4  ;;  %v7675_v22 = vsel %vm6470_vm7, %v4376_v13, %v4377_v63 }
  0xf4   : > { %v7645_v10 = vrot.slane %v3722_v21, 5  ;;  %v8786_v21 = vcombine.low %v7338_v25, %v7357_v14  ;;  %v4381_v25 = vrot.slane %v7575_v41, 5  ;;  %v6049_v14 = vld [vmem:[%s6140_s25 + $0x90] sm:$0xff]   ;;  %v5462_v1 = vrot.slane %v5446_v49, 9  ;;  %v5380_v41 = vld [vmem:[%s6140_s25 + $0x60] sm:$0xf] }
  0xf5   : > { %5844 = vmatmul.mubr.msk.bf16.gmra.mxu1 %vm685_vm3, %v5270_v35  ;;  %v6046_v35 = vld [vmem:[%s6140_s25 + $0x6c] sm:$0xff]   ;;  %v7630_v62 = vrot.slane %v3684_v60, 5  ;;  %v3739_v37 = vrot.slane %v3737_v51, 4 }
  0xf6   : > { %5847 = vmatprep.mubr.msk.bf16.mxu1 %vm685_vm3, %v5271_v23  ;;  %v3713_v23 = vshrl.u32 %v5374_v3, 16  ;;  %v7628_v3 = vrot.slane %v3671_v44, 4  ;;  %v3704_v44 = vrot.slane %v3702_v33, 4  ;;  %v3750_v33 = vshrl.u32 %v7634_v17, 16 }
  0xf7   : > { %v7626_v16 = vpop.f32.mrf.mxu0  ;;  %v3729_v13 = vor.u32 %v3728_v39, %v7645_v10  ;;  %v4388_v39 = vrot.slane %v7597_v7, 5  ;;  %v8790_v7 = vcombine.low %v7349_v43, %v7366_v2  ;;  %v8792_v43 = vcombine.low %v7370_v59, %v7380_v50  ;;  %v6050_v2 = vld [vmem:[%s6140_s25 + $0x9c] sm:$0xff]  }
  0xf8   : > { %8783 = vst [vmem:[#allocation8_spill] sm:$0xff] %v7626_v16  ;;  %v3715_v60 = vrot.slane %v3713_v23, 4  ;;  %v6048_v23 = vld [vmem:[%s6140_s25 + $0x84] sm:$0xff]   ;;  %v7702_v16 = vld [vmem:[%s6140_s25 + $0x5c] sm:$0x1]  ;;  %v4395_v59 = vrot.slane %v7634_v17, 5 }
  0xf9   : > { %v7663_v28 = vpop.f32.mrf.mxu0 }
  0xfa   : > { %5882 = vmatmul.mubr.msk.bf16.gmra.mxu0 %vm685_vm3, %v6046_v35  ;;  %v7642_v35 = vrot.slane %v3698_v24, 5  ;;  %v3746_v24 = vshll.u32 %v7634_v17, 16  ;;  %8787 = vst [vmem:[#allocation12_spill] sm:$0xff] %v7663_v28  ;;  %v3742_v28 = vrot.slane %v3740_v19, 5 }
  0xfb   : > { %5885 = vmatprep.mubr.msk.bf16.mxu0 %vm685_vm3, %v6047_v8  ;;  %v7651_v4 = vpop.f32.mrf.mxu1  ;;  %v7654_v8 = vld [vmem:[%s6140_s25 + $0x50] sm:$0x1]  ;;  %v7695_v49 = vpop.f32.mrf.mxu0 }
  0xfc   : > { %8785 = vst [vmem:[#allocation7_spill] sm:$0xff] %v7651_v4  ;;  %v3705_v34 = vor.u32 %v3704_v44, %v7642_v35  ;;  %v7685_v4 = vrot.slane %v3695_v18, 4  ;;  %v7692_v11 = vrot.slane %v3746_v24, 5  ;;  %v3752_v44 = vrot.slane %v3750_v33, 4  ;;  %8789 = vst [vmem:[#allocation2_spill] sm:$0xff] %v7695_v49 }
  0xfd   : > { %5848 = vmatmul.mubr.msk.bf16.gmra.mxu1 %vm685_vm3, %v8784_v6  ;;  %v7671_v6 = vsel %vm6470_vm7, %v5461_v52, %v4374_v36  ;;  %v3719_v36 = vor.u32 %v3718_v45, %v3715_v60  ;;  %v3732_v52 = vshll.u32 %v7654_v8, 16  ;;  %v7690_v63 = vpop.f32.mrf.mxu1  ;;  %v4383_v18 = vrot.slane %v4381_v25, 4  ;;  %v5447_v24 = vld [vmem:[%s6140_s25 + $0x48] sm:$0xe] }
  0xfe   : > { %5851 = vmatprep.mubr.msk.bf16.mxu1 %vm685_vm3, %v8786_v21  ;;  %v3708_v21 = vshll.u32 %v7640_v58, 16  ;;  %8788 = vst [vmem:[#allocation10_spill] sm:$0xff] %v7690_v63  ;;  %v4384_v60 = vrot.slane %v7640_v58, 5  ;;  %v3706_v51 = vrot.slane %v3705_v34, 4  ;;  %v3761_v33 = vshrl.u32 %v5380_v41, 16 }
  0xff   : > { %v7708_v63 = vsel %vm6470_vm7, %v5462_v1, %v4381_v25  ;;  %v3720_v45 = vrot.slane %v3719_v36, 4  ;;  %v3730_v49 = vrot.slane %v3729_v13, 4  ;;  %v3734_v58 = vrot.slane %v3732_v52, 5  ;;  %v7723_v36 = vld [vmem:[%s6140_s25 + $0x64] sm:$0xf]  ;;  %v7730_v13 = vpop.f32.mrf.mxu0 }
 0x100   : > { %v3710_v19 = vrot.slane %v3708_v21, 5  ;;  %v3701_v34 = vsel %vm6184_vm4, %v7685_v4, %v7642_v35  ;;  %v3743_v21 = vor.u32 %v3742_v28, %v3739_v37  ;;  %v3753_v1 = vor.u32 %v3752_v44, %v7692_v11  ;;  %8793 = vst [vmem:[#allocation14_spill] sm:$0xff] %v7730_v13  ;;  %v5448_v28 = vld [vmem:[%s6140_s25 + $0x54] sm:$0xe]  ;;  %v6054_v13 = vld [vmem:[%s6140_s25 + $0xcc] sm:$0xff]  }
 0x101   : > { %v3756_v25 = vshll.u32 %v7702_v16, 16  ;;  %v7734_v52 = vsel %vm6470_vm7, %v4383_v18, %v4384_v60  ;;  %v5463_v35 = vrot.slane %v5447_v24, 9  ;;  %v4390_v37 = vrot.slane %v4388_v39, 4 }
 0x102   : > { %5886 = vmatmul.mubr.msk.bf16.gmra.mxu0 %vm685_vm3, %v6048_v23  ;;  %v3764_v23 = vshll.u32 %v5380_v41, 16  ;;  %v4391_v4 = vrot.slane %v7654_v8, 5  ;;  %v6051_v41 = vld [vmem:[%s6140_s25 + $0xa8] sm:$0xff]   ;;  %v3711_v44 = vsel %vm6184_vm4, %v3706_v51, %v3710_v19  ;;  %v3763_v50 = vrot.slane %v3761_v33, 4 }
 0x103   : > { %5889 = vmatprep.mubr.msk.bf16.mxu0 %vm685_vm3, %v6049_v14  ;;  %v7714_v14 = vpop.f32.mrf.mxu1  ;;  %v3735_v18 = vsel %vm6184_vm4, %v3730_v49, %v3734_v58  ;;  %v3770_v60 = vshll.u32 %v7723_v36, 16  ;;  %v3774_v8 = vshrl.u32 %v7723_v36, 16  ;;  %v3754_v51 = vrot.slane %v3753_v1, 4  ;;  %v7752_v33 = vld [vmem:[%s6140_s25 + $0x68] sm:$0x1] }
 0x104   : > { %8791 = vst [vmem:[#allocation13_spill] sm:$0xff] %v7714_v14  ;;  %v3744_v14 = vrot.slane %v3743_v21, 4  ;;  %v3758_v17 = vrot.slane %v3756_v25, 5  ;;  %v5464_v19 = vrot.slane %v5448_v28, 9  ;;  %v8796_v49 = vsel %vm6184_vm4, %v7637_v26, %v7630_v62  ;;  %v5383_v25 = vld [vmem:[%s6140_s25 + $0x6c] sm:$0xf] }
 0x105   : > { %5852 = vmatmul.mubr.msk.bf16.gmra.mxu1 %vm685_vm3, %v8790_v7  ;;  %v3766_v7 = vrot.slane %v3764_v23, 5  ;;  %v7749_v24 = vpop.f32.mrf.mxu1  ;;  %v7773_v21 = vsel %vm6470_vm7, %v5463_v35, %v4388_v39  ;;  %v7777_v1 = vsel %vm6470_vm7, %v4390_v37, %v4391_v4  ;;  %v7780_v62 = vcombine.low %v3701_v34, %v3711_v44  ;;  %v5449_v4 = vld [vmem:[%s6140_s25 + $0x60] sm:$0xe]  ;;  %v5389_v44 = vld [vmem:[%s6140_s25 + $0x84] sm:$0xf] }
 0x106   : > { %5855 = vmatprep.mubr.msk.bf16.mxu1 %vm685_vm3, %v8792_v43  ;;  %v3725_v43 = vsel %vm6184_vm4, %v3720_v45, %v7645_v10  ;;  %8794 = vst [vmem:[#allocation15_spill] sm:$0xff] %v7749_v24  ;;  %v8797_v45 = vsel %vm6184_vm4, %v7628_v3, %v7564_v46  ;;  %v4397_v46 = vrot.slane %v4395_v59, 4  ;;  %v4398_v3 = vrot.slane %v7702_v16, 5 }
 0x107   : > { %v7767_v23 = vcombine.low %v8797_v45, %v8796_v49  ;;  %8798 = vst [vmem:[#allocation11_spill] sm:$0xff] %v7780_v62  ;;  %v3767_v26 = vor.u32 %v3766_v7, %v3763_v50  ;;  %v7787_v28 = vcombine.low %v3725_v43, %v3735_v18  ;;  %v7789_v39 = vrot.slane %v3770_v60, 5 }
 0x108   : > { %v7755_v10 = vpop.f32.mrf.mxu0  ;;  %v7791_v35 = vrot.slane %v3774_v8, 4  ;;  %v3780_v37 = vshll.u32 %v7752_v33, 16  ;;  %v8800_v34 = vcombine.low %v7388_v54, %v7403_v56  ;;  %v3749_v50 = vsel %vm6184_vm4, %v3744_v14, %v7692_v11  ;;  %v5386_v54 = vld [vmem:[%s6140_s25 + $0x78] sm:$0xf] }
 0x109   : > { %8795 = vst [vmem:[#allocation9_spill] sm:$0xff] %v7755_v10  ;;  %8799 = vst [vmem:[#allocation16_spill] sm:$0xff] %v7787_v28  ;;  %v3759_v7 = vsel %vm6184_vm4, %v3754_v51, %v3758_v17  ;;  %v7811_v43 = vsel %vm6470_vm7, %v5464_v19, %v4395_v59  ;;  %v8802_v56 = vcombine.low %v7395_v29, %v7416_v42  ;;  %v3785_v60 = vshrl.u32 %v5383_v25, 16  ;;  %v7823_v51 = vld [vmem:[%s6140_s25 + $0x7c] sm:$0xf]  ;;  %v6053_v59 = vld [vmem:[%s6140_s25 + $0xc0] sm:$0xff]  }
 0x10a   : > { %5890 = vmatmul.mubr.msk.bf16.gmra.mxu0 %vm685_vm3, %v6050_v2  ;;  %v7785_v2 = vld [vmem:[%s6140_s25 + $0x70] sm:$0xf]  ;;  %v7818_v18 = vpop.f32.mrf.mxu0  ;;  %v3788_v8 = vshll.u32 %v5383_v25, 16  ;;  %v7828_v17 = vsel %vm6470_vm7, %v4397_v46, %v4398_v3  ;;  %v7830_v29 = vrot.slane %v3767_v26, 4  ;;  %v5465_v42 = vrot.slane %v5449_v4, 9 }
 0x10b   : > { %5893 = vmatprep.mubr.msk.bf16.mxu0 %vm685_vm3, %v6051_v41  ;;  %v6052_v41 = vld [vmem:[%s6140_s25 + $0xb4] sm:$0xff]   ;;  %8803 = vst [vmem:[#allocation18_spill] sm:$0xff] %v7818_v18  ;;  %v3794_v11 = vshll.u32 %v7785_v2, 16  ;;  %v3798_v14 = vshrl.u32 %v7785_v2, 16  ;;  %v4402_v19 = vrot.slane %v7723_v36, 5  ;;  %v7833_v49 = vcombine.low %v3749_v50, %v3759_v7 }
 0x10c   : > { %v3777_v45 = vor.u32 %v7791_v35, %v7789_v39  ;;  %v7837_v25 = vrot.slane %v3780_v37, 5  ;;  %v3809_v46 = vshrl.u32 %v5386_v54, 16  ;;  %v3812_v3 = vshll.u32 %v5386_v54, 16  ;;  %v7849_v4 = vld [vmem:[%s6140_s25 + $0x88] sm:$0xf]  ;;  %v7852_v35 = vpop.f32.mrf.mxu0 }
 0x10d   : > { %5856 = vmatmul.mubr.msk.bf16.gmra.mxu1 %vm685_vm3, %v8800_v34  ;;  %v7799_v16 = vpop.f32.mrf.mxu1  ;;  %8804 = vst [vmem:[#allocation19_spill] sm:$0xff] %v7833_v49  ;;  %v4405_v34 = vrot.slane %v7752_v33, 5  ;;  %v3818_v36 = vshll.u32 %v7823_v51, 16  ;;  %v3822_v26 = vshrl.u32 %v7823_v51, 16  ;;  %8806 = vst [vmem:[#allocation21_spill] sm:$0xff] %v7852_v35  ;;  %v3787_v33 = vrot.slane %v3785_v60, 4 }
 0x10e   : > { %8801 = vst [vmem:[#allocation17_spill] sm:$0xff] %v7799_v16  ;;  %5859 = vmatprep.mubr.msk.bf16.mxu1 %vm685_vm3, %v8802_v56  ;;  %v7841_v56 = vld [vmem:[%s6140_s25 + $0x74] sm:$0x1]  ;;  %v3790_v37 = vrot.slane %v3788_v8, 5  ;;  %v7854_v50 = vrot.slane %v3794_v11, 5  ;;  %v3800_v7 = vrot.slane %v3798_v14, 4  ;;  %v8807_v54 = vcombine.low %v7407_v30, %v7423_v55  ;;  %v7882_v49 = vpop.f32.mrf.mxu0 }
 0x10f   : > { %v7844_v58 = vpop.f32.mrf.mxu1  ;;  %v4404_v16 = vrot.slane %v4402_v19, 4  ;;  %v7867_v60 = vld [vmem:[%s6140_s25 + $0x80] sm:$0x1]  ;;  %v7870_v8 = vld [vmem:[%s6140_s25 + $0x6c] sm:$0xe]  ;;  %v3833_v11 = vshrl.u32 %v5389_v44, 16 }
 0x110   : > { %8805 = vst [vmem:[#allocation20_spill] sm:$0xff] %v7844_v58  ;;  %v7863_v58 = vsel %vm6470_vm7, %v5465_v42, %v4402_v19  ;;  %v3836_v14 = vshll.u32 %v5389_v44, 16  ;;  %v3846_v24 = vshrl.u32 %v7849_v4, 16  ;;  %v3811_v19 = vrot.slane %v3809_v46, 4  ;;  %8809 = vst [vmem:[#allocation23_spill] sm:$0xff] %v7882_v49 }
 0x111   : > { %v7878_v42 = vpop.f32.mrf.mxu1  ;;  %v3814_v35 = vrot.slane %v3812_v3, 5  ;;  %v7880_v18 = vrot.slane %v3818_v36, 5  ;;  %v3824_v10 = vrot.slane %v3822_v26, 4  ;;  %v8810_v44 = vcombine.low %v7427_v15, %v7455_v32  ;;  %v7901_v32 = vld [vmem:[%s6140_s25 + $0x8c] sm:$0x1] }
 0x112   : > { %5894 = vmatmul.mubr.msk.bf16.gmra.mxu0 %vm685_vm3, %v6052_v41  ;;  %v3804_v41 = vshll.u32 %v7841_v56, 16  ;;  %8808 = vst [vmem:[#allocation22_spill] sm:$0xff] %v7878_v42  ;;  %v3791_v30 = vor.u32 %v3790_v37, %v3787_v33  ;;  %v3801_v55 = vor.u32 %v3800_v7, %v7854_v50  ;;  %v3828_v46 = vshll.u32 %v7867_v60, 16  ;;  %v5451_v33 = vld [vmem:[%s6140_s25 + $0x78] sm:$0xe] }
 0x113   : > { %5897 = vmatprep.mubr.msk.bf16.mxu0 %vm685_vm3, %v6053_v59  ;;  %v3842_v59 = vshll.u32 %v7849_v4, 16  ;;  %v7892_v3 = vrot.slane %v3777_v45, 4  ;;  %v7896_v36 = vsel %vm6470_vm7, %v4404_v16, %v4405_v34  ;;  %v5466_v26 = vrot.slane %v7870_v8, 9  ;;  %v7906_v42 = vpop.f32.mrf.mxu1  ;;  %v5392_v8 = vld [vmem:[%s6140_s25 + $0x90] sm:$0xf] }
 0x114   : > { %v4416_v15 = vrot.slane %v7823_v51, 5  ;;  %v3835_v37 = vrot.slane %v3833_v11, 4  ;;  %v3838_v7 = vrot.slane %v3836_v14, 5  ;;  %8811 = vst [vmem:[#allocation24_spill] sm:$0xff] %v7906_v42  ;;  %v3806_v45 = vrot.slane %v3804_v41, 5 }
 0x115   : > { %5860 = vmatmul.mubr.msk.bf16.gmra.mxu1 %vm685_vm3, %v8807_v54  ;;  %v4409_v54 = vrot.slane %v7785_v2, 5  ;;  %v7904_v2 = vrot.slane %v3842_v59, 5  ;;  %v4412_v49 = vrot.slane %v7841_v56, 5  ;;  %v3815_v16 = vor.u32 %v3814_v35, %v3811_v19  ;;  %v7915_v59 = vld [vmem:[%s6140_s25 + $0x94] sm:$0xf] }
 0x116   : > { %5863 = vmatprep.mubr.msk.bf16.mxu1 %vm685_vm3, %v8810_v44  ;;  %v3848_v44 = vrot.slane %v3846_v24, 4  ;;  %v3825_v34 = vor.u32 %v3824_v10, %v7880_v18  ;;  %v3792_v51 = vrot.slane %v3791_v30, 4  ;;  %v3802_v11 = vrot.slane %v3801_v55, 4 }
 0x117   : > { %v4411_v62 = vrot.slane %v4409_v54, 4  ;;  %v3830_v14 = vrot.slane %v3828_v46, 5  ;;  %v8812_v24 = vcombine.low %v7548_v61, %v7552_v40  ;;  %v5467_v56 = vrot.slane %v5451_v33, 9 }
 0x118   : > { %v4418_v35 = vrot.slane %v4416_v15, 4  ;;  %v4419_v10 = vrot.slane %v7867_v60, 5  ;;  %v3852_v41 = vshll.u32 %v7901_v32, 16  ;;  %v3849_v30 = vor.u32 %v3848_v44, %v7904_v2 }
 0x119   : > { %v3857_v55 = vshrl.u32 %v5392_v8, 16  ;;  %v3860_v46 = vshll.u32 %v5392_v8, 16  ;;  %v8814_v61 = vcombine.low %v7467_v9, %v7472_v47  ;;  %v3816_v40 = vrot.slane %v3815_v16, 4 }
 0x11a   : > { %v7911_v28 = vpop.f32.mrf.mxu0  ;;  %5898 = vmatmul.mubr.msk.bf16.gmra.mxu0 %vm685_vm3, %v6054_v13  ;;  %v3839_v13 = vor.u32 %v3838_v7, %v3835_v37  ;;  %v3826_v33 = vrot.slane %v3825_v34, 4  ;;  %v3866_v60 = vshll.u32 %v7915_v59, 16  ;;  %v3783_v37 = vsel %vm6184_vm4, %v7892_v3, %v7837_v25 }
 0x11b   : > { %5937 = vmatprep.mubr.msk.bf16.mxu0 %vm685_vm3, %v8812_v24  ;;  %v3870_v24 = vshrl.u32 %v7915_v59, 16  ;;  %v3797_v9 = vsel %vm6184_vm4, %v3792_v51, %v7854_v50  ;;  %v7947_v47 = vsel %vm6470_vm7, %v5466_v26, %v4409_v54  ;;  %v7951_v7 = vsel %vm6470_vm7, %v4411_v62, %v4412_v49  ;;  %v5452_v54 = vld [vmem:[%s6140_s25 + $0x84] sm:$0xe]  ;;  %v8853_v31 = vld [vmem:[#allocation24_spill] sm:$0xff] }
 0x11c   : > { %v7923_v19 = vpop.f32.mrf.mxu0  ;;  %v7959_v25 = vsel %vm6470_vm7, %v5467_v56, %v4416_v15  ;;  %v7963_v50 = vsel %vm6470_vm7, %v4418_v35, %v4419_v10  ;;  %v3854_v3 = vrot.slane %v3852_v41, 5  ;;  %v3840_v62 = vrot.slane %v3839_v13, 4  ;;  %v7987_v13 = vld [vmem:[%s6140_s25 + $0x98] sm:$0x1] }
 0x11d   : > { %8813 = vst [vmem:[#allocation25_spill] sm:$0xff] %v7923_v19  ;;  %v7926_v42 = vpop.f32.mrf.mxu1  ;;  %5864 = vmatmul.mubr.msk.bf16.gmra.mxu1 %vm685_vm3, %v8814_v61  ;;  %v3850_v49 = vrot.slane %v3849_v30, 4  ;;  %v3859_v16 = vrot.slane %v3857_v55, 4  ;;  %v3862_v34 = vrot.slane %v3860_v46, 5  ;;  %v3821_v15 = vsel %vm6184_vm4, %v3816_v40, %v7880_v18  ;;  %v5395_v30 = vld [vmem:[%s6140_s25 + $0x9c] sm:$0xf] }
 0x11e   : > { %v7934_v19 = vpop.f32.mrf.mxu0  ;;  %5903 = vmatprep.mubr.msk.bf16.mxu1 %vm685_vm3, %v7618_v27  ;;  %v3807_v27 = vsel %vm6184_vm4, %v3802_v11, %v3806_v45  ;;  %v3831_v45 = vsel %vm6184_vm4, %v3826_v33, %v3830_v14  ;;  %v7975_v51 = vrot.slane %v3866_v60, 5  ;;  %v3872_v11 = vrot.slane %v3870_v24, 4  ;;  %v8018_v24 = vld [vmem:[%s6140_s25 + $0xa0] sm:$0xf] }
 0x11f   : > { %v7953_v44 = vpop.f32.mrf.mxu1  ;;  %v8815_v35 = vcombine.low %v7588_v48, %v7592_v38  ;;  %v5481_v10 = vcombine.low %v7811_v43, %v7828_v17  ;;  %v5482_v41 = vcombine.low %v7863_v58, %v7896_v36  ;;  %v5468_v18 = vrot.slane %v5452_v54, 9 }
 0x120   : > { %v7966_v26 = vpop.f32.mrf.mxu0  ;;  %v4423_v14 = vrot.slane %v7849_v4, 5  ;;  %v8816_v48 = vcombine.low %v7671_v6, %v7675_v22  ;;  %v8817_v38 = vsel %vm6184_vm4, %v7830_v29, %v7789_v39  ;;  %v8003_v61 = vcombine.low %v3797_v9, %v3807_v27  ;;  %v5453_v29 = vld [vmem:[%s6140_s25 + $0x90] sm:$0xe]  ;;  %v8824_v4 = vld [vmem:[#allocation2_spill] sm:$0xff] }
 0x121   : > { %v7968_v8 = vpop.f32.mrf.mxu1  ;;  %v8001_v46 = vcombine.low %v8817_v38, %v3783_v37  ;;  %v8009_v60 = vcombine.low %v3821_v15, %v3831_v45  ;;  %v3845_v6 = vsel %vm6184_vm4, %v3840_v62, %v7904_v2  ;;  %v3855_v22 = vsel %vm6184_vm4, %v3850_v49, %v3854_v3 }
 0x122   : > { %v5735_v56 = vpop.f32.mrf.mxu0  ;;  %5938 = vmatmul.mubr.msk.bf16.vlgmr.msra.gmra.mxu0 %vm685_vm3, %v8815_v35  ;;  %v3863_v39 = vor.u32 %v3862_v34, %v3859_v16  ;;  %v3873_v9 = vor.u32 %v3872_v11, %v7975_v51  ;;  %v3876_v27 = vshll.u32 %v7987_v13, 16  ;;  %v3881_v54 = vshrl.u32 %v5395_v30, 16 }
 0x123   : > { %v7990_v55 = vpop.f32.mrf.mxu1  ;;  %5941 = vmatprep.mubr.msk.bf16.mxu0 %vm685_vm3, %v8816_v48  ;;  %v3884_v15 = vshll.u32 %v5395_v30, 16  ;;  %v8029_v3 = vsel %vm6470_vm7, %v5468_v18, %v4423_v14  ;;  %v4425_v62 = vrot.slane %v4423_v14, 4  ;;  %v4426_v49 = vrot.slane %v7901_v32, 5 }
 0x124   : > { %v1489_v33 = vpop.f32.mrf.mxu0  ;;  %v5469_v16 = vrot.slane %v5453_v29, 9  ;;  %v4430_v34 = vrot.slane %v7915_v59, 5  ;;  %v3890_v11 = vshll.u32 %v8018_v24, 16  ;;  %v3894_v35 = vshrl.u32 %v8018_v24, 16 }
 0x125   : > { %v5701_v37 = vpop.f32.mrf.mxu1  ;;  %5904 = vmatmul.mubr.msk.bf16.vlgmr.msra.gmra.mxu1 %vm685_vm3, %v7620_v57  ;;  %v8038_v48 = vcombine.low %v3845_v6, %v3855_v22  ;;  %v8040_v18 = vrot.slane %v3863_v39, 4  ;;  %v3874_v32 = vrot.slane %v3873_v9, 4  ;;  %v3878_v38 = vrot.slane %v3876_v27, 5  ;;  %v5398_v22 = vld [vmem:[%s6140_s25 + $0xa8] sm:$0xf] }
 0x126   : > { %v1073_v45 = vadd.f32 %v5701_v37, %v7516_v5  ;;  %v5736_v2 = vpop.f32.mrf.mxu0  ;;  %5907 = vmatprep.mubr.msk.bf16.mxu1 %vm685_vm3, %v7767_v23  ;;  %v3883_v29 = vrot.slane %v3881_v54, 4  ;;  %v3886_v59 = vrot.slane %v3884_v15, 5  ;;  %v4433_v6 = vrot.slane %v7987_v13, 5  ;;  %v8066_v27 = vld [vmem:[%s6140_s25 + $0xac] sm:$0xf] }
 0x127   : > { %v1064_v57 = vpop.f32.mrf.mxu1  ;;  %v3896_v9 = vrot.slane %v3894_v35, 4  ;;  %v8821_v35 = vld [vmem:[#allocation8_spill] sm:$0xff] }
 0x128   : > { %v8035_v5 = vadd.f32 %v5735_v56, %v1073_v45  ;;  %v1065_v23 = vadd.f32 %v1064_v57, %v7540_v20  ;;  %v1492_v30 = vpop.f32.mrf.mxu0  ;;  %v8818_v45 = vcombine.low %v7708_v63, %v7734_v52  ;;  %v8051_v20 = vsel %vm6470_vm7, %v4425_v62, %v4426_v49  ;;  %v5454_v62 = vld [vmem:[%s6140_s25 + $0x9c] sm:$0xe] }
 0x129   : > { %v5702_v14 = vpop.f32.mrf.mxu1  ;;  %v4432_v63 = vrot.slane %v4430_v34, 4  ;;  %v8063_v52 = vrot.slane %v3890_v11, 5  ;;  %v4437_v49 = vrot.slane %v8018_v24, 5  ;;  %v3914_v24 = vshll.u32 %v8066_v27, 16 }
 0x12a   : > { %v8042_v37 = vadd.f32 %v1489_v33, %v1065_v23  ;;  %v1076_v40 = vadd.f32 %v5702_v14, %v7559_v53  ;;  %v5739_v56 = vpop.f32.mrf.mxu0  ;;  %5942 = vmatmul.mubr.msk.bf16.gmra.mxu0 %vm685_vm3, %v8818_v45  ;;  %v8819_v33 = vcombine.low %v7773_v21, %v7777_v1  ;;  %v8061_v53 = vsel %vm6470_vm7, %v5469_v16, %v4430_v34  ;;  %v5397_v1 = vld [vmem:[%s6140_s25 + $0xa4] sm:$0x1]  ;;  %v8820_v16 = vld [vmem:[#allocation11_spill] sm:$0xff] }
 0x12b   : > { %v1067_v39 = vpop.f32.mrf.mxu1  ;;  %v3869_v21 = vsel %vm6184_vm4, %v8040_v18, %v7975_v51  ;;  %v3905_v34 = vshrl.u32 %v5398_v22, 16  ;;  %v8822_v51 = vld [vmem:[#allocation16_spill] sm:$0xff]  ;;  %v3918_v18 = vshrl.u32 %v8066_v27, 16 }
 0x12c   : > { %5945 = vmatprep.mubr.msk.bf16.mxu0 %vm685_vm3, %v8819_v33  ;;  %v8068_v54 = vadd.f32 %v5736_v2, %v1076_v40  ;;  %v1068_v13 = vadd.f32 %v1067_v39, %v7604_v12  ;;  %v1505_v15 = vpop.f32.mrf.mxu0  ;;  %v3879_v40 = vsel %vm6184_vm4, %v3874_v32, %v3878_v38  ;;  %v3887_v2 = vor.u32 %v3886_v59, %v3883_v29  ;;  %v8823_v59 = vld [vmem:[#allocation12_spill] sm:$0xff] }
 0x12d   : > { %v5705_v57 = vpop.f32.mrf.mxu1  ;;  %5908 = vmatmul.mubr.msk.bf16.gmra.mxu1 %vm685_vm3, %v8820_v16  ;;  %v3908_v12 = vshll.u32 %v5398_v22, 16  ;;  %v8091_v39 = vsel %vm6470_vm7, %v4432_v63, %v4433_v6  ;;  %v3897_v32 = vor.u32 %v3896_v9, %v8063_v52  ;;  %v3900_v38 = vshll.u32 %v5397_v1, 16 }
 0x12e   : > { %v8082_v11 = vadd.f32 %v1492_v30, %v1068_v13  ;;  %v1089_v23 = vadd.f32 %v5705_v57, %v8821_v35  ;;  %v5740_v14 = vpop.f32.mrf.mxu0  ;;  %5911 = vmatprep.mubr.msk.bf16.mxu1 %vm685_vm3, %v8822_v51  ;;  %v5470_v30 = vrot.slane %v5454_v62, 9  ;;  %v4439_v13 = vrot.slane %v4437_v49, 4 }
 0x12f   : > { %v1080_v45 = vpop.f32.mrf.mxu1  ;;  %v4440_v57 = vrot.slane %v5397_v1, 5  ;;  %v8099_v51 = vrot.slane %v3887_v2, 4  ;;  %v3907_v6 = vrot.slane %v3905_v34, 4  ;;  %v3910_v63 = vrot.slane %v3908_v12, 5  ;;  %v8109_v1 = vld [vmem:[%s6140_s25 + $0xb0] sm:$0x1] }
 0x130   : > { %v8094_v29 = vadd.f32 %v5739_v56, %v1089_v23  ;;  %v1081_v22 = vadd.f32 %v1080_v45, %v8823_v59  ;;  %v1508_v33 = vpop.f32.mrf.mxu0  ;;  %v8111_v23 = vrot.slane %v3914_v24, 5  ;;  %v3920_v2 = vrot.slane %v3918_v18, 4  ;;  %v8825_v12 = vld [vmem:[#allocation14_spill] sm:$0xff] }
 0x131   : > { %v5706_v16 = vpop.f32.mrf.mxu1  ;;  %v8121_v43 = vrot.slane %v3897_v32, 4  ;;  %v8123_v17 = vrot.slane %v3900_v38, 5  ;;  %v8131_v58 = vsel %vm6470_vm7, %v5470_v30, %v4437_v49  ;;  %v8135_v36 = vsel %vm6470_vm7, %v4439_v13, %v4440_v57  ;;  %v8147_v30 = vld [vmem:[%s6140_s25 + $0xb8] sm:$0xf] }
 0x132   : > { %v8101_v9 = vadd.f32 %v1505_v15, %v1081_v22  ;;  %v1092_v62 = vadd.f32 %v5706_v16, %v8824_v4  ;;  %v5743_v56 = vpop.f32.mrf.mxu0  ;;  %5946 = vmatmul.mubr.msk.bf16.gmra.mxu0 %vm685_vm3, %v5481_v10  ;;  %v8117_v15 = vcombine.low %v3869_v21, %v3879_v40  ;;  %v5455_v10 = vld [vmem:[%s6140_s25 + $0xa8] sm:$0xe]  ;;  %v3911_v32 = vor.u32 %v3910_v63, %v3907_v6  ;;  %v8827_v22 = vld [vmem:[#allocation9_spill] sm:$0xff] }
 0x133   : > { %v1083_v45 = vpop.f32.mrf.mxu1  ;;  %5949 = vmatprep.mubr.msk.bf16.mxu0 %vm685_vm3, %v5482_v41  ;;  %v5401_v41 = vld [vmem:[%s6140_s25 + $0xb4] sm:$0xf]  ;;  %v8826_v40 = vld [vmem:[#allocation19_spill] sm:$0xff]  ;;  %v3924_v38 = vshll.u32 %v8109_v1, 16  ;;  %v4444_v49 = vrot.slane %v8066_v27, 5  ;;  %v3921_v16 = vor.u32 %v3920_v2, %v8111_v23  ;;  %v3903_v27 = vsel %vm6184_vm4, %v8121_v43, %v8123_v17 }
 0x134   : > { %v8126_v34 = vadd.f32 %v5740_v14, %v1092_v62  ;;  %v1084_v24 = vadd.f32 %v1083_v45, %v8825_v12  ;;  %v1521_v18 = vpop.f32.mrf.mxu0  ;;  %v5471_v62 = vrot.slane %v5455_v10, 9  ;;  %v3929_v6 = vshrl.u32 %v5401_v41, 16 }
 0x135   : > { %v5709_v21 = vpop.f32.mrf.mxu1  ;;  %5912 = vmatmul.mubr.msk.bf16.gmra.mxu1 %vm685_vm3, %v8826_v40  ;;  %v3932_v63 = vshll.u32 %v5401_v41, 16  ;;  %v3938_v2 = vshll.u32 %v8147_v30, 16  ;;  %v3942_v10 = vshrl.u32 %v8147_v30, 16  ;;  %v5404_v40 = vld [vmem:[%s6140_s25 + $0xc0] sm:$0xf]  ;;  %v3912_v4 = vrot.slane %v3911_v32, 4 }
 0x136   : > { %v8149_v59 = vadd.f32 %v1508_v33, %v1084_v24  ;;  %v1105_v13 = vadd.f32 %v5709_v21, %v8827_v22  ;;  %v5744_v57 = vpop.f32.mrf.mxu0  ;;  %5915 = vmatprep.mubr.msk.bf16.mxu1 %vm685_vm3, %v8001_v46  ;;  %v8829_v24 = vld [vmem:[#allocation18_spill] sm:$0xff]  ;;  %v3926_v43 = vrot.slane %v3924_v38, 5  ;;  %v4446_v17 = vrot.slane %v4444_v49, 4 }
 0x137   : > { %v1096_v45 = vpop.f32.mrf.mxu1  ;;  %v4447_v33 = vrot.slane %v8109_v1, 5  ;;  %v8177_v14 = vsel %vm6470_vm7, %v5471_v62, %v4444_v49  ;;  %v8180_v32 = vld [vmem:[%s6140_s25 + $0xc4] sm:$0xf]  ;;  %v8833_v1 = vcombine.low %v7959_v25, %v7963_v50  ;;  %v8192_v62 = vrot.slane %v3938_v2, 5 }
 0x138   : > { %v8161_v12 = vadd.f32 %v5743_v56, %v1105_v13  ;;  %v1097_v21 = vadd.f32 %v1096_v45, %v8829_v24  ;;  %v1524_v46 = vpop.f32.mrf.mxu0  ;;  %v8831_v56 = vld [vmem:[#allocation21_spill] sm:$0xff]  ;;  %v8832_v45 = vcombine.low %v7947_v47, %v7951_v7  ;;  %v3922_v24 = vrot.slane %v3921_v16, 4  ;;  %v8834_v16 = vld [vmem:[#allocation23_spill] sm:$0xff] }
 0x139   : > { %v5710_v22 = vpop.f32.mrf.mxu1  ;;  %v3953_v47 = vshrl.u32 %v5404_v40, 16  ;;  %v3956_v7 = vshll.u32 %v5404_v40, 16  ;;  %v3917_v25 = vsel %vm6184_vm4, %v3912_v4, %v8111_v23  ;;  %v8201_v50 = vsel %vm6470_vm7, %v4446_v17, %v4447_v33  ;;  %v5456_v40 = vld [vmem:[%s6140_s25 + $0xb4] sm:$0xe] }
 0x13a   : > { %8828 = vst [vmem:[#allocation11_spill] sm:$0xff] %v8161_v12  ;;  %v8168_v35 = vadd.f32 %v1521_v18, %v1097_v21  ;;  %v1108_v41 = vadd.f32 %v5710_v22, %v8831_v56  ;;  %v5747_v13 = vpop.f32.mrf.mxu0  ;;  %5950 = vmatmul.mubr.msk.bf16.gmra.mxu0 %vm685_vm3, %v8832_v45  ;;  %v8187_v18 = vld [vmem:[%s6140_s25 + $0xbc] sm:$0x1]  ;;  %v3931_v21 = vrot.slane %v3929_v6, 4  ;;  %v3934_v22 = vrot.slane %v3932_v63, 5 }
 0x13b   : > { %v1099_v38 = vpop.f32.mrf.mxu1  ;;  %5953 = vmatprep.mubr.msk.bf16.mxu0 %vm685_vm3, %v8833_v1  ;;  %v3966_v6 = vshrl.u32 %v8180_v32, 16  ;;  %v3948_v23 = vshll.u32 %v8187_v18, 16  ;;  %v4451_v17 = vrot.slane %v8147_v30, 5  ;;  %v8835_v1 = vld [vmem:[#allocation25_spill] sm:$0xff] }
 0x13c   : > { %8830 = vst [vmem:[#allocation8_spill] sm:$0xff] %v8168_v35  ;;  %v8189_v56 = vadd.f32 %v5744_v57, %v1108_v41  ;;  %v1100_v45 = vadd.f32 %v1099_v38, %v8834_v16  ;;  %v1537_v49 = vpop.f32.mrf.mxu0  ;;  %v3944_v35 = vrot.slane %v3942_v10, 4  ;;  %v3962_v57 = vshll.u32 %v8180_v32, 16 }
 0x13d   : > { %v5713_v12 = vpop.f32.mrf.mxu1  ;;  %5916 = vmatmul.mubr.msk.bf16.gmra.mxu1 %vm685_vm3, %v8003_v61  ;;  %v3927_v61 = vsel %vm6184_vm4, %v3922_v24, %v3926_v43  ;;  %v3935_v33 = vor.u32 %v3934_v22, %v3931_v21  ;;  %v3955_v41 = vrot.slane %v3953_v47, 4  ;;  %v3958_v38 = vrot.slane %v3956_v7, 5 }
 0x13e   : > { %v8205_v63 = vadd.f32 %v1524_v46, %v1100_v45  ;;  %v1121_v2 = vadd.f32 %v5713_v12, %v7911_v28  ;;  %v5748_v10 = vpop.f32.mrf.mxu0  ;;  %5919 = vmatprep.mubr.msk.bf16.mxu1 %vm685_vm3, %v8009_v60  ;;  %v8836_v60 = vsel %vm6184_vm4, %v8099_v51, %v8063_v52  ;;  %v3945_v24 = vor.u32 %v3944_v35, %v8192_v62 }
 0x13f   : > { %v1112_v4 = vpop.f32.mrf.mxu1  ;;  %v8223_v43 = vcombine.low %v8836_v60, %v3903_v27  ;;  %v8226_v30 = vcombine.low %v3917_v25, %v3927_v61  ;;  %v8230_v22 = vrot.slane %v3962_v57, 5  ;;  %v3968_v47 = vrot.slane %v3966_v6, 4  ;;  %v5406_v27 = vld [vmem:[%s6140_s25 + $0xc8] sm:$0x1] }
 0x140   : > { %v8215_v46 = vadd.f32 %v5747_v13, %v1121_v2  ;;  %v1113_v28 = vadd.f32 %v1112_v4, %v8835_v1  ;;  %v1540_v12 = vpop.f32.mrf.mxu0  ;;  %v5488_v13 = vcombine.low %v8177_v14, %v8201_v50  ;;  %v8837_v52 = vcombine.low %v8029_v3, %v8051_v20  ;;  %v5407_v14 = vld [vmem:[%s6140_s25 + $0xcc] sm:$0xf]  ;;  %v8251_v20 = vld [vmem:[%s6140_s25 + $0xd0] sm:$0xf]  ;;  %v5457_v4 = vld [vmem:[%s6140_s25 + $0xc0] sm:$0xe] }
 0x141   : > { %v5714_v21 = vpop.f32.mrf.mxu1  ;;  %v8239_v35 = vrot.slane %v3948_v23, 5  ;;  %v5472_v51 = vrot.slane %v5456_v40, 9  ;;  %v8838_v50 = vcombine.low %v8061_v53, %v8091_v39  ;;  %v4454_v57 = vrot.slane %v8187_v18, 5 }
 0x142   : > { %v8232_v7 = vadd.f32 %v1537_v49, %v1113_v28  ;;  %v1124_v16 = vadd.f32 %v5714_v21, %v7934_v19  ;;  %v5751_v45 = vpop.f32.mrf.mxu0  ;;  %5954 = vmatmul.mubr.msk.bf16.gmra.mxu0 %vm685_vm3, %v8837_v52  ;;  %v8247_v49 = vrot.slane %v3935_v33, 4  ;;  %v4453_v19 = vrot.slane %v4451_v17, 4 }
 0x143   : > { %v1115_v25 = vpop.f32.mrf.mxu1  ;;  %5957 = vmatprep.mubr.msk.bf16.mxu0 %vm685_vm3, %v8838_v50  ;;  %v3959_v3 = vor.u32 %v3958_v38, %v3955_v41  ;;  %v8256_v23 = vrot.slane %v3945_v24, 4  ;;  %v4458_v53 = vrot.slane %v8180_v32, 5  ;;  %v3969_v33 = vor.u32 %v3968_v47, %v8230_v22 }
 0x144   : > { %v8253_v6 = vadd.f32 %v5748_v10, %v1124_v16  ;;  %v1116_v2 = vadd.f32 %v1115_v25, %v7966_v26  ;;  %v1553_v61 = vpop.f32.mrf.mxu0  ;;  %v3972_v18 = vshll.u32 %v5406_v27, 16  ;;  %v3977_v40 = vshrl.u32 %v5407_v14, 16  ;;  %v8841_v10 = vld [vmem:[#allocation4_spill] sm:$0xff]  ;;  %v8842_v16 = vld [vmem:[#allocation3_spill] sm:$0xff] }
 0x145   : > { %v5717_v39 = vpop.f32.mrf.mxu1  ;;  %5920 = vmatmul.mubr.msk.bf16.gmra.mxu1 %vm685_vm3, %v8038_v48  ;;  %v3980_v41 = vshll.u32 %v5407_v14, 16  ;;  %v3986_v28 = vshll.u32 %v8251_v20, 16  ;;  %v3990_v32 = vshrl.u32 %v8251_v20, 16  ;;  %v4452_v48 = vsel %vm6470_vm7, %v5472_v51, %v4451_v17  ;;  %v8843_v17 = vld [vmem:[#allocation6_spill] sm:$0xff] }
 0x146   : > { %8839 = vst [vmem:[#allocation16_spill] sm:$0xff] %v8253_v6  ;;  %v8263_v38 = vadd.f32 %v1540_v12, %v1116_v2  ;;  %v1137_v1 = vadd.f32 %v5717_v39, %v8841_v10  ;;  %v5752_v26 = vpop.f32.mrf.mxu0  ;;  %5923 = vmatprep.mubr.msk.bf16.mxu1 %vm685_vm3, %v8117_v15  ;;  %v4455_v24 = vsel %vm6470_vm7, %v4453_v19, %v4454_v57  ;;  %v3960_v21 = vrot.slane %v3959_v3, 4 }
 0x147   : > { %v1128_v60 = vpop.f32.mrf.mxu1  ;;  %v5473_v12 = vrot.slane %v5457_v4, 9  ;;  %v4460_v25 = vrot.slane %v4458_v53, 4  ;;  %v4461_v15 = vrot.slane %v5406_v27, 5  ;;  %v3970_v2 = vrot.slane %v3969_v33, 4  ;;  %v5409_v33 = vld [vmem:[%s6140_s25 + $0xd4] sm:$0x1] }
 0x148   : > { %8840 = vst [vmem:[#allocation12_spill] sm:$0xff] %v8263_v38  ;;  %v8274_v47 = vadd.f32 %v5751_v45, %v1137_v1  ;;  %v1129_v52 = vadd.f32 %v1128_v60, %v8842_v16  ;;  %v1556_v14 = vpop.f32.mrf.mxu0  ;;  %v3974_v39 = vrot.slane %v3972_v18, 5  ;;  %v3979_v10 = vrot.slane %v3977_v40, 4  ;;  %v8845_v18 = vld [vmem:[#allocation5_spill] sm:$0xff] }
 0x149   : > { %v5718_v50 = vpop.f32.mrf.mxu1  ;;  %v3982_v38 = vrot.slane %v3980_v41, 5  ;;  %v8844_v45 = vcombine.low %v8131_v58, %v8135_v36  ;;  %v8284_v57 = vrot.slane %v3986_v28, 5  ;;  %v3992_v27 = vrot.slane %v3990_v32, 4 }
 0x14a   : > { %v8277_v6 = vadd.f32 %v1553_v61, %v1129_v52  ;;  %v1140_v51 = vadd.f32 %v5718_v50, %v8843_v17  ;;  %v5755_v19 = vpop.f32.mrf.mxu0  ;;  %v3941_v61 = vsel %vm6184_vm4, %v8247_v49, %v8192_v62  ;;  %v3951_v4 = vsel %vm6184_vm4, %v8256_v23, %v8239_v35  ;;  %v5458_v62 = vld [vmem:[%s6140_s25 + $0xcc] sm:$0xe] }
 0x14b   : > { %5958 = vmatmul.mubr.msk.bf16.gmra.mxu0 %vm685_vm3, %v8844_v45  ;;  %v1131_v3 = vpop.f32.mrf.mxu1  ;;  %v4465_v58 = vrot.slane %v8251_v20, 5  ;;  %v4462_v1 = vsel %vm6470_vm7, %v4460_v25, %v4461_v15  ;;  %v5489_v35 = vcombine.low %v4452_v48, %v4455_v24  ;;  %v3965_v20 = vsel %vm6184_vm4, %v3960_v21, %v8230_v22  ;;  %v8847_v25 = vld [vmem:[#allocation10_spill] sm:$0xff] }
 0x14c   : > { %5961 = vmatprep.mubr.msk.bf16.mxu0 %vm685_vm3, %v5488_v13  ;;  %v8297_v36 = vadd.f32 %v5752_v26, %v1140_v51  ;;  %v1132_v40 = vadd.f32 %v1131_v3, %v8845_v18  ;;  %v1569_v41 = vpop.f32.mrf.mxu0  ;;  %v4459_v13 = vsel %vm6470_vm7, %v5473_v12, %v4458_v53  ;;  %v3975_v23 = vsel %vm6184_vm4, %v3970_v2, %v3974_v39  ;;  %v8846_v53 = vld [vmem:[#allocation7_spill] sm:$0xff] }
 0x14d   : > { %v5721_v49 = vpop.f32.mrf.mxu1  ;;  %5924 = vmatmul.mubr.msk.bf16.gmra.mxu1 %vm685_vm3, %v8223_v43  ;;  %v3983_v26 = vor.u32 %v3982_v38, %v3979_v10  ;;  %v3993_v12 = vor.u32 %v3992_v27, %v8284_v57  ;;  %v3996_v43 = vshll.u32 %v5409_v33, 16  ;;  %v5490_v24 = vcombine.low %v4459_v13, %v4462_v1 }
 0x14e   : > { %v8312_v28 = vadd.f32 %v1556_v14, %v1132_v40  ;;  %v1153_v32 = vadd.f32 %v5721_v49, %v8846_v53  ;;  %v5756_v60 = vpop.f32.mrf.mxu0  ;;  %5927 = vmatprep.mubr.msk.bf16.mxu1 %vm685_vm3, %v8226_v30  ;;  %v5474_v16 = vrot.slane %v5458_v62, 9  ;;  %v4467_v52 = vrot.slane %v4465_v58, 4  ;;  %v8848_v30 = vld [vmem:[#allocation13_spill] sm:$0xff] }
 0x14f   : > { %v1144_v48 = vpop.f32.mrf.mxu1  ;;  %v4468_v22 = vrot.slane %v5409_v33, 5  ;;  %v5424_v50 = vcombine.low %v3941_v61, %v3951_v4  ;;  %v5425_v2 = vcombine.low %v3965_v20, %v3975_v23  ;;  %v3984_v39 = vrot.slane %v3983_v26, 4  ;;  %v8849_v33 = vld [vmem:[#allocation15_spill] sm:$0xff]  ;;  %v8850_v62 = vld [vmem:[#allocation17_spill] sm:$0xff]  ;;  %v8851_v26 = vld [vmem:[#allocation20_spill] sm:$0xff] }
 0x150   : > { %v8318_v21 = vadd.f32 %v5755_v19, %v1153_v32  ;;  %v1145_v38 = vadd.f32 %v1144_v48, %v8847_v25  ;;  %v1572_v14 = vpop.f32.mrf.mxu0  ;;  %v3994_v45 = vrot.slane %v3993_v12, 4  ;;  %v3998_v27 = vrot.slane %v3996_v43, 5  ;;  %v8852_v43 = vld [vmem:[#allocation22_spill] sm:$0xff] }
 0x151   : > { %v5722_v15 = vpop.f32.mrf.mxu1  ;;  %v4466_v19 = vsel %vm6470_vm7, %v5474_v16, %v4465_v58  ;;  %v4469_v61 = vsel %vm6470_vm7, %v4467_v52, %v4468_v22  ;;  %v3989_v13 = vsel %vm6184_vm4, %v3984_v39, %v8284_v57 }
 0x152   : > { %v8321_v10 = vadd.f32 %v1569_v41, %v1145_v38  ;;  %v1156_v17 = vadd.f32 %v5722_v15, %v8848_v30  ;;  %v5759_v51 = vpop.f32.mrf.mxu0  ;;  %v3999_v0 = vsel %vm6184_vm4, %v3994_v45, %v3998_v27 }
 0x153   : > { %5962 = vmatmul.mubr.msk.bf16.gmra.mxu0 %vm685_vm3, %v5489_v35  ;;  %v1147_v3 = vpop.f32.mrf.mxu1  ;;  %v5491_v35 = vcombine.low %v4466_v19, %v4469_v61  ;;  %v5426_v12 = vcombine.low %v3989_v13, %v3999_v0 }
 0x154   : > { %5965 = vmatprep.mubr.msk.bf16.mxu0 %vm685_vm3, %v5490_v24  ;;  %v8330_v4 = vadd.f32 %v5756_v60, %v1156_v17  ;;  %v1148_v18 = vadd.f32 %v1147_v3, %v8849_v33  ;;  %v1585_v40 = vpop.f32.mrf.mxu0 }
 0x155   : > { %v5725_v41 = vpop.f32.mrf.mxu1  ;;  %5928 = vmatmul.mubr.msk.bf16.gmra.mxu1 %vm685_vm3, %v5424_v50 }
 0x156   : > { %v8337_v1 = vadd.f32 %v1572_v14, %v1148_v18  ;;  %v1169_v49 = vadd.f32 %v5725_v41, %v8850_v62  ;;  %v5760_v58 = vpop.f32.mrf.mxu0  ;;  %5931 = vmatprep.mubr.msk.bf16.mxu1 %vm685_vm3, %v5425_v2 }
 0x157   : > { %v1160_v20 = vpop.f32.mrf.mxu1 }
 0x158   : > { %v8343_v23 = vadd.f32 %v5759_v51, %v1169_v49  ;;  %v1161_v53 = vadd.f32 %v1160_v20, %v8851_v26  ;;  %v1588_v32 = vpop.f32.mrf.mxu0 }
 0x159   : > { %v5726_v60 = vpop.f32.mrf.mxu1 }
 0x15a   : > { %v8346_v57 = vadd.f32 %v1585_v40, %v1161_v53  ;;  %v1172_v48 = vadd.f32 %v5726_v60, %v8852_v43  ;;  %v5763_v24 = vpop.f32.mrf.mxu0 }
 0x15b   : > { %5966 = vmatmul.mubr.msk.bf16.gmra.mxu0 %vm685_vm3, %v5491_v35  ;;  %v1163_v16 = vpop.f32.mrf.mxu1 }
 0x15c   : > { %v8350_v52 = vadd.f32 %v5760_v58, %v1172_v48  ;;  %v1164_v22 = vadd.f32 %v1163_v16, %v8853_v31  ;;  %v1601_v25 = vpop.f32.mrf.mxu0 }
 0x15d   : > { %v5729_v38 = vpop.f32.mrf.mxu1  ;;  %5932 = vmatmul.mubr.msk.bf16.gmra.mxu1 %vm685_vm3, %v5426_v12 }
 0x15e   : > { %v8354_v14 = vadd.f32 %v1588_v32, %v1164_v22  ;;  %v1185_v15 = vadd.f32 %v5729_v38, %v7926_v42  ;;  %v5764_v50 = vpop.f32.mrf.mxu0 }
 0x15f   : > { %v1176_v2 = vpop.f32.mrf.mxu1 }
 0x160   : > { %v8357_v39 = vadd.f32 %v5763_v24, %v1185_v15  ;;  %v1177_v30 = vadd.f32 %v1176_v2, %v7953_v44  ;;  %v1604_v17 = vpop.f32.mrf.mxu0 }
 0x161   : > { %v5730_v51 = vpop.f32.mrf.mxu1 }
 0x162   : > { %v8360_v45 = vadd.f32 %v1601_v25, %v1177_v30  ;;  %v1188_v27 = vadd.f32 %v5730_v51, %v7968_v8  ;;  %v5803_v3 = vpop.f32.mrf.mxu0  ;;  %v8854_v30 = vld [vmem:[#allocation11_spill] sm:$0xff] }
 0x163   : > { %v1179_v19 = vpop.f32.mrf.mxu1 }
 0x164   : > { %v8363_v61 = vadd.f32 %v5764_v50, %v1188_v27  ;;  %v1180_v33 = vadd.f32 %v1179_v19, %v7990_v55  ;;  %v2577_v18 = vpop.f32.mrf.mxu0 }
 0x165   : > { %v5769_v42 = vpop.f32.mrf.mxu1 }
 0x166   : > { %v8366_v40 = vadd.f32 %v1604_v17, %v1180_v33  ;;  %v1980_v41 = vadd.f32 %v5769_v42, %v8035_v5  ;;  %v5804_v13 = vpop.f32.mrf.mxu0 }
 0x167   : > { %v1851_v44 = vpop.f32.mrf.mxu1 }
 0x168   : > { %v8369_v62 = vadd.f32 %v5803_v3, %v1980_v41  ;;  %v1978_v49 = vadd.f32 %v1851_v44, %v8042_v37  ;;  %v2580_v58 = vpop.f32.mrf.mxu0  ;;  %v8855_v3 = vld [vmem:[#allocation8_spill] sm:$0xff] }
 0x169   : > { %v5770_v8 = vpop.f32.mrf.mxu1 }
 0x16a   : > { %v8372_v0 = vadd.f32 %v2577_v18, %v1978_v49  ;;  %v1981_v35 = vadd.f32 %v5770_v8, %v8068_v54  ;;  %v5807_v20 = vpop.f32.mrf.mxu0 }
 0x16b   : > { %v1854_v55 = vpop.f32.mrf.mxu1 }
 0x16c   : > { %v8375_v26 = vadd.f32 %v5804_v13, %v1981_v35  ;;  %v1979_v53 = vadd.f32 %v1854_v55, %v8082_v11  ;;  %v2593_v32 = vpop.f32.mrf.mxu0 }
 0x16d   : > { %v5773_v5 = vpop.f32.mrf.mxu1 }
 0x16e   : > { %v8378_v60 = vadd.f32 %v2580_v58, %v1979_v53  ;;  %v1984_v12 = vadd.f32 %v5773_v5, %v8094_v29  ;;  %v5808_v43 = vpop.f32.mrf.mxu0 }
 0x16f   : > { %v1867_v37 = vpop.f32.mrf.mxu1 }
 0x170   : > { %v8381_v48 = vadd.f32 %v5807_v20, %v1984_v12  ;;  %v1982_v24 = vadd.f32 %v1867_v37, %v8101_v9  ;;  %v2596_v16 = vpop.f32.mrf.mxu0 }
 0x171   : > { %v5774_v54 = vpop.f32.mrf.mxu1 }
 0x172   : > { %v8384_v31 = vadd.f32 %v2593_v32, %v1982_v24  ;;  %v1985_v22 = vadd.f32 %v5774_v54, %v8126_v34  ;;  %v5811_v25 = vpop.f32.mrf.mxu0  ;;  %v8857_v54 = vld [vmem:[#allocation12_spill] sm:$0xff] }
 0x173   : > { %v1870_v11 = vpop.f32.mrf.mxu1 }
 0x174   : > { %v8387_v38 = vadd.f32 %v5808_v43, %v1985_v22  ;;  %v1983_v15 = vadd.f32 %v1870_v11, %v8149_v59  ;;  %v2609_v50 = vpop.f32.mrf.mxu0  ;;  %v8856_v43 = vld [vmem:[#allocation16_spill] sm:$0xff] }
 0x175   : > { %v5777_v29 = vpop.f32.mrf.mxu1 }
 0x176   : > { %v8390_v2 = vadd.f32 %v2596_v16, %v1983_v15  ;;  %v1988_v17 = vadd.f32 %v5777_v29, %v8854_v30  ;;  %v5812_v51 = vpop.f32.mrf.mxu0 }
 0x177   : > { %v1883_v9 = vpop.f32.mrf.mxu1 }
 0x178   : > { %v8393_v27 = vadd.f32 %v5811_v25, %v1988_v17  ;;  %v1986_v19 = vadd.f32 %v1883_v9, %v8855_v3  ;;  %v2612_v33 = vpop.f32.mrf.mxu0 }
 0x179   : > { %v5778_v34 = vpop.f32.mrf.mxu1 }
 0x17a   : > { %v8396_v18 = vadd.f32 %v2609_v50, %v1986_v19  ;;  %v1989_v42 = vadd.f32 %v5778_v34, %v8189_v56  ;;  %v5815_v41 = vpop.f32.mrf.mxu0 }
 0x17b   : > { %v1886_v59 = vpop.f32.mrf.mxu1 }
 0x17c   : > { %v8399_v13 = vadd.f32 %v5812_v51, %v1989_v42  ;;  %v1987_v44 = vadd.f32 %v1886_v59, %v8205_v63  ;;  %v2625_v49 = vpop.f32.mrf.mxu0 }
 0x17d   : > { %v5781_v58 = vpop.f32.mrf.mxu1 }
 0x17e   : > { %v8402_v8 = vadd.f32 %v2612_v33, %v1987_v44  ;;  %v1992_v35 = vadd.f32 %v5781_v58, %v8215_v46  ;;  %v5816_v20 = vpop.f32.mrf.mxu0 }
 0x17f   : > { %v1899_v55 = vpop.f32.mrf.mxu1 }
 0x180   : > { %v8405_v53 = vadd.f32 %v5815_v41, %v1992_v35  ;;  %v1990_v32 = vadd.f32 %v1899_v55, %v8232_v7  ;;  %v2628_v5 = vpop.f32.mrf.mxu0 }
 0x181   : > { %v5782_v56 = vpop.f32.mrf.mxu1 }
 0x182   : > { %v8408_v12 = vadd.f32 %v2625_v49, %v1990_v32  ;;  %v1993_v37 = vadd.f32 %v5782_v56, %v8856_v43  ;;  %v5819_v24 = vpop.f32.mrf.mxu0 }
 0x183   : > { %v1902_v63 = vpop.f32.mrf.mxu1 }
 0x184   : > { %v8411_v16 = vadd.f32 %v5816_v20, %v1993_v37  ;;  %v1991_v22 = vadd.f32 %v1902_v63, %v8857_v54  ;;  %v2641_v25 = vpop.f32.mrf.mxu0 }
 0x185   : > { %v5785_v46 = vpop.f32.mrf.mxu1 }
 0x186   : > { %v8414_v11 = vadd.f32 %v2628_v5, %v1991_v22  ;;  %v1996_v15 = vadd.f32 %v5785_v46, %v8274_v47  ;;  %v5820_v50 = vpop.f32.mrf.mxu0 }
 0x187   : > { %v1915_v7 = vpop.f32.mrf.mxu1 }
 0x188   : > { %v8417_v29 = vadd.f32 %v5819_v24, %v1996_v15  ;;  %v1994_v30 = vadd.f32 %v1915_v7, %v8277_v6  ;;  %v2644_v17 = vpop.f32.mrf.mxu0 }
 0x189   : > { %v5786_v51 = vpop.f32.mrf.mxu1 }
 0x18a   : > { %v8420_v9 = vadd.f32 %v2641_v25, %v1994_v30  ;;  %v1997_v3 = vadd.f32 %v5786_v51, %v8297_v36  ;;  %v5823_v19 = vpop.f32.mrf.mxu0 }
 0x18b   : > { %v1918_v33 = vpop.f32.mrf.mxu1 }
 0x18c   : > { %v8423_v34 = vadd.f32 %v5820_v50, %v1997_v3  ;;  %v1995_v42 = vadd.f32 %v1918_v33, %v8312_v28  ;;  %v2657_v41 = vpop.f32.mrf.mxu0 }
 0x18d   : > { %v5789_v47 = vpop.f32.mrf.mxu1 }
 0x18e   : > { %v8426_v59 = vadd.f32 %v2644_v17, %v1995_v42  ;;  %v2000_v44 = vadd.f32 %v5789_v47, %v8318_v21  ;;  %v5824_v49 = vpop.f32.mrf.mxu0 }
 0x18f   : > { %v1931_v6 = vpop.f32.mrf.mxu1 }
 0x190   : > { %v8429_v58 = vadd.f32 %v5823_v19, %v2000_v44  ;;  %v1998_v35 = vadd.f32 %v1931_v6, %v8321_v10  ;;  %v2660_v20 = vpop.f32.mrf.mxu0 }
 0x191   : > { %v5790_v36 = vpop.f32.mrf.mxu1 }
 0x192   : > { %v8432_v55 = vadd.f32 %v2657_v41, %v1998_v35  ;;  %v2001_v32 = vadd.f32 %v5790_v36, %v8330_v4  ;;  %v5827_v5 = vpop.f32.mrf.mxu0 }
 0x193   : > { %v1934_v28 = vpop.f32.mrf.mxu1 }
 0x194   : > { %v8435_v56 = vadd.f32 %v5824_v49, %v2001_v32  ;;  %v1999_v43 = vadd.f32 %v1934_v28, %v8337_v1  ;;  %v2673_v37 = vpop.f32.mrf.mxu0 }
 0x195   : > { %v5793_v21 = vpop.f32.mrf.mxu1 }
 0x196   : > { %v8438_v24 = vadd.f32 %v2660_v20, %v1999_v43  ;;  %v2004_v63 = vadd.f32 %v5793_v21, %v8343_v23  ;;  %v5828_v54 = vpop.f32.mrf.mxu0 }
 0x197   : > { %v1947_v10 = vpop.f32.mrf.mxu1 }
 0x198   : > { %v8441_v22 = vadd.f32 %v5827_v5, %v2004_v63  ;;  %v2002_v25 = vadd.f32 %v1947_v10, %v8346_v57  ;;  %v2676_v46 = vpop.f32.mrf.mxu0  ;;  %v6081_v63 = vmov 0.0  }
 0x199   : > { %v5794_v4 = vpop.f32.mrf.mxu1  ;;  %193 = vst [vmem:[%s8474_s17] sm:$0x1] %v6081_v63  ;;  %194 = vst [vmem:[%s8480_s20] sm:$0x1] %v6081_v63 }
 0x19a   : > { %v8444_v15 = vadd.f32 %v2673_v37, %v2002_v25  ;;  %v2005_v50 = vadd.f32 %v5794_v4, %v8350_v52  ;;  %v5831_v7 = vpop.f32.mrf.mxu0 }
 0x19b   : > { %v1950_v1 = vpop.f32.mrf.mxu1 }
 0x19c   : > { %8858 = vst [vmem:[#allocation2_spill] sm:$0xff] %v8444_v15  ;;  %v8447_v30 = vadd.f32 %v5828_v54, %v2005_v50  ;;  %v2003_v17 = vadd.f32 %v1950_v1, %v8354_v14  ;;  %v2689_v51 = vpop.f32.mrf.mxu0 }
 0x19d   : > { %v5797_v23 = vpop.f32.mrf.mxu1 }
 0x19e   : > { %v8450_v3 = vadd.f32 %v2676_v46, %v2003_v17  ;;  %v2008_v19 = vadd.f32 %v5797_v23, %v8357_v39  ;;  %v5832_v33 = vpop.f32.mrf.mxu0 }
 0x19f   : > { %v1963_v57 = vpop.f32.mrf.mxu1 }
 0x1a0   : > { %8859 = vst [vmem:[#allocation14_spill] sm:$0xff] %v8450_v3  ;;  %v8453_v42 = vadd.f32 %v5831_v7, %v2008_v19  ;;  %v2006_v41 = vadd.f32 %v1963_v57, %v8360_v45  ;;  %v2692_v47 = vpop.f32.mrf.mxu0 }
 0x1a1   : > { %v5798_v52 = vpop.f32.mrf.mxu1 }
 0x1a2   : > { %v8456_v44 = vadd.f32 %v2689_v51, %v2006_v41  ;;  %v2009_v49 = vadd.f32 %v5798_v52, %v8363_v61  ;;  %v5871_v14 = vpop.f32.mrf.mxu0 }
 0x1a3   : > { %v1966_v6 = vpop.f32.mrf.mxu1 }
 0x1a4   : > { %8860 = vst [vmem:[#allocation19_spill] sm:$0xff] %v8456_v44  ;;  %v8459_v35 = vadd.f32 %v5832_v33, %v2009_v49  ;;  %v2007_v39 = vadd.f32 %v1966_v6, %v8366_v40  ;;  %v3409_v20 = vpop.f32.mrf.mxu0 }
 0x1a5   : > { %v5837_v36 = vpop.f32.mrf.mxu1 }
 0x1a6   : > { %v8462_v32 = vadd.f32 %v2692_v47, %v2007_v39  ;;  %v3176_v45 = vadd.f32 %v5837_v36, %v8369_v62  ;;  %v5872_v5 = vpop.f32.mrf.mxu0 }
 0x1a7   : > { %v3047_v28 = vpop.f32.mrf.mxu1 }
 0x1a8   : > { %8861 = vst [vmem:[#allocation9_spill] sm:$0xff] %v8462_v32  ;;  %v8465_v43 = vadd.f32 %v5871_v14, %v3176_v45  ;;  %v3174_v37 = vadd.f32 %v3047_v28, %v8372_v0  ;;  %v8468_v61 = vpop.f32.mrf.mxu0 }
 0x1a9   : > { %v5838_v21 = vpop.f32.mrf.mxu1 }
 0x1aa   : > { %v8482_v40 = vadd.f32 %v3409_v20, %v3174_v37  ;;  %v3177_v62 = vadd.f32 %v5838_v21, %v8375_v26  ;;  %v5875_v0 = vpop.f32.mrf.mxu0 }
 0x1ab   : > { %v8487_v54 = vpop.f32.mrf.mxu1 }
 0x1ac   : > { %v8489_v10 = vadd.f32 %v5872_v5, %v3177_v62  ;;  %v8491_v25 = vpop.f32.mrf.mxu0 }
 0x1ad   : > { %v5841_v46 = vpop.f32.mrf.mxu1 }
 0x1ae   : > { %v3180_v4 = vadd.f32 %v5841_v46, %v8381_v48  ;;  %v5876_v50 = vpop.f32.mrf.mxu0 }
 0x1af   : > { %v8494_v7 = vpop.f32.mrf.mxu1 }
 0x1b0   : > { %v8496_v1 = vadd.f32 %v5875_v0, %v3180_v4  ;;  %v8498_v17 = vpop.f32.mrf.mxu0 }
 0x1b1   : > { %v5842_v26 = vpop.f32.mrf.mxu1 }
 0x1b2   : > { %v3181_v51 = vadd.f32 %v5842_v26, %v8387_v38  ;;  %v5879_v23 = vpop.f32.mrf.mxu0 }
 0x1b3   : > { %v8501_v19 = vpop.f32.mrf.mxu1 }
 0x1b4   : > { %v8503_v33 = vadd.f32 %v5876_v50, %v3181_v51  ;;  %v8505_v57 = vpop.f32.mrf.mxu0 }
 0x1b5   : > { %v5845_v41 = vpop.f32.mrf.mxu1 }
 0x1b6   : > { %v3184_v48 = vadd.f32 %v5845_v41, %v8393_v27  ;;  %v5880_v47 = vpop.f32.mrf.mxu0 }
 0x1b7   : > { %v8508_v52 = vpop.f32.mrf.mxu1 }
 0x1b8   : > { %v8510_v49 = vadd.f32 %v5879_v23, %v3184_v48  ;;  %v8512_v14 = vpop.f32.mrf.mxu0 }
 0x1b9   : > { %v5846_v6 = vpop.f32.mrf.mxu1 }
 0x1ba   : > { %v3185_v38 = vadd.f32 %v5846_v6, %v8399_v13  ;;  %v5883_v39 = vpop.f32.mrf.mxu0 }
 0x1bb   : > { %v8515_v20 = vpop.f32.mrf.mxu1 }
 0x1bc   : > { %v8517_v36 = vadd.f32 %v5880_v47, %v3185_v38  ;;  %v8519_v45 = vpop.f32.mrf.mxu0 }
 0x1bd   : > { %v5849_v5 = vpop.f32.mrf.mxu1 }
 0x1be   : > { %v3188_v27 = vadd.f32 %v5849_v5, %v8405_v53  ;;  %v5884_v28 = vpop.f32.mrf.mxu0 }
 0x1bf   : > { %v8522_v37 = vpop.f32.mrf.mxu1 }
 0x1c0   : > { %v8524_v21 = vadd.f32 %v5883_v39, %v3188_v27  ;;  %v8526_v62 = vpop.f32.mrf.mxu0 }
 0x1c1   : > { %v5850_v0 = vpop.f32.mrf.mxu1 }
 0x1c2   : > { %v3189_v13 = vadd.f32 %v5850_v0, %v8411_v16  ;;  %v5887_v63 = vpop.f32.mrf.mxu0 }
 0x1c3   : > { %v8529_v46 = vpop.f32.mrf.mxu1 }
 0x1c4   : > { %v8531_v4 = vadd.f32 %v5884_v28, %v3189_v13  ;;  %v8533_v50 = vpop.f32.mrf.mxu0 }
 0x1c5   : > { %v5853_v26 = vpop.f32.mrf.mxu1 }
 0x1c6   : > { %v3192_v53 = vadd.f32 %v5853_v26, %v8417_v29  ;;  %v5888_v51 = vpop.f32.mrf.mxu0 }
 0x1c7   : > { %v8536_v23 = vpop.f32.mrf.mxu1 }
 0x1c8   : > { %v8538_v41 = vadd.f32 %v5887_v63, %v3192_v53  ;;  %v8540_v48 = vpop.f32.mrf.mxu0 }
 0x1c9   : > { %v5854_v47 = vpop.f32.mrf.mxu1 }
 0x1ca   : > { %v3193_v16 = vadd.f32 %v5854_v47, %v8423_v34  ;;  %v5891_v6 = vpop.f32.mrf.mxu0 }
 0x1cb   : > { %v8543_v38 = vpop.f32.mrf.mxu1 }
 0x1cc   : > { %v8545_v39 = vadd.f32 %v5888_v51, %v3193_v16  ;;  %v8547_v5 = vpop.f32.mrf.mxu0 }
 0x1cd   : > { %v5857_v27 = vpop.f32.mrf.mxu1 }
 0x1ce   : > { %v3196_v29 = vadd.f32 %v5857_v27, %v8429_v58  ;;  %v5892_v28 = vpop.f32.mrf.mxu0 }
 0x1cf   : > { %v8550_v0 = vpop.f32.mrf.mxu1 }
 0x1d0   : > { %v8552_v13 = vadd.f32 %v5891_v6, %v3196_v29  ;;  %v8554_v63 = vpop.f32.mrf.mxu0 }
 0x1d1   : > { %v5858_v26 = vpop.f32.mrf.mxu1 }
 0x1d2   : > { %8862 = vst [vmem:[#allocation18_spill] sm:$0xff] %v8552_v13  ;;  %v3197_v34 = vadd.f32 %v5858_v26, %v8435_v56  ;;  %v5895_v53 = vpop.f32.mrf.mxu0 }
 0x1d3   : > { %v8557_v47 = vpop.f32.mrf.mxu1 }
 0x1d4   : > { %v8559_v51 = vadd.f32 %v5892_v28, %v3197_v34  ;;  %v8561_v16 = vpop.f32.mrf.mxu0 }
 0x1d5   : > { %8864 = vst [vmem:[#allocation23_spill] sm:$0xff] %v8561_v16  ;;  %v5861_v32 = vpop.f32.mrf.mxu1 }
 0x1d6   : > { %8863 = vst [vmem:[#allocation21_spill] sm:$0xff] %v8559_v51  ;;  %v3200_v58 = vadd.f32 %v5861_v32, %v8441_v22  ;;  %v5896_v27 = vpop.f32.mrf.mxu0 }
 0x1d7   : > { %v8564_v44 = vpop.f32.mrf.mxu1 }
 0x1d8   : > { %8865 = vst [vmem:[#allocation25_spill] sm:$0xff] %v8564_v44  ;;  %v8566_v6 = vadd.f32 %v5895_v53, %v3200_v58  ;;  %v8568_v29 = vpop.f32.mrf.mxu0 }
 0x1d9   : > { %8867 = vst [vmem:[#allocation3_spill] sm:$0xff] %v8568_v29  ;;  %v5862_v3 = vpop.f32.mrf.mxu1 }
 0x1da   : > { %8866 = vst [vmem:[#allocation4_spill] sm:$0xff] %v8566_v6  ;;  %v3201_v56 = vadd.f32 %v5862_v3, %v8447_v30  ;;  %v5899_v26 = vpop.f32.mrf.mxu0 }
 0x1db   : > { %v8571_v13 = vpop.f32.mrf.mxu1 }
 0x1dc   : > { %8868 = vst [vmem:[#allocation6_spill] sm:$0xff] %v8571_v13  ;;  %v8573_v28 = vadd.f32 %v5896_v27, %v3201_v56  ;;  %v8575_v34 = vpop.f32.mrf.mxu0 }
 0x1dd   : > { %8870 = vst [vmem:[#allocation7_spill] sm:$0xff] %v8575_v34  ;;  %v5865_v16 = vpop.f32.mrf.mxu1 }
 0x1de   : > { %8869 = vst [vmem:[#allocation5_spill] sm:$0xff] %v8573_v28  ;;  %v3204_v22 = vadd.f32 %v5865_v16, %v8453_v42  ;;  %v5900_v32 = vpop.f32.mrf.mxu0  ;;  %v3175_v42 = vadd.f32 %v8487_v54, %v8378_v60  ;;  %v3179_v54 = vadd.f32 %v8501_v19, %v8390_v2 }
 0x1df   : > { %v8578_v51 = vpop.f32.mrf.mxu1 }
 0x1e0   : > { %8871 = vst [vmem:[#allocation10_spill] sm:$0xff] %v8578_v51  ;;  %v8580_v53 = vadd.f32 %v5899_v26, %v3204_v22  ;;  %v8582_v58 = vpop.f32.mrf.mxu0 }
 0x1e1   : > { %8873 = vst [vmem:[#allocation15_spill] sm:$0xff] %v8582_v58  ;;  %v5866_v6 = vpop.f32.mrf.mxu1  ;;  %v3537_v58 = vadd.f32 %v8468_v61, %v3175_v42 }
 0x1e2   : > { %8872 = vst [vmem:[#allocation13_spill] sm:$0xff] %v8580_v53  ;;  %v3205_v30 = vadd.f32 %v5866_v6, %v8459_v35  ;;  %v5939_v3 = vpop.f32.mrf.mxu0  ;;  %v3178_v35 = vadd.f32 %v8494_v7, %v8384_v31 }
 0x1e3   : > { %v8585_v29 = vpop.f32.mrf.mxu1 }
 0x1e4   : > { %8874 = vst [vmem:[#allocation17_spill] sm:$0xff] %v8585_v29  ;;  %v8587_v27 = vadd.f32 %v5900_v32, %v3205_v30  ;;  %v4605_v56 = vpop.f32.mrf.mxu0 }
 0x1e5   : > { %v5905_v34 = vpop.f32.mrf.mxu1 }
 0x1e6   : > { %8875 = vst [vmem:[#allocation20_spill] sm:$0xff] %v8587_v27  ;;  %v5940_v16 = vpop.f32.mrf.mxu0  ;;  %v4264_v6 = vadd.f32 %v5905_v34, %v8465_v43 }
 0x1e7   : > { %v4135_v28 = vpop.f32.mrf.mxu1 }
 0x1e8   : > { %v4262_v26 = vadd.f32 %v4135_v28, %v8482_v40  ;;  %v4608_v22 = vpop.f32.mrf.mxu0  ;;  %v3540_v28 = vadd.f32 %v8491_v25, %v3178_v35  ;;  %v4734_v13 = vadd.f32 %v5939_v3, %v4264_v6 }
 0x1e9   : > { %v5906_v53 = vpop.f32.mrf.mxu1 }
 0x1ea   : > { %v5943_v32 = vpop.f32.mrf.mxu0  ;;  %v4265_v30 = vadd.f32 %v5906_v53, %v8489_v10  ;;  %v4732_v29 = vadd.f32 %v4605_v56, %v4262_v26  ;;  %v3541_v53 = vadd.f32 %v8498_v17, %v3179_v54  ;;  %v4807_v56 = vmul.f32 %v4734_v13, %v4734_v13 }
 0x1eb   : > { %v4138_v27 = vpop.f32.mrf.mxu1 }
 0x1ec   : > { %v4263_v51 = vadd.f32 %v4138_v27, %v3537_v58  ;;  %v4621_v60 = vpop.f32.mrf.mxu0  ;;  %v4735_v44 = vadd.f32 %v5940_v16, %v4265_v30  ;;  %v4805_v7 = vmul.f32 %v4732_v29, %v4732_v29 }
 0x1ed   : > { %v5909_v40 = vpop.f32.mrf.mxu1 }
 0x1ee   : > { %v4733_v61 = vadd.f32 %v4608_v22, %v4263_v51  ;;  %v5944_v42 = vpop.f32.mrf.mxu0  ;;  %v4268_v58 = vadd.f32 %v5909_v40, %v8496_v1  ;;  %v3182_v51 = vadd.f32 %v8508_v52, %v8396_v18  ;;  %v4808_v3 = vmul.f32 %v4735_v44, %v4735_v44 }
 0x1ef   : > { %v4151_v31 = vpop.f32.mrf.mxu1  ;;  %v3183_v1 = vadd.f32 %v8515_v20, %v8402_v8 }
 0x1f0   : > { %v4765_v43 = vadd.f32 %v4733_v61, %v4732_v29  ;;  %v4806_v34 = vmul.f32 %v4733_v61, %v4733_v61  ;;  %v4266_v15 = vadd.f32 %v4151_v31, %v3540_v28  ;;  %v4624_v10 = vpop.f32.mrf.mxu0  ;;  %v4738_v17 = vadd.f32 %v5943_v32, %v4268_v58 }
 0x1f1   : > { %v5910_v27 = vpop.f32.mrf.mxu1  ;;  %v3544_v18 = vadd.f32 %v8505_v57, %v3182_v51 }
 0x1f2   : > { %v4766_v2 = vadd.f32 %v4765_v43, %v4734_v13  ;;  %v4837_v19 = vadd.f32 %v4806_v34, %v4805_v7  ;;  %v4736_v26 = vadd.f32 %v4621_v60, %v4266_v15  ;;  %v5947_v25 = vpop.f32.mrf.mxu0  ;;  %v4269_v35 = vadd.f32 %v5910_v27, %v8503_v33 }
 0x1f3   : > { %v4154_v16 = vpop.f32.mrf.mxu1  ;;  %v3186_v43 = vadd.f32 %v8522_v37, %v8408_v12  ;;  %v3545_v34 = vadd.f32 %v8512_v14, %v3183_v1 }
 0x1f4   : > { %v4838_v22 = vadd.f32 %v4837_v19, %v4807_v56  ;;  %v4767_v29 = vadd.f32 %v4766_v2, %v4735_v44  ;;  %v4267_v6 = vadd.f32 %v4154_v16, %v3541_v53  ;;  %v4637_v30 = vpop.f32.mrf.mxu0  ;;  %v4809_v40 = vmul.f32 %v4736_v26, %v4736_v26 }
 0x1f5   : > { %v5913_v54 = vpop.f32.mrf.mxu1  ;;  %v4739_v31 = vadd.f32 %v5944_v42, %v4269_v35  ;;  %v4811_v53 = vmul.f32 %v4738_v17, %v4738_v17  ;;  %v3548_v12 = vadd.f32 %v8519_v45, %v3186_v43  ;;  %v3190_v45 = vadd.f32 %v8536_v23, %v8420_v9 }
 0x1f6   : > { %v4768_v13 = vadd.f32 %v4767_v29, %v4736_v26  ;;  %v4839_v15 = vadd.f32 %v4838_v22, %v4808_v3  ;;  %v4737_v60 = vadd.f32 %v4624_v10, %v4267_v6  ;;  %v5948_v28 = vpop.f32.mrf.mxu0  ;;  %v4272_v8 = vadd.f32 %v5913_v54, %v8510_v49 }
 0x1f7   : > { %v4167_v52 = vpop.f32.mrf.mxu1  ;;  %v4812_v2 = vmul.f32 %v4739_v31, %v4739_v31  ;;  %v3187_v6 = vadd.f32 %v8529_v46, %v8414_v11  ;;  %v3552_v43 = vadd.f32 %v8533_v50, %v3190_v45 }
 0x1f8   : > { %v4840_v61 = vadd.f32 %v4839_v15, %v4809_v40  ;;  %v4769_v44 = vadd.f32 %v4768_v13, %v4737_v60  ;;  %v4810_v7 = vmul.f32 %v4737_v60, %v4737_v60  ;;  %v4640_v33 = vpop.f32.mrf.mxu0  ;;  %v4270_v20 = vadd.f32 %v4167_v52, %v3544_v18 }
 0x1f9   : > { %v5914_v32 = vpop.f32.mrf.mxu1  ;;  %v4742_v49 = vadd.f32 %v5947_v25, %v4272_v8 }
 0x1fa   : > { %v4770_v10 = vadd.f32 %v4769_v44, %v4738_v17  ;;  %v4841_v58 = vadd.f32 %v4840_v61, %v4810_v7  ;;  %v5951_v27 = vpop.f32.mrf.mxu0  ;;  %v4740_v57 = vadd.f32 %v4637_v30, %v4270_v20  ;;  %v4273_v56 = vadd.f32 %v5914_v32, %v8517_v36 }
 0x1fb   : > { %v4170_v42 = vpop.f32.mrf.mxu1  ;;  %v4815_v15 = vmul.f32 %v4742_v49, %v4742_v49  ;;  %v3191_v20 = vadd.f32 %v8543_v38, %v8426_v59 }
 0x1fc   : > { %v4842_v19 = vadd.f32 %v4841_v58, %v4811_v53  ;;  %v4771_v26 = vadd.f32 %v4770_v10, %v4739_v31  ;;  %v4271_v51 = vadd.f32 %v4170_v42, %v3545_v34  ;;  %v4653_v3 = vpop.f32.mrf.mxu0  ;;  %v4813_v22 = vmul.f32 %v4740_v57, %v4740_v57 }
 0x1fd   : > { %v5917_v37 = vpop.f32.mrf.mxu1  ;;  %v4743_v30 = vadd.f32 %v5948_v28, %v4273_v56  ;;  %v3549_v31 = vadd.f32 %v8526_v62, %v3187_v6 }
 0x1fe   : > { %v4772_v16 = vadd.f32 %v4771_v26, %v4740_v57  ;;  %v4843_v14 = vadd.f32 %v4842_v19, %v4812_v2  ;;  %v4741_v29 = vadd.f32 %v4640_v33, %v4271_v51  ;;  %v5952_v35 = vpop.f32.mrf.mxu0  ;;  %v4276_v11 = vadd.f32 %v5917_v37, %v8524_v21 }
 0x1ff   : > { %v4183_v36 = vpop.f32.mrf.mxu1  ;;  %v4816_v28 = vmul.f32 %v4743_v30, %v4743_v30  ;;  %v3194_v51 = vadd.f32 %v8550_v0, %v8432_v55  ;;  %v3195_v55 = vadd.f32 %v8557_v47, %v8438_v24 }
 0x200   : > { %v4844_v1 = vadd.f32 %v4843_v14, %v4813_v22  ;;  %v4773_v17 = vadd.f32 %v4772_v16, %v4741_v29  ;;  %v4814_v54 = vmul.f32 %v4741_v29, %v4741_v29  ;;  %v4274_v13 = vadd.f32 %v4183_v36, %v3548_v12  ;;  %v4656_v40 = vpop.f32.mrf.mxu0 }
 0x201   : > { %v5918_v25 = vpop.f32.mrf.mxu1  ;;  %v4746_v10 = vadd.f32 %v5951_v27, %v4276_v11 }
 0x202   : > { %v4774_v60 = vadd.f32 %v4773_v17, %v4742_v49  ;;  %v4845_v18 = vadd.f32 %v4844_v1, %v4814_v54  ;;  %v4744_v52 = vadd.f32 %v4653_v3, %v4274_v13  ;;  %v5955_v61 = vpop.f32.mrf.mxu0  ;;  %v4277_v8 = vadd.f32 %v5918_v25, %v8531_v4 }
 0x203   : > { %v4186_v46 = vpop.f32.mrf.mxu1  ;;  %v3553_v4 = vadd.f32 %v8540_v48, %v3191_v20  ;;  %v4819_v3 = vmul.f32 %v4746_v10, %v4746_v10  ;;  %v3556_v48 = vadd.f32 %v8547_v5, %v3194_v51  ;;  %v8876_v5 = vld [vmem:[#allocation2_spill] sm:$0xff] }
 0x204   : > { %v4846_v44 = vadd.f32 %v4845_v18, %v4815_v15  ;;  %v4775_v7 = vadd.f32 %v4774_v60, %v4743_v30  ;;  %v4669_v33 = vpop.f32.mrf.mxu0  ;;  %v4275_v9 = vadd.f32 %v4186_v46, %v3549_v31  ;;  %v4817_v34 = vmul.f32 %v4744_v52, %v4744_v52  ;;  %v8877_v31 = vld [vmem:[#allocation25_spill] sm:$0xff] }
 0x205   : > { %v5921_v23 = vpop.f32.mrf.mxu1  ;;  %v4747_v2 = vadd.f32 %v5952_v35, %v4277_v8  ;;  %v3198_v11 = vadd.f32 %v8877_v31, %v8876_v5 }
 0x206   : > { %v4776_v32 = vadd.f32 %v4775_v7, %v4744_v52  ;;  %v4847_v53 = vadd.f32 %v4846_v44, %v4816_v28  ;;  %v5956_v62 = vpop.f32.mrf.mxu0  ;;  %v4745_v21 = vadd.f32 %v4656_v40, %v4275_v9  ;;  %v4280_v59 = vadd.f32 %v5921_v23, %v8538_v41  ;;  %v8878_v28 = vld [vmem:[#allocation18_spill] sm:$0xff] }
 0x207   : > { %v4199_v58 = vpop.f32.mrf.mxu1  ;;  %v4820_v14 = vmul.f32 %v4747_v2, %v4747_v2  ;;  %v3557_v52 = vadd.f32 %v8554_v63, %v3195_v55  ;;  %v8880_v63 = vld [vmem:[#allocation23_spill] sm:$0xff] }
 0x208   : > { %v4848_v57 = vadd.f32 %v4847_v53, %v4817_v34  ;;  %v4278_v56 = vadd.f32 %v4199_v58, %v3552_v43  ;;  %v4672_v42 = vpop.f32.mrf.mxu0  ;;  %v4777_v19 = vadd.f32 %v4776_v32, %v4745_v21  ;;  %v4818_v50 = vmul.f32 %v4745_v21, %v4745_v21  ;;  %v8879_v32 = vld [vmem:[#allocation21_spill] sm:$0xff]  ;;  %v8882_v21 = vld [vmem:[#allocation6_spill] sm:$0xff] }
 0x209   : > { %v5922_v26 = vpop.f32.mrf.mxu1  ;;  %v4750_v41 = vadd.f32 %v5955_v61, %v4280_v59 }
 0x20a   : > { %v4778_v12 = vadd.f32 %v4777_v19, %v4746_v10  ;;  %v4849_v27 = vadd.f32 %v4848_v57, %v4818_v50  ;;  %v4748_v49 = vadd.f32 %v4669_v33, %v4278_v56  ;;  %v4281_v6 = vadd.f32 %v5922_v26, %v8545_v39  ;;  %v8881_v10 = vld [vmem:[#allocation14_spill] sm:$0xff] }
 0x20b   : > { %v5959_v38 = vpop.f32.mrf.mxu0  ;;  %v4202_v37 = vpop.f32.mrf.mxu1  ;;  %v4823_v24 = vmul.f32 %v4750_v41, %v4750_v41  ;;  %v3199_v58 = vadd.f32 %v8882_v21, %v8881_v10 }
 0x20c   : > { %v4279_v16 = vadd.f32 %v4202_v37, %v3553_v4  ;;  %v4850_v29 = vadd.f32 %v4849_v27, %v4819_v3  ;;  %v4779_v35 = vadd.f32 %v4778_v12, %v4747_v2  ;;  %v4821_v17 = vmul.f32 %v4748_v49, %v4748_v49  ;;  %v8883_v37 = vld [vmem:[#allocation3_spill] sm:$0xff] }
 0x20d   : > { %v4685_v22 = vpop.f32.mrf.mxu0  ;;  %v5925_v30 = vpop.f32.mrf.mxu1  ;;  %v4751_v60 = vadd.f32 %v5956_v62, %v4281_v6  ;;  %v3560_v62 = vadd.f32 %v8880_v63, %v3198_v11  ;;  %v8892_v63 = vld [vmem:[#allocation13_spill] sm:$0xff] }
 0x20e   : > { %v4749_v0 = vadd.f32 %v4672_v42, %v4279_v16  ;;  %v4780_v1 = vadd.f32 %v4779_v35, %v4748_v49  ;;  %v4851_v54 = vadd.f32 %v4850_v29, %v4820_v14  ;;  %v4284_v44 = vadd.f32 %v5925_v30, %v8878_v28  ;;  %v8885_v14 = vld [vmem:[#allocation10_spill] sm:$0xff]  ;;  %v8886_v35 = vld [vmem:[#allocation4_spill] sm:$0xff] }
 0x20f   : > { %v5960_v36 = vpop.f32.mrf.mxu0  ;;  %v4215_v13 = vpop.f32.mrf.mxu1  ;;  %v4824_v9 = vmul.f32 %v4751_v60, %v4751_v60  ;;  %v3561_v16 = vadd.f32 %v8883_v37, %v3199_v58 }
 0x210   : > { %v4822_v40 = vmul.f32 %v4749_v0, %v4749_v0  ;;  %v4282_v45 = vadd.f32 %v4215_v13, %v3556_v48  ;;  %v4852_v15 = vadd.f32 %v4851_v54, %v4821_v17  ;;  %v4781_v18 = vadd.f32 %v4780_v1, %v4749_v0 }
 0x211   : > { %v4688_v25 = vpop.f32.mrf.mxu0  ;;  %v5926_v39 = vpop.f32.mrf.mxu1  ;;  %v4754_v42 = vadd.f32 %v5959_v38, %v4284_v44 }
 0x212   : > { %v4782_v61 = vadd.f32 %v4781_v18, %v4750_v41  ;;  %v4853_v46 = vadd.f32 %v4852_v15, %v4822_v40  ;;  %v4752_v7 = vadd.f32 %v4685_v22, %v4282_v45  ;;  %v4285_v34 = vadd.f32 %v5926_v39, %v8879_v32  ;;  %v8884_v22 = vld [vmem:[#allocation19_spill] sm:$0xff]  ;;  %v8889_v18 = vld [vmem:[#allocation9_spill] sm:$0xff] }
 0x213   : > { %v5963_v47 = vpop.f32.mrf.mxu0  ;;  %v4218_v33 = vpop.f32.mrf.mxu1  ;;  %v3202_v29 = vadd.f32 %v8885_v14, %v8884_v22  ;;  %v4827_v38 = vmul.f32 %v4754_v42, %v4754_v42  ;;  %v8888_v15 = vld [vmem:[#allocation7_spill] sm:$0xff]  ;;  %v8890_v39 = vld [vmem:[#allocation17_spill] sm:$0xff] }
 0x214   : > { %v4283_v43 = vadd.f32 %v4218_v33, %v3557_v52  ;;  %v4854_v23 = vadd.f32 %v4853_v46, %v4823_v24  ;;  %v4783_v20 = vadd.f32 %v4782_v61, %v4751_v60  ;;  %v4825_v19 = vmul.f32 %v4752_v7, %v4752_v7 }
 0x215   : > { %v4701_v8 = vpop.f32.mrf.mxu0  ;;  %v5929_v53 = vpop.f32.mrf.mxu1  ;;  %v4755_v12 = vadd.f32 %v5960_v36, %v4285_v34  ;;  %v8887_v36 = vld [vmem:[#allocation5_spill] sm:$0xff]  ;;  %v3564_v60 = vadd.f32 %v8888_v15, %v3202_v29  ;;  %v3203_v52 = vadd.f32 %v8890_v39, %v8889_v18 }
 0x216   : > { %v4753_v57 = vadd.f32 %v4688_v25, %v4283_v43  ;;  %v4784_v2 = vadd.f32 %v4783_v20, %v4752_v7  ;;  %v4855_v50 = vadd.f32 %v4854_v23, %v4824_v9  ;;  %v4288_v6 = vadd.f32 %v5929_v53, %v8886_v35  ;;  %v8891_v23 = vld [vmem:[#allocation15_spill] sm:$0xff] }
 0x217   : > { %v5964_v56 = vpop.f32.mrf.mxu0  ;;  %v4231_v26 = vpop.f32.mrf.mxu1  ;;  %v4828_v17 = vmul.f32 %v4755_v12, %v4755_v12  ;;  %v3565_v20 = vadd.f32 %v8891_v23, %v3203_v52 }
 0x218   : > { %v4826_v4 = vmul.f32 %v4753_v57, %v4753_v57  ;;  %v4286_v51 = vadd.f32 %v4231_v26, %v3560_v62  ;;  %v4856_v3 = vadd.f32 %v4855_v50, %v4825_v19  ;;  %v4785_v27 = vadd.f32 %v4784_v2, %v4753_v57  ;;  %v8893_v2 = vld [vmem:[#allocation20_spill] sm:$0xff] }
 0x219   : > { %v4704_v59 = vpop.f32.mrf.mxu0  ;;  %v5930_v49 = vpop.f32.mrf.mxu1  ;;  %v4758_v5 = vadd.f32 %v5963_v47, %v4288_v6 }
 0x21a   : > { %v4786_v48 = vadd.f32 %v4785_v27, %v4754_v42  ;;  %v4857_v55 = vadd.f32 %v4856_v3, %v4826_v4  ;;  %v4756_v41 = vadd.f32 %v4701_v8, %v4286_v51  ;;  %v4289_v40 = vadd.f32 %v5930_v49, %v8887_v36 }
 0x21b   : > { %v5967_v30 = vpop.f32.mrf.mxu0  ;;  %v4234_v0 = vpop.f32.mrf.mxu1  ;;  %v4831_v32 = vmul.f32 %v4758_v5, %v4758_v5 }
 0x21c   : > { %v4287_v1 = vadd.f32 %v4234_v0, %v3561_v16  ;;  %v4858_v54 = vadd.f32 %v4857_v55, %v4827_v38  ;;  %v4787_v13 = vadd.f32 %v4786_v48, %v4755_v12  ;;  %v4829_v24 = vmul.f32 %v4756_v41, %v4756_v41 }
 0x21d   : > { %v5933_v45 = vpop.f32.mrf.mxu1  ;;  %v4717_v25 = vpop.f32.mrf.mxu0  ;;  %v4759_v33 = vadd.f32 %v5964_v56, %v4289_v40 }
 0x21e   : > { %v4757_v31 = vadd.f32 %v4704_v59, %v4287_v1  ;;  %v4788_v11 = vadd.f32 %v4787_v13, %v4756_v41  ;;  %v4859_v61 = vadd.f32 %v4858_v54, %v4828_v17  ;;  %v4292_v62 = vadd.f32 %v5933_v45, %v8892_v63  ;;  %v4764_v13 = vld [vmem:[%s8474_s17] sm:$0x1] }
 0x21f   : > { %v4247_v46 = vpop.f32.mrf.mxu1  ;;  %v5968_v9 = vpop.f32.mrf.mxu0  ;;  %v4832_v58 = vmul.f32 %v4759_v33, %v4759_v33  ;;  %v4804_v45 = vld [vmem:[%s8480_s20] sm:$0x1] }
 0x220   : > { %v4830_v28 = vmul.f32 %v4757_v31, %v4757_v31  ;;  %v4290_v44 = vadd.f32 %v4247_v46, %v3564_v60  ;;  %v4860_v7 = vadd.f32 %v4859_v61, %v4829_v24  ;;  %v4789_v43 = vadd.f32 %v4788_v11, %v4757_v31 }
 0x221   : > { %v5934_v8 = vpop.f32.mrf.mxu1  ;;  %v4720_v50 = vpop.f32.mrf.mxu0  ;;  %v4762_v26 = vadd.f32 %v5967_v30, %v4292_v62 }
 0x222   : > { %v4790_v34 = vadd.f32 %v4789_v43, %v4758_v5  ;;  %v4861_v53 = vadd.f32 %v4860_v7, %v4830_v28  ;;  %v4760_v47 = vadd.f32 %v4717_v25, %v4290_v44  ;;  %v4293_v19 = vadd.f32 %v5934_v8, %v8893_v2 }
 0x223   : > { %v4250_v10 = vpop.f32.mrf.mxu1  ;;  %v4835_v37 = vmul.f32 %v4762_v26, %v4762_v26 }
 0x224   : > { %v4291_v21 = vadd.f32 %v4250_v10, %v3565_v20  ;;  %v4862_v57 = vadd.f32 %v4861_v53, %v4831_v32  ;;  %v4791_v42 = vadd.f32 %v4790_v34, %v4759_v33  ;;  %v4833_v51 = vmul.f32 %v4760_v47, %v4760_v47 }
 0x225   : > { %v4763_v27 = vadd.f32 %v5968_v9, %v4293_v19 }
 0x226   : > { %v4761_v56 = vadd.f32 %v4720_v50, %v4291_v21  ;;  %v4792_v4 = vadd.f32 %v4791_v42, %v4760_v47  ;;  %v4863_v59 = vadd.f32 %v4862_v57, %v4832_v58 }
 0x227   : > { %v4836_v14 = vmul.f32 %v4763_v27, %v4763_v27 }
 0x228   : > { %v4834_v3 = vmul.f32 %v4761_v56, %v4761_v56  ;;  %v4864_v12 = vadd.f32 %v4863_v59, %v4833_v51  ;;  %v4793_v49 = vadd.f32 %v4792_v4, %v4761_v56 }
 0x22a   : > { %v4794_v16 = vadd.f32 %v4793_v49, %v4762_v26  ;;  %v4865_v22 = vadd.f32 %v4864_v12, %v4834_v3 }
 0x22c   : > { %v4795_v29 = vadd.f32 %v4794_v16, %v4763_v27  ;;  %v4866_v35 = vadd.f32 %v4865_v22, %v4835_v37 }
 0x22e   : > { %v4796_v6 = vrot.slane %v4795_v29, 4  ;;  %v4867_v38 = vadd.f32 %v4866_v35, %v4836_v14 }
 0x230   : > { %v4797_v48 = vadd.f32 %v4796_v6, %v4795_v29  ;;  %v4868_v30 = vrot.slane %v4867_v38, 4 }
 0x232   : > { %v4798_v55 = vrot.slane %v4797_v48, 2  ;;  %v4869_v41 = vadd.f32 %v4868_v30, %v4867_v38 }
 0x234   : > { %v4799_v0 = vadd.f32 %v4798_v55, %v4797_v48  ;;  %v4870_v1 = vrot.slane %v4869_v41, 2 }
 0x236   : > { %v4800_v17 = vrot.slane %v4799_v0, 1  ;;  %v4871_v54 = vadd.f32 %v4870_v1, %v4869_v41 }
 0x238   : > { %v4801_v36 = vadd.f32 %v4800_v17, %v4799_v0  ;;  %v4872_v40 = vrot.slane %v4871_v54, 1 }
 0x23a   : > { %v4802_v25 = vadd.f32 %v4801_v36, %v4764_v13  ;;  %v4873_v15 = vadd.f32 %v4872_v40, %v4871_v54 }
 0x23c   : > { %4803 = vst [vmem:[%s8474_s17] sm:$0x1] %v4802_v25  ;;  %v4874_v60 = vadd.f32 %v4873_v15, %v4804_v45 }
 0x23e   : > { %4875 = vst [vmem:[%s8480_s20] sm:$0x1] %v4874_v60 }
 0x23f PF: > { %s14_s14 = sadd.s32 1, %s6079_s14   ;;  %s8894_s12 = smov %s6075_s13 }
 0x240   : > { %p11_p5 = scmp.ge.s32.totalorder %s14_s14, 4   ;;  %s8895_s13 = smov %s8897_s15 }
 0x242   :  { %13 = sbr.rel (!%p11_p5) target bundleno = 2 (0x2), region = 85 }

// kernel: cnnblock_forward.3
= control target key start
LH: loop header
LB: loop body
LE: loop exit
PB: predicated region body
PF: predicated region fallthrough
CT: control target
= control target key end

     0   :  { %s6232_s15 = smov 0   ;;  %s6234_s16 = smov 0   ;;  %s8963_s0 = inlined_call_operand.vmem [shape: bf16[2,18,18,8], index: 0, kind: input, shape index: {}]   ;;  %s8964_s1 = inlined_call_operand.vmem [shape: bf16[9,8,128], index: 1, kind: input, shape index: {}]   ;;  %s8965_s2 = inlined_call_operand.vmem [shape: f32[1,128], index: 2, kind: input, shape index: {}]   ;;  %s8966_s3 = inlined_call_operand.vmem [shape: f32[1,128], index: 3, kind: input, shape index: {}]   ;;  %s8967_s4 = inlined_call_operand.vmem [shape: f32[2,256,128], index: 4, kind: output, shape index: {}]  }
   0x1   :  { %s6236_s17 = smov 0  }
   0x2 LB: > { %s26_s18 = sadd.s32 1, %s6201_s16  ;;  %p5092_p0 = scmp.ge.s32.totalorder %s6205_s17, 1  ;;  %s6205_s17 = sphi %s6236_s17, %s14_s17   ;;  %s6201_s16 = sphi %s6234_s16, %s9239_s16   ;;  %s6197_s15 = sphi %s6232_s15, %s9238_s15  }
   0x3   : > { %p28_p1 = scmp.ge.s32.totalorder %s26_s18, 2  ;;  %p176_p2 = scmp.lt.s32.totalorder %s6205_s17, 3 }
   0x5   : > { %s9241_s18 = smov (%p28_p1, %s26_s18), 0  ;;  %p177_p3 = pnand %p5092_p0, %p176_p2 }
   0x7   : > { %180 = sbr.rel (%p177_p3) target bundleno = 560 (0x230), region = 36 }
   0xc   : > { %v5096_v0 = vld [vmem:[%s8964_s1 + $0x4] sm:$0xf]  ;;  %vm761_vm0 = vcmask 1043456   ;;  %p206_p4 = scmp.lt.s32.totalorder %s6197_s15, 1  ;;  %v258_v2 = vld [vmem:[%s8964_s1] sm:$0xf] }
   0xd   : > { %6099 = vmatprep.subr.msk.bf16.mxu1 %vm761_vm0, %v5096_v0  ;;  %6098 = vmatprep.subr.msk.bf16.mxu0 %vm761_vm0, %v5096_v0  ;;  %v763_v1 = vsel %vm761_vm0, %v5096_v0, 0  ;;  %v5177_v3 = vld [vmem:[%s8964_s1 + $0x8] sm:$0xf]  ;;  %vm275_vm1 = vsmask.f32 3328  ;;  %v6273_v4 = vsel %vm761_vm0, %v258_v2, 0 }
   0xe   : > { %6097 = vmatpush3.bf16.msra.mxu1 %v763_v1  ;;  %5791 = vmatpush3.bf16.msra.mxu0 %v763_v1  ;;  %s9243_s15 = smov (!%p206_p4, %s6197_s15), 1  ;;  %vm276_vm2 = vsmask.f32 7440  ;;  %vm712_vm3 = vcmask 64512   ;;  %v6299_v16 = vsel %vm761_vm0, %v5177_v3, 0  ;;  %vm1266_vm5 = vcmask 1042432  }
   0xf   : > { %6100 = vmatprep.subr.msk.bf16.mxu1 %vm761_vm0, %v258_v2  ;;  %6101 = vmatprep.subr.msk.bf16.mxu0 %vm761_vm0, %v5177_v3  ;;  %s6108_s25 = smul.u32 216, %s9243_s15  ;;  %vm6314_vm4 = vmor %vm275_vm1, %vm276_vm2  ;;  %vm1267_vm6 = vcmask 1046532   ;;  %s5636_s23 = sshll.u32 %s9243_s15, 8 }
  0x10   : > { %vm6600_vm7 = vmor %vm1266_vm5, %vm1267_vm6 }
  0x11   : > { %s6270_s28 = scalar_lea.vmem %s8963_s0, %s6108_s25  ;;  %s8779_s25 = scalar_lea.vmem %s8967_s4, %s5636_s23 }
  0x12   : > { %v6276_v5 = vld [vmem:[%s6270_s28] sm:$0xf]  ;;  %v6279_v6 = vld [vmem:[%s6270_s28 + $0x4] sm:$0xf]  ;;  %v6282_v7 = vld [vmem:[%s6270_s28 + $0x8] sm:$0x1] }
  0x13   : > { %v279_v8 = vshrl.u32 %v6276_v5, 16  ;;  %v282_v9 = vshll.u32 %v6276_v5, 16  ;;  %v288_v10 = vshll.u32 %v6279_v6, 16  ;;  %v292_v11 = vshrl.u32 %v6279_v6, 16  ;;  %v6289_v12 = vld [vmem:[%s6270_s28 + $0x60] sm:$0xf] }
  0x14   : > { %v298_v13 = vshll.u32 %v6282_v7, 16  ;;  %v6293_v14 = vld [vmem:[%s6270_s28 + $0x64] sm:$0xf]  ;;  %v6296_v15 = vld [vmem:[%s6270_s28 + $0x68] sm:$0x1]  ;;  %v471_v22 = vshrl.u32 %v6289_v12, 16 }
  0x15   : > { %v281_v17 = vrot.slane %v279_v8, 4  ;;  %v284_v18 = vrot.slane %v282_v9, 5  ;;  %v290_v19 = vrot.slane %v288_v10, 5  ;;  %v294_v20 = vrot.slane %v292_v11, 4  ;;  %v6307_v29 = vld [vmem:[%s6270_s28 + $0xc] sm:$0xf] }
  0x16   : > { %v300_v21 = vrot.slane %v298_v13, 5  ;;  %v474_v23 = vshll.u32 %v6289_v12, 16  ;;  %v480_v24 = vshll.u32 %v6293_v14, 16  ;;  %v484_v27 = vshrl.u32 %v6293_v14, 16  ;;  %v6310_v30 = vld [vmem:[%s6270_s28 + $0x10] sm:$0xf] }
  0x17   : > { %v285_v25 = vor.u32 %v284_v18, %v281_v17  ;;  %v295_v26 = vor.u32 %v294_v20, %v290_v19  ;;  %v490_v28 = vshll.u32 %v6296_v15, 16  ;;  %v473_v33 = vrot.slane %v471_v22, 4  ;;  %v6320_v41 = vld [vmem:[%s6270_s28 + $0x14] sm:$0x1]  ;;  %v6331_v53 = vld [vmem:[%s6270_s28 + $0x6c] sm:$0xf] }
  0x18   : > { %v476_v34 = vrot.slane %v474_v23, 5  ;;  %v482_v35 = vrot.slane %v480_v24, 5  ;;  %v486_v38 = vrot.slane %v484_v27, 4  ;;  %v303_v42 = vshrl.u32 %v6307_v29, 16  ;;  %v6335_v58 = vld [vmem:[%s6270_s28 + $0x70] sm:$0xf] }
  0x19   : > { %v286_v36 = vrot.slane %v285_v25, 4  ;;  %v296_v37 = vrot.slane %v295_v26, 4  ;;  %v492_v39 = vrot.slane %v490_v28, 5  ;;  %v306_v43 = vshll.u32 %v6307_v29, 16  ;;  %v6343_v63 = vld [vmem:[%s6270_s28 + $0x74] sm:$0x1] }
  0x1a   : > { %v477_v40 = vor.u32 %v476_v34, %v473_v33  ;;  %v312_v44 = vshll.u32 %v6310_v30, 16  ;;  %v487_v47 = vor.u32 %v486_v38, %v482_v35  ;;  %v316_v48 = vshrl.u32 %v6310_v30, 16  ;;  %v6349_v8 = vld [vmem:[%s6270_s28 + $0x18] sm:$0xf]  ;;  %v6362_v25 = vld [vmem:[%s6270_s28 + $0x20] sm:$0x1] }
  0x1b   : > { %v291_v45 = vsel %vm6314_vm4, %v286_v36, %v290_v19  ;;  %v301_v46 = vsel %vm6314_vm4, %v296_v37, %v300_v21  ;;  %v305_v51 = vrot.slane %v303_v42, 4  ;;  %v308_v52 = vrot.slane %v306_v43, 5  ;;  %v6356_v21 = vld [vmem:[%s6270_s28 + $0x1c] sm:$0xf] }
  0x1c   : > { %v5097_v49 = vcombine.low %v291_v45, %v301_v46  ;;  %v478_v50 = vrot.slane %v477_v40, 4  ;;  %v488_v54 = vrot.slane %v487_v47, 4  ;;  %v314_v55 = vrot.slane %v312_v44, 5  ;;  %v6375_v40 = vld [vmem:[%s8964_s1 + $0x10] sm:$0xf] }
  0x1d   : > { %v318_v56 = vrot.slane %v316_v48, 4  ;;  %v322_v57 = vshll.u32 %v6320_v41, 16  ;;  %v309_v60 = vor.u32 %v308_v52, %v305_v51  ;;  %v495_v3 = vshrl.u32 %v6331_v53, 16  ;;  %v6380_v46 = vld [vmem:[%s6270_s28 + $0x7c] sm:$0xf] }
  0x1e   : > { %5792 = vmatprep.mubr.msk.bf16.mxu0 %vm712_vm3, %v5097_v49  ;;  %v483_v59 = vsel %vm6314_vm4, %v478_v50, %v482_v35  ;;  %v493_v0 = vsel %vm6314_vm4, %v488_v54, %v492_v39  ;;  %v498_v11 = vshll.u32 %v6331_v53, 16  ;;  %v504_v13 = vshll.u32 %v6335_v58, 16  ;;  %v6369_v35 = vld [vmem:[%s6270_s28 + $0x78] sm:$0xf] }
  0x1f   : > { %v319_v1 = vor.u32 %v318_v56, %v314_v55  ;;  %v324_v2 = vrot.slane %v322_v57, 5  ;;  %v5105_v9 = vcombine.low %v483_v59, %v493_v0  ;;  %v310_v10 = vrot.slane %v309_v60, 4  ;;  %v6387_v56 = vld [vmem:[%s6270_s28 + $0x80] sm:$0x1] }
  0x20   : > { %v497_v18 = vrot.slane %v495_v3, 4  ;;  %v508_v19 = vshrl.u32 %v6335_v58, 16  ;;  %v514_v20 = vshll.u32 %v6343_v63, 16  ;;  %v500_v23 = vrot.slane %v498_v11, 5  ;;  %9003 = vst [vmem:[#allocation2_spill] sm:$0xff] %v6387_v56 }
  0x21   : > { %v320_v17 = vrot.slane %v319_v1, 4  ;;  %5808 = vmatprep.mubr.msk.bf16.mxu1 %vm712_vm3, %v5105_v9  ;;  %v315_v22 = vsel %vm6314_vm4, %v310_v10, %v314_v55  ;;  %v506_v24 = vrot.slane %v504_v13, 5  ;;  %v327_v26 = vshrl.u32 %v6349_v8, 16  ;;  %v6393_v1 = vld [vmem:[%s6270_s28 + $0x24] sm:$0xf] }
  0x22   : > { %v510_v28 = vrot.slane %v508_v19, 4  ;;  %v516_v33 = vrot.slane %v514_v20, 5  ;;  %v330_v34 = vshll.u32 %v6349_v8, 16  ;;  %v501_v37 = vor.u32 %v500_v23, %v497_v18  ;;  %v6401_v10 = vld [vmem:[%s6270_s28 + $0x28] sm:$0xf] }
  0x23   : > { %v325_v27 = vsel %vm6314_vm4, %v320_v17, %v324_v2  ;;  %v329_v38 = vrot.slane %v327_v26, 4  ;;  %v336_v39 = vshll.u32 %v6356_v21, 16  ;;  %v340_v44 = vshrl.u32 %v6356_v21, 16  ;;  %v6407_v19 = vld [vmem:[%s8964_s1 + $0xc] sm:$0xf] }
  0x24   : > { %v5098_v36 = vcombine.low %v315_v22, %v325_v27  ;;  %v511_v42 = vor.u32 %v510_v28, %v506_v24  ;;  %v332_v43 = vrot.slane %v330_v34, 5  ;;  %v346_v45 = vshll.u32 %v6362_v25, 16 }
  0x25   : > { %v502_v47 = vrot.slane %v501_v37, 4  ;;  %v338_v48 = vrot.slane %v336_v39, 5  ;;  %v519_v49 = vshrl.u32 %v6369_v35, 16  ;;  %v522_v50 = vshll.u32 %v6369_v35, 16 }
  0x26   : > { %5793 = vmatmul.mubr.msk.bf16.vlgmr.msra.gmra.mxu0 %vm712_vm3, %v5098_v36  ;;  %v512_v51 = vrot.slane %v511_v42, 4  ;;  %v333_v52 = vor.u32 %v332_v43, %v329_v38  ;;  %v342_v54 = vrot.slane %v340_v44, 4  ;;  %v348_v55 = vrot.slane %v346_v45, 5  ;;  %v6419_v36 = vld [vmem:[%s6270_s28 + $0x84] sm:$0xf] }
  0x27   : > { %5859 = vmatpush3.bf16.msra.mxu0 %v6299_v16  ;;  %v507_v57 = vsel %vm6314_vm4, %v502_v47, %v506_v24  ;;  %v521_v59 = vrot.slane %v519_v49, 4  ;;  %v524_v60 = vrot.slane %v522_v50, 5  ;;  %v528_v0 = vshll.u32 %v6380_v46, 16  ;;  %v6412_v24 = vld [vmem:[%s6270_s28 + $0x2c] sm:$0x1] }
  0x28   : > { %6103 = vmatprep.subr.msk.bf16.mxu0 %vm761_vm0, %v6375_v40  ;;  %v517_v16 = vsel %vm6314_vm4, %v512_v51, %v516_v33  ;;  %v334_v2 = vrot.slane %v333_v52, 4  ;;  %v343_v3 = vor.u32 %v342_v54, %v338_v48  ;;  %v532_v9 = vshrl.u32 %v6380_v46, 16  ;;  %v6426_v43 = vld [vmem:[%s6270_s28 + $0x88] sm:$0xf]  ;;  %v6434_v51 = vld [vmem:[%s6270_s28 + $0x8c] sm:$0x1] }
  0x29   : > { %v5106_v11 = vcombine.low %v507_v57, %v517_v16  ;;  %v525_v13 = vor.u32 %v524_v60, %v521_v59  ;;  %v530_v17 = vrot.slane %v528_v0, 5  ;;  %v538_v18 = vshll.u32 %v6387_v56, 16  ;;  %9004 = vst [vmem:[#allocation3_spill] sm:$0xff] %v6434_v51  ;;  %v6442_v60 = vld [vmem:[%s6270_s28 + $0x30] sm:$0xf] }
  0x2a   : > { %v339_v20 = vsel %vm6314_vm4, %v334_v2, %v338_v48  ;;  %v344_v22 = vrot.slane %v343_v3, 4  ;;  %v534_v23 = vrot.slane %v532_v9, 4  ;;  %v351_v26 = vshrl.u32 %v6393_v1, 16  ;;  %v6447_v9 = vld [vmem:[%s6270_s28 + $0x34] sm:$0xf] }
  0x2b   : > { %5809 = vmatmul.mubr.msk.bf16.vlgmr.msra.gmra.mxu1 %vm712_vm3, %v5106_v11  ;;  %v526_v27 = vrot.slane %v525_v13, 4  ;;  %v540_v28 = vrot.slane %v538_v18, 5  ;;  %v354_v33 = vshll.u32 %v6393_v1, 16  ;;  %v360_v34 = vshll.u32 %v6401_v10, 16 }
  0x2c   : > { %5825 = vmatpush3.bf16.msra.mxu1 %v6273_v4  ;;  %v349_v37 = vsel %vm6314_vm4, %v344_v22, %v348_v55  ;;  %v535_v38 = vor.u32 %v534_v23, %v530_v17  ;;  %v353_v39 = vrot.slane %v351_v26, 4  ;;  %v364_v42 = vshrl.u32 %v6401_v10, 16 }
  0x2d   : > { %v5099_v44 = vcombine.low %v339_v20, %v349_v37  ;;  %v531_v45 = vsel %vm6314_vm4, %v526_v27, %v530_v17  ;;  %v356_v47 = vrot.slane %v354_v33, 5  ;;  %v362_v48 = vrot.slane %v360_v34, 5  ;;  %6102 = vmatprep.subr.msk.bf16.mxu1 %vm761_vm0, %v6407_v19  ;;  %v6455_v33 = vld [vmem:[%s6270_s28 + $0x38] sm:$0x1] }
  0x2e   : > { %v536_v4 = vrot.slane %v535_v38, 4  ;;  %v366_v49 = vrot.slane %v364_v42, 4  ;;  %v370_v50 = vshll.u32 %v6412_v24, 16  ;;  %v543_v52 = vshrl.u32 %v6419_v36, 16  ;;  %v6460_v38 = vld [vmem:[%s6270_s28 + $0x90] sm:$0xf] }
  0x2f   : > { %5796 = vmatprep.mubr.msk.bf16.mxu0 %vm712_vm3, %v5099_v44  ;;  %v357_v54 = vor.u32 %v356_v47, %v353_v39  ;;  %v546_v55 = vshll.u32 %v6419_v36, 16  ;;  %v552_v57 = vshll.u32 %v6426_v43, 16  ;;  %v556_v59 = vshrl.u32 %v6426_v43, 16  ;;  %9005 = vst [vmem:[#allocation4_spill] sm:$0xff] %v6460_v38  ;;  %v6465_v47 = vld [vmem:[%s6270_s28 + $0x94] sm:$0xf] }
  0x30   : > { %v541_v0 = vsel %vm6314_vm4, %v536_v4, %v540_v28  ;;  %v367_v16 = vor.u32 %v366_v49, %v362_v48  ;;  %v372_v2 = vrot.slane %v370_v50, 5  ;;  %v545_v3 = vrot.slane %v543_v52, 4  ;;  %9006 = vst [vmem:[#allocation5_spill] sm:$0xff] %v6465_v47 }
  0x31   : > { %v5107_v11 = vcombine.low %v531_v45, %v541_v0  ;;  %v358_v13 = vrot.slane %v357_v54, 4  ;;  %v548_v17 = vrot.slane %v546_v55, 5  ;;  %v554_v18 = vrot.slane %v552_v57, 5 }
  0x32   : > { %v368_v20 = vrot.slane %v367_v16, 4  ;;  %v558_v22 = vrot.slane %v556_v59, 4  ;;  %v562_v23 = vshll.u32 %v6434_v51, 16  ;;  %v375_v26 = vshrl.u32 %v6442_v60, 16  ;;  %v6474_v16 = vld [vmem:[%s6270_s28 + $0x98] sm:$0x1] }
  0x33   : > { %5812 = vmatprep.mubr.msk.bf16.mxu1 %vm712_vm3, %v5107_v11  ;;  %v363_v27 = vsel %vm6314_vm4, %v358_v13, %v362_v48  ;;  %v549_v28 = vor.u32 %v548_v17, %v545_v3  ;;  %v378_v34 = vshll.u32 %v6442_v60, 16  ;;  %v384_v37 = vshll.u32 %v6447_v9, 16  ;;  %9007 = vst [vmem:[#allocation6_spill] sm:$0xff] %v6474_v16  ;;  %v6479_v11 = vld [vmem:[%s6270_s28 + $0x3c] sm:$0xf] }
  0x34   : > { %v373_v39 = vsel %vm6314_vm4, %v368_v20, %v372_v2  ;;  %v559_v42 = vor.u32 %v558_v22, %v554_v18  ;;  %v564_v44 = vrot.slane %v562_v23, 5  ;;  %v377_v45 = vrot.slane %v375_v26, 4  ;;  %v6484_v23 = vld [vmem:[%s6270_s28 + $0x40] sm:$0xf]  ;;  %v1219_v51 = vld [vmem:[%s6270_s28 + $0xc] sm:$0xe] }
  0x35   : > { %v5100_v48 = vcombine.low %v363_v27, %v373_v39  ;;  %v550_v4 = vrot.slane %v549_v28, 4  ;;  %v380_v49 = vrot.slane %v378_v34, 5  ;;  %v386_v50 = vrot.slane %v384_v37, 5 }
  0x36   : > { %v560_v52 = vrot.slane %v559_v42, 4  ;;  %v388_v54 = vshrl.u32 %v6447_v9, 16  ;;  %v394_v55 = vshll.u32 %v6455_v33, 16  ;;  %v567_v57 = vshrl.u32 %v6460_v38, 16 }
  0x37   : > { %5797 = vmatmul.mubr.msk.bf16.gmra.mxu0 %vm712_vm3, %v5100_v48  ;;  %v555_v59 = vsel %vm6314_vm4, %v550_v4, %v554_v18  ;;  %v381_v0 = vor.u32 %v380_v49, %v377_v45  ;;  %v570_v2 = vshll.u32 %v6460_v38, 16  ;;  %v576_v3 = vshll.u32 %v6465_v47, 16  ;;  %v6493_v48 = vld [vmem:[%s6270_s28 + $0x44] sm:$0x1] }
  0x38   : > { %v565_v13 = vsel %vm6314_vm4, %v560_v52, %v564_v44  ;;  %v390_v17 = vrot.slane %v388_v54, 4  ;;  %v396_v20 = vrot.slane %v394_v55, 5  ;;  %v569_v22 = vrot.slane %v567_v57, 4  ;;  %v6498_v52 = vld [vmem:[%s6270_s28 + $0x9c] sm:$0xf] }
  0x39   : > { %v5108_v18 = vcombine.low %v555_v59, %v565_v13  ;;  %v382_v26 = vrot.slane %v381_v0, 4  ;;  %v572_v27 = vrot.slane %v570_v2, 5  ;;  %v578_v28 = vrot.slane %v576_v3, 5  ;;  %9008 = vst [vmem:[#allocation7_spill] sm:$0xff] %v6498_v52  ;;  %v6502_v13 = vld [vmem:[%s6270_s28 + $0xa0] sm:$0xf] }
  0x3a   : > { %v391_v34 = vor.u32 %v390_v17, %v386_v50  ;;  %v580_v37 = vshrl.u32 %v6465_v47, 16  ;;  %v586_v39 = vshll.u32 %v6474_v16, 16  ;;  %v399_v42 = vshrl.u32 %v6479_v11, 16  ;;  %9009 = vst [vmem:[#allocation8_spill] sm:$0xff] %v6502_v13 }
  0x3b   : > { %5813 = vmatmul.mubr.msk.bf16.gmra.mxu1 %vm712_vm3, %v5108_v18  ;;  %v387_v44 = vsel %vm6314_vm4, %v382_v26, %v386_v50  ;;  %v573_v45 = vor.u32 %v572_v27, %v569_v22  ;;  %v402_v4 = vshll.u32 %v6479_v11, 16  ;;  %v408_v49 = vshll.u32 %v6484_v23, 16  ;;  %v6508_v26 = vld [vmem:[%s6270_s28 + $0xa4] sm:$0x1] }
  0x3c   : > { %v392_v54 = vrot.slane %v391_v34, 4  ;;  %v582_v55 = vrot.slane %v580_v37, 4  ;;  %v588_v57 = vrot.slane %v586_v39, 5  ;;  %v401_v59 = vrot.slane %v399_v42, 4  ;;  %9010 = vst [vmem:[#allocation9_spill] sm:$0xff] %v6508_v26 }
  0x3d   : > { %v574_v0 = vrot.slane %v573_v45, 4  ;;  %v404_v2 = vrot.slane %v402_v4, 5  ;;  %v410_v3 = vrot.slane %v408_v49, 5  ;;  %v412_v50 = vshrl.u32 %v6484_v23, 16  ;;  %v6512_v34 = vld [vmem:[%s6270_s28 + $0x48] sm:$0xf] }
  0x3e   : > { %v397_v17 = vsel %vm6314_vm4, %v392_v54, %v396_v20  ;;  %v583_v22 = vor.u32 %v582_v55, %v578_v28  ;;  %v418_v18 = vshll.u32 %v6493_v48, 16  ;;  %v591_v27 = vshrl.u32 %v6498_v52, 16 }
  0x3f   : > { %v5101_v37 = vcombine.low %v387_v44, %v397_v17  ;;  %v579_v39 = vsel %vm6314_vm4, %v574_v0, %v578_v28  ;;  %v405_v42 = vor.u32 %v404_v2, %v401_v59  ;;  %v414_v45 = vrot.slane %v412_v50, 4  ;;  %v6521_v17 = vld [vmem:[%s6270_s28 + $0x4c] sm:$0xf]  ;;  %v6527_v2 = vld [vmem:[%s6270_s28 + $0x50] sm:$0x1] }
  0x40   : > { %v584_v4 = vrot.slane %v583_v22, 4  ;;  %v420_v49 = vrot.slane %v418_v18, 5  ;;  %v593_v20 = vrot.slane %v591_v27, 4  ;;  %v594_v54 = vshll.u32 %v6498_v52, 16 }
  0x41   : > { %5800 = vmatprep.mubr.msk.bf16.mxu0 %vm712_vm3, %v5101_v37  ;;  %v406_v55 = vrot.slane %v405_v42, 4  ;;  %v415_v62 = vor.u32 %v414_v45, %v410_v3  ;;  %v600_v32 = vshll.u32 %v6502_v13, 16  ;;  %v604_v44 = vshrl.u32 %v6502_v13, 16  ;;  %v6533_v42 = vld [vmem:[%s6270_s28 + $0xa8] sm:$0xf] }
  0x42   : > { %v589_v28 = vsel %vm6314_vm4, %v584_v4, %v588_v57  ;;  %v596_v59 = vrot.slane %v594_v54, 5  ;;  %v610_v0 = vshll.u32 %v6508_v26, 16  ;;  %v423_v50 = vshrl.u32 %v6512_v34, 16  ;;  %9011 = vst [vmem:[#allocation10_spill] sm:$0xff] %v6533_v42 }
  0x43   : > { %v5109_v22 = vcombine.low %v579_v39, %v589_v28  ;;  %v411_v18 = vsel %vm6314_vm4, %v406_v55, %v410_v3  ;;  %v416_v27 = vrot.slane %v415_v62, 4  ;;  %v602_v37 = vrot.slane %v600_v32, 5 }
  0x44   : > { %v597_v45 = vor.u32 %v596_v59, %v593_v20  ;;  %v606_v61 = vrot.slane %v604_v44, 4  ;;  %v612_v57 = vrot.slane %v610_v0, 5  ;;  %v425_v4 = vrot.slane %v423_v50, 4  ;;  %v6543_v44 = vld [vmem:[%s6270_s28 + $0xac] sm:$0xf] }
  0x45   : > { %5816 = vmatprep.mubr.msk.bf16.mxu1 %vm712_vm3, %v5109_v22  ;;  %v421_v54 = vsel %vm6314_vm4, %v416_v27, %v420_v49  ;;  %v426_v39 = vshll.u32 %v6512_v34, 16  ;;  %v432_v28 = vshll.u32 %v6521_v17, 16  ;;  %v436_v62 = vshrl.u32 %v6521_v17, 16  ;;  %9012 = vst [vmem:[#allocation11_spill] sm:$0xff] %v6543_v44  ;;  %v6546_v22 = vld [vmem:[%s6270_s28 + $0xb0] sm:$0x1] }
  0x46   : > { %v5102_v3 = vcombine.low %v411_v18, %v421_v54  ;;  %v598_v32 = vrot.slane %v597_v45, 4  ;;  %v607_v55 = vor.u32 %v606_v61, %v602_v37  ;;  %v442_v20 = vshll.u32 %v6527_v2, 16  ;;  %9013 = vst [vmem:[#allocation12_spill] sm:$0xff] %v6546_v22 }
  0x47   : > { %v428_v59 = vrot.slane %v426_v39, 5  ;;  %v434_v0 = vrot.slane %v432_v28, 5  ;;  %v438_v50 = vrot.slane %v436_v62, 4  ;;  %v615_v49 = vshrl.u32 %v6533_v42, 16  ;;  %v6555_v62 = vld [vmem:[%s6270_s28 + $0x54] sm:$0xf] }
  0x48   : > { %5801 = vmatmul.mubr.msk.bf16.gmra.mxu0 %vm712_vm3, %v5102_v3  ;;  %v603_v18 = vsel %vm6314_vm4, %v598_v32, %v602_v37  ;;  %v608_v27 = vrot.slane %v607_v55, 4  ;;  %v444_v61 = vrot.slane %v442_v20, 5  ;;  %v618_v45 = vshll.u32 %v6533_v42, 16  ;;  %v6562_v55 = vld [vmem:[%s6270_s28 + $0x58] sm:$0xf] }
  0x49   : > { %v429_v54 = vor.u32 %v428_v59, %v425_v4  ;;  %v439_v56 = vor.u32 %v438_v50, %v434_v0  ;;  %v617_v39 = vrot.slane %v615_v49, 4  ;;  %v624_v28 = vshll.u32 %v6543_v44, 16  ;;  %v6565_v49 = vld [vmem:[%s6270_s28 + $0x5c] sm:$0x1] }
  0x4a   : > { %v613_v3 = vsel %vm6314_vm4, %v608_v27, %v612_v57  ;;  %v620_v26 = vrot.slane %v618_v45, 5  ;;  %v628_v37 = vshrl.u32 %v6543_v44, 16  ;;  %v634_v32 = vshll.u32 %v6546_v22, 16  ;;  %v1218_v22 = vld [vmem:[%s6270_s28] sm:$0xe] }
  0x4b   : > { %v5110_v4 = vcombine.low %v603_v18, %v613_v3  ;;  %v430_v20 = vrot.slane %v429_v54, 4  ;;  %v440_v59 = vrot.slane %v439_v56, 4  ;;  %v626_v50 = vrot.slane %v624_v28, 5  ;;  %v6576_v54 = vld [vmem:[%s6270_s28 + $0xb4] sm:$0xf] }
  0x4c   : > { %v621_v42 = vor.u32 %v620_v26, %v617_v39  ;;  %v630_v52 = vrot.slane %v628_v37, 4  ;;  %v636_v13 = vrot.slane %v634_v32, 5  ;;  %v447_v57 = vshrl.u32 %v6555_v62, 16  ;;  %9014 = vst [vmem:[#allocation13_spill] sm:$0xff] %v6576_v54  ;;  %v6579_v37 = vld [vmem:[%s6270_s28 + $0xb8] sm:$0xf] }
  0x4d   : > { %5817 = vmatmul.mubr.msk.bf16.gmra.mxu1 %vm712_vm3, %v5110_v4  ;;  %v435_v27 = vsel %vm6314_vm4, %v430_v20, %v434_v0  ;;  %v445_v18 = vsel %vm6314_vm4, %v440_v59, %v444_v61  ;;  %v450_v56 = vshll.u32 %v6555_v62, 16  ;;  %v456_v45 = vshll.u32 %v6562_v55, 16  ;;  %v6584_v61 = vld [vmem:[%s6270_s28 + $0xbc] sm:$0x1] }
  0x4e   : > { %v5103_v26 = vcombine.low %v435_v27, %v445_v18  ;;  %v622_v39 = vrot.slane %v621_v42, 4  ;;  %v631_v28 = vor.u32 %v630_v52, %v626_v50  ;;  %v449_v3 = vrot.slane %v447_v57, 4 }
  0x4f   : > { %v452_v32 = vrot.slane %v450_v56, 5  ;;  %v458_v4 = vrot.slane %v456_v45, 5  ;;  %v460_v0 = vshrl.u32 %v6562_v55, 16  ;;  %v466_v20 = vshll.u32 %v6565_v49, 16 }
  0x50   : > { %5804 = vmatprep.mubr.msk.bf16.mxu0 %vm712_vm3, %v5103_v26  ;;  %v627_v59 = vsel %vm6314_vm4, %v622_v39, %v626_v50  ;;  %v632_v27 = vrot.slane %v631_v28, 4  ;;  %v639_v52 = vshrl.u32 %v6576_v54, 16  ;;  %v642_v42 = vshll.u32 %v6576_v54, 16 }
  0x51   : > { %v453_v57 = vor.u32 %v452_v32, %v449_v3  ;;  %v462_v18 = vrot.slane %v460_v0, 4  ;;  %v468_v56 = vrot.slane %v466_v20, 5  ;;  %v648_v45 = vshll.u32 %v6579_v37, 16 }
  0x52   : > { %v637_v44 = vsel %vm6314_vm4, %v632_v27, %v636_v13  ;;  %v641_v16 = vrot.slane %v639_v52, 4  ;;  %v644_v26 = vrot.slane %v642_v42, 5  ;;  %v652_v38 = vshrl.u32 %v6579_v37, 16 }
  0x53   : > { %v5111_v50 = vcombine.low %v627_v59, %v637_v44  ;;  %v454_v39 = vrot.slane %v453_v57, 4  ;;  %v463_v28 = vor.u32 %v462_v18, %v458_v4  ;;  %v650_v47 = vrot.slane %v648_v45, 5  ;;  %v1220_v57 = vld [vmem:[%s6270_s28 + $0x18] sm:$0xe] }
  0x54   : > { %v645_v54 = vor.u32 %v644_v26, %v641_v16  ;;  %v654_v3 = vrot.slane %v652_v38, 4  ;;  %v658_v32 = vshll.u32 %v6584_v61, 16  ;;  %v5161_v13 = vrot.slane %v1218_v22, 9 }
  0x55   : > { %5820 = vmatprep.mubr.msk.bf16.mxu1 %vm712_vm3, %v5111_v50  ;;  %v459_v44 = vsel %vm6314_vm4, %v454_v39, %v458_v4  ;;  %v464_v20 = vrot.slane %v463_v28, 4  ;;  %v1271_v59 = vrot.slane %v6279_v6, 5  ;;  %v5130_v38 = vcombine.low %v6307_v29, %v6310_v30 }
  0x56   : > { %v646_v16 = vrot.slane %v645_v54, 4  ;;  %v655_v27 = vor.u32 %v654_v3, %v650_v47  ;;  %v660_v52 = vrot.slane %v658_v32, 5  ;;  %v5162_v42 = vrot.slane %v1219_v51, 9 }
  0x57   : > { %v469_v18 = vsel %vm6314_vm4, %v464_v20, %v468_v56  ;;  %v1272_v22 = vsel %vm6600_vm7, %v5161_v13, %v1271_v59  ;;  %v1273_v45 = vrot.slane %v1271_v59, 4  ;;  %v9017_v4 = vrot.slane %v6310_v30, 5 }
  0x58   : > { %v5104_v50 = vcombine.low %v459_v44, %v469_v18  ;;  %v651_v54 = vsel %vm6314_vm4, %v646_v16, %v650_v47  ;;  %v656_v39 = vrot.slane %v655_v27, 4  ;;  %v5129_v51 = vcombine.low %v6276_v5, %v6279_v6  ;;  %v1221_v27 = vld [vmem:[%s6270_s28 + $0x24] sm:$0xe] }
  0x59   : > { %v1280_v26 = vrot.slane %v9017_v4, 4  ;;  %v9018_v28 = vrot.slane %v6282_v7, 5  ;;  %v9019_v3 = vmov %v9017_v4  ;;  %v5131_v13 = vcombine.low %v6349_v8, %v6356_v21  ;;  %v1223_v4 = vld [vmem:[%s6270_s28 + $0x3c] sm:$0xe] }
  0x5a   : > { %v1279_v32 = vsel %vm6600_vm7, %v5162_v42, %v9019_v3  ;;  %v5163_v44 = vrot.slane %v1220_v57, 9  ;;  %5805 = vmatmul.mubr.msk.bf16.gmra.mxu0 %vm712_vm3, %v5104_v50  ;;  %v661_v47 = vsel %vm6314_vm4, %v656_v39, %v660_v52  ;;  %v9020_v6 = vrot.slane %v6320_v41, 5  ;;  %v1222_v42 = vld [vmem:[%s6270_s28 + $0x30] sm:$0xe]  ;;  %v1224_v39 = vld [vmem:[%s6270_s28 + $0x48] sm:$0xe] }
  0x5b   : > { %v1275_v56 = vsel %vm6600_vm7, %v1273_v45, %v9018_v28  ;;  %v1285_v20 = vrot.slane %v6356_v21, 5  ;;  %v5112_v59 = vcombine.low %v651_v54, %v661_v47  ;;  %v1288_v16 = vrot.slane %v6362_v25, 5  ;;  %v1225_v47 = vld [vmem:[%s6270_s28 + $0x54] sm:$0xe]  ;;  %v6895_v21 = vld [vmem:[%s6270_s28 + $0x2c] sm:$0x1] }
  0x5c   : > { %v5178_v5 = vcombine.low %v1272_v22, %v1275_v56  ;;  %v1282_v7 = vsel %vm6600_vm7, %v1280_v26, %v9020_v6  ;;  %v1842_v52 = vsel %vm761_vm0, %v6407_v19, 0  ;;  %v1292_v18 = vrot.slane %v6401_v10, 5 }
  0x5d   : > { %v1286_v41 = vsel %vm6600_vm7, %v5163_v44, %v1285_v20  ;;  %v1287_v57 = vrot.slane %v1285_v20, 4  ;;  %5821 = vmatmul.mubr.msk.bf16.gmra.mxu1 %vm712_vm3, %v5112_v59  ;;  %v5179_v22 = vcombine.low %v1279_v32, %v1282_v7  ;;  %v2568_v25 = vsel %vm761_vm0, %v6375_v40, 0 }
  0x5e   : > { %5860 = vmatprep.mubr.msk.bf16.mxu0 %vm712_vm3, %v5178_v5  ;;  %v1299_v45 = vrot.slane %v6447_v9, 5  ;;  %5826 = vmatprep.mubr.msk.bf16.mxu1 %vm712_vm3, %v5129_v51  ;;  %v5164_v26 = vrot.slane %v1221_v27, 9  ;;  %v1295_v50 = vrot.slane %v6412_v24, 5  ;;  %v5165_v54 = vrot.slane %v1222_v42, 9  ;;  %v6667_v24 = vld [vmem:[%s8964_s1 + $0x18] sm:$0xf] }
  0x5f   : > { %v1289_v19 = vsel %vm6600_vm7, %v1287_v57, %v1288_v16  ;;  %v1294_v56 = vrot.slane %v1292_v18, 4  ;;  %v1302_v32 = vrot.slane %v6455_v33, 5  ;;  %v5166_v44 = vrot.slane %v1223_v4, 9 }
  0x60   : > { %v5180_v28 = vcombine.low %v1286_v41, %v1289_v19  ;;  %v1301_v3 = vrot.slane %v1299_v45, 4  ;;  %v1306_v40 = vrot.slane %v6484_v23, 5  ;;  %v1330_v5 = vrot.slane %v6296_v15, 5 }
  0x61   : > { %v1309_v51 = vrot.slane %v6493_v48, 5  ;;  %v5167_v6 = vrot.slane %v1224_v39, 9  ;;  %v1313_v7 = vrot.slane %v6521_v17, 5  ;;  %v5132_v33 = vcombine.low %v6393_v1, %v6401_v10  ;;  %v1226_v1 = vld [vmem:[%s6270_s28 + $0x60] sm:$0xe] }
  0x62   : > { %5861 = vmatmul.mubr.msk.bf16.vlgmr.msra.gmra.mxu0 %vm712_vm3, %v5179_v22  ;;  %v1293_v20 = vsel %vm6600_vm7, %v5164_v26, %v1292_v18  ;;  %v1308_v59 = vrot.slane %v1306_v40, 4  ;;  %v1316_v16 = vrot.slane %v6527_v2, 5  ;;  %v1296_v48 = vsel %vm6600_vm7, %v1294_v56, %v1295_v50  ;;  %v6695_v22 = vld [vmem:[%s8964_s1 + $0x14] sm:$0xf]  ;;  %v6720_v50 = vld [vmem:[%s6270_s28 + $0x6c] sm:$0xe] }
  0x63   : > { %5927 = vmatpush3.bf16.msra.mxu0 %v2568_v25  ;;  %5864 = vmatprep.mubr.msk.bf16.mxu0 %vm712_vm3, %v5180_v28  ;;  %v1300_v27 = vsel %vm6600_vm7, %v5165_v54, %v1299_v45  ;;  %v1303_v42 = vsel %vm6600_vm7, %v1301_v3, %v1302_v32  ;;  %v1315_v41 = vrot.slane %v1313_v7, 4  ;;  %v6685_v10 = vsel %vm6600_vm7, %v5166_v44, %v1306_v40  ;;  %v1229_v39 = vld [vmem:[%s6270_s28 + $0x84] sm:$0xe]  ;;  %v6749_v44 = vld [vmem:[%s6270_s28 + $0x78] sm:$0xe] }
  0x64   : > { %v6689_v2 = vsel %vm6600_vm7, %v5167_v6, %v1313_v7  ;;  %v5168_v57 = vrot.slane %v1225_v47, 9  ;;  %v1320_v18 = vrot.slane %v6562_v55, 5  ;;  %6105 = vmatprep.subr.msk.bf16.mxu0 %vm761_vm0, %v6667_v24  ;;  %v6705_v25 = vsel %vm6600_vm7, %v1308_v59, %v1309_v51  ;;  %v1230_v40 = vld [vmem:[%s6270_s28 + $0x90] sm:$0xe] }
  0x65   : > { %5827 = vmatmul.mubr.msk.bf16.vlgmr.msra.gmra.mxu1 %vm712_vm3, %v5130_v38  ;;  %v6709_v45 = vsel %vm6600_vm7, %v1315_v41, %v1316_v16  ;;  %v1323_v4 = vrot.slane %v6565_v49, 5  ;;  %v1327_v19 = vrot.slane %v6293_v14, 5  ;;  %v5181_v29 = vcombine.low %v1293_v20, %v1296_v48  ;;  %v9021_v48 = vld [vmem:[#allocation3_spill] sm:$0xff] }
  0x66   : > { %5893 = vmatpush3.bf16.msra.mxu1 %v1842_v52  ;;  %5830 = vmatprep.mubr.msk.bf16.mxu1 %vm712_vm3, %v5131_v13  ;;  %v5133_v30 = vcombine.low %v6442_v60, %v6447_v9  ;;  %v1322_v38 = vrot.slane %v1320_v18, 4  ;;  %v5169_v26 = vrot.slane %v1226_v1, 9  ;;  %v5182_v49 = vcombine.low %v1300_v27, %v1303_v42  ;;  %v1231_v42 = vld [vmem:[%s6270_s28 + $0x9c] sm:$0xe] }
  0x67   : > { %v5134_v52 = vcombine.low %v6479_v11, %v6484_v23  ;;  %v5135_v8 = vcombine.low %v6512_v34, %v6521_v17  ;;  %6104 = vmatprep.subr.msk.bf16.mxu1 %vm761_vm0, %v6695_v22  ;;  %v5183_v60 = vcombine.low %v6685_v10, %v6705_v25  ;;  %v5184_v9 = vcombine.low %v6689_v2, %v6709_v45  ;;  %v9022_v10 = vld [vmem:[#allocation5_spill] sm:$0xff]  ;;  %v9023_v2 = vld [vmem:[#allocation4_spill] sm:$0xff] }
  0x68   : > { %v1329_v54 = vrot.slane %v1327_v19, 4  ;;  %v6739_v28 = vsel %vm6600_vm7, %v5168_v57, %v1320_v18  ;;  %v6743_v56 = vsel %vm6600_vm7, %v1322_v38, %v1323_v4  ;;  %v5170_v32 = vrot.slane %v6720_v50, 9  ;;  %v1232_v18 = vld [vmem:[%s6270_s28 + $0xa8] sm:$0xe]  ;;  %v9025_v38 = vld [vmem:[#allocation8_spill] sm:$0xff] }
  0x69   : > { %v6755_v47 = vsel %vm6600_vm7, %v5169_v26, %v1327_v19  ;;  %v1334_v51 = vrot.slane %v6335_v58, 5  ;;  %v1337_v6 = vrot.slane %v6343_v63, 5  ;;  %v5172_v59 = vrot.slane %v1229_v39, 9  ;;  %v9024_v19 = vld [vmem:[#allocation6_spill] sm:$0xff]  ;;  %v9026_v26 = vld [vmem:[#allocation7_spill] sm:$0xff] }
  0x6a   : > { %5865 = vmatmul.mubr.msk.bf16.gmra.mxu0 %vm712_vm3, %v5181_v29  ;;  %v1348_v16 = vrot.slane %v6426_v43, 5  ;;  %v1351_v27 = vrot.slane %v9021_v48, 5  ;;  %v5185_v41 = vcombine.low %v6739_v28, %v6743_v56  ;;  %v6773_v63 = vsel %vm6600_vm7, %v1329_v54, %v1330_v5  ;;  %v9028_v48 = vld [vmem:[#allocation11_spill] sm:$0xff] }
  0x6b   : > { %5868 = vmatprep.mubr.msk.bf16.mxu0 %vm712_vm3, %v5182_v49  ;;  %v5171_v1 = vrot.slane %v6749_v44, 9  ;;  %v5173_v4 = vrot.slane %v1230_v40, 9  ;;  %v1355_v15 = vrot.slane %v9022_v10, 5  ;;  %v1336_v5 = vrot.slane %v1334_v51, 4  ;;  %v5275_v57 = vld [vmem:[%s6270_s28 + $0xc] sm:$0xf] }
  0x6c   : > { %v6782_v25 = vsel %vm6600_vm7, %v5172_v59, %v1348_v16  ;;  %v1350_v45 = vrot.slane %v1348_v16, 4  ;;  %v1358_v29 = vrot.slane %v9024_v19, 5  ;;  %v5174_v49 = vrot.slane %v1231_v42, 9  ;;  %v9027_v59 = vld [vmem:[#allocation9_spill] sm:$0xff]  ;;  %v9029_v42 = vld [vmem:[#allocation10_spill] sm:$0xff] }
  0x6d   : > { %5831 = vmatmul.mubr.msk.bf16.gmra.mxu1 %vm712_vm3, %v5132_v33  ;;  %v1341_v33 = vrot.slane %v6380_v46, 5  ;;  %v6796_v39 = vsel %vm6600_vm7, %v5173_v4, %v1355_v15  ;;  %v1357_v44 = vrot.slane %v1355_v15, 4  ;;  %v1362_v40 = vrot.slane %v9025_v38, 5  ;;  %v9030_v15 = vld [vmem:[#allocation12_spill] sm:$0xff] }
  0x6e   : > { %5834 = vmatprep.mubr.msk.bf16.mxu1 %vm712_vm3, %v5133_v30  ;;  %v6792_v54 = vsel %vm6600_vm7, %v1350_v45, %v1351_v27  ;;  %v1365_v16 = vrot.slane %v9027_v59, 5  ;;  %v5175_v45 = vrot.slane %v1232_v18, 9  ;;  %v1369_v4 = vrot.slane %v9028_v48, 5 }
  0x6f   : > { %v6806_v27 = vsel %vm6600_vm7, %v1357_v44, %v1358_v29  ;;  %v1372_v50 = vrot.slane %v9030_v15, 5  ;;  %v6816_v19 = vsel %vm6600_vm7, %v5174_v49, %v1362_v40  ;;  %v1364_v7 = vrot.slane %v1362_v40, 4  ;;  %v9031_v29 = vld [vmem:[#allocation13_spill] sm:$0xff]  ;;  %v9032_v15 = vld [vmem:[#allocation2_spill] sm:$0xff]  ;;  %v6831_v49 = vld [vmem:[%s6270_s28 + $0x10] sm:$0xf] }
  0x70   : > { %v6823_v18 = vsel %vm6600_vm7, %v5170_v32, %v1334_v51  ;;  %v6828_v59 = vsel %vm6600_vm7, %v5175_v45, %v1369_v4  ;;  %v1371_v30 = vrot.slane %v1369_v4, 4  ;;  %v5278_v40 = vld [vmem:[%s6270_s28 + $0x18] sm:$0xf]  ;;  %v1343_v20 = vrot.slane %v1341_v33, 4 }
  0x71   : > { %v2086_v44 = vshrl.u32 %v5275_v57, 16  ;;  %v2089_v32 = vshll.u32 %v5275_v57, 16  ;;  %v5186_v51 = vcombine.low %v6755_v47, %v6773_v63  ;;  %v6846_v45 = vsel %vm6600_vm7, %v1336_v5, %v1337_v6  ;;  %v1233_v57 = vld [vmem:[%s6270_s28 + $0xb4] sm:$0xe]  ;;  %v6867_v47 = vld [vmem:[%s6270_s28 + $0x14] sm:$0x1] }
  0x72   : > { %5869 = vmatmul.mubr.msk.bf16.gmra.mxu0 %vm712_vm3, %v5183_v60  ;;  %v1344_v60 = vrot.slane %v9032_v15, 5  ;;  %v6861_v11 = vsel %vm6600_vm7, %v5171_v1, %v1341_v33  ;;  %v2095_v6 = vshll.u32 %v6831_v49, 16  ;;  %v5279_v63 = vld [vmem:[%s6270_s28 + $0x1c] sm:$0xf]  ;;  %v2099_v17 = vshrl.u32 %v6831_v49, 16 }
  0x73   : > { %5872 = vmatprep.mubr.msk.bf16.mxu0 %vm712_vm3, %v5184_v9  ;;  %v6836_v9 = vsel %vm6600_vm7, %v1364_v7, %v1365_v16  ;;  %v6852_v7 = vsel %vm6600_vm7, %v1371_v30, %v1372_v50  ;;  %v2088_v5 = vrot.slane %v2086_v44, 4  ;;  %v2091_v34 = vrot.slane %v2089_v32, 5  ;;  %v5281_v15 = vld [vmem:[%s6270_s28 + $0x24] sm:$0xf]  ;;  %v6880_v44 = vld [vmem:[%s6270_s28 + $0x28] sm:$0xf] }
  0x74   : > { %v2110_v50 = vshrl.u32 %v5278_v40, 16  ;;  %v1345_v1 = vsel %vm6600_vm7, %v1343_v20, %v1344_v60  ;;  %v5176_v33 = vrot.slane %v1233_v57, 9  ;;  %v6875_v30 = vrot.slane %v2095_v6, 5 }
  0x75   : > { %5835 = vmatmul.mubr.msk.bf16.gmra.mxu1 %vm712_vm3, %v5134_v52  ;;  %v1376_v52 = vrot.slane %v6579_v37, 5  ;;  %v2113_v16 = vshll.u32 %v5278_v40, 16  ;;  %v1379_v23 = vrot.slane %v6584_v61, 5  ;;  %v2101_v4 = vrot.slane %v2099_v17, 4 }
  0x76   : > { %5838 = vmatprep.mubr.msk.bf16.mxu1 %vm712_vm3, %v5135_v8  ;;  %v5280_v8 = vld [vmem:[%s6270_s28 + $0x20] sm:$0x1]  ;;  %v2112_v3 = vrot.slane %v2110_v50, 4  ;;  %v2119_v13 = vshll.u32 %v5279_v63, 16  ;;  %v2105_v20 = vshll.u32 %v6867_v47, 16  ;;  %v2123_v57 = vshrl.u32 %v5279_v63, 16 }
  0x77   : > { %v1378_v32 = vrot.slane %v1376_v52, 4  ;;  %v2115_v60 = vrot.slane %v2113_v16, 5  ;;  %v5187_v61 = vcombine.low %v6823_v18, %v6846_v45  ;;  %v5188_v40 = vcombine.low %v6861_v11, %v1345_v1 }
  0x78   : > { %v2092_v6 = vor.u32 %v2091_v34, %v2088_v5  ;;  %v6891_v17 = vrot.slane %v2119_v13, 5  ;;  %v2102_v28 = vor.u32 %v2101_v4, %v6875_v30  ;;  %v2129_v50 = vshll.u32 %v5280_v8, 16  ;;  %v6918_v5 = vld [vmem:[%s6270_s28 + $0x34] sm:$0xf] }
  0x79   : > { %v2116_v56 = vor.u32 %v2115_v60, %v2112_v3  ;;  %v6903_v18 = vsel %vm6600_vm7, %v5176_v33, %v1376_v52  ;;  %v2134_v13 = vshrl.u32 %v5281_v15, 16  ;;  %v2137_v45 = vshll.u32 %v5281_v15, 16  ;;  %v5284_v52 = vld [vmem:[%s6270_s28 + $0x30] sm:$0xf] }
  0x7a   : > { %5873 = vmatmul.mubr.msk.bf16.gmra.mxu0 %vm712_vm3, %v5185_v41  ;;  %v2125_v41 = vrot.slane %v2123_v57, 4  ;;  %v2143_v11 = vshll.u32 %v6880_v44, 16  ;;  %v9034_v3 = vcombine.low %v6289_v12, %v6293_v14  ;;  %v6912_v4 = vsel %vm6600_vm7, %v1378_v32, %v1379_v23 }
  0x7b   : > { %5876 = vmatprep.mubr.msk.bf16.mxu0 %vm712_vm3, %v5186_v51  ;;  %v9033_v51 = vcombine.low %v6555_v62, %v6562_v55  ;;  %v2107_v62 = vrot.slane %v2105_v20, 5  ;;  %v2147_v63 = vshrl.u32 %v6880_v44, 16  ;;  %v2093_v34 = vrot.slane %v2092_v6, 4 }
  0x7c   : > { %v2126_v55 = vor.u32 %v2125_v41, %v6891_v17  ;;  %v2136_v8 = vrot.slane %v2134_v13, 4  ;;  %v2139_v1 = vrot.slane %v2137_v45, 5  ;;  %v6920_v33 = vrot.slane %v2143_v11, 5  ;;  %v6926_v41 = vld [vmem:[%s6270_s28 + $0x38] sm:$0x1] }
  0x7d   : > { %5839 = vmatmul.mubr.msk.bf16.gmra.mxu1 %vm712_vm3, %v9033_v51  ;;  %v2103_v12 = vrot.slane %v2102_v28, 4  ;;  %v2117_v14 = vrot.slane %v2116_v56, 4  ;;  %v2131_v16 = vrot.slane %v2129_v50, 5  ;;  %v2149_v23 = vrot.slane %v2147_v63, 4  ;;  %v5287_v13 = vld [vmem:[%s6270_s28 + $0x3c] sm:$0xf] }
  0x7e   : > { %5842 = vmatprep.mubr.msk.bf16.mxu1 %vm712_vm3, %v9034_v3  ;;  %v2127_v15 = vrot.slane %v2126_v55, 4  ;;  %v2153_v32 = vshll.u32 %v6895_v21, 16  ;;  %v2158_v20 = vshrl.u32 %v5284_v52, 16  ;;  %v2161_v60 = vshll.u32 %v5284_v52, 16 }
  0x7f   : > { %v2140_v57 = vor.u32 %v2139_v1, %v2136_v8  ;;  %v2150_v6 = vor.u32 %v2149_v23, %v6920_v33  ;;  %v2167_v28 = vshll.u32 %v6918_v5, 16  ;;  %v2171_v56 = vshrl.u32 %v6918_v5, 16  ;;  %v5290_v8 = vld [vmem:[%s6270_s28 + $0x48] sm:$0xf]  ;;  %v6953_v1 = vld [vmem:[%s6270_s28 + $0x4c] sm:$0xf] }
  0x80   : > { %v2160_v50 = vrot.slane %v2158_v20, 4  ;;  %v2163_v51 = vrot.slane %v2161_v60, 5  ;;  %v9035_v3 = vcombine.low %v6331_v53, %v6335_v58  ;;  %v5193_v55 = vcombine.low %v6903_v18, %v6912_v4 }
  0x81   : > { %v6932_v45 = vrot.slane %v2167_v28, 5  ;;  %v2173_v11 = vrot.slane %v2171_v56, 4  ;;  %v2108_v63 = vsel %vm6314_vm4, %v2103_v12, %v2107_v62  ;;  %v2122_v52 = vsel %vm6314_vm4, %v2117_v14, %v6891_v17 }
  0x82   : > { %5877 = vmatmul.mubr.msk.bf16.gmra.mxu0 %vm712_vm3, %v5187_v61  ;;  %v6935_v61 = vld [vmem:[%s6270_s28 + $0x40] sm:$0xf]  ;;  %v9036_v53 = vcombine.low %v6369_v35, %v6380_v46  ;;  %v2132_v58 = vsel %vm6314_vm4, %v2127_v15, %v2131_v16  ;;  %v2141_v23 = vrot.slane %v2140_v57, 4  ;;  %v2164_v20 = vor.u32 %v2163_v51, %v2160_v50  ;;  %v6987_v50 = vld [vmem:[%s6270_s28 + $0x44] sm:$0x1] }
  0x83   : > { %5880 = vmatprep.mubr.msk.bf16.mxu0 %vm712_vm3, %v5188_v40  ;;  %v2098_v40 = vsel %vm6314_vm4, %v2093_v34, %v6875_v30  ;;  %v2151_v30 = vrot.slane %v2150_v6, 4  ;;  %v2155_v34 = vrot.slane %v2153_v32, 5  ;;  %v2177_v62 = vshll.u32 %v6926_v41, 16  ;;  %v5293_v51 = vld [vmem:[%s6270_s28 + $0x54] sm:$0xf] }
  0x84   : > { %v2182_v12 = vshrl.u32 %v5287_v13, 16  ;;  %v2185_v17 = vshll.u32 %v5287_v13, 16  ;;  %v6964_v14 = vsel %vm761_vm0, %v6695_v22, 0  ;;  %v2174_v35 = vor.u32 %v2173_v11, %v6932_v45 }
  0x85   : > { %5843 = vmatmul.mubr.msk.bf16.gmra.mxu1 %vm712_vm3, %v9035_v3  ;;  %v2191_v46 = vshll.u32 %v6935_v61, 16  ;;  %v2195_v16 = vshrl.u32 %v6935_v61, 16  ;;  %v6969_v15 = vcombine.low %v2098_v40, %v2108_v63  ;;  %v6973_v32 = vsel %vm761_vm0, %v6667_v24, 0  ;;  %v6996_v40 = vld [vmem:[%s6270_s28 + $0x58] sm:$0xf] }
  0x86   : > { %5846 = vmatprep.mubr.msk.bf16.mxu1 %vm712_vm3, %v9036_v53  ;;  %v2206_v60 = vshrl.u32 %v5290_v8, 16  ;;  %v2209_v57 = vshll.u32 %v5290_v8, 16  ;;  %v9037_v6 = vcombine.low %v6782_v25, %v6792_v54  ;;  %v6979_v22 = vcombine.low %v2122_v52, %v2132_v58  ;;  %v7001_v8 = vld [vmem:[%s6270_s28 + $0x50] sm:$0x1] }
  0x87   : > { %v2146_v28 = vsel %vm6314_vm4, %v2141_v23, %v6920_v33  ;;  %v2156_v56 = vsel %vm6314_vm4, %v2151_v30, %v2155_v34  ;;  %v2215_v24 = vshll.u32 %v6953_v1, 16  ;;  %v9038_v25 = vcombine.low %v6796_v39, %v6806_v27  ;;  %v5296_v34 = vld [vmem:[%s6270_s28 + $0x60] sm:$0xf] }
  0x88   : > { %v2165_v54 = vrot.slane %v2164_v20, 4  ;;  %v2179_v13 = vrot.slane %v2177_v62, 5  ;;  %v2184_v11 = vrot.slane %v2182_v12, 4  ;;  %v2187_v3 = vrot.slane %v2185_v17, 5 }
  0x89   : > { %v2175_v33 = vrot.slane %v2174_v35, 4  ;;  %v6998_v63 = vrot.slane %v2191_v46, 5  ;;  %v2197_v52 = vrot.slane %v2195_v16, 4  ;;  %v2219_v53 = vshrl.u32 %v6953_v1, 16  ;;  %v7018_v35 = vld [vmem:[%s6270_s28 + $0x5c] sm:$0x1] }
  0x8a   : > { %5881 = vmatmul.mubr.msk.bf16.gmra.mxu0 %vm712_vm3, %v9037_v6  ;;  %v9039_v39 = vcombine.low %v6419_v36, %v6426_v43  ;;  %v2208_v27 = vrot.slane %v2206_v60, 4  ;;  %v2211_v58 = vrot.slane %v2209_v57, 5  ;;  %v2230_v23 = vshrl.u32 %v5293_v51, 16 }
  0x8b   : > { %5884 = vmatprep.mubr.msk.bf16.mxu0 %vm712_vm3, %v9038_v25  ;;  %v2233_v30 = vshll.u32 %v5293_v51, 16  ;;  %v9040_v20 = vcombine.low %v9023_v2, %v9022_v10  ;;  %v7013_v62 = vcombine.low %v2146_v28, %v2156_v56  ;;  %v7015_v12 = vrot.slane %v2215_v24, 5  ;;  %v7031_v28 = vld [vmem:[%s6270_s28 + $0x64] sm:$0xf] }
  0x8c   : > { %v2221_v17 = vrot.slane %v2219_v53, 4  ;;  %v2239_v36 = vshll.u32 %v6996_v40, 16  ;;  %v2201_v43 = vshll.u32 %v6987_v50, 16  ;;  %v2232_v46 = vrot.slane %v2230_v23, 4 }
  0x8d   : > { %5847 = vmatmul.mubr.msk.bf16.gmra.mxu1 %vm712_vm3, %v9039_v39  ;;  %v2235_v16 = vrot.slane %v2233_v30, 5  ;;  %v2243_v60 = vshrl.u32 %v6996_v40, 16  ;;  %v2170_v10 = vsel %vm6314_vm4, %v2165_v54, %v6932_v45  ;;  %v2180_v2 = vsel %vm6314_vm4, %v2175_v33, %v2179_v13  ;;  %v7053_v30 = vld [vmem:[%s6270_s28 + $0x68] sm:$0x1] }
  0x8e   : > { %5850 = vmatprep.mubr.msk.bf16.mxu1 %vm712_vm3, %v9040_v20  ;;  %v2188_v57 = vor.u32 %v2187_v3, %v2184_v11  ;;  %v7028_v6 = vrot.slane %v2239_v36, 5  ;;  %v2198_v56 = vor.u32 %v2197_v52, %v6998_v63  ;;  %v2212_v24 = vor.u32 %v2211_v58, %v2208_v27  ;;  %v5299_v3 = vld [vmem:[%s6270_s28 + $0x6c] sm:$0xf]  ;;  %v7050_v27 = vld [vmem:[%s6270_s28 + $0x70] sm:$0xf] }
  0x8f   : > { %v2225_v51 = vshll.u32 %v7001_v8, 16  ;;  %v2245_v25 = vrot.slane %v2243_v60, 4  ;;  %v9041_v53 = vcombine.low %v6816_v19, %v6836_v9  ;;  %v2222_v45 = vor.u32 %v2221_v17, %v7015_v12 }
  0x90   : > { %v2236_v54 = vor.u32 %v2235_v16, %v2232_v46  ;;  %v2254_v13 = vshrl.u32 %v5296_v34, 16  ;;  %v2257_v11 = vshll.u32 %v5296_v34, 16  ;;  %v9042_v33 = vcombine.low %v6828_v59, %v6852_v7  ;;  %v5302_v16 = vld [vmem:[%s6270_s28 + $0x78] sm:$0xf] }
  0x91   : > { %v2246_v52 = vor.u32 %v2245_v25, %v7028_v6  ;;  %v2249_v39 = vshll.u32 %v7018_v35, 16  ;;  %v2263_v19 = vshll.u32 %v7031_v28, 16  ;;  %v2267_v9 = vshrl.u32 %v7031_v28, 16 }
  0x92   : > { %5885 = vmatmul.mubr.msk.bf16.gmra.mxu0 %vm712_vm3, %v9041_v53  ;;  %v2189_v58 = vrot.slane %v2188_v57, 4  ;;  %v2203_v23 = vrot.slane %v2201_v43, 5  ;;  %v2256_v34 = vrot.slane %v2254_v13, 4  ;;  %v2259_v20 = vrot.slane %v2257_v11, 5 }
  0x93   : > { %5888 = vmatprep.mubr.msk.bf16.mxu0 %vm712_vm3, %v9042_v33  ;;  %v9043_v59 = vcombine.low %v9026_v26, %v9025_v38  ;;  %v7059_v7 = vcombine.low %v2170_v10, %v2180_v2  ;;  %v2199_v17 = vrot.slane %v2198_v56, 4  ;;  %v2213_v36 = vrot.slane %v2212_v24, 4  ;;  %v7069_v2 = vld [vmem:[%s6270_s28 + $0x7c] sm:$0xf] }
  0x94   : > { %v7061_v46 = vrot.slane %v2263_v19, 5  ;;  %v9044_v43 = vcombine.low %v9029_v42, %v9028_v48  ;;  %v2223_v60 = vrot.slane %v2222_v45, 4  ;;  %v2227_v57 = vrot.slane %v2225_v51, 5  ;;  %9045 = vst [vmem:[#allocation3_spill] sm:$0xff] %v7069_v2  ;;  %v5305_v19 = vld [vmem:[%s6270_s28 + $0x84] sm:$0xf] }
  0x95   : > { %5851 = vmatmul.mubr.msk.bf16.gmra.mxu1 %vm712_vm3, %v9043_v59  ;;  %v2237_v25 = vrot.slane %v2236_v54, 4  ;;  %v2269_v38 = vrot.slane %v2267_v9, 4  ;;  %v2247_v26 = vrot.slane %v2246_v52, 4  ;;  %v2251_v53 = vrot.slane %v2249_v39, 5 }
  0x96   : > { %5854 = vmatprep.mubr.msk.bf16.mxu1 %vm712_vm3, %v9044_v43  ;;  %v2260_v13 = vor.u32 %v2259_v20, %v2256_v34  ;;  %v2278_v10 = vshrl.u32 %v5299_v3, 16  ;;  %v2194_v56 = vsel %vm6314_vm4, %v2189_v58, %v6998_v63  ;;  %v2281_v24 = vshll.u32 %v5299_v3, 16  ;;  %v6149_v63 = vld [vmem:[%s6270_s28 + $0xc] sm:$0xff]   ;;  %v7103_v34 = vld [vmem:[%s6270_s28 + $0x88] sm:$0xf] }
  0x97   : > { %v2287_v48 = vshll.u32 %v7050_v27, 16  ;;  %v2291_v42 = vshrl.u32 %v7050_v27, 16  ;;  %v2204_v51 = vsel %vm6314_vm4, %v2199_v17, %v2203_v23  ;;  %v2218_v45 = vsel %vm6314_vm4, %v2213_v36, %v7015_v12  ;;  %9046 = vst [vmem:[#allocation5_spill] sm:$0xff] %v7103_v34  ;;  %v7112_v36 = vld [vmem:[%s6270_s28 + $0x74] sm:$0x1] }
  0x98   : > { %v2270_v54 = vor.u32 %v2269_v38, %v7061_v46  ;;  %v2273_v11 = vshll.u32 %v7053_v30, 16  ;;  %v2228_v3 = vsel %vm6314_vm4, %v2223_v60, %v2227_v57  ;;  %v2242_v33 = vsel %vm6314_vm4, %v2237_v25, %v7028_v6  ;;  %9048 = vst [vmem:[#allocation4_spill] sm:$0xff] %v7112_v36  ;;  %v7122_v38 = vld [vmem:[%s6270_s28 + $0x80] sm:$0x1] }
  0x99   : > { %v2302_v52 = vshrl.u32 %v5302_v16, 16  ;;  %v2305_v12 = vshll.u32 %v5302_v16, 16  ;;  %v2252_v18 = vsel %vm6314_vm4, %v2247_v26, %v2251_v53  ;;  %v2261_v4 = vrot.slane %v2260_v13, 4  ;;  %9049 = vst [vmem:[#allocation6_spill] sm:$0xff] %v7122_v38  ;;  %v7125_v26 = vld [vmem:[%s6270_s28 + $0x8c] sm:$0x1] }
  0x9a   : > { %5889 = vmatmul.mubr.msk.bf16.gmra.mxu0 %vm712_vm3, %v5193_v55  ;;  %v2280_v55 = vrot.slane %v2278_v10, 4  ;;  %v2311_v39 = vshll.u32 %v7069_v2, 16  ;;  %v2283_v9 = vrot.slane %v2281_v24, 5  ;;  %v7099_v58 = vrot.slane %v2287_v48, 5  ;;  %9050 = vst [vmem:[#allocation8_spill] sm:$0xff] %v7125_v26  ;;  %v6150_v10 = vld [vmem:[%s6270_s28 + $0x18] sm:$0xff]  }
  0x9b   : > { %5928 = vmatprep.mubr.msk.bf16.mxu0 %vm712_vm3, %v6969_v15  ;;  %v2293_v23 = vrot.slane %v2291_v42, 4  ;;  %v2315_v6 = vshrl.u32 %v7069_v2, 16  ;;  %v9047_v15 = vcombine.low %v9031_v29, %v6579_v37  ;;  %v7109_v20 = vcombine.low %v2194_v56, %v2204_v51  ;;  %v5308_v51 = vld [vmem:[%s6270_s28 + $0x90] sm:$0xf] }
  0x9c   : > { %v2271_v59 = vrot.slane %v2270_v54, 4  ;;  %v2275_v17 = vrot.slane %v2273_v11, 5  ;;  %v2304_v16 = vrot.slane %v2302_v52, 4  ;;  %v2307_v43 = vrot.slane %v2305_v12, 5 }
  0x9d   : > { %5855 = vmatmul.mubr.msk.bf16.gmra.mxu1 %vm712_vm3, %v9047_v15  ;;  %v7115_v60 = vrot.slane %v2311_v39, 5  ;;  %v2317_v57 = vrot.slane %v2315_v6, 4  ;;  %v2326_v25 = vshrl.u32 %v5305_v19, 16  ;;  %v7117_v37 = vcombine.low %v2218_v45, %v2228_v3  ;;  %v7136_v45 = vld [vmem:[%s6270_s28 + $0x94] sm:$0xf] }
  0x9e   : > { %5894 = vmatprep.mubr.msk.bf16.mxu1 %vm712_vm3, %v6149_v63  ;;  %v7119_v29 = vcombine.low %v2242_v33, %v2252_v18  ;;  %v2329_v53 = vshll.u32 %v5305_v19, 16  ;;  %v2335_v13 = vshll.u32 %v7103_v34, 16  ;;  %v2266_v56 = vsel %vm6314_vm4, %v2261_v4, %v7061_v46  ;;  %9051 = vst [vmem:[#allocation7_spill] sm:$0xff] %v7136_v45  ;;  %v7144_v33 = vld [vmem:[%s8964_s1 + $0x20] sm:$0xf]  ;;  %v6151_v46 = vld [vmem:[%s6270_s28 + $0x24] sm:$0xff]  }
  0x9f   : > { %v2284_v24 = vor.u32 %v2283_v9, %v2280_v55  ;;  %v2294_v48 = vor.u32 %v2293_v23, %v7099_v58  ;;  %v2297_v42 = vshll.u32 %v7112_v36, 16  ;;  %v2328_v54 = vrot.slane %v2326_v25, 4  ;;  %9052 = vst [vmem:[#allocation9_spill] sm:$0xff] %v7144_v33 }
  0xa0   : > { %v2331_v11 = vrot.slane %v2329_v53, 5  ;;  %v7138_v63 = vrot.slane %v2335_v13, 5  ;;  %v2339_v3 = vshrl.u32 %v7103_v34, 16  ;;  %v2276_v52 = vsel %vm6314_vm4, %v2271_v59, %v2275_v17 }
  0xa1   : > { %v2308_v12 = vor.u32 %v2307_v43, %v2304_v16  ;;  %v2318_v18 = vor.u32 %v2317_v57, %v7115_v60  ;;  %v2321_v4 = vshll.u32 %v7122_v38, 16  ;;  %v2350_v19 = vshrl.u32 %v5308_v51, 16  ;;  %v7178_v57 = vld [vmem:[%s6270_s28 + $0xa0] sm:$0xf] }
  0xa2   : > { %5929 = vmatmul.mubr.msk.bf16.vlgmr.msra.gmra.mxu0 %vm712_vm3, %v6979_v22  ;;  %v2332_v55 = vor.u32 %v2331_v11, %v2328_v54  ;;  %v2341_v39 = vrot.slane %v2339_v3, 4  ;;  %v2353_v9 = vshll.u32 %v5308_v51, 16  ;;  %v5311_v22 = vld [vmem:[%s6270_s28 + $0x9c] sm:$0xf]  ;;  %v7157_v23 = vrot.slane %v2284_v24, 4  ;;  %9054 = vst [vmem:[#allocation10_spill] sm:$0xff] %v7178_v57 }
  0xa3   : > { %5995 = vmatpush3.bf16.msra.mxu0 %v6973_v32  ;;  %5932 = vmatprep.mubr.msk.bf16.mxu0 %vm712_vm3, %v7013_v62  ;;  %v7159_v6 = vrot.slane %v2297_v42, 5  ;;  %v2345_v15 = vshll.u32 %v7125_v26, 16  ;;  %v2359_v59 = vshll.u32 %v7136_v45, 16  ;;  %v7166_v32 = vld [vmem:[%s8964_s1 + $0x1c] sm:$0xf]  ;;  %v7171_v62 = vcombine.low %v2266_v56, %v2276_v52 }
  0xa4   : > { %9053 = vst [vmem:[#allocation11_spill] sm:$0xff] %v7166_v32  ;;  %6107 = vmatprep.subr.msk.bf16.mxu0 %vm761_vm0, %v7144_v33  ;;  %v7173_v17 = vrot.slane %v2294_v48, 4  ;;  %v2342_v16 = vor.u32 %v2341_v39, %v7138_v63  ;;  %v2363_v43 = vshrl.u32 %v7136_v45, 16  ;;  %v7182_v25 = vrot.slane %v2308_v12, 4  ;;  %v7191_v56 = vld [vmem:[%s6270_s28 + $0x98] sm:$0x1] }
  0xa5   : > { %5895 = vmatmul.mubr.msk.bf16.vlgmr.msra.gmra.mxu1 %vm712_vm3, %v6150_v10  ;;  %v7184_v53 = vrot.slane %v2318_v18, 4  ;;  %v7186_v13 = vrot.slane %v2321_v4, 5  ;;  %v7188_v10 = vrot.slane %v2332_v55, 4  ;;  %9055 = vst [vmem:[#allocation12_spill] sm:$0xff] %v7191_v56  ;;  %v2352_v24 = vrot.slane %v2350_v19, 4  ;;  %v6153_v19 = vld [vmem:[%s6270_s28 + $0x3c] sm:$0xff]  }
  0xa6   : > { %5961 = vmatpush3.bf16.msra.mxu1 %v6964_v14  ;;  %5898 = vmatprep.mubr.msk.bf16.mxu1 %vm712_vm3, %v6151_v46  ;;  %v2355_v48 = vrot.slane %v2353_v9, 5  ;;  %v2374_v42 = vshrl.u32 %v5311_v22, 16  ;;  %v2377_v51 = vshll.u32 %v5311_v22, 16  ;;  %v6152_v14 = vld [vmem:[%s6270_s28 + $0x30] sm:$0xff]   ;;  %v7200_v11 = vrot.slane %v2345_v15, 5 }
  0xa7   : > { %6106 = vmatprep.subr.msk.bf16.mxu1 %vm761_vm0, %v7166_v32  ;;  %v7202_v3 = vrot.slane %v2359_v59, 5  ;;  %v2383_v46 = vshll.u32 %v7178_v57, 16  ;;  %v5314_v52 = vld [vmem:[%s6270_s28 + $0xa8] sm:$0xf]  ;;  %v7206_v12 = vrot.slane %v2342_v16, 4  ;;  %v2365_v18 = vrot.slane %v2363_v43, 4 }
  0xa8   : > { %v2369_v4 = vshll.u32 %v7191_v56, 16  ;;  %v2387_v55 = vshrl.u32 %v7178_v57, 16  ;;  %v7211_v39 = vld [vmem:[%s6270_s28 + $0xac] sm:$0xf]  ;;  %v2356_v59 = vor.u32 %v2355_v48, %v2352_v24  ;;  %v7235_v16 = vld [vmem:[%s6270_s28 + $0xa4] sm:$0x1] }
  0xa9   : > { %9056 = vst [vmem:[#allocation13_spill] sm:$0xff] %v7211_v39  ;;  %9057 = vst [vmem:[#allocation2_spill] sm:$0xff] %v7235_v16  ;;  %v2376_v43 = vrot.slane %v2374_v42, 4  ;;  %v2379_v22 = vrot.slane %v2377_v51, 5  ;;  %v2398_v54 = vshrl.u32 %v5314_v52, 16  ;;  %v7237_v9 = vrot.slane %v2383_v46, 5 }
  0xaa   : > { %5933 = vmatmul.mubr.msk.bf16.gmra.mxu0 %vm712_vm3, %v7059_v7  ;;  %v2389_v32 = vrot.slane %v2387_v55, 4  ;;  %v2401_v15 = vshll.u32 %v5314_v52, 16  ;;  %v2407_v33 = vshll.u32 %v7211_v39, 16  ;;  %v5317_v57 = vld [vmem:[%s6270_s28 + $0xb4] sm:$0xf]  ;;  %v2366_v24 = vor.u32 %v2365_v18, %v7202_v3 }
  0xab   : > { %5936 = vmatprep.mubr.msk.bf16.mxu0 %vm712_vm3, %v7109_v20  ;;  %v2348_v20 = vsel %vm6314_vm4, %v7206_v12, %v7200_v11  ;;  %v7247_v48 = vrot.slane %v2369_v4, 5  ;;  %v7250_v42 = vld [vmem:[%s6270_s28 + $0xb0] sm:$0x1]  ;;  %v2400_v51 = vrot.slane %v2398_v54, 4  ;;  %v7253_v46 = vld [vmem:[%s6270_s28 + $0xb8] sm:$0xf]  ;;  %v2380_v18 = vor.u32 %v2379_v22, %v2376_v43 }
  0xac   : > { %9058 = vst [vmem:[#allocation14_spill] sm:$0xff] %v7250_v42  ;;  %9059 = vst [vmem:[#allocation15_spill] sm:$0xff] %v7253_v46  ;;  %v2403_v52 = vrot.slane %v2401_v15, 5  ;;  %v7257_v55 = vrot.slane %v2407_v33, 5  ;;  %v2411_v11 = vshrl.u32 %v7211_v39, 16  ;;  %v7260_v12 = vrot.slane %v2356_v59, 4 }
  0xad   : > { %5899 = vmatmul.mubr.msk.bf16.gmra.mxu1 %vm712_vm3, %v6152_v14  ;;  %v2393_v14 = vshll.u32 %v7235_v16, 16  ;;  %v7263_v4 = vld [vmem:[%s6270_s28 + $0xbc] sm:$0x1]  ;;  %v2422_v54 = vshrl.u32 %v5317_v57, 16  ;;  %v2425_v7 = vshll.u32 %v5317_v57, 16  ;;  %v2390_v56 = vor.u32 %v2389_v32, %v7237_v9  ;;  %v6154_v16 = vld [vmem:[%s6270_s28 + $0x48] sm:$0xff]  }
  0xae   : > { %5902 = vmatprep.mubr.msk.bf16.mxu1 %vm712_vm3, %v6153_v19  ;;  %v2413_v45 = vrot.slane %v2411_v11, 4  ;;  %v2417_v19 = vshll.u32 %v7250_v42, 16  ;;  %v2431_v15 = vshll.u32 %v7253_v46, 16  ;;  %v5320_v33 = vld [vmem:[%s6270_s28 + $0xc0] sm:$0xf]  ;;  %v2404_v26 = vor.u32 %v2403_v52, %v2400_v51  ;;  %v6155_v57 = vld [vmem:[%s6270_s28 + $0x54] sm:$0xff]  }
  0xaf   : > { %v2424_v39 = vrot.slane %v2422_v54, 4  ;;  %v2427_v34 = vrot.slane %v2425_v7, 5  ;;  %v2435_v59 = vshrl.u32 %v7253_v46, 16  ;;  %v7272_v22 = vld [vmem:[%s6270_s28 + $0xc4] sm:$0xf]  ;;  %v2367_v43 = vrot.slane %v2366_v24, 4 }
  0xb0   : > { %v2395_v32 = vrot.slane %v2393_v14, 5  ;;  %v2414_v11 = vor.u32 %v2413_v45, %v7257_v55  ;;  %v2433_v42 = vrot.slane %v2431_v15, 5  ;;  %v2441_v7 = vshll.u32 %v7263_v4, 16  ;;  %v7284_v45 = vld [vmem:[%s6270_s28 + $0xc8] sm:$0x1] }
  0xb1   : > { %v2428_v51 = vor.u32 %v2427_v34, %v2424_v39  ;;  %v2437_v52 = vrot.slane %v2435_v59, 4  ;;  %v2446_v54 = vshrl.u32 %v5320_v33, 16  ;;  %v2381_v46 = vrot.slane %v2380_v18, 4 }
  0xb2   : > { %5937 = vmatmul.mubr.msk.bf16.gmra.mxu0 %vm712_vm3, %v7117_v37  ;;  %v2391_v38 = vrot.slane %v2390_v56, 4  ;;  %v2449_v2 = vshll.u32 %v5320_v33, 16  ;;  %v2455_v37 = vshll.u32 %v7272_v22, 16  ;;  %v2405_v24 = vrot.slane %v2404_v26, 4 }
  0xb3   : > { %5940 = vmatprep.mubr.msk.bf16.mxu0 %vm712_vm3, %v7119_v29  ;;  %v2419_v14 = vrot.slane %v2417_v19, 5  ;;  %v2438_v36 = vor.u32 %v2437_v52, %v2433_v42  ;;  %v2448_v15 = vrot.slane %v2446_v54, 4  ;;  %v2415_v34 = vrot.slane %v2414_v11, 4 }
  0xb4   : > { %v2451_v29 = vrot.slane %v2449_v2, 5  ;;  %v7287_v39 = vrot.slane %v2455_v37, 5  ;;  %v2459_v56 = vshrl.u32 %v7272_v22, 16  ;;  %v9060_v26 = vsel %vm6314_vm4, %v7173_v17, %v7159_v6 }
  0xb5   : > { %5903 = vmatmul.mubr.msk.bf16.gmra.mxu1 %vm712_vm3, %v6154_v16  ;;  %v9061_v16 = vsel %vm6314_vm4, %v7157_v23, %v7099_v58  ;;  %v2429_v19 = vrot.slane %v2428_v51, 4  ;;  %v2439_v33 = vrot.slane %v2438_v36, 4  ;;  %v2443_v2 = vrot.slane %v2441_v7, 5  ;;  %v6156_v23 = vld [vmem:[%s6270_s28 + $0x60] sm:$0xff]  }
  0xb6   : > { %5906 = vmatprep.mubr.msk.bf16.mxu1 %vm712_vm3, %v6155_v57  ;;  %v5332_v18 = vcombine.low %v9061_v16, %v9060_v26  ;;  %v9062_v59 = vsel %vm6314_vm4, %v7184_v53, %v7186_v13  ;;  %v9063_v6 = vsel %vm6314_vm4, %v7182_v25, %v7115_v60  ;;  %v2452_v57 = vor.u32 %v2451_v29, %v2448_v15  ;;  %v5358_v13 = vld [vmem:[%s6270_s28 + $0x24] sm:$0xe]  ;;  %v5361_v26 = vld [vmem:[%s6270_s28 + $0x48] sm:$0xe] }
  0xb7   : > { %v5333_v17 = vcombine.low %v9063_v6, %v9062_v59  ;;  %v2461_v11 = vrot.slane %v2459_v56, 4  ;;  %v2465_v58 = vshll.u32 %v7284_v45, 16  ;;  %v9064_v36 = vsel %vm6314_vm4, %v7188_v10, %v7138_v63  ;;  %v6157_v63 = vld [vmem:[%s6270_s28 + $0x6c] sm:$0xff]   ;;  %v5362_v6 = vld [vmem:[%s6270_s28 + $0x54] sm:$0xe] }
  0xb8   : > { %v5334_v51 = vcombine.low %v9064_v36, %v2348_v20  ;;  %v2362_v53 = vsel %vm6314_vm4, %v7260_v12, %v7202_v3  ;;  %v2372_v60 = vsel %vm6314_vm4, %v2367_v43, %v7247_v48  ;;  %v2386_v25 = vsel %vm6314_vm4, %v2381_v46, %v7237_v9  ;;  %v7340_v12 = vld [vmem:[%s6270_s28 + $0xc] sm:$0xe] }
  0xb9   : > { %v2396_v10 = vsel %vm6314_vm4, %v2391_v38, %v2395_v32  ;;  %v2410_v3 = vsel %vm6314_vm4, %v2405_v24, %v7257_v55  ;;  %v2420_v20 = vsel %vm6314_vm4, %v2415_v34, %v2419_v14  ;;  %v2462_v48 = vor.u32 %v2461_v11, %v7287_v39  ;;  %v5359_v55 = vld [vmem:[%s6270_s28 + $0x30] sm:$0xe]  ;;  %v5360_v14 = vld [vmem:[%s6270_s28 + $0x3c] sm:$0xe] }
  0xba   : > { %5941 = vmatmul.mubr.msk.bf16.gmra.mxu0 %vm712_vm3, %v7171_v62  ;;  %v2434_v62 = vsel %vm6314_vm4, %v2429_v19, %v2433_v42  ;;  %v2444_v38 = vsel %vm6314_vm4, %v2439_v33, %v2443_v2  ;;  %v7347_v9 = vrot.slane %v2452_v57, 4  ;;  %v2829_v46 = vrot.slane %v6831_v49, 5  ;;  %v6158_v57 = vld [vmem:[%s6270_s28 + $0x78] sm:$0xff]  }
  0xbb   : > { %5944 = vmatprep.mubr.msk.bf16.mxu0 %vm712_vm3, %v5332_v18  ;;  %v7351_v43 = vcombine.low %v2362_v53, %v2372_v60  ;;  %v7353_v32 = vrot.slane %v2462_v48, 4  ;;  %v7355_v52 = vrot.slane %v2465_v58, 5  ;;  %v5374_v7 = vrot.slane %v5358_v13, 9  ;;  %v6159_v53 = vld [vmem:[%s6270_s28 + $0x84] sm:$0xff]   ;;  %v5363_v13 = vld [vmem:[%s6270_s28 + $0x60] sm:$0xe] }
  0xbc   : > { %v7358_v54 = vcombine.low %v2386_v25, %v2396_v10  ;;  %v7360_v42 = vcombine.low %v2410_v3, %v2420_v20  ;;  %v5372_v37 = vrot.slane %v7340_v12, 9  ;;  %v2843_v24 = vrot.slane %v6880_v44, 5  ;;  %v6165_v49 = vld [vmem:[%s6270_s28 + $0x18] sm:$0xff]  }
  0xbd   : > { %5907 = vmatmul.mubr.msk.bf16.gmra.mxu1 %vm712_vm3, %v6156_v23  ;;  %v7366_v15 = vcombine.low %v2434_v62, %v2444_v38  ;;  %v2832_v34 = vrot.slane %v6867_v47, 5  ;;  %v2846_v29 = vrot.slane %v6895_v21, 5  ;;  %v5375_v56 = vrot.slane %v5359_v55, 9  ;;  %v5365_v55 = vld [vmem:[%s6270_s28 + $0x78] sm:$0xe] }
  0xbe   : > { %5910 = vmatprep.mubr.msk.bf16.mxu1 %vm712_vm3, %v6157_v63  ;;  %v2458_v16 = vsel %vm6314_vm4, %v7347_v9, %v7287_v39  ;;  %v7377_v44 = vrot.slane %v2829_v46, 4  ;;  %v7381_v18 = vsel %vm6600_vm7, %v5374_v7, %v2843_v24  ;;  %v2845_v19 = vrot.slane %v2843_v24, 4 }
  0xbf   : > { %v2468_v21 = vsel %vm6314_vm4, %v7353_v32, %v7355_v52  ;;  %v2850_v33 = vrot.slane %v6918_v5, 5  ;;  %v2853_v2 = vrot.slane %v6926_v41, 5  ;;  %v5376_v59 = vrot.slane %v5360_v14, 9  ;;  %v6164_v52 = vld [vmem:[%s6270_s28 + $0xc0] sm:$0xff]  }
  0xc0   : > { %v7393_v11 = vsel %vm6600_vm7, %v2845_v19, %v2846_v29  ;;  %v2857_v58 = vrot.slane %v6935_v61, 5  ;;  %v2860_v23 = vrot.slane %v6987_v50, 5  ;;  %v5377_v36 = vrot.slane %v5361_v26, 9  ;;  %v5366_v19 = vld [vmem:[%s6270_s28 + $0x84] sm:$0xe] }
  0xc1   : > { %v5391_v5 = vcombine.low %v7381_v18, %v7393_v11  ;;  %v7403_v41 = vsel %vm6600_vm7, %v5375_v56, %v2850_v33  ;;  %v2852_v60 = vrot.slane %v2850_v33, 4  ;;  %v2864_v25 = vrot.slane %v6953_v1, 5 }
  0xc2   : > { %5945 = vmatmul.mubr.msk.bf16.gmra.mxu0 %vm712_vm3, %v5333_v17  ;;  %v7410_v61 = vsel %vm6600_vm7, %v5376_v59, %v2857_v58  ;;  %v2859_v50 = vrot.slane %v2857_v58, 4  ;;  %v2867_v17 = vrot.slane %v7001_v8, 5  ;;  %v5378_v63 = vrot.slane %v5362_v6, 9  ;;  %v9065_v59 = vld [vmem:[#allocation4_spill] sm:$0xff] }
  0xc3   : > { %5948 = vmatprep.mubr.msk.bf16.mxu0 %vm712_vm3, %v5334_v51  ;;  %v7415_v10 = vsel %vm6600_vm7, %v2852_v60, %v2853_v2  ;;  %v7419_v3 = vsel %vm6600_vm7, %v5377_v36, %v2864_v25  ;;  %v2866_v1 = vrot.slane %v2864_v25, 4  ;;  %v2871_v20 = vrot.slane %v6996_v40, 5  ;;  %v5364_v51 = vld [vmem:[%s6270_s28 + $0x6c] sm:$0xe]  ;;  %v6160_v58 = vld [vmem:[%s6270_s28 + $0x90] sm:$0xff]  }
  0xc4   : > { %v5392_v48 = vcombine.low %v7403_v41, %v7415_v10  ;;  %v7428_v8 = vsel %vm6600_vm7, %v2859_v50, %v2860_v23  ;;  %v2874_v62 = vrot.slane %v7018_v35, 5  ;;  %v5379_v38 = vrot.slane %v5363_v13, 9  ;;  %v9066_v36 = vld [vmem:[#allocation3_spill] sm:$0xff]  ;;  %v5367_v60 = vld [vmem:[%s6270_s28 + $0x90] sm:$0xe]  ;;  %v9067_v50 = vld [vmem:[#allocation6_spill] sm:$0xff] }
  0xc5   : > { %5911 = vmatmul.mubr.msk.bf16.gmra.mxu1 %vm712_vm3, %v6158_v57  ;;  %v5393_v40 = vcombine.low %v7410_v61, %v7428_v8  ;;  %v7437_v7 = vsel %vm6600_vm7, %v2866_v1, %v2867_v17  ;;  %v7441_v24 = vsel %vm6600_vm7, %v5378_v63, %v2871_v20  ;;  %v2873_v14 = vrot.slane %v2871_v20, 4 }
  0xc6   : > { %5914 = vmatprep.mubr.msk.bf16.mxu1 %vm712_vm3, %v6159_v53  ;;  %v5394_v35 = vcombine.low %v7419_v3, %v7437_v7  ;;  %v2878_v29 = vrot.slane %v7031_v28, 5  ;;  %v2881_v56 = vrot.slane %v7053_v30, 5  ;;  %v5380_v26 = vrot.slane %v5364_v51, 9  ;;  %v9068_v51 = vld [vmem:[#allocation5_spill] sm:$0xff]  ;;  %v5498_v3 = vld [vmem:[%s6270_s28 + $0x48] sm:$0xf] }
  0xc7   : > { %v7450_v33 = vsel %vm6600_vm7, %v2873_v14, %v2874_v62  ;;  %v2885_v2 = vrot.slane %v7050_v27, 5  ;;  %v2888_v6 = vrot.slane %v9065_v59, 5  ;;  %v5381_v57 = vrot.slane %v5365_v55, 9  ;;  %v6161_v27 = vld [vmem:[%s6270_s28 + $0x9c] sm:$0xff]   ;;  %v9076_v55 = vld [vmem:[#allocation15_spill] sm:$0xff] }
  0xc8   : > { %v5395_v23 = vcombine.low %v7441_v24, %v7450_v33  ;;  %v7459_v28 = vsel %vm6600_vm7, %v5379_v38, %v2878_v29  ;;  %v2880_v30 = vrot.slane %v2878_v29, 4  ;;  %v2892_v53 = vrot.slane %v9066_v36, 5  ;;  %v5368_v38 = vld [vmem:[%s6270_s28 + $0x9c] sm:$0xe]  ;;  %v9071_v36 = vld [vmem:[#allocation12_spill] sm:$0xff] }
  0xc9   : > { %v7468_v25 = vsel %vm6600_vm7, %v5380_v26, %v2885_v2  ;;  %v2887_v13 = vrot.slane %v2885_v2, 4  ;;  %v2895_v17 = vrot.slane %v9067_v50, 5  ;;  %v5382_v63 = vrot.slane %v5366_v19, 9  ;;  %v5369_v26 = vld [vmem:[%s6270_s28 + $0xa8] sm:$0xe] }
  0xca   : > { %5949 = vmatmul.mubr.msk.bf16.gmra.mxu0 %vm712_vm3, %v7351_v43  ;;  %v7475_v1 = vsel %vm6600_vm7, %v2880_v30, %v2881_v56  ;;  %v7479_v43 = vsel %vm6600_vm7, %v5381_v57, %v2892_v53  ;;  %v2894_v20 = vrot.slane %v2892_v53, 4  ;;  %v2899_v62 = vrot.slane %v9068_v51, 5  ;;  %v5371_v57 = vld [vmem:[%s6270_s28 + $0xc0] sm:$0xe]  ;;  %v6162_v19 = vld [vmem:[%s6270_s28 + $0xa8] sm:$0xff]  }
  0xcb   : > { %5952 = vmatprep.mubr.msk.bf16.mxu0 %vm712_vm3, %v7358_v54  ;;  %v7487_v14 = vsel %vm6600_vm7, %v2887_v13, %v2888_v6  ;;  %v9069_v54 = vld [vmem:[#allocation8_spill] sm:$0xff]  ;;  %v5383_v56 = vrot.slane %v5367_v60, 9  ;;  %v2909_v53 = vrot.slane %v9071_v36, 5  ;;  %v5384_v60 = vrot.slane %v5368_v38, 9  ;;  %v9074_v38 = vld [vmem:[#allocation13_spill] sm:$0xff] }
  0xcc   : > { %v2902_v29 = vrot.slane %v9069_v54, 5  ;;  %v7496_v2 = vsel %vm6600_vm7, %v2894_v20, %v2895_v17  ;;  %v7500_v59 = vsel %vm6600_vm7, %v5382_v63, %v2899_v62  ;;  %v2901_v6 = vrot.slane %v2899_v62, 4  ;;  %v5370_v13 = vld [vmem:[%s6270_s28 + $0xb4] sm:$0xe]  ;;  %v9072_v17 = vld [vmem:[#allocation10_spill] sm:$0xff] }
  0xcd   : > { %5915 = vmatmul.mubr.msk.bf16.gmra.mxu1 %vm712_vm3, %v6160_v58  ;;  %v9070_v58 = vld [vmem:[#allocation7_spill] sm:$0xff]  ;;  %v2913_v63 = vrot.slane %v9072_v17, 5  ;;  %v9073_v20 = vld [vmem:[#allocation2_spill] sm:$0xff]  ;;  %v5385_v62 = vrot.slane %v5369_v26, 9  ;;  %v2920_v36 = vrot.slane %v9074_v38, 5  ;;  %v5386_v26 = vrot.slane %v5370_v13, 9 }
  0xce   : > { %5918 = vmatprep.mubr.msk.bf16.mxu1 %vm712_vm3, %v6161_v27  ;;  %v2906_v30 = vrot.slane %v9070_v58, 5  ;;  %v7510_v50 = vsel %vm6600_vm7, %v2901_v6, %v2902_v29  ;;  %v2916_v51 = vrot.slane %v9073_v20, 5  ;;  %v9075_v17 = vld [vmem:[#allocation14_spill] sm:$0xff]  ;;  %v6163_v27 = vld [vmem:[%s6270_s28 + $0xb4] sm:$0xff]   ;;  %v2833_v39 = vsel %vm6600_vm7, %v7377_v44, %v2832_v34  ;;  %v7727_v7 = vld [vmem:[%s6270_s28 + $0x4c] sm:$0xf] }
  0xcf   : > { %v7525_v29 = vsel %vm6600_vm7, %v5384_v60, %v2913_v63  ;;  %v2915_v6 = vrot.slane %v2913_v63, 4  ;;  %v2923_v20 = vrot.slane %v9075_v17, 5  ;;  %v2922_v38 = vrot.slane %v2920_v36, 4  ;;  %v6182_v44 = vld [vmem:[%s6270_s28 + $0x20] sm:$0x1] }
  0xd0   : > { %v7518_v54 = vsel %vm6600_vm7, %v5383_v56, %v2906_v30  ;;  %v2908_v58 = vrot.slane %v2906_v30, 4  ;;  %v7537_v30 = vsel %vm6600_vm7, %v5385_v62, %v2920_v36  ;;  %v2927_v60 = vrot.slane %v9076_v55, 5 }
  0xd1   : > { %v5387_v63 = vrot.slane %v5371_v57, 9  ;;  %v7553_v55 = vsel %vm6600_vm7, %v2922_v38, %v2923_v20  ;;  %v2934_v57 = vrot.slane %v7272_v22, 5  ;;  %v2830_v22 = vsel %vm6600_vm7, %v5372_v37, %v2829_v46  ;;  %v6167_v38 = vld [vmem:[%s6270_s28 + $0x30] sm:$0xff]  }
  0xd2   : > { %5953 = vmatmul.mubr.msk.bf16.gmra.mxu0 %vm712_vm3, %v7360_v42  ;;  %v7533_v56 = vsel %vm6600_vm7, %v2908_v58, %v2909_v53  ;;  %v7546_v42 = vsel %vm6600_vm7, %v2915_v6, %v2916_v51  ;;  %v2930_v53 = vrot.slane %v7263_v4, 5  ;;  %v2929_v58 = vrot.slane %v2927_v60, 4 }
  0xd3   : > { %5956 = vmatprep.mubr.msk.bf16.mxu0 %vm712_vm3, %v7366_v15  ;;  %v7557_v15 = vsel %vm6600_vm7, %v5386_v26, %v2927_v60  ;;  %v2937_v51 = vrot.slane %v7284_v45, 5  ;;  %v5357_v45 = vld [vmem:[%s6270_s28 + $0x18] sm:$0xe]  ;;  %v7597_v9 = vsel %vm6600_vm7, %v5387_v63, %v2934_v57  ;;  %v2936_v46 = vrot.slane %v2934_v57, 4  ;;  %v6166_v26 = vld [vmem:[%s6270_s28 + $0x24] sm:$0xff]  }
  0xd4   : > { %v7585_v32 = vsel %vm6600_vm7, %v2929_v58, %v2930_v53  ;;  %v5373_v37 = vrot.slane %v5357_v45, 9  ;;  %v5389_v34 = vcombine.low %v2830_v22, %v2833_v39  ;;  %v9077_v60 = vld [vmem:[#allocation9_spill] sm:$0xff] }
  0xd5   : > { %5919 = vmatmul.mubr.msk.bf16.gmra.mxu1 %vm712_vm3, %v6162_v19  ;;  %v5339_v19 = vcombine.low %v2458_v16, %v2468_v21  ;;  %v7602_v47 = vsel %vm6600_vm7, %v2936_v46, %v2937_v51  ;;  %v2839_v21 = vrot.slane %v6182_v44, 5  ;;  %v4596_v53 = vsel %vm761_vm0, %v9077_v60, 0  ;;  %v5486_v63 = vld [vmem:[%s6270_s28 + $0x18] sm:$0xf]  ;;  %v5487_v57 = vld [vmem:[%s6270_s28 + $0x1c] sm:$0xf] }
  0xd6   : > { %5922 = vmatprep.mubr.msk.bf16.mxu1 %vm712_vm3, %v6163_v27  ;;  %v6181_v27 = vld [vmem:[%s6270_s28 + $0x1c] sm:$0xf]  ;;  %v5489_v51 = vld [vmem:[%s6270_s28 + $0x24] sm:$0xf]  ;;  %v3644_v45 = vshrl.u32 %v5486_v63, 16  ;;  %v3653_v39 = vshll.u32 %v5487_v57, 16 }
  0xd7   : > { %v2836_v36 = vrot.slane %v6181_v27, 5  ;;  %v3647_v27 = vshll.u32 %v5486_v63, 16  ;;  %v3668_v46 = vshrl.u32 %v5489_v51, 16  ;;  %v6169_v44 = vld [vmem:[%s6270_s28 + $0x48] sm:$0xff]   ;;  %v5567_v60 = vld [vmem:[%s6270_s28 + $0x18] sm:$0xe] }
  0xd8   : > { %v7643_v63 = vld [vmem:[%s6270_s28 + $0x2c] sm:$0x1] }
  0xd9   : > { %v2838_v16 = vrot.slane %v2836_v36, 4  ;;  %v2837_v17 = vsel %vm6600_vm7, %v5373_v37, %v2836_v36  ;;  %v7627_v36 = vld [vmem:[%s6270_s28 + $0x28] sm:$0xf]  ;;  %v6168_v37 = vld [vmem:[%s6270_s28 + $0x3c] sm:$0xff]   ;;  %v3670_v18 = vrot.slane %v3668_v46, 4 }
  0xda   : > { %5957 = vmatmul.mubr.msk.bf16.gmra.mxu0 %vm712_vm3, %v5339_v19  ;;  %v9078_v19 = vld [vmem:[#allocation11_spill] sm:$0xff] }
  0xdb   : > { %5996 = vmatprep.mubr.msk.bf16.mxu0 %vm712_vm3, %v6165_v49  ;;  %v2840_v20 = vsel %vm6600_vm7, %v2838_v16, %v2839_v21  ;;  %v4126_v22 = vsel %vm761_vm0, %v9078_v19, 0  ;;  %v3657_v49 = vshrl.u32 %v5487_v57, 16  ;;  %v3681_v16 = vshrl.u32 %v7627_v36, 16  ;;  %v5488_v21 = vld [vmem:[%s6270_s28 + $0x20] sm:$0x1] }
  0xdc   : > { %v5390_v58 = vcombine.low %v2837_v17, %v2840_v20  ;;  %v3646_v17 = vrot.slane %v3644_v45, 4  ;;  %v3649_v20 = vrot.slane %v3647_v27, 5  ;;  %v5492_v19 = vld [vmem:[%s6270_s28 + $0x30] sm:$0xf]  ;;  %v3663_v45 = vshll.u32 %v5488_v21, 16 }
  0xdd   : > { %5923 = vmatmul.mubr.msk.bf16.gmra.mxu1 %vm712_vm3, %v6164_v52  ;;  %v3671_v52 = vshll.u32 %v5489_v51, 16  ;;  %v3683_v51 = vrot.slane %v3681_v16, 4  ;;  %v5583_v27 = vrot.slane %v5567_v60, 9  ;;  %v4390_v46 = vrot.slane %v5488_v21, 5  ;;  %v5568_v16 = vld [vmem:[%s6270_s28 + $0x24] sm:$0xe] }
  0xde   : > { %5962 = vmatprep.mubr.msk.bf16.mxu1 %vm712_vm3, %v5389_v34  ;;  %v3677_v34 = vshll.u32 %v7627_v36, 16  ;;  %v6170_v21 = vld [vmem:[%s6270_s28 + $0x54] sm:$0xff]   ;;  %v3695_v10 = vshll.u32 %v5492_v19, 16  ;;  %v6171_v60 = vld [vmem:[%s6270_s28 + $0x60] sm:$0xff]  }
  0xdf   : > { %v3673_v11 = vrot.slane %v3671_v52, 5  ;;  %v3687_v52 = vshll.u32 %v7643_v63, 16 }
  0xe2   : > { %5997 = vmatmul.mubr.msk.bf16.vlgmr.msra.gmra.mxu0 %vm712_vm3, %v6166_v26  ;;  %v7639_v26 = vrot.slane %v3653_v39, 5 }
  0xe3   : > { %6063 = vmatpush3.bf16.msra.mxu0 %v4596_v53  ;;  %6000 = vmatprep.mubr.msk.bf16.mxu0 %vm712_vm3, %v6167_v38  ;;  %v3659_v38 = vrot.slane %v3657_v49, 4  ;;  %v4387_v53 = vrot.slane %v5487_v57, 5  ;;  %v7653_v57 = vld [vmem:[%s6270_s28 + $0x34] sm:$0xf] }
  0xe5   : > { %5963 = vmatmul.mubr.msk.bf16.vlgmr.msra.gmra.mxu1 %vm712_vm3, %v5390_v58  ;;  %v7648_v58 = vrot.slane %v3677_v34, 5  ;;  %v3660_v39 = vor.u32 %v3659_v38, %v7639_v26  ;;  %v4389_v49 = vrot.slane %v4387_v53, 4  ;;  %v3674_v34 = vor.u32 %v3673_v11, %v3670_v18 }
  0xe6   : > { %6029 = vmatpush3.bf16.msra.mxu1 %v4126_v22  ;;  %5966 = vmatprep.mubr.msk.bf16.mxu1 %vm712_vm3, %v5391_v5  ;;  %v7646_v5 = vpop.f32.mrf.mxu0  ;;  %v3650_v22 = vor.u32 %v3649_v20, %v3646_v17  ;;  %v3692_v17 = vshrl.u32 %v5492_v19, 16  ;;  %v3705_v38 = vshrl.u32 %v7653_v57, 16  ;;  %v7678_v61 = vsel %vm6600_vm7, %v5583_v27, %v4387_v53  ;;  %v5495_v19 = vld [vmem:[%s6270_s28 + $0x3c] sm:$0xf] }
  0xe7   : > { %v3684_v41 = vor.u32 %v3683_v51, %v7648_v58  ;;  %v3661_v8 = vrot.slane %v3660_v39, 4  ;;  %v3689_v11 = vrot.slane %v3687_v52, 5  ;;  %v5584_v51 = vrot.slane %v5568_v16, 9  ;;  %v7692_v39 = vld [vmem:[%s6270_s28 + $0x38] sm:$0x1] }
  0xe8   : > { %v7670_v20 = vpop.f32.mrf.mxu0  ;;  %v3651_v18 = vrot.slane %v3650_v22, 4  ;;  %v3675_v12 = vrot.slane %v3674_v34, 4  ;;  %v4397_v22 = vrot.slane %v7643_v63, 5  ;;  %v3707_v52 = vrot.slane %v3705_v38, 4 }
  0xe9   : > { %v3685_v27 = vrot.slane %v3684_v41, 4  ;;  %v3716_v34 = vshrl.u32 %v5495_v19, 16  ;;  %v3719_v16 = vshll.u32 %v5495_v19, 16  ;;  %v7705_v41 = vld [vmem:[%s6270_s28 + $0x40] sm:$0xf] }
  0xea   : > { %6001 = vmatmul.mubr.msk.bf16.gmra.mxu0 %vm712_vm3, %v6168_v37  ;;  %v7689_v53 = vpop.f32.mrf.mxu0  ;;  %v3656_v63 = vsel %vm6314_vm4, %v3651_v18, %v7639_v26  ;;  %v3680_v26 = vsel %vm6314_vm4, %v3675_v12, %v7648_v58  ;;  %v5569_v18 = vld [vmem:[%s6270_s28 + $0x30] sm:$0xe]  ;;  %v3725_v24 = vshll.u32 %v7705_v41, 16  ;;  %v3729_v33 = vshrl.u32 %v7705_v41, 16 }
  0xeb   : > { %6004 = vmatprep.mubr.msk.bf16.mxu0 %vm712_vm3, %v6169_v44  ;;  %v7661_v37 = vpop.f32.mrf.mxu1  ;;  %v4394_v44 = vrot.slane %v7627_v36, 5  ;;  %v3665_v36 = vrot.slane %v3663_v45, 5  ;;  %v3694_v45 = vrot.slane %v3692_v17, 4  ;;  %v3690_v58 = vsel %vm6314_vm4, %v3685_v27, %v3689_v11 }
  0xec   : > { %9079 = vst [vmem:[#allocation4_spill] sm:$0xff] %v7661_v37  ;;  %v7734_v12 = vpop.f32.mrf.mxu0  ;;  %v3721_v19 = vrot.slane %v3719_v16, 5  ;;  %v3753_v11 = vshrl.u32 %v7727_v7, 16 }
  0xed   : > { %5967 = vmatmul.mubr.msk.bf16.gmra.mxu1 %vm712_vm3, %v5392_v48  ;;  %v3701_v48 = vshll.u32 %v7653_v57, 16  ;;  %v7685_v6 = vpop.f32.mrf.mxu1  ;;  %v4396_v4 = vrot.slane %v4394_v44, 4  ;;  %v3666_v17 = vsel %vm6314_vm4, %v3661_v8, %v3665_v36  ;;  %v4401_v36 = vrot.slane %v7653_v57, 5  ;;  %v6173_v8 = vld [vmem:[%s6270_s28 + $0x78] sm:$0xff]  }
  0xee   : > { %5970 = vmatprep.mubr.msk.bf16.mxu1 %vm712_vm3, %v5393_v40  ;;  %v7682_v40 = vsel %vm6600_vm7, %v4389_v49, %v4390_v46  ;;  %9080 = vst [vmem:[#allocation3_spill] sm:$0xff] %v7685_v6  ;;  %v3697_v49 = vrot.slane %v3695_v10, 5  ;;  %v7748_v27 = vcombine.low %v3656_v63, %v3666_v17  ;;  %v7750_v57 = vcombine.low %v3680_v26, %v3690_v58  ;;  %v7764_v17 = vld [vmem:[%s6270_s28 + $0x58] sm:$0xf]  ;;  %v7770_v58 = vld [vmem:[%s6270_s28 + $0x44] sm:$0x1] }
  0xef   : > { %v7694_v46 = vrot.slane %v3701_v48, 5  ;;  %v7711_v10 = vpop.f32.mrf.mxu1  ;;  %v7718_v48 = vsel %vm6600_vm7, %v5584_v51, %v4394_v44  ;;  %v7722_v38 = vsel %vm6600_vm7, %v4396_v4, %v4397_v22  ;;  %v3718_v51 = vrot.slane %v3716_v34, 4  ;;  %v5501_v34 = vld [vmem:[%s6270_s28 + $0x54] sm:$0xf] }
  0xf0   : > { %9081 = vst [vmem:[#allocation6_spill] sm:$0xff] %v7711_v10  ;;  %v3698_v44 = vor.u32 %v3697_v49, %v3694_v45  ;;  %v3743_v22 = vshll.u32 %v5498_v3, 16  ;;  %v4403_v13 = vrot.slane %v4401_v36, 4  ;;  %v4404_v63 = vrot.slane %v7692_v39, 5  ;;  %v5570_v49 = vld [vmem:[%s6270_s28 + $0x3c] sm:$0xe] }
  0xf1   : > { %v3708_v4 = vor.u32 %v3707_v52, %v7694_v46  ;;  %v7746_v45 = vpop.f32.mrf.mxu1  ;;  %v5585_v52 = vrot.slane %v5569_v18, 9  ;;  %v3722_v18 = vor.u32 %v3721_v19, %v3718_v51  ;;  %v9084_v6 = vcombine.low %v7459_v28, %v7475_v1 }
  0xf2   : > { %6005 = vmatmul.mubr.msk.bf16.gmra.mxu0 %vm712_vm3, %v6170_v21  ;;  %v3749_v21 = vshll.u32 %v7727_v7, 16  ;;  %9082 = vst [vmem:[#allocation5_spill] sm:$0xff] %v7746_v45  ;;  %v3745_v45 = vrot.slane %v3743_v22, 5  ;;  %v3764_v51 = vshrl.u32 %v5501_v34, 16  ;;  %v3767_v19 = vshll.u32 %v5501_v34, 16 }
  0xf3   : > { %6008 = vmatprep.mubr.msk.bf16.mxu0 %vm712_vm3, %v6171_v60  ;;  %v3711_v60 = vshll.u32 %v7692_v39, 16  ;;  %v7767_v26 = vrot.slane %v3708_v4, 4  ;;  %v3755_v39 = vrot.slane %v3753_v11, 4  ;;  %v7805_v22 = vsel %vm6600_vm7, %v4403_v13, %v4404_v63 }
  0xf4   : > { %v7775_v10 = vrot.slane %v3749_v21, 5  ;;  %v9086_v21 = vcombine.low %v7468_v25, %v7487_v14  ;;  %v4408_v25 = vrot.slane %v7705_v41, 5  ;;  %v6175_v14 = vld [vmem:[%s6270_s28 + $0x90] sm:$0xff]   ;;  %v5586_v1 = vrot.slane %v5570_v49, 9  ;;  %v5504_v41 = vld [vmem:[%s6270_s28 + $0x60] sm:$0xf] }
  0xf5   : > { %5971 = vmatmul.mubr.msk.bf16.gmra.mxu1 %vm712_vm3, %v5394_v35  ;;  %v6172_v35 = vld [vmem:[%s6270_s28 + $0x6c] sm:$0xff]   ;;  %v7760_v62 = vrot.slane %v3711_v60, 5  ;;  %v3766_v37 = vrot.slane %v3764_v51, 4 }
  0xf6   : > { %5974 = vmatprep.mubr.msk.bf16.mxu1 %vm712_vm3, %v5395_v23  ;;  %v3740_v23 = vshrl.u32 %v5498_v3, 16  ;;  %v7758_v3 = vrot.slane %v3698_v44, 4  ;;  %v3731_v44 = vrot.slane %v3729_v33, 4  ;;  %v3777_v33 = vshrl.u32 %v7764_v17, 16 }
  0xf7   : > { %v7756_v16 = vpop.f32.mrf.mxu0  ;;  %v3756_v13 = vor.u32 %v3755_v39, %v7775_v10  ;;  %v4415_v39 = vrot.slane %v7727_v7, 5  ;;  %v9090_v7 = vcombine.low %v7479_v43, %v7496_v2  ;;  %v9092_v43 = vcombine.low %v7500_v59, %v7510_v50  ;;  %v6176_v2 = vld [vmem:[%s6270_s28 + $0x9c] sm:$0xff]  }
  0xf8   : > { %9083 = vst [vmem:[#allocation8_spill] sm:$0xff] %v7756_v16  ;;  %v3742_v60 = vrot.slane %v3740_v23, 4  ;;  %v6174_v23 = vld [vmem:[%s6270_s28 + $0x84] sm:$0xff]   ;;  %v7832_v16 = vld [vmem:[%s6270_s28 + $0x5c] sm:$0x1]  ;;  %v4422_v59 = vrot.slane %v7764_v17, 5 }
  0xf9   : > { %v7793_v28 = vpop.f32.mrf.mxu0 }
  0xfa   : > { %6009 = vmatmul.mubr.msk.bf16.gmra.mxu0 %vm712_vm3, %v6172_v35  ;;  %v7772_v35 = vrot.slane %v3725_v24, 5  ;;  %v3773_v24 = vshll.u32 %v7764_v17, 16  ;;  %9087 = vst [vmem:[#allocation12_spill] sm:$0xff] %v7793_v28  ;;  %v3769_v28 = vrot.slane %v3767_v19, 5 }
  0xfb   : > { %6012 = vmatprep.mubr.msk.bf16.mxu0 %vm712_vm3, %v6173_v8  ;;  %v7781_v4 = vpop.f32.mrf.mxu1  ;;  %v7784_v8 = vld [vmem:[%s6270_s28 + $0x50] sm:$0x1]  ;;  %v7825_v49 = vpop.f32.mrf.mxu0 }
  0xfc   : > { %9085 = vst [vmem:[#allocation7_spill] sm:$0xff] %v7781_v4  ;;  %v3732_v34 = vor.u32 %v3731_v44, %v7772_v35  ;;  %v7815_v4 = vrot.slane %v3722_v18, 4  ;;  %v7822_v11 = vrot.slane %v3773_v24, 5  ;;  %v3779_v44 = vrot.slane %v3777_v33, 4  ;;  %9089 = vst [vmem:[#allocation2_spill] sm:$0xff] %v7825_v49 }
  0xfd   : > { %5975 = vmatmul.mubr.msk.bf16.gmra.mxu1 %vm712_vm3, %v9084_v6  ;;  %v7801_v6 = vsel %vm6600_vm7, %v5585_v52, %v4401_v36  ;;  %v3746_v36 = vor.u32 %v3745_v45, %v3742_v60  ;;  %v3759_v52 = vshll.u32 %v7784_v8, 16  ;;  %v7820_v63 = vpop.f32.mrf.mxu1  ;;  %v4410_v18 = vrot.slane %v4408_v25, 4  ;;  %v5571_v24 = vld [vmem:[%s6270_s28 + $0x48] sm:$0xe] }
  0xfe   : > { %5978 = vmatprep.mubr.msk.bf16.mxu1 %vm712_vm3, %v9086_v21  ;;  %v3735_v21 = vshll.u32 %v7770_v58, 16  ;;  %9088 = vst [vmem:[#allocation10_spill] sm:$0xff] %v7820_v63  ;;  %v4411_v60 = vrot.slane %v7770_v58, 5  ;;  %v3733_v51 = vrot.slane %v3732_v34, 4  ;;  %v3788_v33 = vshrl.u32 %v5504_v41, 16 }
  0xff   : > { %v7838_v63 = vsel %vm6600_vm7, %v5586_v1, %v4408_v25  ;;  %v3747_v45 = vrot.slane %v3746_v36, 4  ;;  %v3757_v49 = vrot.slane %v3756_v13, 4  ;;  %v3761_v58 = vrot.slane %v3759_v52, 5  ;;  %v7853_v36 = vld [vmem:[%s6270_s28 + $0x64] sm:$0xf]  ;;  %v7860_v13 = vpop.f32.mrf.mxu0 }
 0x100   : > { %v3737_v19 = vrot.slane %v3735_v21, 5  ;;  %v3728_v34 = vsel %vm6314_vm4, %v7815_v4, %v7772_v35  ;;  %v3770_v21 = vor.u32 %v3769_v28, %v3766_v37  ;;  %v3780_v1 = vor.u32 %v3779_v44, %v7822_v11  ;;  %9093 = vst [vmem:[#allocation14_spill] sm:$0xff] %v7860_v13  ;;  %v5572_v28 = vld [vmem:[%s6270_s28 + $0x54] sm:$0xe]  ;;  %v6180_v13 = vld [vmem:[%s6270_s28 + $0xcc] sm:$0xff]  }
 0x101   : > { %v3783_v25 = vshll.u32 %v7832_v16, 16  ;;  %v7864_v52 = vsel %vm6600_vm7, %v4410_v18, %v4411_v60  ;;  %v5587_v35 = vrot.slane %v5571_v24, 9  ;;  %v4417_v37 = vrot.slane %v4415_v39, 4 }
 0x102   : > { %6013 = vmatmul.mubr.msk.bf16.gmra.mxu0 %vm712_vm3, %v6174_v23  ;;  %v3791_v23 = vshll.u32 %v5504_v41, 16  ;;  %v4418_v4 = vrot.slane %v7784_v8, 5  ;;  %v6177_v41 = vld [vmem:[%s6270_s28 + $0xa8] sm:$0xff]   ;;  %v3738_v44 = vsel %vm6314_vm4, %v3733_v51, %v3737_v19  ;;  %v3790_v50 = vrot.slane %v3788_v33, 4 }
 0x103   : > { %6016 = vmatprep.mubr.msk.bf16.mxu0 %vm712_vm3, %v6175_v14  ;;  %v7844_v14 = vpop.f32.mrf.mxu1  ;;  %v3762_v18 = vsel %vm6314_vm4, %v3757_v49, %v3761_v58  ;;  %v3797_v60 = vshll.u32 %v7853_v36, 16  ;;  %v3801_v8 = vshrl.u32 %v7853_v36, 16  ;;  %v3781_v51 = vrot.slane %v3780_v1, 4  ;;  %v7882_v33 = vld [vmem:[%s6270_s28 + $0x68] sm:$0x1] }
 0x104   : > { %9091 = vst [vmem:[#allocation13_spill] sm:$0xff] %v7844_v14  ;;  %v3771_v14 = vrot.slane %v3770_v21, 4  ;;  %v3785_v17 = vrot.slane %v3783_v25, 5  ;;  %v5588_v19 = vrot.slane %v5572_v28, 9  ;;  %v9096_v49 = vsel %vm6314_vm4, %v7767_v26, %v7760_v62  ;;  %v5507_v25 = vld [vmem:[%s6270_s28 + $0x6c] sm:$0xf] }
 0x105   : > { %5979 = vmatmul.mubr.msk.bf16.gmra.mxu1 %vm712_vm3, %v9090_v7  ;;  %v3793_v7 = vrot.slane %v3791_v23, 5  ;;  %v7879_v24 = vpop.f32.mrf.mxu1  ;;  %v7903_v21 = vsel %vm6600_vm7, %v5587_v35, %v4415_v39  ;;  %v7907_v1 = vsel %vm6600_vm7, %v4417_v37, %v4418_v4  ;;  %v7910_v62 = vcombine.low %v3728_v34, %v3738_v44  ;;  %v5573_v4 = vld [vmem:[%s6270_s28 + $0x60] sm:$0xe]  ;;  %v5513_v44 = vld [vmem:[%s6270_s28 + $0x84] sm:$0xf] }
 0x106   : > { %5982 = vmatprep.mubr.msk.bf16.mxu1 %vm712_vm3, %v9092_v43  ;;  %v3752_v43 = vsel %vm6314_vm4, %v3747_v45, %v7775_v10  ;;  %9094 = vst [vmem:[#allocation15_spill] sm:$0xff] %v7879_v24  ;;  %v9097_v45 = vsel %vm6314_vm4, %v7758_v3, %v7694_v46  ;;  %v4424_v46 = vrot.slane %v4422_v59, 4  ;;  %v4425_v3 = vrot.slane %v7832_v16, 5 }
 0x107   : > { %v7897_v23 = vcombine.low %v9097_v45, %v9096_v49  ;;  %9098 = vst [vmem:[#allocation11_spill] sm:$0xff] %v7910_v62  ;;  %v3794_v26 = vor.u32 %v3793_v7, %v3790_v50  ;;  %v7917_v28 = vcombine.low %v3752_v43, %v3762_v18  ;;  %v7919_v39 = vrot.slane %v3797_v60, 5 }
 0x108   : > { %v7885_v10 = vpop.f32.mrf.mxu0  ;;  %v7921_v35 = vrot.slane %v3801_v8, 4  ;;  %v3807_v37 = vshll.u32 %v7882_v33, 16  ;;  %v9100_v34 = vcombine.low %v7518_v54, %v7533_v56  ;;  %v3776_v50 = vsel %vm6314_vm4, %v3771_v14, %v7822_v11  ;;  %v5510_v54 = vld [vmem:[%s6270_s28 + $0x78] sm:$0xf] }
 0x109   : > { %9095 = vst [vmem:[#allocation9_spill] sm:$0xff] %v7885_v10  ;;  %9099 = vst [vmem:[#allocation16_spill] sm:$0xff] %v7917_v28  ;;  %v3786_v7 = vsel %vm6314_vm4, %v3781_v51, %v3785_v17  ;;  %v7941_v43 = vsel %vm6600_vm7, %v5588_v19, %v4422_v59  ;;  %v9102_v56 = vcombine.low %v7525_v29, %v7546_v42  ;;  %v3812_v60 = vshrl.u32 %v5507_v25, 16  ;;  %v7953_v51 = vld [vmem:[%s6270_s28 + $0x7c] sm:$0xf]  ;;  %v6179_v59 = vld [vmem:[%s6270_s28 + $0xc0] sm:$0xff]  }
 0x10a   : > { %6017 = vmatmul.mubr.msk.bf16.gmra.mxu0 %vm712_vm3, %v6176_v2  ;;  %v7915_v2 = vld [vmem:[%s6270_s28 + $0x70] sm:$0xf]  ;;  %v7948_v18 = vpop.f32.mrf.mxu0  ;;  %v3815_v8 = vshll.u32 %v5507_v25, 16  ;;  %v7958_v17 = vsel %vm6600_vm7, %v4424_v46, %v4425_v3  ;;  %v7960_v29 = vrot.slane %v3794_v26, 4  ;;  %v5589_v42 = vrot.slane %v5573_v4, 9 }
 0x10b   : > { %6020 = vmatprep.mubr.msk.bf16.mxu0 %vm712_vm3, %v6177_v41  ;;  %v6178_v41 = vld [vmem:[%s6270_s28 + $0xb4] sm:$0xff]   ;;  %9103 = vst [vmem:[#allocation18_spill] sm:$0xff] %v7948_v18  ;;  %v3821_v11 = vshll.u32 %v7915_v2, 16  ;;  %v3825_v14 = vshrl.u32 %v7915_v2, 16  ;;  %v4429_v19 = vrot.slane %v7853_v36, 5  ;;  %v7963_v49 = vcombine.low %v3776_v50, %v3786_v7 }
 0x10c   : > { %v3804_v45 = vor.u32 %v7921_v35, %v7919_v39  ;;  %v7967_v25 = vrot.slane %v3807_v37, 5  ;;  %v3836_v46 = vshrl.u32 %v5510_v54, 16  ;;  %v3839_v3 = vshll.u32 %v5510_v54, 16  ;;  %v7979_v4 = vld [vmem:[%s6270_s28 + $0x88] sm:$0xf]  ;;  %v7982_v35 = vpop.f32.mrf.mxu0 }
 0x10d   : > { %5983 = vmatmul.mubr.msk.bf16.gmra.mxu1 %vm712_vm3, %v9100_v34  ;;  %v7929_v16 = vpop.f32.mrf.mxu1  ;;  %9104 = vst [vmem:[#allocation19_spill] sm:$0xff] %v7963_v49  ;;  %v4432_v34 = vrot.slane %v7882_v33, 5  ;;  %v3845_v36 = vshll.u32 %v7953_v51, 16  ;;  %v3849_v26 = vshrl.u32 %v7953_v51, 16  ;;  %9106 = vst [vmem:[#allocation21_spill] sm:$0xff] %v7982_v35  ;;  %v3814_v33 = vrot.slane %v3812_v60, 4 }
 0x10e   : > { %9101 = vst [vmem:[#allocation17_spill] sm:$0xff] %v7929_v16  ;;  %5986 = vmatprep.mubr.msk.bf16.mxu1 %vm712_vm3, %v9102_v56  ;;  %v7971_v56 = vld [vmem:[%s6270_s28 + $0x74] sm:$0x1]  ;;  %v3817_v37 = vrot.slane %v3815_v8, 5  ;;  %v7984_v50 = vrot.slane %v3821_v11, 5  ;;  %v3827_v7 = vrot.slane %v3825_v14, 4  ;;  %v9107_v54 = vcombine.low %v7537_v30, %v7553_v55  ;;  %v8012_v49 = vpop.f32.mrf.mxu0 }
 0x10f   : > { %v7974_v58 = vpop.f32.mrf.mxu1  ;;  %v4431_v16 = vrot.slane %v4429_v19, 4  ;;  %v7997_v60 = vld [vmem:[%s6270_s28 + $0x80] sm:$0x1]  ;;  %v8000_v8 = vld [vmem:[%s6270_s28 + $0x6c] sm:$0xe]  ;;  %v3860_v11 = vshrl.u32 %v5513_v44, 16 }
 0x110   : > { %9105 = vst [vmem:[#allocation20_spill] sm:$0xff] %v7974_v58  ;;  %v7993_v58 = vsel %vm6600_vm7, %v5589_v42, %v4429_v19  ;;  %v3863_v14 = vshll.u32 %v5513_v44, 16  ;;  %v3873_v24 = vshrl.u32 %v7979_v4, 16  ;;  %v3838_v19 = vrot.slane %v3836_v46, 4  ;;  %9109 = vst [vmem:[#allocation23_spill] sm:$0xff] %v8012_v49 }
 0x111   : > { %v8008_v42 = vpop.f32.mrf.mxu1  ;;  %v3841_v35 = vrot.slane %v3839_v3, 5  ;;  %v8010_v18 = vrot.slane %v3845_v36, 5  ;;  %v3851_v10 = vrot.slane %v3849_v26, 4  ;;  %v9110_v44 = vcombine.low %v7557_v15, %v7585_v32  ;;  %v8031_v32 = vld [vmem:[%s6270_s28 + $0x8c] sm:$0x1] }
 0x112   : > { %6021 = vmatmul.mubr.msk.bf16.gmra.mxu0 %vm712_vm3, %v6178_v41  ;;  %v3831_v41 = vshll.u32 %v7971_v56, 16  ;;  %9108 = vst [vmem:[#allocation22_spill] sm:$0xff] %v8008_v42  ;;  %v3818_v30 = vor.u32 %v3817_v37, %v3814_v33  ;;  %v3828_v55 = vor.u32 %v3827_v7, %v7984_v50  ;;  %v3855_v46 = vshll.u32 %v7997_v60, 16  ;;  %v5575_v33 = vld [vmem:[%s6270_s28 + $0x78] sm:$0xe] }
 0x113   : > { %6024 = vmatprep.mubr.msk.bf16.mxu0 %vm712_vm3, %v6179_v59  ;;  %v3869_v59 = vshll.u32 %v7979_v4, 16  ;;  %v8022_v3 = vrot.slane %v3804_v45, 4  ;;  %v8026_v36 = vsel %vm6600_vm7, %v4431_v16, %v4432_v34  ;;  %v5590_v26 = vrot.slane %v8000_v8, 9  ;;  %v8036_v42 = vpop.f32.mrf.mxu1  ;;  %v5516_v8 = vld [vmem:[%s6270_s28 + $0x90] sm:$0xf] }
 0x114   : > { %v4443_v15 = vrot.slane %v7953_v51, 5  ;;  %v3862_v37 = vrot.slane %v3860_v11, 4  ;;  %v3865_v7 = vrot.slane %v3863_v14, 5  ;;  %9111 = vst [vmem:[#allocation24_spill] sm:$0xff] %v8036_v42  ;;  %v3833_v45 = vrot.slane %v3831_v41, 5 }
 0x115   : > { %5987 = vmatmul.mubr.msk.bf16.gmra.mxu1 %vm712_vm3, %v9107_v54  ;;  %v4436_v54 = vrot.slane %v7915_v2, 5  ;;  %v8034_v2 = vrot.slane %v3869_v59, 5  ;;  %v4439_v49 = vrot.slane %v7971_v56, 5  ;;  %v3842_v16 = vor.u32 %v3841_v35, %v3838_v19  ;;  %v8045_v59 = vld [vmem:[%s6270_s28 + $0x94] sm:$0xf] }
 0x116   : > { %5990 = vmatprep.mubr.msk.bf16.mxu1 %vm712_vm3, %v9110_v44  ;;  %v3875_v44 = vrot.slane %v3873_v24, 4  ;;  %v3852_v34 = vor.u32 %v3851_v10, %v8010_v18  ;;  %v3819_v51 = vrot.slane %v3818_v30, 4  ;;  %v3829_v11 = vrot.slane %v3828_v55, 4 }
 0x117   : > { %v4438_v62 = vrot.slane %v4436_v54, 4  ;;  %v3857_v14 = vrot.slane %v3855_v46, 5  ;;  %v9112_v24 = vcombine.low %v7678_v61, %v7682_v40  ;;  %v5591_v56 = vrot.slane %v5575_v33, 9 }
 0x118   : > { %v4445_v35 = vrot.slane %v4443_v15, 4  ;;  %v4446_v10 = vrot.slane %v7997_v60, 5  ;;  %v3879_v41 = vshll.u32 %v8031_v32, 16  ;;  %v3876_v30 = vor.u32 %v3875_v44, %v8034_v2 }
 0x119   : > { %v3884_v55 = vshrl.u32 %v5516_v8, 16  ;;  %v3887_v46 = vshll.u32 %v5516_v8, 16  ;;  %v9114_v61 = vcombine.low %v7597_v9, %v7602_v47  ;;  %v3843_v40 = vrot.slane %v3842_v16, 4 }
 0x11a   : > { %v8041_v28 = vpop.f32.mrf.mxu0  ;;  %6025 = vmatmul.mubr.msk.bf16.gmra.mxu0 %vm712_vm3, %v6180_v13  ;;  %v3866_v13 = vor.u32 %v3865_v7, %v3862_v37  ;;  %v3853_v33 = vrot.slane %v3852_v34, 4  ;;  %v3893_v60 = vshll.u32 %v8045_v59, 16  ;;  %v3810_v37 = vsel %vm6314_vm4, %v8022_v3, %v7967_v25 }
 0x11b   : > { %6064 = vmatprep.mubr.msk.bf16.mxu0 %vm712_vm3, %v9112_v24  ;;  %v3897_v24 = vshrl.u32 %v8045_v59, 16  ;;  %v3824_v9 = vsel %vm6314_vm4, %v3819_v51, %v7984_v50  ;;  %v8077_v47 = vsel %vm6600_vm7, %v5590_v26, %v4436_v54  ;;  %v8081_v7 = vsel %vm6600_vm7, %v4438_v62, %v4439_v49  ;;  %v5576_v54 = vld [vmem:[%s6270_s28 + $0x84] sm:$0xe]  ;;  %v9153_v31 = vld [vmem:[#allocation24_spill] sm:$0xff] }
 0x11c   : > { %v8053_v19 = vpop.f32.mrf.mxu0  ;;  %v8089_v25 = vsel %vm6600_vm7, %v5591_v56, %v4443_v15  ;;  %v8093_v50 = vsel %vm6600_vm7, %v4445_v35, %v4446_v10  ;;  %v3881_v3 = vrot.slane %v3879_v41, 5  ;;  %v3867_v62 = vrot.slane %v3866_v13, 4  ;;  %v8117_v13 = vld [vmem:[%s6270_s28 + $0x98] sm:$0x1] }
 0x11d   : > { %9113 = vst [vmem:[#allocation25_spill] sm:$0xff] %v8053_v19  ;;  %v8056_v42 = vpop.f32.mrf.mxu1  ;;  %5991 = vmatmul.mubr.msk.bf16.gmra.mxu1 %vm712_vm3, %v9114_v61  ;;  %v3877_v49 = vrot.slane %v3876_v30, 4  ;;  %v3886_v16 = vrot.slane %v3884_v55, 4  ;;  %v3889_v34 = vrot.slane %v3887_v46, 5  ;;  %v3848_v15 = vsel %vm6314_vm4, %v3843_v40, %v8010_v18  ;;  %v5519_v30 = vld [vmem:[%s6270_s28 + $0x9c] sm:$0xf] }
 0x11e   : > { %v8064_v19 = vpop.f32.mrf.mxu0  ;;  %6030 = vmatprep.mubr.msk.bf16.mxu1 %vm712_vm3, %v7748_v27  ;;  %v3834_v27 = vsel %vm6314_vm4, %v3829_v11, %v3833_v45  ;;  %v3858_v45 = vsel %vm6314_vm4, %v3853_v33, %v3857_v14  ;;  %v8105_v51 = vrot.slane %v3893_v60, 5  ;;  %v3899_v11 = vrot.slane %v3897_v24, 4  ;;  %v8148_v24 = vld [vmem:[%s6270_s28 + $0xa0] sm:$0xf] }
 0x11f   : > { %v8083_v44 = vpop.f32.mrf.mxu1  ;;  %v9115_v35 = vcombine.low %v7718_v48, %v7722_v38  ;;  %v5605_v10 = vcombine.low %v7941_v43, %v7958_v17  ;;  %v5606_v41 = vcombine.low %v7993_v58, %v8026_v36  ;;  %v5592_v18 = vrot.slane %v5576_v54, 9 }
 0x120   : > { %v8096_v26 = vpop.f32.mrf.mxu0  ;;  %v4450_v14 = vrot.slane %v7979_v4, 5  ;;  %v9116_v48 = vcombine.low %v7801_v6, %v7805_v22  ;;  %v9117_v38 = vsel %vm6314_vm4, %v7960_v29, %v7919_v39  ;;  %v8133_v61 = vcombine.low %v3824_v9, %v3834_v27  ;;  %v5577_v29 = vld [vmem:[%s6270_s28 + $0x90] sm:$0xe]  ;;  %v9124_v4 = vld [vmem:[#allocation2_spill] sm:$0xff] }
 0x121   : > { %v8098_v8 = vpop.f32.mrf.mxu1  ;;  %v8131_v46 = vcombine.low %v9117_v38, %v3810_v37  ;;  %v8139_v60 = vcombine.low %v3848_v15, %v3858_v45  ;;  %v3872_v6 = vsel %vm6314_vm4, %v3867_v62, %v8034_v2  ;;  %v3882_v22 = vsel %vm6314_vm4, %v3877_v49, %v3881_v3 }
 0x122   : > { %v5862_v56 = vpop.f32.mrf.mxu0  ;;  %6065 = vmatmul.mubr.msk.bf16.vlgmr.msra.gmra.mxu0 %vm712_vm3, %v9115_v35  ;;  %v3890_v39 = vor.u32 %v3889_v34, %v3886_v16  ;;  %v3900_v9 = vor.u32 %v3899_v11, %v8105_v51  ;;  %v3903_v27 = vshll.u32 %v8117_v13, 16  ;;  %v3908_v54 = vshrl.u32 %v5519_v30, 16 }
 0x123   : > { %v8120_v55 = vpop.f32.mrf.mxu1  ;;  %6068 = vmatprep.mubr.msk.bf16.mxu0 %vm712_vm3, %v9116_v48  ;;  %v3911_v15 = vshll.u32 %v5519_v30, 16  ;;  %v8159_v3 = vsel %vm6600_vm7, %v5592_v18, %v4450_v14  ;;  %v4452_v62 = vrot.slane %v4450_v14, 4  ;;  %v4453_v49 = vrot.slane %v8031_v32, 5 }
 0x124   : > { %v1516_v33 = vpop.f32.mrf.mxu0  ;;  %v5593_v16 = vrot.slane %v5577_v29, 9  ;;  %v4457_v34 = vrot.slane %v8045_v59, 5  ;;  %v3917_v11 = vshll.u32 %v8148_v24, 16  ;;  %v3921_v35 = vshrl.u32 %v8148_v24, 16 }
 0x125   : > { %v5828_v37 = vpop.f32.mrf.mxu1  ;;  %6031 = vmatmul.mubr.msk.bf16.vlgmr.msra.gmra.mxu1 %vm712_vm3, %v7750_v57  ;;  %v8168_v48 = vcombine.low %v3872_v6, %v3882_v22  ;;  %v8170_v18 = vrot.slane %v3890_v39, 4  ;;  %v3901_v32 = vrot.slane %v3900_v9, 4  ;;  %v3905_v38 = vrot.slane %v3903_v27, 5  ;;  %v5522_v22 = vld [vmem:[%s6270_s28 + $0xa8] sm:$0xf] }
 0x126   : > { %v1100_v45 = vadd.f32 %v5828_v37, %v7646_v5  ;;  %v5863_v2 = vpop.f32.mrf.mxu0  ;;  %6034 = vmatprep.mubr.msk.bf16.mxu1 %vm712_vm3, %v7897_v23  ;;  %v3910_v29 = vrot.slane %v3908_v54, 4  ;;  %v3913_v59 = vrot.slane %v3911_v15, 5  ;;  %v4460_v6 = vrot.slane %v8117_v13, 5  ;;  %v8196_v27 = vld [vmem:[%s6270_s28 + $0xac] sm:$0xf] }
 0x127   : > { %v1091_v57 = vpop.f32.mrf.mxu1  ;;  %v3923_v9 = vrot.slane %v3921_v35, 4  ;;  %v9121_v35 = vld [vmem:[#allocation8_spill] sm:$0xff] }
 0x128   : > { %v8165_v5 = vadd.f32 %v5862_v56, %v1100_v45  ;;  %v1092_v23 = vadd.f32 %v1091_v57, %v7670_v20  ;;  %v1519_v30 = vpop.f32.mrf.mxu0  ;;  %v9118_v45 = vcombine.low %v7838_v63, %v7864_v52  ;;  %v8181_v20 = vsel %vm6600_vm7, %v4452_v62, %v4453_v49  ;;  %v5578_v62 = vld [vmem:[%s6270_s28 + $0x9c] sm:$0xe] }
 0x129   : > { %v5829_v14 = vpop.f32.mrf.mxu1  ;;  %v4459_v63 = vrot.slane %v4457_v34, 4  ;;  %v8193_v52 = vrot.slane %v3917_v11, 5  ;;  %v4464_v49 = vrot.slane %v8148_v24, 5  ;;  %v3941_v24 = vshll.u32 %v8196_v27, 16 }
 0x12a   : > { %v8172_v37 = vadd.f32 %v1516_v33, %v1092_v23  ;;  %v1103_v40 = vadd.f32 %v5829_v14, %v7689_v53  ;;  %v5866_v56 = vpop.f32.mrf.mxu0  ;;  %6069 = vmatmul.mubr.msk.bf16.gmra.mxu0 %vm712_vm3, %v9118_v45  ;;  %v9119_v33 = vcombine.low %v7903_v21, %v7907_v1  ;;  %v8191_v53 = vsel %vm6600_vm7, %v5593_v16, %v4457_v34  ;;  %v5521_v1 = vld [vmem:[%s6270_s28 + $0xa4] sm:$0x1]  ;;  %v9120_v16 = vld [vmem:[#allocation11_spill] sm:$0xff] }
 0x12b   : > { %v1094_v39 = vpop.f32.mrf.mxu1  ;;  %v3896_v21 = vsel %vm6314_vm4, %v8170_v18, %v8105_v51  ;;  %v3932_v34 = vshrl.u32 %v5522_v22, 16  ;;  %v9122_v51 = vld [vmem:[#allocation16_spill] sm:$0xff]  ;;  %v3945_v18 = vshrl.u32 %v8196_v27, 16 }
 0x12c   : > { %6072 = vmatprep.mubr.msk.bf16.mxu0 %vm712_vm3, %v9119_v33  ;;  %v8198_v54 = vadd.f32 %v5863_v2, %v1103_v40  ;;  %v1095_v13 = vadd.f32 %v1094_v39, %v7734_v12  ;;  %v1532_v15 = vpop.f32.mrf.mxu0  ;;  %v3906_v40 = vsel %vm6314_vm4, %v3901_v32, %v3905_v38  ;;  %v3914_v2 = vor.u32 %v3913_v59, %v3910_v29  ;;  %v9123_v59 = vld [vmem:[#allocation12_spill] sm:$0xff] }
 0x12d   : > { %v5832_v57 = vpop.f32.mrf.mxu1  ;;  %6035 = vmatmul.mubr.msk.bf16.gmra.mxu1 %vm712_vm3, %v9120_v16  ;;  %v3935_v12 = vshll.u32 %v5522_v22, 16  ;;  %v8221_v39 = vsel %vm6600_vm7, %v4459_v63, %v4460_v6  ;;  %v3924_v32 = vor.u32 %v3923_v9, %v8193_v52  ;;  %v3927_v38 = vshll.u32 %v5521_v1, 16 }
 0x12e   : > { %v8212_v11 = vadd.f32 %v1519_v30, %v1095_v13  ;;  %v1116_v23 = vadd.f32 %v5832_v57, %v9121_v35  ;;  %v5867_v14 = vpop.f32.mrf.mxu0  ;;  %6038 = vmatprep.mubr.msk.bf16.mxu1 %vm712_vm3, %v9122_v51  ;;  %v5594_v30 = vrot.slane %v5578_v62, 9  ;;  %v4466_v13 = vrot.slane %v4464_v49, 4 }
 0x12f   : > { %v1107_v45 = vpop.f32.mrf.mxu1  ;;  %v4467_v57 = vrot.slane %v5521_v1, 5  ;;  %v8229_v51 = vrot.slane %v3914_v2, 4  ;;  %v3934_v6 = vrot.slane %v3932_v34, 4  ;;  %v3937_v63 = vrot.slane %v3935_v12, 5  ;;  %v8239_v1 = vld [vmem:[%s6270_s28 + $0xb0] sm:$0x1] }
 0x130   : > { %v8224_v29 = vadd.f32 %v5866_v56, %v1116_v23  ;;  %v1108_v22 = vadd.f32 %v1107_v45, %v9123_v59  ;;  %v1535_v33 = vpop.f32.mrf.mxu0  ;;  %v8241_v23 = vrot.slane %v3941_v24, 5  ;;  %v3947_v2 = vrot.slane %v3945_v18, 4  ;;  %v9125_v12 = vld [vmem:[#allocation14_spill] sm:$0xff] }
 0x131   : > { %v5833_v16 = vpop.f32.mrf.mxu1  ;;  %v8251_v43 = vrot.slane %v3924_v32, 4  ;;  %v8253_v17 = vrot.slane %v3927_v38, 5  ;;  %v8261_v58 = vsel %vm6600_vm7, %v5594_v30, %v4464_v49  ;;  %v8265_v36 = vsel %vm6600_vm7, %v4466_v13, %v4467_v57  ;;  %v8277_v30 = vld [vmem:[%s6270_s28 + $0xb8] sm:$0xf] }
 0x132   : > { %v8231_v9 = vadd.f32 %v1532_v15, %v1108_v22  ;;  %v1119_v62 = vadd.f32 %v5833_v16, %v9124_v4  ;;  %v5870_v56 = vpop.f32.mrf.mxu0  ;;  %6073 = vmatmul.mubr.msk.bf16.gmra.mxu0 %vm712_vm3, %v5605_v10  ;;  %v8247_v15 = vcombine.low %v3896_v21, %v3906_v40  ;;  %v5579_v10 = vld [vmem:[%s6270_s28 + $0xa8] sm:$0xe]  ;;  %v3938_v32 = vor.u32 %v3937_v63, %v3934_v6  ;;  %v9127_v22 = vld [vmem:[#allocation9_spill] sm:$0xff] }
 0x133   : > { %v1110_v45 = vpop.f32.mrf.mxu1  ;;  %6076 = vmatprep.mubr.msk.bf16.mxu0 %vm712_vm3, %v5606_v41  ;;  %v5525_v41 = vld [vmem:[%s6270_s28 + $0xb4] sm:$0xf]  ;;  %v9126_v40 = vld [vmem:[#allocation19_spill] sm:$0xff]  ;;  %v3951_v38 = vshll.u32 %v8239_v1, 16  ;;  %v4471_v49 = vrot.slane %v8196_v27, 5  ;;  %v3948_v16 = vor.u32 %v3947_v2, %v8241_v23  ;;  %v3930_v27 = vsel %vm6314_vm4, %v8251_v43, %v8253_v17 }
 0x134   : > { %v8256_v34 = vadd.f32 %v5867_v14, %v1119_v62  ;;  %v1111_v24 = vadd.f32 %v1110_v45, %v9125_v12  ;;  %v1548_v18 = vpop.f32.mrf.mxu0  ;;  %v5595_v62 = vrot.slane %v5579_v10, 9  ;;  %v3956_v6 = vshrl.u32 %v5525_v41, 16 }
 0x135   : > { %v5836_v21 = vpop.f32.mrf.mxu1  ;;  %6039 = vmatmul.mubr.msk.bf16.gmra.mxu1 %vm712_vm3, %v9126_v40  ;;  %v3959_v63 = vshll.u32 %v5525_v41, 16  ;;  %v3965_v2 = vshll.u32 %v8277_v30, 16  ;;  %v3969_v10 = vshrl.u32 %v8277_v30, 16  ;;  %v5528_v40 = vld [vmem:[%s6270_s28 + $0xc0] sm:$0xf]  ;;  %v3939_v4 = vrot.slane %v3938_v32, 4 }
 0x136   : > { %v8279_v59 = vadd.f32 %v1535_v33, %v1111_v24  ;;  %v1132_v13 = vadd.f32 %v5836_v21, %v9127_v22  ;;  %v5871_v57 = vpop.f32.mrf.mxu0  ;;  %6042 = vmatprep.mubr.msk.bf16.mxu1 %vm712_vm3, %v8131_v46  ;;  %v9129_v24 = vld [vmem:[#allocation18_spill] sm:$0xff]  ;;  %v3953_v43 = vrot.slane %v3951_v38, 5  ;;  %v4473_v17 = vrot.slane %v4471_v49, 4 }
 0x137   : > { %v1123_v45 = vpop.f32.mrf.mxu1  ;;  %v4474_v33 = vrot.slane %v8239_v1, 5  ;;  %v8307_v14 = vsel %vm6600_vm7, %v5595_v62, %v4471_v49  ;;  %v8310_v32 = vld [vmem:[%s6270_s28 + $0xc4] sm:$0xf]  ;;  %v9133_v1 = vcombine.low %v8089_v25, %v8093_v50  ;;  %v8322_v62 = vrot.slane %v3965_v2, 5 }
 0x138   : > { %v8291_v12 = vadd.f32 %v5870_v56, %v1132_v13  ;;  %v1124_v21 = vadd.f32 %v1123_v45, %v9129_v24  ;;  %v1551_v46 = vpop.f32.mrf.mxu0  ;;  %v9131_v56 = vld [vmem:[#allocation21_spill] sm:$0xff]  ;;  %v9132_v45 = vcombine.low %v8077_v47, %v8081_v7  ;;  %v3949_v24 = vrot.slane %v3948_v16, 4  ;;  %v9134_v16 = vld [vmem:[#allocation23_spill] sm:$0xff] }
 0x139   : > { %v5837_v22 = vpop.f32.mrf.mxu1  ;;  %v3980_v47 = vshrl.u32 %v5528_v40, 16  ;;  %v3983_v7 = vshll.u32 %v5528_v40, 16  ;;  %v3944_v25 = vsel %vm6314_vm4, %v3939_v4, %v8241_v23  ;;  %v8331_v50 = vsel %vm6600_vm7, %v4473_v17, %v4474_v33  ;;  %v5580_v40 = vld [vmem:[%s6270_s28 + $0xb4] sm:$0xe] }
 0x13a   : > { %9128 = vst [vmem:[#allocation11_spill] sm:$0xff] %v8291_v12  ;;  %v8298_v35 = vadd.f32 %v1548_v18, %v1124_v21  ;;  %v1135_v41 = vadd.f32 %v5837_v22, %v9131_v56  ;;  %v5874_v13 = vpop.f32.mrf.mxu0  ;;  %6077 = vmatmul.mubr.msk.bf16.gmra.mxu0 %vm712_vm3, %v9132_v45  ;;  %v8317_v18 = vld [vmem:[%s6270_s28 + $0xbc] sm:$0x1]  ;;  %v3958_v21 = vrot.slane %v3956_v6, 4  ;;  %v3961_v22 = vrot.slane %v3959_v63, 5 }
 0x13b   : > { %v1126_v38 = vpop.f32.mrf.mxu1  ;;  %6080 = vmatprep.mubr.msk.bf16.mxu0 %vm712_vm3, %v9133_v1  ;;  %v3993_v6 = vshrl.u32 %v8310_v32, 16  ;;  %v3975_v23 = vshll.u32 %v8317_v18, 16  ;;  %v4478_v17 = vrot.slane %v8277_v30, 5  ;;  %v9135_v1 = vld [vmem:[#allocation25_spill] sm:$0xff] }
 0x13c   : > { %9130 = vst [vmem:[#allocation8_spill] sm:$0xff] %v8298_v35  ;;  %v8319_v56 = vadd.f32 %v5871_v57, %v1135_v41  ;;  %v1127_v45 = vadd.f32 %v1126_v38, %v9134_v16  ;;  %v1564_v49 = vpop.f32.mrf.mxu0  ;;  %v3971_v35 = vrot.slane %v3969_v10, 4  ;;  %v3989_v57 = vshll.u32 %v8310_v32, 16 }
 0x13d   : > { %v5840_v12 = vpop.f32.mrf.mxu1  ;;  %6043 = vmatmul.mubr.msk.bf16.gmra.mxu1 %vm712_vm3, %v8133_v61  ;;  %v3954_v61 = vsel %vm6314_vm4, %v3949_v24, %v3953_v43  ;;  %v3962_v33 = vor.u32 %v3961_v22, %v3958_v21  ;;  %v3982_v41 = vrot.slane %v3980_v47, 4  ;;  %v3985_v38 = vrot.slane %v3983_v7, 5 }
 0x13e   : > { %v8335_v63 = vadd.f32 %v1551_v46, %v1127_v45  ;;  %v1148_v2 = vadd.f32 %v5840_v12, %v8041_v28  ;;  %v5875_v10 = vpop.f32.mrf.mxu0  ;;  %6046 = vmatprep.mubr.msk.bf16.mxu1 %vm712_vm3, %v8139_v60  ;;  %v9136_v60 = vsel %vm6314_vm4, %v8229_v51, %v8193_v52  ;;  %v3972_v24 = vor.u32 %v3971_v35, %v8322_v62 }
 0x13f   : > { %v1139_v4 = vpop.f32.mrf.mxu1  ;;  %v8353_v43 = vcombine.low %v9136_v60, %v3930_v27  ;;  %v8356_v30 = vcombine.low %v3944_v25, %v3954_v61  ;;  %v8360_v22 = vrot.slane %v3989_v57, 5  ;;  %v3995_v47 = vrot.slane %v3993_v6, 4  ;;  %v5530_v27 = vld [vmem:[%s6270_s28 + $0xc8] sm:$0x1] }
 0x140   : > { %v8345_v46 = vadd.f32 %v5874_v13, %v1148_v2  ;;  %v1140_v28 = vadd.f32 %v1139_v4, %v9135_v1  ;;  %v1567_v12 = vpop.f32.mrf.mxu0  ;;  %v5612_v13 = vcombine.low %v8307_v14, %v8331_v50  ;;  %v9137_v52 = vcombine.low %v8159_v3, %v8181_v20  ;;  %v5531_v14 = vld [vmem:[%s6270_s28 + $0xcc] sm:$0xf]  ;;  %v8381_v20 = vld [vmem:[%s6270_s28 + $0xd0] sm:$0xf]  ;;  %v5581_v4 = vld [vmem:[%s6270_s28 + $0xc0] sm:$0xe] }
 0x141   : > { %v5841_v21 = vpop.f32.mrf.mxu1  ;;  %v8369_v35 = vrot.slane %v3975_v23, 5  ;;  %v5596_v51 = vrot.slane %v5580_v40, 9  ;;  %v9138_v50 = vcombine.low %v8191_v53, %v8221_v39  ;;  %v4481_v57 = vrot.slane %v8317_v18, 5 }
 0x142   : > { %v8362_v7 = vadd.f32 %v1564_v49, %v1140_v28  ;;  %v1151_v16 = vadd.f32 %v5841_v21, %v8064_v19  ;;  %v5878_v45 = vpop.f32.mrf.mxu0  ;;  %6081 = vmatmul.mubr.msk.bf16.gmra.mxu0 %vm712_vm3, %v9137_v52  ;;  %v8377_v49 = vrot.slane %v3962_v33, 4  ;;  %v4480_v19 = vrot.slane %v4478_v17, 4 }
 0x143   : > { %v1142_v25 = vpop.f32.mrf.mxu1  ;;  %6084 = vmatprep.mubr.msk.bf16.mxu0 %vm712_vm3, %v9138_v50  ;;  %v3986_v3 = vor.u32 %v3985_v38, %v3982_v41  ;;  %v8386_v23 = vrot.slane %v3972_v24, 4  ;;  %v4485_v53 = vrot.slane %v8310_v32, 5  ;;  %v3996_v33 = vor.u32 %v3995_v47, %v8360_v22 }
 0x144   : > { %v8383_v6 = vadd.f32 %v5875_v10, %v1151_v16  ;;  %v1143_v2 = vadd.f32 %v1142_v25, %v8096_v26  ;;  %v1580_v61 = vpop.f32.mrf.mxu0  ;;  %v3999_v18 = vshll.u32 %v5530_v27, 16  ;;  %v4004_v40 = vshrl.u32 %v5531_v14, 16  ;;  %v9141_v10 = vld [vmem:[#allocation4_spill] sm:$0xff]  ;;  %v9142_v16 = vld [vmem:[#allocation3_spill] sm:$0xff] }
 0x145   : > { %v5844_v39 = vpop.f32.mrf.mxu1  ;;  %6047 = vmatmul.mubr.msk.bf16.gmra.mxu1 %vm712_vm3, %v8168_v48  ;;  %v4007_v41 = vshll.u32 %v5531_v14, 16  ;;  %v4013_v28 = vshll.u32 %v8381_v20, 16  ;;  %v4017_v32 = vshrl.u32 %v8381_v20, 16  ;;  %v4479_v48 = vsel %vm6600_vm7, %v5596_v51, %v4478_v17  ;;  %v9143_v17 = vld [vmem:[#allocation6_spill] sm:$0xff] }
 0x146   : > { %9139 = vst [vmem:[#allocation16_spill] sm:$0xff] %v8383_v6  ;;  %v8393_v38 = vadd.f32 %v1567_v12, %v1143_v2  ;;  %v1164_v1 = vadd.f32 %v5844_v39, %v9141_v10  ;;  %v5879_v26 = vpop.f32.mrf.mxu0  ;;  %6050 = vmatprep.mubr.msk.bf16.mxu1 %vm712_vm3, %v8247_v15  ;;  %v4482_v24 = vsel %vm6600_vm7, %v4480_v19, %v4481_v57  ;;  %v3987_v21 = vrot.slane %v3986_v3, 4 }
 0x147   : > { %v1155_v60 = vpop.f32.mrf.mxu1  ;;  %v5597_v12 = vrot.slane %v5581_v4, 9  ;;  %v4487_v25 = vrot.slane %v4485_v53, 4  ;;  %v4488_v15 = vrot.slane %v5530_v27, 5  ;;  %v3997_v2 = vrot.slane %v3996_v33, 4  ;;  %v5533_v33 = vld [vmem:[%s6270_s28 + $0xd4] sm:$0x1] }
 0x148   : > { %9140 = vst [vmem:[#allocation12_spill] sm:$0xff] %v8393_v38  ;;  %v8404_v47 = vadd.f32 %v5878_v45, %v1164_v1  ;;  %v1156_v52 = vadd.f32 %v1155_v60, %v9142_v16  ;;  %v1583_v14 = vpop.f32.mrf.mxu0  ;;  %v4001_v39 = vrot.slane %v3999_v18, 5  ;;  %v4006_v10 = vrot.slane %v4004_v40, 4  ;;  %v9145_v18 = vld [vmem:[#allocation5_spill] sm:$0xff] }
 0x149   : > { %v5845_v50 = vpop.f32.mrf.mxu1  ;;  %v4009_v38 = vrot.slane %v4007_v41, 5  ;;  %v9144_v45 = vcombine.low %v8261_v58, %v8265_v36  ;;  %v8414_v57 = vrot.slane %v4013_v28, 5  ;;  %v4019_v27 = vrot.slane %v4017_v32, 4 }
 0x14a   : > { %v8407_v6 = vadd.f32 %v1580_v61, %v1156_v52  ;;  %v1167_v51 = vadd.f32 %v5845_v50, %v9143_v17  ;;  %v5882_v19 = vpop.f32.mrf.mxu0  ;;  %v3968_v61 = vsel %vm6314_vm4, %v8377_v49, %v8322_v62  ;;  %v3978_v4 = vsel %vm6314_vm4, %v8386_v23, %v8369_v35  ;;  %v5582_v62 = vld [vmem:[%s6270_s28 + $0xcc] sm:$0xe] }
 0x14b   : > { %6085 = vmatmul.mubr.msk.bf16.gmra.mxu0 %vm712_vm3, %v9144_v45  ;;  %v1158_v3 = vpop.f32.mrf.mxu1  ;;  %v4492_v58 = vrot.slane %v8381_v20, 5  ;;  %v4489_v1 = vsel %vm6600_vm7, %v4487_v25, %v4488_v15  ;;  %v5613_v35 = vcombine.low %v4479_v48, %v4482_v24  ;;  %v3992_v20 = vsel %vm6314_vm4, %v3987_v21, %v8360_v22  ;;  %v9147_v25 = vld [vmem:[#allocation10_spill] sm:$0xff] }
 0x14c   : > { %6088 = vmatprep.mubr.msk.bf16.mxu0 %vm712_vm3, %v5612_v13  ;;  %v8427_v36 = vadd.f32 %v5879_v26, %v1167_v51  ;;  %v1159_v40 = vadd.f32 %v1158_v3, %v9145_v18  ;;  %v1596_v41 = vpop.f32.mrf.mxu0  ;;  %v4486_v13 = vsel %vm6600_vm7, %v5597_v12, %v4485_v53  ;;  %v4002_v23 = vsel %vm6314_vm4, %v3997_v2, %v4001_v39  ;;  %v9146_v53 = vld [vmem:[#allocation7_spill] sm:$0xff] }
 0x14d   : > { %v5848_v49 = vpop.f32.mrf.mxu1  ;;  %6051 = vmatmul.mubr.msk.bf16.gmra.mxu1 %vm712_vm3, %v8353_v43  ;;  %v4010_v26 = vor.u32 %v4009_v38, %v4006_v10  ;;  %v4020_v12 = vor.u32 %v4019_v27, %v8414_v57  ;;  %v4023_v43 = vshll.u32 %v5533_v33, 16  ;;  %v5614_v24 = vcombine.low %v4486_v13, %v4489_v1 }
 0x14e   : > { %v8442_v28 = vadd.f32 %v1583_v14, %v1159_v40  ;;  %v1180_v32 = vadd.f32 %v5848_v49, %v9146_v53  ;;  %v5883_v60 = vpop.f32.mrf.mxu0  ;;  %6054 = vmatprep.mubr.msk.bf16.mxu1 %vm712_vm3, %v8356_v30  ;;  %v5598_v16 = vrot.slane %v5582_v62, 9  ;;  %v4494_v52 = vrot.slane %v4492_v58, 4  ;;  %v9148_v30 = vld [vmem:[#allocation13_spill] sm:$0xff] }
 0x14f   : > { %v1171_v48 = vpop.f32.mrf.mxu1  ;;  %v4495_v22 = vrot.slane %v5533_v33, 5  ;;  %v5548_v50 = vcombine.low %v3968_v61, %v3978_v4  ;;  %v5549_v2 = vcombine.low %v3992_v20, %v4002_v23  ;;  %v4011_v39 = vrot.slane %v4010_v26, 4  ;;  %v9149_v33 = vld [vmem:[#allocation15_spill] sm:$0xff]  ;;  %v9150_v62 = vld [vmem:[#allocation17_spill] sm:$0xff]  ;;  %v9151_v26 = vld [vmem:[#allocation20_spill] sm:$0xff] }
 0x150   : > { %v8448_v21 = vadd.f32 %v5882_v19, %v1180_v32  ;;  %v1172_v38 = vadd.f32 %v1171_v48, %v9147_v25  ;;  %v1599_v14 = vpop.f32.mrf.mxu0  ;;  %v4021_v45 = vrot.slane %v4020_v12, 4  ;;  %v4025_v27 = vrot.slane %v4023_v43, 5  ;;  %v9152_v43 = vld [vmem:[#allocation22_spill] sm:$0xff] }
 0x151   : > { %v5849_v15 = vpop.f32.mrf.mxu1  ;;  %v4493_v19 = vsel %vm6600_vm7, %v5598_v16, %v4492_v58  ;;  %v4496_v61 = vsel %vm6600_vm7, %v4494_v52, %v4495_v22  ;;  %v4016_v13 = vsel %vm6314_vm4, %v4011_v39, %v8414_v57 }
 0x152   : > { %v8451_v10 = vadd.f32 %v1596_v41, %v1172_v38  ;;  %v1183_v17 = vadd.f32 %v5849_v15, %v9148_v30  ;;  %v5886_v51 = vpop.f32.mrf.mxu0  ;;  %v4026_v0 = vsel %vm6314_vm4, %v4021_v45, %v4025_v27 }
 0x153   : > { %6089 = vmatmul.mubr.msk.bf16.gmra.mxu0 %vm712_vm3, %v5613_v35  ;;  %v1174_v3 = vpop.f32.mrf.mxu1  ;;  %v5615_v35 = vcombine.low %v4493_v19, %v4496_v61  ;;  %v5550_v12 = vcombine.low %v4016_v13, %v4026_v0 }
 0x154   : > { %6092 = vmatprep.mubr.msk.bf16.mxu0 %vm712_vm3, %v5614_v24  ;;  %v8460_v4 = vadd.f32 %v5883_v60, %v1183_v17  ;;  %v1175_v18 = vadd.f32 %v1174_v3, %v9149_v33  ;;  %v1612_v40 = vpop.f32.mrf.mxu0 }
 0x155   : > { %v5852_v41 = vpop.f32.mrf.mxu1  ;;  %6055 = vmatmul.mubr.msk.bf16.gmra.mxu1 %vm712_vm3, %v5548_v50 }
 0x156   : > { %v8467_v1 = vadd.f32 %v1599_v14, %v1175_v18  ;;  %v1196_v49 = vadd.f32 %v5852_v41, %v9150_v62  ;;  %v5887_v58 = vpop.f32.mrf.mxu0  ;;  %6058 = vmatprep.mubr.msk.bf16.mxu1 %vm712_vm3, %v5549_v2 }
 0x157   : > { %v1187_v20 = vpop.f32.mrf.mxu1 }
 0x158   : > { %v8473_v23 = vadd.f32 %v5886_v51, %v1196_v49  ;;  %v1188_v53 = vadd.f32 %v1187_v20, %v9151_v26  ;;  %v1615_v32 = vpop.f32.mrf.mxu0 }
 0x159   : > { %v5853_v60 = vpop.f32.mrf.mxu1 }
 0x15a   : > { %v8476_v57 = vadd.f32 %v1612_v40, %v1188_v53  ;;  %v1199_v48 = vadd.f32 %v5853_v60, %v9152_v43  ;;  %v5890_v24 = vpop.f32.mrf.mxu0 }
 0x15b   : > { %6093 = vmatmul.mubr.msk.bf16.gmra.mxu0 %vm712_vm3, %v5615_v35  ;;  %v1190_v16 = vpop.f32.mrf.mxu1 }
 0x15c   : > { %v8480_v52 = vadd.f32 %v5887_v58, %v1199_v48  ;;  %v1191_v22 = vadd.f32 %v1190_v16, %v9153_v31  ;;  %v1628_v25 = vpop.f32.mrf.mxu0 }
 0x15d   : > { %v5856_v38 = vpop.f32.mrf.mxu1  ;;  %6059 = vmatmul.mubr.msk.bf16.gmra.mxu1 %vm712_vm3, %v5550_v12 }
 0x15e   : > { %v8484_v14 = vadd.f32 %v1615_v32, %v1191_v22  ;;  %v1212_v15 = vadd.f32 %v5856_v38, %v8056_v42  ;;  %v5891_v50 = vpop.f32.mrf.mxu0 }
 0x15f   : > { %v1203_v2 = vpop.f32.mrf.mxu1 }
 0x160   : > { %v8487_v39 = vadd.f32 %v5890_v24, %v1212_v15  ;;  %v1204_v30 = vadd.f32 %v1203_v2, %v8083_v44  ;;  %v1631_v17 = vpop.f32.mrf.mxu0 }
 0x161   : > { %v5857_v51 = vpop.f32.mrf.mxu1 }
 0x162   : > { %v8490_v45 = vadd.f32 %v1628_v25, %v1204_v30  ;;  %v1215_v27 = vadd.f32 %v5857_v51, %v8098_v8  ;;  %v5930_v3 = vpop.f32.mrf.mxu0  ;;  %v9154_v30 = vld [vmem:[#allocation11_spill] sm:$0xff] }
 0x163   : > { %v1206_v19 = vpop.f32.mrf.mxu1 }
 0x164   : > { %v8493_v61 = vadd.f32 %v5891_v50, %v1215_v27  ;;  %v1207_v33 = vadd.f32 %v1206_v19, %v8120_v55  ;;  %v2604_v18 = vpop.f32.mrf.mxu0 }
 0x165   : > { %v5896_v42 = vpop.f32.mrf.mxu1 }
 0x166   : > { %v8496_v40 = vadd.f32 %v1631_v17, %v1207_v33  ;;  %v2007_v41 = vadd.f32 %v5896_v42, %v8165_v5  ;;  %v5931_v13 = vpop.f32.mrf.mxu0 }
 0x167   : > { %v1878_v44 = vpop.f32.mrf.mxu1 }
 0x168   : > { %v8499_v62 = vadd.f32 %v5930_v3, %v2007_v41  ;;  %v2005_v49 = vadd.f32 %v1878_v44, %v8172_v37  ;;  %v2607_v58 = vpop.f32.mrf.mxu0  ;;  %v9155_v3 = vld [vmem:[#allocation8_spill] sm:$0xff] }
 0x169   : > { %v5897_v8 = vpop.f32.mrf.mxu1 }
 0x16a   : > { %v8502_v0 = vadd.f32 %v2604_v18, %v2005_v49  ;;  %v2008_v35 = vadd.f32 %v5897_v8, %v8198_v54  ;;  %v5934_v20 = vpop.f32.mrf.mxu0 }
 0x16b   : > { %v1881_v55 = vpop.f32.mrf.mxu1 }
 0x16c   : > { %v8505_v26 = vadd.f32 %v5931_v13, %v2008_v35  ;;  %v2006_v53 = vadd.f32 %v1881_v55, %v8212_v11  ;;  %v2620_v32 = vpop.f32.mrf.mxu0 }
 0x16d   : > { %v5900_v5 = vpop.f32.mrf.mxu1 }
 0x16e   : > { %v8508_v60 = vadd.f32 %v2607_v58, %v2006_v53  ;;  %v2011_v12 = vadd.f32 %v5900_v5, %v8224_v29  ;;  %v5935_v43 = vpop.f32.mrf.mxu0 }
 0x16f   : > { %v1894_v37 = vpop.f32.mrf.mxu1 }
 0x170   : > { %v8511_v48 = vadd.f32 %v5934_v20, %v2011_v12  ;;  %v2009_v24 = vadd.f32 %v1894_v37, %v8231_v9  ;;  %v2623_v16 = vpop.f32.mrf.mxu0 }
 0x171   : > { %v5901_v54 = vpop.f32.mrf.mxu1 }
 0x172   : > { %v8514_v31 = vadd.f32 %v2620_v32, %v2009_v24  ;;  %v2012_v22 = vadd.f32 %v5901_v54, %v8256_v34  ;;  %v5938_v25 = vpop.f32.mrf.mxu0  ;;  %v9157_v54 = vld [vmem:[#allocation12_spill] sm:$0xff] }
 0x173   : > { %v1897_v11 = vpop.f32.mrf.mxu1 }
 0x174   : > { %v8517_v38 = vadd.f32 %v5935_v43, %v2012_v22  ;;  %v2010_v15 = vadd.f32 %v1897_v11, %v8279_v59  ;;  %v2636_v50 = vpop.f32.mrf.mxu0  ;;  %v9156_v43 = vld [vmem:[#allocation16_spill] sm:$0xff] }
 0x175   : > { %v5904_v29 = vpop.f32.mrf.mxu1 }
 0x176   : > { %v8520_v2 = vadd.f32 %v2623_v16, %v2010_v15  ;;  %v2015_v17 = vadd.f32 %v5904_v29, %v9154_v30  ;;  %v5939_v51 = vpop.f32.mrf.mxu0 }
 0x177   : > { %v1910_v9 = vpop.f32.mrf.mxu1 }
 0x178   : > { %v8523_v27 = vadd.f32 %v5938_v25, %v2015_v17  ;;  %v2013_v19 = vadd.f32 %v1910_v9, %v9155_v3  ;;  %v2639_v33 = vpop.f32.mrf.mxu0 }
 0x179   : > { %v5905_v34 = vpop.f32.mrf.mxu1 }
 0x17a   : > { %v8526_v18 = vadd.f32 %v2636_v50, %v2013_v19  ;;  %v2016_v42 = vadd.f32 %v5905_v34, %v8319_v56  ;;  %v5942_v41 = vpop.f32.mrf.mxu0 }
 0x17b   : > { %v1913_v59 = vpop.f32.mrf.mxu1 }
 0x17c   : > { %v8529_v13 = vadd.f32 %v5939_v51, %v2016_v42  ;;  %v2014_v44 = vadd.f32 %v1913_v59, %v8335_v63  ;;  %v2652_v49 = vpop.f32.mrf.mxu0 }
 0x17d   : > { %v5908_v58 = vpop.f32.mrf.mxu1 }
 0x17e   : > { %v8532_v8 = vadd.f32 %v2639_v33, %v2014_v44  ;;  %v2019_v35 = vadd.f32 %v5908_v58, %v8345_v46  ;;  %v5943_v20 = vpop.f32.mrf.mxu0 }
 0x17f   : > { %v1926_v55 = vpop.f32.mrf.mxu1 }
 0x180   : > { %v8535_v53 = vadd.f32 %v5942_v41, %v2019_v35  ;;  %v2017_v32 = vadd.f32 %v1926_v55, %v8362_v7  ;;  %v2655_v5 = vpop.f32.mrf.mxu0 }
 0x181   : > { %v5909_v56 = vpop.f32.mrf.mxu1 }
 0x182   : > { %v8538_v12 = vadd.f32 %v2652_v49, %v2017_v32  ;;  %v2020_v37 = vadd.f32 %v5909_v56, %v9156_v43  ;;  %v5946_v24 = vpop.f32.mrf.mxu0 }
 0x183   : > { %v1929_v63 = vpop.f32.mrf.mxu1 }
 0x184   : > { %v8541_v16 = vadd.f32 %v5943_v20, %v2020_v37  ;;  %v2018_v22 = vadd.f32 %v1929_v63, %v9157_v54  ;;  %v2668_v25 = vpop.f32.mrf.mxu0 }
 0x185   : > { %v5912_v46 = vpop.f32.mrf.mxu1 }
 0x186   : > { %v8544_v11 = vadd.f32 %v2655_v5, %v2018_v22  ;;  %v2023_v15 = vadd.f32 %v5912_v46, %v8404_v47  ;;  %v5947_v50 = vpop.f32.mrf.mxu0 }
 0x187   : > { %v1942_v7 = vpop.f32.mrf.mxu1 }
 0x188   : > { %v8547_v29 = vadd.f32 %v5946_v24, %v2023_v15  ;;  %v2021_v30 = vadd.f32 %v1942_v7, %v8407_v6  ;;  %v2671_v17 = vpop.f32.mrf.mxu0 }
 0x189   : > { %v5913_v51 = vpop.f32.mrf.mxu1 }
 0x18a   : > { %v8550_v9 = vadd.f32 %v2668_v25, %v2021_v30  ;;  %v2024_v3 = vadd.f32 %v5913_v51, %v8427_v36  ;;  %v5950_v19 = vpop.f32.mrf.mxu0 }
 0x18b   : > { %v1945_v33 = vpop.f32.mrf.mxu1 }
 0x18c   : > { %v8553_v34 = vadd.f32 %v5947_v50, %v2024_v3  ;;  %v2022_v42 = vadd.f32 %v1945_v33, %v8442_v28  ;;  %v2684_v41 = vpop.f32.mrf.mxu0 }
 0x18d   : > { %v5916_v47 = vpop.f32.mrf.mxu1 }
 0x18e   : > { %9158 = vst [vmem:[#allocation2_spill] sm:$0xff] %v8553_v34  ;;  %v8556_v59 = vadd.f32 %v2671_v17, %v2022_v42  ;;  %v2027_v44 = vadd.f32 %v5916_v47, %v8448_v21  ;;  %v5951_v49 = vpop.f32.mrf.mxu0 }
 0x18f   : > { %v1958_v6 = vpop.f32.mrf.mxu1 }
 0x190   : > { %9159 = vst [vmem:[#allocation14_spill] sm:$0xff] %v8556_v59  ;;  %v8559_v58 = vadd.f32 %v5950_v19, %v2027_v44  ;;  %v2025_v35 = vadd.f32 %v1958_v6, %v8451_v10  ;;  %v2687_v20 = vpop.f32.mrf.mxu0 }
 0x191   : > { %v5917_v36 = vpop.f32.mrf.mxu1 }
 0x192   : > { %9160 = vst [vmem:[#allocation19_spill] sm:$0xff] %v8559_v58  ;;  %v8562_v55 = vadd.f32 %v2684_v41, %v2025_v35  ;;  %v2028_v32 = vadd.f32 %v5917_v36, %v8460_v4  ;;  %v5954_v5 = vpop.f32.mrf.mxu0 }
 0x193   : > { %v1961_v28 = vpop.f32.mrf.mxu1 }
 0x194   : > { %9161 = vst [vmem:[#allocation9_spill] sm:$0xff] %v8562_v55  ;;  %v8565_v56 = vadd.f32 %v5951_v49, %v2028_v32  ;;  %v2026_v43 = vadd.f32 %v1961_v28, %v8467_v1  ;;  %v2700_v37 = vpop.f32.mrf.mxu0 }
 0x195   : > { %v5920_v21 = vpop.f32.mrf.mxu1 }
 0x196   : > { %9162 = vst [vmem:[#allocation18_spill] sm:$0xff] %v8565_v56  ;;  %v8568_v24 = vadd.f32 %v2687_v20, %v2026_v43  ;;  %v2031_v63 = vadd.f32 %v5920_v21, %v8473_v23  ;;  %v5955_v54 = vpop.f32.mrf.mxu0 }
 0x197   : > { %v1974_v10 = vpop.f32.mrf.mxu1 }
 0x198   : > { %9163 = vst [vmem:[#allocation21_spill] sm:$0xff] %v8568_v24  ;;  %v8571_v22 = vadd.f32 %v5954_v5, %v2031_v63  ;;  %v2029_v25 = vadd.f32 %v1974_v10, %v8476_v57  ;;  %v2703_v46 = vpop.f32.mrf.mxu0 }
 0x199   : > { %v5921_v4 = vpop.f32.mrf.mxu1 }
 0x19a   : > { %9164 = vst [vmem:[#allocation23_spill] sm:$0xff] %v8571_v22  ;;  %v8574_v15 = vadd.f32 %v2700_v37, %v2029_v25  ;;  %v2032_v50 = vadd.f32 %v5921_v4, %v8480_v52  ;;  %v5958_v7 = vpop.f32.mrf.mxu0 }
 0x19b   : > { %v1977_v1 = vpop.f32.mrf.mxu1 }
 0x19c   : > { %9165 = vst [vmem:[#allocation25_spill] sm:$0xff] %v8574_v15  ;;  %v8577_v30 = vadd.f32 %v5955_v54, %v2032_v50  ;;  %v2030_v17 = vadd.f32 %v1977_v1, %v8484_v14  ;;  %v2716_v51 = vpop.f32.mrf.mxu0 }
 0x19d   : > { %v5924_v23 = vpop.f32.mrf.mxu1 }
 0x19e   : > { %9166 = vst [vmem:[#allocation4_spill] sm:$0xff] %v8577_v30  ;;  %v8580_v3 = vadd.f32 %v2703_v46, %v2030_v17  ;;  %v2035_v19 = vadd.f32 %v5924_v23, %v8487_v39  ;;  %v5959_v33 = vpop.f32.mrf.mxu0 }
 0x19f   : > { %v1990_v57 = vpop.f32.mrf.mxu1 }
 0x1a0   : > { %9167 = vst [vmem:[#allocation3_spill] sm:$0xff] %v8580_v3  ;;  %v8583_v42 = vadd.f32 %v5958_v7, %v2035_v19  ;;  %v2033_v41 = vadd.f32 %v1990_v57, %v8490_v45  ;;  %v2719_v47 = vpop.f32.mrf.mxu0 }
 0x1a1   : > { %v5925_v52 = vpop.f32.mrf.mxu1 }
 0x1a2   : > { %9168 = vst [vmem:[#allocation6_spill] sm:$0xff] %v8583_v42  ;;  %v8586_v44 = vadd.f32 %v2716_v51, %v2033_v41  ;;  %v2036_v49 = vadd.f32 %v5925_v52, %v8493_v61  ;;  %v8589_v6 = vpop.f32.mrf.mxu0 }
 0x1a3   : > { %v1993_v14 = vpop.f32.mrf.mxu1 }
 0x1a4   : > { %9169 = vst [vmem:[#allocation5_spill] sm:$0xff] %v8586_v44  ;;  %v8591_v35 = vadd.f32 %v5959_v33, %v2036_v49  ;;  %v2034_v20 = vadd.f32 %v1993_v14, %v8496_v40  ;;  %v8594_v39 = vpop.f32.mrf.mxu0 }
 0x1a5   : > { %v5964_v36 = vpop.f32.mrf.mxu1 }
 0x1a6   : > { %9170 = vst [vmem:[#allocation7_spill] sm:$0xff] %v8591_v35  ;;  %v8596_v32 = vadd.f32 %v2719_v47, %v2034_v20  ;;  %v8598_v5 = vpop.f32.mrf.mxu0 }
 0x1a7   : > { %v3074_v45 = vpop.f32.mrf.mxu1 }
 0x1a8   : > { %9171 = vst [vmem:[#allocation10_spill] sm:$0xff] %v8596_v32  ;;  %v8600_v28 = vpop.f32.mrf.mxu0 }
 0x1a9   : > { %v5965_v43 = vpop.f32.mrf.mxu1 }
 0x1aa   : > { %v8602_v37 = vpop.f32.mrf.mxu0 }
 0x1ab   : > { %v3077_v61 = vpop.f32.mrf.mxu1 }
 0x1ac   : > { %v8604_v21 = vpop.f32.mrf.mxu0 }
 0x1ad   : > { %v5968_v63 = vpop.f32.mrf.mxu1 }
 0x1ae   : > { %v8606_v54 = vpop.f32.mrf.mxu0 }
 0x1af   : > { %v3090_v40 = vpop.f32.mrf.mxu1 }
 0x1b0   : > { %v8608_v10 = vpop.f32.mrf.mxu0 }
 0x1b1   : > { %v5969_v25 = vpop.f32.mrf.mxu1 }
 0x1b2   : > { %v8610_v46 = vpop.f32.mrf.mxu0 }
 0x1b3   : > { %v3093_v4 = vpop.f32.mrf.mxu1 }
 0x1b4   : > { %v8612_v50 = vpop.f32.mrf.mxu0 }
 0x1b5   : > { %v5972_v7 = vpop.f32.mrf.mxu1 }
 0x1b6   : > { %v8614_v1 = vpop.f32.mrf.mxu0 }
 0x1b7   : > { %v3106_v17 = vpop.f32.mrf.mxu1 }
 0x1b8   : > { %v8616_v51 = vpop.f32.mrf.mxu0 }
 0x1b9   : > { %v5973_v23 = vpop.f32.mrf.mxu1 }
 0x1ba   : > { %v8618_v19 = vpop.f32.mrf.mxu0 }
 0x1bb   : > { %v8620_v33 = vpop.f32.mrf.mxu1 }
 0x1bc   : > { %v8622_v57 = vpop.f32.mrf.mxu0 }
 0x1bd   : > { %v5976_v41 = vpop.f32.mrf.mxu1 }
 0x1be   : > { %v8624_v47 = vpop.f32.mrf.mxu0 }
 0x1bf   : > { %v3122_v52 = vpop.f32.mrf.mxu1 }
 0x1c0   : > { %v8626_v49 = vpop.f32.mrf.mxu0 }
 0x1c1   : > { %v5977_v14 = vpop.f32.mrf.mxu1 }
 0x1c2   : > { %v8628_v20 = vpop.f32.mrf.mxu0 }
 0x1c3   : > { %v8630_v32 = vpop.f32.mrf.mxu1 }
 0x1c4   : > { %v8632_v35 = vpop.f32.mrf.mxu0 }
 0x1c5   : > { %9172 = vst [vmem:[#allocation13_spill] sm:$0xff] %v8632_v35  ;;  %v8634_v44 = vpop.f32.mrf.mxu1 }
 0x1c6   : > { %v8636_v42 = vpop.f32.mrf.mxu0 }
 0x1c7   : > { %9173 = vst [vmem:[#allocation15_spill] sm:$0xff] %v8636_v42  ;;  %v8638_v3 = vpop.f32.mrf.mxu1 }
 0x1c8   : > { %v8640_v30 = vpop.f32.mrf.mxu0 }
 0x1c9   : > { %9174 = vst [vmem:[#allocation17_spill] sm:$0xff] %v8640_v30  ;;  %v8642_v15 = vpop.f32.mrf.mxu1 }
 0x1ca   : > { %9175 = vst [vmem:[#allocation20_spill] sm:$0xff] %v8642_v15  ;;  %v8644_v22 = vpop.f32.mrf.mxu0 }
 0x1cb   : > { %9176 = vst [vmem:[#allocation22_spill] sm:$0xff] %v8644_v22  ;;  %v8646_v24 = vpop.f32.mrf.mxu1 }
 0x1cc   : > { %9177 = vst [vmem:[#allocation24_spill] sm:$0xff] %v8646_v24  ;;  %v8648_v56 = vpop.f32.mrf.mxu0 }
 0x1cd   : > { %9178 = vst [vmem:[#allocation11_spill] sm:$0xff] %v8648_v56  ;;  %v8650_v55 = vpop.f32.mrf.mxu1 }
 0x1ce   : > { %9179 = vst [vmem:[#allocation8_spill] sm:$0xff] %v8650_v55  ;;  %v8652_v58 = vpop.f32.mrf.mxu0 }
 0x1cf   : > { %9180 = vst [vmem:[#allocation16_spill] sm:$0xff] %v8652_v58  ;;  %v8654_v59 = vpop.f32.mrf.mxu1 }
 0x1d0   : > { %9181 = vst [vmem:[#allocation12_spill] sm:$0xff] %v8654_v59  ;;  %v8656_v34 = vpop.f32.mrf.mxu0 }
 0x1d1   : > { %9182 = vst [vmem:[#allocation26_spill] sm:$0xff] %v8656_v34  ;;  %v8658_v42 = vpop.f32.mrf.mxu1 }
 0x1d2   : > { %9183 = vst [vmem:[#allocation27_spill] sm:$0xff] %v8658_v42  ;;  %v8660_v35 = vpop.f32.mrf.mxu0 }
 0x1d3   : > { %9184 = vst [vmem:[#allocation28_spill] sm:$0xff] %v8660_v35  ;;  %v8662_v30 = vpop.f32.mrf.mxu1 }
 0x1d4   : > { %9185 = vst [vmem:[#allocation29_spill] sm:$0xff] %v8662_v30  ;;  %v8664_v15 = vpop.f32.mrf.mxu0 }
 0x1d5   : > { %9186 = vst [vmem:[#allocation30_spill] sm:$0xff] %v8664_v15  ;;  %v8666_v22 = vpop.f32.mrf.mxu1 }
 0x1d6   : > { %9187 = vst [vmem:[#allocation31_spill] sm:$0xff] %v8666_v22  ;;  %v8668_v24 = vpop.f32.mrf.mxu0 }
 0x1d7   : > { %9188 = vst [vmem:[#allocation32_spill] sm:$0xff] %v8668_v24  ;;  %v8670_v56 = vpop.f32.mrf.mxu1  ;;  %v3203_v24 = vadd.f32 %v5964_v36, %v8499_v62  ;;  %v3206_v36 = vadd.f32 %v3093_v4, %v8520_v2  ;;  %v3212_v2 = vadd.f32 %v5973_v23, %v8529_v13  ;;  %v9199_v23 = vld [vmem:[#allocation2_spill] sm:$0xff] }
 0x1d8   : > { %9189 = vst [vmem:[#allocation33_spill] sm:$0xff] %v8670_v56  ;;  %v8672_v55 = vpop.f32.mrf.mxu0  ;;  %v3201_v56 = vadd.f32 %v3074_v45, %v8502_v0 }
 0x1d9   : > { %9190 = vst [vmem:[#allocation34_spill] sm:$0xff] %v8672_v55  ;;  %v8674_v58 = vpop.f32.mrf.mxu1  ;;  %v3204_v55 = vadd.f32 %v5965_v43, %v8505_v26  ;;  %v3565_v62 = vadd.f32 %v8589_v6, %v3203_v24  ;;  %v3211_v26 = vadd.f32 %v5972_v7, %v8523_v27  ;;  %v8727_v6 = vadd.f32 %v8608_v10, %v3206_v36  ;;  %v9204_v36 = vld [vmem:[#allocation8_spill] sm:$0xff] }
 0x1da   : > { %9191 = vst [vmem:[#allocation35_spill] sm:$0xff] %v8674_v58  ;;  %v8676_v59 = vpop.f32.mrf.mxu0  ;;  %v3563_v0 = vadd.f32 %v8594_v39, %v3201_v56 }
 0x1db   : > { %9192 = vst [vmem:[#allocation36_spill] sm:$0xff] %v8676_v59  ;;  %v8678_v34 = vpop.f32.mrf.mxu1  ;;  %v3202_v59 = vadd.f32 %v3077_v61, %v8508_v60  ;;  %v8730_v13 = vadd.f32 %v8610_v46, %v3211_v26 }
 0x1dc   : > { %9193 = vst [vmem:[#allocation37_spill] sm:$0xff] %v8678_v34  ;;  %v8680_v42 = vpop.f32.mrf.mxu0  ;;  %v3207_v34 = vadd.f32 %v5968_v63, %v8511_v48  ;;  %v3566_v48 = vadd.f32 %v8598_v5, %v3204_v55  ;;  %v3210_v55 = vadd.f32 %v8620_v33, %v8532_v8 }
 0x1dd   : > { %9194 = vst [vmem:[#allocation38_spill] sm:$0xff] %v8680_v42  ;;  %v8682_v35 = vpop.f32.mrf.mxu1  ;;  %v3205_v42 = vadd.f32 %v3090_v40, %v8514_v31  ;;  %v3564_v45 = vadd.f32 %v8600_v28, %v3202_v59  ;;  %v3215_v59 = vadd.f32 %v5976_v41, %v8535_v53  ;;  %v3217_v28 = vadd.f32 %v8638_v3, %v8550_v9 }
 0x1de   : > { %9195 = vst [vmem:[#allocation39_spill] sm:$0xff] %v8682_v35  ;;  %v8684_v30 = vpop.f32.mrf.mxu0  ;;  %v3569_v31 = vadd.f32 %v8602_v37, %v3207_v34  ;;  %v3213_v34 = vadd.f32 %v3122_v52, %v8538_v12  ;;  %v3214_v12 = vadd.f32 %v8630_v32, %v8544_v11  ;;  %v8744_v37 = vld [vmem:[%s8966_s3] ss:$0 sm:$0xff]  ;;  %v8751_v32 = vadd.f32 %v8616_v51, %v3210_v55 }
 0x1df   : > { %9196 = vst [vmem:[#allocation40_spill] sm:$0xff] %v8684_v30  ;;  %v8686_v15 = vpop.f32.mrf.mxu1  ;;  %v3208_v30 = vadd.f32 %v5969_v25, %v8517_v38  ;;  %v3209_v38 = vadd.f32 %v3106_v17, %v8526_v18  ;;  %v8710_v61 = vadd.f32 %v8604_v21, %v3205_v42  ;;  %v3216_v18 = vadd.f32 %v5977_v14, %v8541_v16  ;;  %v8724_v42 = vld [vmem:[%s8965_s2] ss:$0 sm:$0xff]  ;;  %v9198_v17 = vld [vmem:[#allocation13_spill] sm:$0xff] }
 0x1e0   : > { %9197 = vst [vmem:[#allocation41_spill] sm:$0xff] %v8686_v15  ;;  %v8690_v22 = vpop.f32.mrf.mxu0  ;;  %v3219_v16 = vadd.f32 %v8634_v44, %v8547_v29  ;;  %v8747_v21 = vadd.f32 %v8614_v1, %v3212_v2  ;;  %v8754_v29 = vadd.f32 %v8618_v19, %v3215_v59  ;;  %v8757_v9 = vadd.f32 %v8622_v57, %v3213_v34  ;;  %v9200_v19 = vld [vmem:[#allocation20_spill] sm:$0xff]  ;;  %v9201_v14 = vld [vmem:[#allocation14_spill] sm:$0xff] }
 0x1e1   : > { %v8695_v58 = vpop.f32.mrf.mxu1  ;;  %v8713_v24 = vadd.f32 %v8606_v54, %v3208_v30  ;;  %v8733_v53 = vadd.f32 %v8612_v50, %v3209_v38  ;;  %v8760_v3 = vadd.f32 %v8624_v47, %v3216_v18  ;;  %v8766_v7 = vadd.f32 %v8626_v49, %v3214_v12  ;;  %v9206_v12 = vld [vmem:[#allocation17_spill] sm:$0xff] }
 0x1e2   : > { %v6066_v35 = vpop.f32.mrf.mxu0  ;;  %v8769_v1 = vadd.f32 %v8628_v20, %v3219_v16  ;;  %v8772_v51 = vadd.f32 %v9198_v17, %v3217_v28  ;;  %v3220_v33 = vadd.f32 %v9200_v19, %v9199_v23  ;;  %v9202_v20 = vld [vmem:[#allocation24_spill] sm:$0xff]  ;;  %v9208_v23 = vld [vmem:[#allocation9_spill] sm:$0xff] }
 0x1e3   : > { %v8699_v15 = vpop.f32.mrf.mxu1 }
 0x1e4   : > { %v4632_v60 = vpop.f32.mrf.mxu0 }
 0x1e5   : > { %v6032_v43 = vpop.f32.mrf.mxu1 }
 0x1e6   : > { %v4291_v56 = vadd.f32 %v6032_v43, %v3565_v62  ;;  %v6067_v27 = vpop.f32.mrf.mxu0  ;;  %v3218_v62 = vadd.f32 %v9202_v20, %v9201_v14 }
 0x1e7   : > { %v4162_v30 = vpop.f32.mrf.mxu1 }
 0x1e8   : > { %v4761_v39 = vadd.f32 %v6066_v35, %v4291_v56  ;;  %v4289_v8 = vadd.f32 %v4162_v30, %v3563_v0  ;;  %v4635_v5 = vpop.f32.mrf.mxu0  ;;  %v9203_v0 = vld [vmem:[#allocation19_spill] sm:$0xff]  ;;  %v8796_v16 = vadd.f32 %v9206_v12, %v3218_v62 }
 0x1e9   : > { %v6033_v35 = vpop.f32.mrf.mxu1  ;;  %v3223_v26 = vadd.f32 %v9204_v36, %v9203_v0 }
 0x1ea   : > { %v4800_v63 = vmul.f32 %v8724_v42, %v4761_v39  ;;  %v4759_v54 = vadd.f32 %v4632_v60, %v4289_v8  ;;  %v4292_v40 = vadd.f32 %v6033_v35, %v3566_v48  ;;  %v6070_v11 = vpop.f32.mrf.mxu0 }
 0x1eb   : > { %v4165_v44 = vpop.f32.mrf.mxu1 }
 0x1ec   : > { %v4839_v10 = vadd.f32 %v8744_v37, %v4800_v63  ;;  %v4798_v25 = vmul.f32 %v8724_v42, %v4759_v54  ;;  %v4762_v46 = vadd.f32 %v6067_v27, %v4292_v40  ;;  %v4290_v4 = vadd.f32 %v4165_v44, %v3564_v45  ;;  %v4648_v50 = vpop.f32.mrf.mxu0  ;;  %v9205_v27 = vld [vmem:[#allocation15_spill] sm:$0xff]  ;;  %v9207_v40 = vld [vmem:[#allocation22_spill] sm:$0xff] }
 0x1ed   : > { %v6036_v57 = vpop.f32.mrf.mxu1  ;;  %v8789_v55 = vadd.f32 %v9205_v27, %v3220_v33 }
 0x1ee   : > { %vm4871_vm8 = vcmp.gt.f32.partialorder %v4839_v10, 0.0  ;;  %v4903_v41 = vmul.f32 0.1, %v4839_v10  ;;  %v4837_v47 = vadd.f32 %v8744_v37, %v4798_v25  ;;  %v4801_v52 = vmul.f32 %v8724_v42, %v4762_v46  ;;  %v6071_v49 = vpop.f32.mrf.mxu0 }
 0x1ef   : > { %v4760_v60 = vadd.f32 %v4635_v5, %v4290_v4  ;;  %v4295_v48 = vadd.f32 %v6036_v57, %v3569_v31  ;;  %v4178_v45 = vpop.f32.mrf.mxu1 }
 0x1f0   : > { %v4935_v38 = vsel %vm4871_vm8, %v4839_v10, %v4903_v41  ;;  %vm4869_vm9 = vcmp.gt.f32.partialorder %v4837_v47, 0.0  ;;  %v4901_v43 = vmul.f32 0.1, %v4837_v47  ;;  %v4840_v2 = vadd.f32 %v8744_v37, %v4801_v52  ;;  %v4651_v56 = vpop.f32.mrf.mxu0 }
 0x1f1   : > { %4967 = vst [vmem:[%s8779_s25 + $0x10] sm:$0xff] %v4935_v38  ;;  %v4799_v59 = vmul.f32 %v8724_v42, %v4760_v60  ;;  %v4765_v34 = vadd.f32 %v6070_v11, %v4295_v48  ;;  %v4293_v18 = vadd.f32 %v4178_v45, %v8710_v61  ;;  %v6037_v30 = vpop.f32.mrf.mxu1  ;;  %v8802_v61 = vadd.f32 %v9207_v40, %v3223_v26  ;;  %v9210_v60 = vld [vmem:[#allocation18_spill] sm:$0xff]  ;;  %v9211_v48 = vld [vmem:[#allocation27_spill] sm:$0xff] }
 0x1f2   : > { %v4933_v39 = vsel %vm4869_vm9, %v4837_v47, %v4901_v43  ;;  %vm4872_vm10 = vcmp.gt.f32.partialorder %v4840_v2, 0.0  ;;  %v4904_v31 = vmul.f32 0.1, %v4840_v2  ;;  %v4296_v8 = vadd.f32 %v6037_v30, %v8713_v24  ;;  %v6074_v5 = vpop.f32.mrf.mxu0 }
 0x1f3   : > { %4965 = vst [vmem:[%s8779_s25] sm:$0xff] %v4933_v39  ;;  %v4838_v28 = vadd.f32 %v8744_v37, %v4799_v59  ;;  %v4804_v35 = vmul.f32 %v8724_v42, %v4765_v34  ;;  %v4763_v63 = vadd.f32 %v4648_v50, %v4293_v18  ;;  %v4181_v54 = vpop.f32.mrf.mxu1  ;;  %v9209_v50 = vld [vmem:[#allocation12_spill] sm:$0xff]  ;;  %v9212_v34 = vld [vmem:[#allocation21_spill] sm:$0xff] }
 0x1f4   : > { %v4936_v11 = vsel %vm4872_vm10, %v4840_v2, %v4904_v31  ;;  %v4766_v44 = vadd.f32 %v6071_v49, %v4296_v8  ;;  %v4294_v10 = vadd.f32 %v4181_v54, %v8727_v6  ;;  %v4664_v25 = vpop.f32.mrf.mxu0  ;;  %v3221_v19 = vadd.f32 %v9209_v50, %v9208_v23 }
 0x1f5   : > { %4968 = vst [vmem:[%s8779_s25 + $0x18] sm:$0xff] %v4936_v11  ;;  %vm4870_vm11 = vcmp.gt.f32.partialorder %v4838_v28, 0.0  ;;  %v4902_v24 = vmul.f32 0.1, %v4838_v28  ;;  %v4843_v46 = vadd.f32 %v8744_v37, %v4804_v35  ;;  %v4802_v4 = vmul.f32 %v8724_v42, %v4763_v63  ;;  %v6040_v17 = vpop.f32.mrf.mxu1  ;;  %v9214_v63 = vld [vmem:[#allocation11_spill] sm:$0xff] }
 0x1f6   : > { %v4805_v33 = vmul.f32 %v8724_v42, %v4766_v44  ;;  %v4764_v57 = vadd.f32 %v4651_v56, %v4294_v10  ;;  %v4299_v41 = vadd.f32 %v6040_v17, %v8730_v13  ;;  %v6075_v47 = vpop.f32.mrf.mxu0  ;;  %v3224_v13 = vadd.f32 %v9211_v48, %v9210_v60 }
 0x1f7   : > { %v4934_v6 = vsel %vm4870_vm11, %v4838_v28, %v4902_v24  ;;  %vm4875_vm12 = vcmp.gt.f32.partialorder %v4843_v46, 0.0  ;;  %v4907_v52 = vmul.f32 0.1, %v4843_v46  ;;  %v4841_v49 = vadd.f32 %v8744_v37, %v4802_v4  ;;  %v4194_v14 = vpop.f32.mrf.mxu1  ;;  %v9215_v4 = vld [vmem:[#allocation16_spill] sm:$0xff] }
 0x1f8   : > { %4966 = vst [vmem:[%s8779_s25 + $0x8] sm:$0xff] %v4934_v6  ;;  %v4844_v20 = vadd.f32 %v8744_v37, %v4805_v33  ;;  %v4803_v62 = vmul.f32 %v8724_v42, %v4764_v57  ;;  %v4769_v0 = vadd.f32 %v6074_v5, %v4299_v41  ;;  %v4297_v36 = vadd.f32 %v4194_v14, %v8733_v53  ;;  %v4667_v26 = vpop.f32.mrf.mxu0  ;;  %v9213_v53 = vld [vmem:[#allocation29_spill] sm:$0xff]  ;;  %v9216_v57 = vld [vmem:[#allocation26_spill] sm:$0xff] }
 0x1f9   : > { %v4939_v45 = vsel %vm4875_vm12, %v4843_v46, %v4907_v52  ;;  %vm4873_vm13 = vcmp.gt.f32.partialorder %v4841_v49, 0.0  ;;  %v4905_v38 = vmul.f32 0.1, %v4841_v49  ;;  %v6041_v43 = vpop.f32.mrf.mxu1  ;;  %v3222_v18 = vadd.f32 %v9213_v53, %v9212_v34  ;;  %v9219_v53 = vld [vmem:[#allocation25_spill] sm:$0xff] }
 0x1fa   : > { %4971 = vst [vmem:[%s8779_s25 + $0x30] sm:$0xff] %v4939_v45  ;;  %vm4876_vm14 = vcmp.gt.f32.partialorder %v4844_v20, 0.0  ;;  %v4908_v2 = vmul.f32 0.1, %v4844_v20  ;;  %v4842_v56 = vadd.f32 %v8744_v37, %v4803_v62  ;;  %v4808_v27 = vmul.f32 %v8724_v42, %v4769_v0  ;;  %v6078_v59 = vpop.f32.mrf.mxu0  ;;  %v9217_v62 = vld [vmem:[#allocation23_spill] sm:$0xff] }
 0x1fb   : > { %v4937_v30 = vsel %vm4873_vm13, %v4841_v49, %v4905_v38  ;;  %v4767_v39 = vadd.f32 %v4664_v25, %v4297_v36  ;;  %v4300_v31 = vadd.f32 %v6041_v43, %v8747_v21  ;;  %v4197_v8 = vpop.f32.mrf.mxu1  ;;  %v8828_v54 = vadd.f32 %v9214_v63, %v3221_v19  ;;  %v9218_v0 = vld [vmem:[#allocation31_spill] sm:$0xff] }
 0x1fc   : > { %4969 = vst [vmem:[%s8779_s25 + $0x20] sm:$0xff] %v4937_v30  ;;  %v4940_v5 = vsel %vm4876_vm14, %v4844_v20, %v4908_v2  ;;  %vm4874_vm15 = vcmp.gt.f32.partialorder %v4842_v56, 0.0  ;;  %v4906_v12 = vmul.f32 0.1, %v4842_v56  ;;  %v4847_v28 = vadd.f32 %v8744_v37, %v4808_v27  ;;  %v4680_v35 = vpop.f32.mrf.mxu0 }
 0x1fd   : > { %4972 = vst [vmem:[%s8779_s25 + $0x38] sm:$0xff] %v4940_v5  ;;  %v4806_v40 = vmul.f32 %v8724_v42, %v4767_v39  ;;  %v4770_v11 = vadd.f32 %v6075_v47, %v4300_v31  ;;  %v4298_v44 = vadd.f32 %v4197_v8, %v8751_v32  ;;  %v6044_v10 = vpop.f32.mrf.mxu1  ;;  %v8835_v17 = vadd.f32 %v9215_v4, %v3224_v13  ;;  %v9223_v4 = vld [vmem:[#allocation28_spill] sm:$0xff] }
 0x1fe   : > { %v4938_v21 = vsel %vm4874_vm15, %v4842_v56, %v4906_v12  ;;  %vm4879_vm0 = vcmp.gt.f32.partialorder %v4847_v28, 0.0  ;;  %v4911_v25 = vmul.f32 0.1, %v4847_v28  ;;  %v4303_v24 = vadd.f32 %v6044_v10, %v8754_v29  ;;  %v6079_v46 = vpop.f32.mrf.mxu0 }
 0x1ff   : > { %4970 = vst [vmem:[%s8779_s25 + $0x28] sm:$0xff] %v4938_v21  ;;  %v4845_v23 = vadd.f32 %v8744_v37, %v4806_v40  ;;  %v4809_v50 = vmul.f32 %v8724_v42, %v4770_v11  ;;  %v4768_v19 = vadd.f32 %v4667_v26, %v4298_v44  ;;  %v4210_v33 = vpop.f32.mrf.mxu1  ;;  %v8841_v32 = vadd.f32 %v9216_v57, %v3222_v18  ;;  %v9220_v18 = vld [vmem:[#allocation33_spill] sm:$0xff] }
 0x200   : > { %v4943_v41 = vsel %vm4879_vm0, %v4847_v28, %v4911_v25  ;;  %v4773_v47 = vadd.f32 %v6078_v59, %v4303_v24  ;;  %v4301_v6 = vadd.f32 %v4210_v33, %v8757_v9  ;;  %v4683_v52 = vpop.f32.mrf.mxu0  ;;  %v3227_v36 = vadd.f32 %v9218_v0, %v9217_v62  ;;  %v9225_v0 = vld [vmem:[#allocation32_spill] sm:$0xff] }
 0x201   : > { %4975 = vst [vmem:[%s8779_s25 + $0x50] sm:$0xff] %v4943_v41  ;;  %vm4877_vm1 = vcmp.gt.f32.partialorder %v4845_v23, 0.0  ;;  %v4909_v29 = vmul.f32 0.1, %v4845_v23  ;;  %v4848_v49 = vadd.f32 %v8744_v37, %v4809_v50  ;;  %v4807_v14 = vmul.f32 %v8724_v42, %v4768_v19  ;;  %v6045_v20 = vpop.f32.mrf.mxu1 }
 0x202   : > { %v4812_v26 = vmul.f32 %v8724_v42, %v4773_v47  ;;  %v4771_v60 = vadd.f32 %v4680_v35, %v4301_v6  ;;  %v4304_v48 = vadd.f32 %v6045_v20, %v8760_v3  ;;  %v6082_v13 = vpop.f32.mrf.mxu0  ;;  %v3225_v3 = vadd.f32 %v9220_v18, %v9219_v53  ;;  %v9221_v35 = vld [vmem:[#allocation4_spill] sm:$0xff] }
 0x203   : > { %v4941_v9 = vsel %vm4877_vm1, %v4845_v23, %v4909_v29  ;;  %vm4880_vm2 = vcmp.gt.f32.partialorder %v4848_v49, 0.0  ;;  %v4912_v45 = vmul.f32 0.1, %v4848_v49  ;;  %v4846_v38 = vadd.f32 %v8744_v37, %v4807_v14  ;;  %v4213_v43 = vpop.f32.mrf.mxu1 }
 0x204   : > { %4973 = vst [vmem:[%s8779_s25 + $0x40] sm:$0xff] %v4941_v9  ;;  %v4851_v2 = vadd.f32 %v8744_v37, %v4812_v26  ;;  %v4810_v56 = vmul.f32 %v8724_v42, %v4771_v60  ;;  %v4774_v27 = vadd.f32 %v6079_v46, %v4304_v48  ;;  %v4302_v59 = vadd.f32 %v4213_v43, %v8766_v7  ;;  %v4696_v34 = vpop.f32.mrf.mxu0  ;;  %v9222_v7 = vld [vmem:[#allocation35_spill] sm:$0xff]  ;;  %v9227_v43 = vld [vmem:[#allocation37_spill] sm:$0xff] }
 0x205   : > { %v4944_v30 = vsel %vm4880_vm2, %v4848_v49, %v4912_v45  ;;  %vm4878_vm3 = vcmp.gt.f32.partialorder %v4846_v38, 0.0  ;;  %v4910_v39 = vmul.f32 0.1, %v4846_v38  ;;  %v6048_v31 = vpop.f32.mrf.mxu1  ;;  %v3228_v63 = vadd.f32 %v9222_v7, %v9221_v35 }
 0x206   : > { %4976 = vst [vmem:[%s8779_s25 + $0x58] sm:$0xff] %v4944_v30  ;;  %vm4883_vm4 = vcmp.gt.f32.partialorder %v4851_v2, 0.0  ;;  %v4915_v8 = vmul.f32 0.1, %v4851_v2  ;;  %v4849_v5 = vadd.f32 %v8744_v37, %v4810_v56  ;;  %v4813_v12 = vmul.f32 %v8724_v42, %v4774_v27  ;;  %v6083_v28 = vpop.f32.mrf.mxu0 }
 0x207   : > { %v4942_v40 = vsel %vm4878_vm3, %v4846_v38, %v4910_v39  ;;  %v4772_v11 = vadd.f32 %v4683_v52, %v4302_v59  ;;  %v4307_v44 = vadd.f32 %v6048_v31, %v8769_v1  ;;  %v4226_v10 = vpop.f32.mrf.mxu1  ;;  %v8867_v23 = vadd.f32 %v9223_v4, %v3227_v36  ;;  %v9224_v52 = vld [vmem:[#allocation30_spill] sm:$0xff]  ;;  %v9226_v38 = vld [vmem:[#allocation3_spill] sm:$0xff] }
 0x208   : > { %4974 = vst [vmem:[%s8779_s25 + $0x48] sm:$0xff] %v4942_v40  ;;  %v4947_v21 = vsel %vm4883_vm4, %v4851_v2, %v4915_v8  ;;  %vm4881_vm5 = vcmp.gt.f32.partialorder %v4849_v5, 0.0  ;;  %v4913_v25 = vmul.f32 0.1, %v4849_v5  ;;  %v4852_v24 = vadd.f32 %v8744_v37, %v4813_v12  ;;  %v4699_v46 = vpop.f32.mrf.mxu0  ;;  %v9228_v12 = vld [vmem:[#allocation6_spill] sm:$0xff] }
 0x209   : > { %4979 = vst [vmem:[%s8779_s25 + $0x70] sm:$0xff] %v4947_v21  ;;  %v4811_v50 = vmul.f32 %v8724_v42, %v4772_v11  ;;  %v4777_v19 = vadd.f32 %v6082_v13, %v4307_v44  ;;  %v4305_v33 = vadd.f32 %v4226_v10, %v8772_v51  ;;  %v6049_v57 = vpop.f32.mrf.mxu1  ;;  %v8874_v29 = vadd.f32 %v9224_v52, %v3225_v3  ;;  %v9230_v21 = vld [vmem:[#allocation5_spill] sm:$0xff] }
 0x20a   : > { %v4945_v1 = vsel %vm4881_vm5, %v4849_v5, %v4913_v25  ;;  %vm4884_vm6 = vcmp.gt.f32.partialorder %v4852_v24, 0.0  ;;  %v4916_v41 = vmul.f32 0.1, %v4852_v24  ;;  %v4308_v47 = vadd.f32 %v6049_v57, %v8789_v55 }
 0x20b   : > { %v6086_v6 = vpop.f32.mrf.mxu0  ;;  %4977 = vst [vmem:[%s8779_s25 + $0x60] sm:$0xff] %v4945_v1  ;;  %v4850_v49 = vadd.f32 %v8744_v37, %v4811_v50  ;;  %v4816_v14 = vmul.f32 %v8724_v42, %v4777_v19  ;;  %v4775_v20 = vadd.f32 %v4696_v34, %v4305_v33  ;;  %v4229_v62 = vpop.f32.mrf.mxu1  ;;  %v8880_v51 = vadd.f32 %v9225_v0, %v3228_v63 }
 0x20c   : > { %v4948_v36 = vsel %vm4884_vm6, %v4852_v24, %v4916_v41  ;;  %v4778_v26 = vadd.f32 %v6083_v28, %v4308_v47  ;;  %v4306_v60 = vadd.f32 %v4229_v62, %v8796_v16  ;;  %v3226_v2 = vadd.f32 %v9227_v43, %v9226_v38  ;;  %v9229_v28 = vld [vmem:[#allocation39_spill] sm:$0xff]  ;;  %v9232_v41 = vld [vmem:[#allocation34_spill] sm:$0xff] }
 0x20d   : > { %v4712_v48 = vpop.f32.mrf.mxu0  ;;  %4980 = vst [vmem:[%s8779_s25 + $0x78] sm:$0xff] %v4948_v36  ;;  %vm4882_vm7 = vcmp.gt.f32.partialorder %v4850_v49, 0.0  ;;  %v4914_v55 = vmul.f32 0.1, %v4850_v49  ;;  %v4855_v13 = vadd.f32 %v8744_v37, %v4816_v14  ;;  %v4814_v9 = vmul.f32 %v8724_v42, %v4775_v20  ;;  %v6052_v45 = vpop.f32.mrf.mxu1  ;;  %v9233_v36 = vld [vmem:[#allocation36_spill] sm:$0xff] }
 0x20e   : > { %v4817_v56 = vmul.f32 %v8724_v42, %v4778_v26  ;;  %v4776_v27 = vadd.f32 %v4699_v46, %v4306_v60  ;;  %v4311_v59 = vadd.f32 %v6052_v45, %v8802_v61  ;;  %v3231_v61 = vadd.f32 %v9229_v28, %v9228_v12 }
 0x20f   : > { %v6087_v34 = vpop.f32.mrf.mxu0  ;;  %v4946_v16 = vsel %vm4882_vm7, %v4850_v49, %v4914_v55  ;;  %vm4887_vm8 = vcmp.gt.f32.partialorder %v4855_v13, 0.0  ;;  %v4919_v53 = vmul.f32 0.1, %v4855_v13  ;;  %v4853_v18 = vadd.f32 %v8744_v37, %v4814_v9  ;;  %v4242_v3 = vpop.f32.mrf.mxu1  ;;  %v9234_v9 = vld [vmem:[#allocation38_spill] sm:$0xff] }
 0x210   : > { %4978 = vst [vmem:[%s8779_s25 + $0x68] sm:$0xff] %v4946_v16  ;;  %v4856_v30 = vadd.f32 %v8744_v37, %v4817_v56  ;;  %v4815_v39 = vmul.f32 %v8724_v42, %v4776_v27  ;;  %v4781_v31 = vadd.f32 %v6086_v6, %v4311_v59  ;;  %v4309_v8 = vadd.f32 %v4242_v3, %v8828_v54  ;;  %v9231_v54 = vld [vmem:[#allocation41_spill] sm:$0xff] }
 0x211   : > { %v4715_v5 = vpop.f32.mrf.mxu0  ;;  %v4951_v35 = vsel %vm4887_vm8, %v4855_v13, %v4919_v53  ;;  %vm4885_vm9 = vcmp.gt.f32.partialorder %v4853_v18, 0.0  ;;  %v4917_v7 = vmul.f32 0.1, %v4853_v18  ;;  %v6053_v63 = vpop.f32.mrf.mxu1  ;;  %v3229_v25 = vadd.f32 %v9231_v54, %v9230_v21  ;;  %v9237_v21 = vld [vmem:[#allocation40_spill] sm:$0xff] }
 0x212   : > { %4983 = vst [vmem:[%s8779_s25 + $0x90] sm:$0xff] %v4951_v35  ;;  %vm4888_vm10 = vcmp.gt.f32.partialorder %v4856_v30, 0.0  ;;  %v4920_v40 = vmul.f32 0.1, %v4856_v30  ;;  %v4854_v11 = vadd.f32 %v8744_v37, %v4815_v39  ;;  %v4820_v44 = vmul.f32 %v8724_v42, %v4781_v31 }
 0x213   : > { %v6090_v10 = vpop.f32.mrf.mxu0  ;;  %v4949_v24 = vsel %vm4885_vm9, %v4853_v18, %v4917_v7  ;;  %v4779_v46 = vadd.f32 %v4712_v48, %v4309_v8  ;;  %v4312_v4 = vadd.f32 %v6053_v63, %v8835_v17  ;;  %v4245_v50 = vpop.f32.mrf.mxu1  ;;  %v3588_v47 = vadd.f32 %v9232_v41, %v3226_v2 }
 0x214   : > { %4981 = vst [vmem:[%s8779_s25 + $0x80] sm:$0xff] %v4949_v24  ;;  %v4952_v19 = vsel %vm4888_vm10, %v4856_v30, %v4920_v40  ;;  %vm4886_vm11 = vcmp.gt.f32.partialorder %v4854_v11, 0.0  ;;  %v4918_v33 = vmul.f32 0.1, %v4854_v11  ;;  %v4859_v57 = vadd.f32 %v8744_v37, %v4820_v44 }
 0x215   : > { %v4728_v1 = vpop.f32.mrf.mxu0  ;;  %4984 = vst [vmem:[%s8779_s25 + $0x98] sm:$0xff] %v4952_v19  ;;  %v4818_v6 = vmul.f32 %v8724_v42, %v4779_v46  ;;  %v4782_v52 = vadd.f32 %v6087_v34, %v4312_v4  ;;  %v4310_v49 = vadd.f32 %v4245_v50, %v8841_v32  ;;  %v6056_v14 = vpop.f32.mrf.mxu1  ;;  %v3593_v26 = vadd.f32 %v9233_v36, %v3231_v61  ;;  %v9235_v34 = vld [vmem:[#allocation7_spill] sm:$0xff]  ;;  %v9236_v61 = vld [vmem:[#allocation10_spill] sm:$0xff] }
 0x216   : > { %v4950_v20 = vsel %vm4886_vm11, %v4854_v11, %v4918_v33  ;;  %vm4891_vm12 = vcmp.gt.f32.partialorder %v4859_v57, 0.0  ;;  %v4923_v17 = vmul.f32 0.1, %v4859_v57  ;;  %v4315_v62 = vadd.f32 %v6056_v14, %v8867_v23 }
 0x217   : > { %v6091_v0 = vpop.f32.mrf.mxu0  ;;  %4982 = vst [vmem:[%s8779_s25 + $0x88] sm:$0xff] %v4950_v20  ;;  %v4857_v60 = vadd.f32 %v8744_v37, %v4818_v6  ;;  %v4821_v48 = vmul.f32 %v8724_v42, %v4782_v52  ;;  %v4780_v55 = vadd.f32 %v4715_v5, %v4310_v49  ;;  %v4258_v13 = vpop.f32.mrf.mxu1  ;;  %v3591_v45 = vadd.f32 %v9234_v9, %v3229_v25 }
 0x218   : > { %v4955_v32 = vsel %vm4891_vm12, %v4859_v57, %v4923_v17  ;;  %v4785_v38 = vadd.f32 %v6090_v10, %v4315_v62  ;;  %v4313_v43 = vadd.f32 %v4258_v13, %v8874_v29  ;;  %v3232_v16 = vadd.f32 %v8695_v58, %v9235_v34 }
 0x219   : > { %v4731_v2 = vpop.f32.mrf.mxu0  ;;  %4987 = vst [vmem:[%s8779_s25 + $0xb0] sm:$0xff] %v4955_v32  ;;  %vm4889_vm13 = vcmp.gt.f32.partialorder %v4857_v60, 0.0  ;;  %v4921_v23 = vmul.f32 0.1, %v4857_v60  ;;  %v4860_v56 = vadd.f32 %v8744_v37, %v4821_v48  ;;  %v4819_v27 = vmul.f32 %v8724_v42, %v4780_v55  ;;  %v6057_v59 = vpop.f32.mrf.mxu1 }
 0x21a   : > { %v4824_v53 = vmul.f32 %v8724_v42, %v4785_v38  ;;  %v4783_v18 = vadd.f32 %v4728_v1, %v4313_v43  ;;  %v4316_v3 = vadd.f32 %v6057_v59, %v8880_v51  ;;  %v3230_v35 = vadd.f32 %v8699_v15, %v9236_v61 }
 0x21b   : > { %v6094_v30 = vpop.f32.mrf.mxu0  ;;  %v4953_v29 = vsel %vm4889_vm13, %v4857_v60, %v4921_v23  ;;  %vm4892_vm14 = vcmp.gt.f32.partialorder %v4860_v56, 0.0  ;;  %v4924_v39 = vmul.f32 0.1, %v4860_v56  ;;  %v4858_v31 = vadd.f32 %v8744_v37, %v4819_v27  ;;  %v4261_v8 = vpop.f32.mrf.mxu1 }
 0x21c   : > { %4985 = vst [vmem:[%s8779_s25 + $0xa0] sm:$0xff] %v4953_v29  ;;  %v4863_v5 = vadd.f32 %v8744_v37, %v4824_v53  ;;  %v4822_v12 = vmul.f32 %v8724_v42, %v4783_v18  ;;  %v4786_v28 = vadd.f32 %v6091_v0, %v4316_v3  ;;  %v4314_v58 = vadd.f32 %v4261_v8, %v3588_v47 }
 0x21d   : > { %v4956_v51 = vsel %vm4892_vm14, %v4860_v56, %v4924_v39  ;;  %vm4890_vm15 = vcmp.gt.f32.partialorder %v4858_v31, 0.0  ;;  %v4922_v7 = vmul.f32 0.1, %v4858_v31  ;;  %v6060_v63 = vpop.f32.mrf.mxu1  ;;  %v4744_v40 = vpop.f32.mrf.mxu0  ;;  %v3594_v54 = vadd.f32 %v9237_v21, %v3232_v16 }
 0x21e   : > { %4988 = vst [vmem:[%s8779_s25 + $0xb8] sm:$0xff] %v4956_v51  ;;  %vm4895_vm0 = vcmp.gt.f32.partialorder %v4863_v5, 0.0  ;;  %v4927_v11 = vmul.f32 0.1, %v4863_v5  ;;  %v4861_v44 = vadd.f32 %v8744_v37, %v4822_v12  ;;  %v4825_v10 = vmul.f32 %v8724_v42, %v4786_v28 }
 0x21f   : > { %v4954_v25 = vsel %vm4890_vm15, %v4858_v31, %v4922_v7  ;;  %v4784_v24 = vadd.f32 %v4731_v2, %v4314_v58  ;;  %v4319_v46 = vadd.f32 %v6060_v63, %v3593_v26  ;;  %v4274_v15 = vpop.f32.mrf.mxu1  ;;  %v3592_v33 = vadd.f32 %v8690_v22, %v3230_v35  ;;  %v6095_v6 = vpop.f32.mrf.mxu0 }
 0x220   : > { %4986 = vst [vmem:[%s8779_s25 + $0xa8] sm:$0xff] %v4954_v25  ;;  %v4959_v4 = vsel %vm4895_vm0, %v4863_v5, %v4927_v11  ;;  %vm4893_vm1 = vcmp.gt.f32.partialorder %v4861_v44, 0.0  ;;  %v4925_v50 = vmul.f32 0.1, %v4861_v44  ;;  %v4864_v19 = vadd.f32 %v8744_v37, %v4825_v10 }
 0x221   : > { %4991 = vst [vmem:[%s8779_s25 + $0xd0] sm:$0xff] %v4959_v4  ;;  %v4823_v57 = vmul.f32 %v8724_v42, %v4784_v24  ;;  %v4789_v1 = vadd.f32 %v6094_v30, %v4319_v46  ;;  %v4317_v41 = vadd.f32 %v4274_v15, %v3591_v45  ;;  %v6061_v47 = vpop.f32.mrf.mxu1  ;;  %v4747_v13 = vpop.f32.mrf.mxu0 }
 0x222   : > { %v4957_v52 = vsel %vm4893_vm1, %v4861_v44, %v4925_v50  ;;  %vm4896_vm2 = vcmp.gt.f32.partialorder %v4864_v19, 0.0  ;;  %v4928_v49 = vmul.f32 0.1, %v4864_v19  ;;  %v4320_v14 = vadd.f32 %v6061_v47, %v3594_v54 }
 0x223   : > { %4989 = vst [vmem:[%s8779_s25 + $0xc0] sm:$0xff] %v4957_v52  ;;  %v4862_v20 = vadd.f32 %v8744_v37, %v4823_v57  ;;  %v4828_v17 = vmul.f32 %v8724_v42, %v4789_v1  ;;  %v4787_v62 = vadd.f32 %v4744_v40, %v4317_v41  ;;  %v4277_v0 = vpop.f32.mrf.mxu1 }
 0x224   : > { %v4960_v22 = vsel %vm4896_vm2, %v4864_v19, %v4928_v49  ;;  %v4790_v36 = vadd.f32 %v6095_v6, %v4320_v14  ;;  %v4318_v26 = vadd.f32 %v4277_v0, %v3592_v33 }
 0x225   : > { %4992 = vst [vmem:[%s8779_s25 + $0xd8] sm:$0xff] %v4960_v22  ;;  %vm4894_vm3 = vcmp.gt.f32.partialorder %v4862_v20, 0.0  ;;  %v4926_v60 = vmul.f32 0.1, %v4862_v20  ;;  %v4867_v48 = vadd.f32 %v8744_v37, %v4828_v17  ;;  %v4826_v55 = vmul.f32 %v8724_v42, %v4787_v62 }
 0x226   : > { %v4829_v9 = vmul.f32 %v8724_v42, %v4790_v36  ;;  %v4788_v45 = vadd.f32 %v4747_v13, %v4318_v26 }
 0x227   : > { %v4958_v32 = vsel %vm4894_vm3, %v4862_v20, %v4926_v60  ;;  %vm4899_vm4 = vcmp.gt.f32.partialorder %v4867_v48, 0.0  ;;  %v4931_v38 = vmul.f32 0.1, %v4867_v48  ;;  %v4865_v43 = vadd.f32 %v8744_v37, %v4826_v55 }
 0x228   : > { %4990 = vst [vmem:[%s8779_s25 + $0xc8] sm:$0xff] %v4958_v32  ;;  %v4868_v2 = vadd.f32 %v8744_v37, %v4829_v9  ;;  %v4827_v23 = vmul.f32 %v8724_v42, %v4788_v45 }
 0x229   : > { %v4963_v56 = vsel %vm4899_vm4, %v4867_v48, %v4931_v38  ;;  %vm4897_vm5 = vcmp.gt.f32.partialorder %v4865_v43, 0.0  ;;  %v4929_v27 = vmul.f32 0.1, %v4865_v43 }
 0x22a   : > { %4995 = vst [vmem:[%s8779_s25 + $0xf0] sm:$0xff] %v4963_v56  ;;  %vm4900_vm6 = vcmp.gt.f32.partialorder %v4868_v2, 0.0  ;;  %v4932_v59 = vmul.f32 0.1, %v4868_v2  ;;  %v4866_v34 = vadd.f32 %v8744_v37, %v4827_v23 }
 0x22b   : > { %v4961_v16 = vsel %vm4897_vm5, %v4865_v43, %v4929_v27 }
 0x22c   : > { %4993 = vst [vmem:[%s8779_s25 + $0xe0] sm:$0xff] %v4961_v16  ;;  %v4964_v53 = vsel %vm4900_vm6, %v4868_v2, %v4932_v59  ;;  %vm4898_vm7 = vcmp.gt.f32.partialorder %v4866_v34, 0.0  ;;  %v4930_v18 = vmul.f32 0.1, %v4866_v34 }
 0x22d   : > { %4996 = vst [vmem:[%s8779_s25 + $0xf8] sm:$0xff] %v4964_v53 }
 0x22e   : > { %v4962_v3 = vsel %vm4898_vm7, %v4866_v34, %v4930_v18 }
 0x22f   : > { %4994 = vst [vmem:[%s8779_s25 + $0xe8] sm:$0xff] %v4962_v3 }
 0x230 PF: > { %s14_s17 = sadd.s32 1, %s6205_s17   ;;  %s9238_s15 = smov %s6201_s16 }
 0x231   : > { %p11_p5 = scmp.ge.s32.totalorder %s14_s17, 4   ;;  %s9239_s16 = smov %s9241_s18 }
 0x233   :  { %13 = sbr.rel (!%p11_p5) target bundleno = 2 (0x2), region = 77 }

</bundles_post_ra>
